<compile_context>
chip_gen: v5e
topology: v5e:2x2
jax: 0.10.0
libtpu: 0.0.40
codegen_flags: <defaults>
</compile_context>

<pallas_src>
import functools

import jax
import jax.numpy as jnp
from jax.experimental import pallas as pl
from jax.experimental.pallas import tpu as pltpu

BN_EPS = 1e-5
TM_MAX = 512                 # M-tile for the im2col matmul (multiple of 8)
ROW_TILE_BYTES = 1 << 20     # per-input-block budget for pool/unpool row tiling
SOFTMAX_TILE = 4096          # lane tile for the softmax head (multiple of 128)


# ----------------------------- Pallas kernels ------------------------------

def _conv_mm_kernel(p_ref, w_ref, scale_ref, shift_ref, o_ref, *, relu):
    """One M-tile of an im2col convolution: o = affine(patches @ w), optional ReLU.

    patches block: (TM, K2*Cin) bf16, weights: (K2*Cin, Cout) bf16, accumulate f32 on the MXU,
    fuse the per-output-channel affine (folded BatchNorm + conv bias) and ReLU, single store.
    """
    acc = jnp.dot(p_ref[...], w_ref[...], preferred_element_type=jnp.float32)
    y = acc * scale_ref[...] + shift_ref[...]
    if relu:
        y = jnp.maximum(y, 0.0)
    o_ref[...] = y.astype(o_ref.dtype)


def _maxpool_kernel(a_ref, b_ref, c_ref, d_ref, v_ref, i_ref):
    # a..d: the 4 elements of each 2x2 window in PyTorch row-major window-scan order
    # (0,0),(0,1),(1,0),(1,1); blocks are (TR, Wo, C) in NHWC row tiles.
    a, b, c, d = a_ref[...], b_ref[...], c_ref[...], d_ref[...]
    m = jnp.maximum(jnp.maximum(a, b), jnp.maximum(c, d))
    idx = jnp.where(b >= m, 1, jnp.where(c >= m, 2, 3))
    idx = jnp.where(a >= m, 0, idx)                      # first-max tie break
    v_ref[...] = m
    i_ref[...] = idx.astype(jnp.int8)                    # indices 0..3 stored as int8


def _maxunpool_kernel(v_ref, i_ref, a_ref, b_ref, c_ref, d_ref):
    # Scatter each max back into its 2x2 window slot, zeros elsewhere (MaxUnpool2d semantics).
    v = v_ref[...]
    idx = i_ref[...].astype(jnp.int32)                   # int8 is storage-only; widen for compute
    zero = jnp.zeros_like(v)
    a_ref[...] = jnp.where(idx == 0, v, zero)
    b_ref[...] = jnp.where(idx == 1, v, zero)
    c_ref[...] = jnp.where(idx == 2, v, zero)
    d_ref[...] = jnp.where(idx == 3, v, zero)


def _softmax_kernel(x_ref, o_ref):
    # x block: (1, C, T) -- channels on the (small) sublane axis, spatial on lanes (dense stores).
    x = x_ref[...].astype(jnp.float32)
    m = jnp.max(x, axis=1, keepdims=True)
    e = jnp.exp(x - m)
    o_ref[...] = e / jnp.sum(e, axis=1, keepdims=True)


# ------------------------------ op wrappers --------------------------------

def _pick_tm(M):
    return M if M <= TM_MAX else TM_MAX


def _row_tile(num_rows, row_bytes):
    return min(num_rows, max(1, ROW_TILE_BYTES // max(1, row_bytes)))


def conv2d_affine(x, w_oihw, scale, shift, *, relu, pad=0):
    """Valid correlation (after optional symmetric zero pad) + per-output-channel affine +
    optional ReLU.  x: (N,H,W,Cin);  w_oihw: (Cout,Cin,KH,KW).  Returns bf16 NHWC."""
    if pad:
        x = jnp.pad(x, ((0, 0), (pad, pad), (pad, pad), (0, 0)))
    N, H, W, Cin = x.shape
    Cout, _, KH, KW = w_oihw.shape
    Ho, Wo = H - KH + 1, W - KW + 1
    M = N * Ho * Wo
    K = KH * KW * Cin

    xb = x.astype(jnp.bfloat16)
    if KH == 1 and KW == 1:
        patches = xb.reshape(M, Cin)
    else:
        # im2col with the taps folded into the contraction dim: (M, KH*KW*Cin).
        pats = [xb[:, kh:kh + Ho, kw:kw + Wo, :].reshape(M, Cin)
                for kh in range(KH) for kw in range(KW)]
        patches = jnp.concatenate(pats, axis=1)
    wk = jnp.transpose(w_oihw, (2, 3, 1, 0)).reshape(K, Cout).astype(jnp.bfloat16)

    tm = _pick_tm(M)
    block_bytes = 2 * ((tm * K + K * Cout) * 2 + 2 * Cout * 4 + tm * Cout * 2)  # double-buffered
    vmem_limit = int(min(max(2 * block_bytes, 16 << 20), 48 << 20))

    out = pl.pallas_call(
        functools.partial(_conv_mm_kernel, relu=relu),
        out_shape=jax.ShapeDtypeStruct((M, Cout), jnp.bfloat16),
        grid_spec=pltpu.PrefetchScalarGridSpec(
            num_scalar_prefetch=0,
            grid=(pl.cdiv(M, tm),),
            in_specs=[
                pl.BlockSpec((tm, K), lambda i: (i, 0)),
                pl.BlockSpec((K, Cout), lambda i: (0, 0)),
                pl.BlockSpec((1, Cout), lambda i: (0, 0)),
                pl.BlockSpec((1, Cout), lambda i: (0, 0)),
            ],
            out_specs=pl.BlockSpec((tm, Cout), lambda i: (i, 0)),
        ),
        compiler_params=pltpu.CompilerParams(
            dimension_semantics=("parallel",),
            vmem_limit_bytes=vmem_limit),
    )(patches, wk,
      scale.reshape(1, Cout).astype(jnp.float32),
      shift.reshape(1, Cout).astype(jnp.float32))
    return out.reshape(N, Ho, Wo, Cout)


def maxpool2x2(x):
    """MaxPool2d(2,2) with (window-local) indices. x: (N,H,W,C). Returns (vals, idx_int8)."""
    N, H, W, C = x.shape
    Ho, Wo = H // 2, W // 2
    xs = x[:, :2 * Ho, :2 * Wo, :]
    R = N * Ho
    a = xs[:, 0::2, 0::2, :].reshape(R, Wo, C)
    b = xs[:, 0::2, 1::2, :].reshape(R, Wo, C)
    c = xs[:, 1::2, 0::2, :].reshape(R, Wo, C)
    d = xs[:, 1::2, 1::2, :].reshape(R, Wo, C)

    tr = _row_tile(R, Wo * C * x.dtype.itemsize)
    spec = pl.BlockSpec((tr, Wo, C), lambda i: (i, 0, 0))
    vals, idx = pl.pallas_call(
        _maxpool_kernel,
        out_shape=(jax.ShapeDtypeStruct((R, Wo, C), x.dtype),
                   jax.ShapeDtypeStruct((R, Wo, C), jnp.int8)),
        grid_spec=pltpu.PrefetchScalarGridSpec(
            num_scalar_prefetch=0,
            grid=(pl.cdiv(R, tr),),
            in_specs=[spec, spec, spec, spec],
            out_specs=[spec, spec],
        ),
        compiler_params=pltpu.CompilerParams(dimension_semantics=("parallel",)),
    )(a, b, c, d)
    return vals.reshape(N, Ho, Wo, C), idx.reshape(N, Ho, Wo, C)


def maxunpool2x2(vals, idx, out_hw):
    """MaxUnpool2d(2,2) with output_size. vals: (N,Ho,Wo,C) bf16, idx: int8 in {0..3}."""
    N, Ho, Wo, C = vals.shape
    Hout, Wout = out_hw
    # TODO(synk): odd output_size (floor-cropped pooling) is not handled; the demo shapes keep
    # every pre-pool spatial size even, so this matches MaxUnpool2d exactly.
    assert (Hout, Wout) == (2 * Ho, 2 * Wo)
    R = N * Ho

    tr = _row_tile(R, Wo * C * vals.dtype.itemsize)
    spec = pl.BlockSpec((tr, Wo, C), lambda i: (i, 0, 0))
    oshape = jax.ShapeDtypeStruct((R, Wo, C), vals.dtype)
    a, b, c, d = pl.pallas_call(
        _maxunpool_kernel,
        out_shape=(oshape, oshape, oshape, oshape),
        grid_spec=pltpu.PrefetchScalarGridSpec(
            num_scalar_prefetch=0,
            grid=(pl.cdiv(R, tr),),
            in_specs=[spec, spec],
            out_specs=[spec, spec, spec, spec],
        ),
        compiler_params=pltpu.CompilerParams(dimension_semantics=("parallel",)),
    )(vals.reshape(R, Wo, C), idx.reshape(R, Wo, C))

    a = a.reshape(N, Ho, Wo, C); b = b.reshape(N, Ho, Wo, C)
    c = c.reshape(N, Ho, Wo, C); d = d.reshape(N, Ho, Wo, C)
    top = jnp.stack([a, b], axis=3).reshape(N, Ho, 2 * Wo, C)   # interleave along W (even rows)
    bot = jnp.stack([c, d], axis=3).reshape(N, Ho, 2 * Wo, C)   # interleave along W (odd rows)
    return jnp.stack([top, bot], axis=2).reshape(N, 2 * Ho, 2 * Wo, C)


def softmax_channels_nchw(x_nhwc):
    """Softmax over channels (dim=1 in NCHW); lane-dense over H*W. Returns f32 NCHW."""
    N, H, W, C = x_nhwc.shape
    HW = H * W
    xc = jnp.transpose(x_nhwc, (0, 3, 1, 2)).reshape(N, C, HW)   # this IS the final NCHW transpose
    t = HW if HW <= SOFTMAX_TILE else SOFTMAX_TILE
    spec = pl.BlockSpec((1, C, t), lambda n, i: (n, 0, i))
    y = pl.pallas_call(
        _softmax_kernel,
        out_shape=jax.ShapeDtypeStruct((N, C, HW), jnp.float32),
        grid_spec=pltpu.PrefetchScalarGridSpec(
            num_scalar_prefetch=0,
            grid=(N, pl.cdiv(HW, t)),
            in_specs=[spec],
            out_specs=spec,
        ),
        compiler_params=pltpu.CompilerParams(dimension_semantics=("parallel", "parallel")),
    )(xc)
    return y.reshape(N, C, H, W)


# --------------------------- parameters (init) ------------------------------

def _conv_bn_layer(key, cin, cout, *, transpose):
    kw, kb, kg, kbt, km, kv = jax.random.split(key, 6)
    wshape = (cin, cout, 3, 3) if transpose else (cout, cin, 3, 3)
    return dict(
        w=0.1 * jax.random.normal(kw, wshape, jnp.float32),
        b=0.1 * jax.random.normal(kb, (cout,), jnp.float32),
        gamma=1.0 + 0.1 * jax.random.normal(kg, (cout,), jnp.float32),
        beta=0.1 * jax.random.normal(kbt, (cout,), jnp.float32),
        mean=0.1 * jax.random.normal(km, (cout,), jnp.float32),
        var=1.0 + 0.1 * jax.random.uniform(kv, (cout,), jnp.float32),
    )


def build_params(key, architecture, in_channels, out_channels):
    params = {}
    # --- encoder (mirrors HorseshoeEncoder.__init__) ---
    enc_blocks = []
    ic = in_channels
    for (n_blocks, oc) in architecture:
        layers = []
        for _ in range(n_blocks):
            key, sub = jax.random.split(key)
            layers.append(_conv_bn_layer(sub, ic, oc, transpose=False))
            ic = oc
        enc_blocks.append(layers)
    key, k1, k2 = jax.random.split(key, 3)
    params["enc_blocks"] = enc_blocks
    params["conv1x1_w"] = 0.1 * jax.random.normal(k1, (256, ic, 1, 1), jnp.float32)
    params["conv1x1_b"] = 0.1 * jax.random.normal(k2, (256,), jnp.float32)

    # --- decoder (mirrors HorseshoeDecoder.__init__) ---
    arch_len = len(architecture)
    dec_blocks = {}
    oc_d = out_channels
    ic_d = in_channels
    for i, (n_blocks, ic_d) in enumerate(architecture):
        layers = []
        for _ in range(n_blocks):
            key, sub = jax.random.split(key)
            layers.insert(0, _conv_bn_layer(sub, ic_d, oc_d, transpose=True))
            oc_d = ic_d
        dec_blocks[arch_len - i - 1] = layers
    key, k1, k2 = jax.random.split(key, 3)
    params["dec_blocks"] = dec_blocks
    params["tconv1x1_w"] = 0.1 * jax.random.normal(k1, (256, ic_d, 1, 1), jnp.float32)
    params["tconv1x1_b"] = 0.1 * jax.random.normal(k2, (ic_d,), jnp.float32)
    return params


# ------------------------------- forward ------------------------------------

def _fold_bn(lyr):
    scale = lyr["gamma"] / jnp.sqrt(lyr["var"] + BN_EPS)
    shift = lyr["beta"] + scale * (lyr["b"] - lyr["mean"])
    return scale, shift


def horseshoe_forward(params, x_nchw):
    x = jnp.transpose(x_nchw, (0, 2, 3, 1)).astype(jnp.bfloat16)   # NCHW -> NHWC, bf16 activations

    # ---------------- encoder ----------------
    pooling_indices = []
    input_sizes = []
    for block in params["enc_blocks"]:
        for lyr in block:
            scale, shift = _fold_bn(lyr)
            x = conv2d_affine(x, lyr["w"], scale, shift, relu=True)
        input_sizes.append(x.shape)          # pre-pool NHWC size
        x, idx = maxpool2x2(x)
        pooling_indices.append(idx)

    # ---------------- fused 1x1 bottleneck ----------------
    # Conv2d(ic,256,1) followed by ConvTranspose2d(256,ic,1) with no nonlinearity in between
    # collapses to a single ic->ic 1x1 conv: W = w1^T @ wt, b = b1 @ wt + bt.
    ic = x.shape[-1]
    w1 = params["conv1x1_w"].reshape(256, ic)        # Conv2d weight (out=256, in=ic)
    wt = params["tconv1x1_w"].reshape(256, ic)       # ConvTranspose2d weight (in=256, out=ic)
    w_fused = jnp.transpose(w1) @ wt                 # (ic_in, ic_out)
    b_fused = params["conv1x1_b"] @ wt + params["tconv1x1_b"]
    w_oihw = jnp.transpose(w_fused).reshape(ic, ic, 1, 1)
    x = conv2d_affine(x, w_oihw, jnp.ones((ic,), jnp.float32), b_fused, relu=False)

    # ---------------- decoder ----------------
    for i in range(len(params["dec_blocks"])):
        layers = params["dec_blocks"][i]
        idx = pooling_indices.pop()
        size = input_sizes.pop()
        x = maxunpool2x2(x, idx, (size[1], size[2]))
        for lyr in layers:
            # ConvTranspose2d(k=3, s=1, p=0) == full-padded correlation with the spatially
            # flipped, (in,out)-transposed kernel.
            w_conv = jnp.transpose(jnp.flip(lyr["w"], axis=(2, 3)), (1, 0, 2, 3))
            scale, shift = _fold_bn(lyr)
            x = conv2d_affine(x, w_conv, scale, shift, relu=True, pad=2)

    # Softmax over channels; output is already NCHW f32 (PyTorch convention).
    return softmax_channels_nchw(x)


# --------------------------------- main --------------------------------------

if __name__ == "__main__":
    # Small architecture (structurally identical to the default [(2,16),(2,32),...]),
    # chosen so every pre-pool spatial size is even: 20 -> 16 -> pool 8 -> 4 -> pool 2.
    ARCH = [(2, 8), (2, 16)]
    IN_C, OUT_C = 3, 2

    key = jax.random.PRNGKey(0)
    kp, kx = jax.random.split(key)
    params = build_params(kp, ARCH, IN_C, OUT_C)

    x = jax.random.normal(kx, (2, IN_C, 20, 20), jnp.float32)   # NCHW input, like PyTorch

    fwd = jax.jit(functools.partial(horseshoe_forward, params))
    y = jax.block_until_ready(fwd(x))

    assert y.shape == (2, OUT_C, 20, 20), y.shape
    assert y.dtype == jnp.float32
    # softmax over channels must sum to 1 everywhere
    assert jnp.allclose(jnp.sum(y, axis=1), 1.0, atol=1e-5)

    print("KERNEL_OK")
</pallas_src>

<mosaic_0001>
module attributes {stable_mosaic.version = 11 : i64} {
  func.func @_conv_mm_kernel(%arg0: i32, %arg1: memref<512x27xbf16, #tpu.memory_space<vmem>>, %arg2: memref<27x8xbf16, #tpu.memory_space<vmem>>, %arg3: memref<1x8xf32, #tpu.memory_space<vmem>>, %arg4: memref<1x8xf32, #tpu.memory_space<vmem>>, %arg5: memref<512x8xbf16, #tpu.memory_space<vmem>>) attributes {dimension_semantics = [#tpu.dimension_semantics<parallel>], iteration_bounds = array<i64: 2>, scalar_prefetch = 0 : i64, scratch_operands = 0 : i64, tpu.core_type = #tpu.core_type<tc>, window_params = [{transform_indices = @transform_0, window_bounds = array<i64: 512, 27>}, {pipeline_mode = #tpu.pipeline_mode<synchronous>, transform_indices = @transform_1, window_bounds = array<i64: 27, 8>}, {pipeline_mode = #tpu.pipeline_mode<synchronous>, transform_indices = @transform_2, window_bounds = array<i64: 1, 8>}, {pipeline_mode = #tpu.pipeline_mode<synchronous>, transform_indices = @transform_3, window_bounds = array<i64: 1, 8>}, {transform_indices = @transform_4, window_bounds = array<i64: 512, 8>}]} {
    %c0 = arith.constant 0 : index
    %c0_0 = arith.constant 0 : index
    %0 = vector.load %arg1[%c0, %c0_0] : memref<512x27xbf16, #tpu.memory_space<vmem>>, vector<512x27xbf16>
    %c0_1 = arith.constant 0 : index
    %c0_2 = arith.constant 0 : index
    %1 = vector.load %arg2[%c0_1, %c0_2] : memref<27x8xbf16, #tpu.memory_space<vmem>>, vector<27x8xbf16>
    %cst = arith.constant dense<0.000000e+00> : vector<512x8xf32>
    %2 = tpu.matmul %0, %1, %cst {dimension_numbers = #tpu.dot_dimension_numbers<[1], [0], [0], [1], [0, 0, 1, 1], [], []>} : vector<512x27xbf16>, vector<27x8xbf16>, vector<512x8xf32> -> vector<512x8xf32>
    %c0_3 = arith.constant 0 : index
    %c0_4 = arith.constant 0 : index
    %3 = vector.load %arg3[%c0_3, %c0_4] : memref<1x8xf32, #tpu.memory_space<vmem>>, vector<1x8xf32>
    %4 = vector.broadcast %3 : vector<1x8xf32> to vector<512x8xf32>
    %5 = arith.mulf %2, %4 : vector<512x8xf32>
    %c0_5 = arith.constant 0 : index
    %c0_6 = arith.constant 0 : index
    %6 = vector.load %arg4[%c0_5, %c0_6] : memref<1x8xf32, #tpu.memory_space<vmem>>, vector<1x8xf32>
    %7 = vector.broadcast %6 : vector<1x8xf32> to vector<512x8xf32>
    %8 = arith.addf %5, %7 : vector<512x8xf32>
    %cst_7 = arith.constant 0.000000e+00 : f32
    %9 = vector.broadcast %cst_7 : f32 to vector<512x8xf32>
    %10 = arith.maximumf %8, %9 : vector<512x8xf32>
    %11 = arith.truncf %10 : vector<512x8xf32> to vector<512x8xbf16>
    %c0_8 = arith.constant 0 : index
    %c0_9 = arith.constant 0 : index
    %12 = vector.load %arg5[%c0_8, %c0_9] : memref<512x8xbf16, #tpu.memory_space<vmem>>, vector<512x8xbf16>
    tpu.vector_store %arg5[%c0_8, %c0_9], %11 {strides = array<i32>} : memref<512x8xbf16, #tpu.memory_space<vmem>>, vector<512x8xbf16>,
    return
  }
  func.func @transform_0(%arg0: i32) -> (i32, i32) {
    %c0_i32 = arith.constant 0 : i32
    %c0_i32_0 = arith.constant 0 : i32
    return %arg0, %c0_i32 : i32, i32
  }
  func.func @transform_1(%arg0: i32) -> (i32, i32) {
    %c0_i32 = arith.constant 0 : i32
    %c0_i32_0 = arith.constant 0 : i32
    %c0_i32_1 = arith.constant 0 : i32
    return %c0_i32, %c0_i32_0 : i32, i32
  }
  func.func @transform_2(%arg0: i32) -> (i32, i32) {
    %c0_i32 = arith.constant 0 : i32
    %c0_i32_0 = arith.constant 0 : i32
    %c0_i32_1 = arith.constant 0 : i32
    return %c0_i32, %c0_i32_0 : i32, i32
  }
  func.func @transform_3(%arg0: i32) -> (i32, i32) {
    %c0_i32 = arith.constant 0 : i32
    %c0_i32_0 = arith.constant 0 : i32
    %c0_i32_1 = arith.constant 0 : i32
    return %c0_i32, %c0_i32_0 : i32, i32
  }
  func.func @transform_4(%arg0: i32) -> (i32, i32) {
    %c0_i32 = arith.constant 0 : i32
    %c0_i32_0 = arith.constant 0 : i32
    return %arg0, %c0_i32 : i32, i32
  }
}

module attributes {stable_mosaic.version = 11 : i64} {
  func.func @_conv_mm_kernel(%arg0: i32, %arg1: memref<512x72xbf16, #tpu.memory_space<vmem>>, %arg2: memref<72x8xbf16, #tpu.memory_space<vmem>>, %arg3: memref<1x8xf32, #tpu.memory_space<vmem>>, %arg4: memref<1x8xf32, #tpu.memory_space<vmem>>, %arg5: memref<512x8xbf16, #tpu.memory_space<vmem>>) attributes {dimension_semantics = [#tpu.dimension_semantics<parallel>], iteration_bounds = array<i64: 1>, scalar_prefetch = 0 : i64, scratch_operands = 0 : i64, tpu.core_type = #tpu.core_type<tc>, window_params = [{transform_indices = @transform_0, window_bounds = array<i64: 512, 72>}, {pipeline_mode = #tpu.pipeline_mode<synchronous>, transform_indices = @transform_1, window_bounds = array<i64: 72, 8>}, {pipeline_mode = #tpu.pipeline_mode<synchronous>, transform_indices = @transform_2, window_bounds = array<i64: 1, 8>}, {pipeline_mode = #tpu.pipeline_mode<synchronous>, transform_indices = @transform_3, window_bounds = array<i64: 1, 8>}, {transform_indices = @transform_4, window_bounds = array<i64: 512, 8>}]} {
    %c0 = arith.constant 0 : index
    %c0_0 = arith.constant 0 : index
    %0 = vector.load %arg1[%c0, %c0_0] : memref<512x72xbf16, #tpu.memory_space<vmem>>, vector<512x72xbf16>
    %c0_1 = arith.constant 0 : index
    %c0_2 = arith.constant 0 : index
    %1 = vector.load %arg2[%c0_1, %c0_2] : memref<72x8xbf16, #tpu.memory_space<vmem>>, vector<72x8xbf16>
    %cst = arith.constant dense<0.000000e+00> : vector<512x8xf32>
    %2 = tpu.matmul %0, %1, %cst {dimension_numbers = #tpu.dot_dimension_numbers<[1], [0], [0], [1], [0, 0, 1, 1], [], []>} : vector<512x72xbf16>, vector<72x8xbf16>, vector<512x8xf32> -> vector<512x8xf32>
    %c0_3 = arith.constant 0 : index
    %c0_4 = arith.constant 0 : index
    %3 = vector.load %arg3[%c0_3, %c0_4] : memref<1x8xf32, #tpu.memory_space<vmem>>, vector<1x8xf32>
    %4 = vector.broadcast %3 : vector<1x8xf32> to vector<512x8xf32>
    %5 = arith.mulf %2, %4 : vector<512x8xf32>
    %c0_5 = arith.constant 0 : index
    %c0_6 = arith.constant 0 : index
    %6 = vector.load %arg4[%c0_5, %c0_6] : memref<1x8xf32, #tpu.memory_space<vmem>>, vector<1x8xf32>
    %7 = vector.broadcast %6 : vector<1x8xf32> to vector<512x8xf32>
    %8 = arith.addf %5, %7 : vector<512x8xf32>
    %cst_7 = arith.constant 0.000000e+00 : f32
    %9 = vector.broadcast %cst_7 : f32 to vector<512x8xf32>
    %10 = arith.maximumf %8, %9 : vector<512x8xf32>
    %11 = arith.truncf %10 : vector<512x8xf32> to vector<512x8xbf16>
    %c0_8 = arith.constant 0 : index
    %c0_9 = arith.constant 0 : index
    %12 = vector.load %arg5[%c0_8, %c0_9] : memref<512x8xbf16, #tpu.memory_space<vmem>>, vector<512x8xbf16>
    tpu.vector_store %arg5[%c0_8, %c0_9], %11 {strides = array<i32>} : memref<512x8xbf16, #tpu.memory_space<vmem>>, vector<512x8xbf16>,
    return
  }
  func.func @transform_0(%arg0: i32) -> (i32, i32) {
    %c0_i32 = arith.constant 0 : i32
    %c0_i32_0 = arith.constant 0 : i32
    return %arg0, %c0_i32 : i32, i32
  }
  func.func @transform_1(%arg0: i32) -> (i32, i32) {
    %c0_i32 = arith.constant 0 : i32
    %c0_i32_0 = arith.constant 0 : i32
    %c0_i32_1 = arith.constant 0 : i32
    return %c0_i32, %c0_i32_0 : i32, i32
  }
  func.func @transform_2(%arg0: i32) -> (i32, i32) {
    %c0_i32 = arith.constant 0 : i32
    %c0_i32_0 = arith.constant 0 : i32
    %c0_i32_1 = arith.constant 0 : i32
    return %c0_i32, %c0_i32_0 : i32, i32
  }
  func.func @transform_3(%arg0: i32) -> (i32, i32) {
    %c0_i32 = arith.constant 0 : i32
    %c0_i32_0 = arith.constant 0 : i32
    %c0_i32_1 = arith.constant 0 : i32
    return %c0_i32, %c0_i32_0 : i32, i32
  }
  func.func @transform_4(%arg0: i32) -> (i32, i32) {
    %c0_i32 = arith.constant 0 : i32
    %c0_i32_0 = arith.constant 0 : i32
    return %arg0, %c0_i32 : i32, i32
  }
}

module attributes {stable_mosaic.version = 11 : i64} {
  func.func @_maxpool_kernel(%arg0: i32, %arg1: memref<16x8x8xbf16, #tpu.memory_space<vmem>>, %arg2: memref<16x8x8xbf16, #tpu.memory_space<vmem>>, %arg3: memref<16x8x8xbf16, #tpu.memory_space<vmem>>, %arg4: memref<16x8x8xbf16, #tpu.memory_space<vmem>>, %arg5: memref<16x8x8xbf16, #tpu.memory_space<vmem>>, %arg6: memref<16x8x8xi8, #tpu.memory_space<vmem>>) attributes {dimension_semantics = [#tpu.dimension_semantics<parallel>], iteration_bounds = array<i64: 1>, scalar_prefetch = 0 : i64, scratch_operands = 0 : i64, tpu.core_type = #tpu.core_type<tc>, window_params = [{transform_indices = @transform_0, window_bounds = array<i64: 16, 8, 8>}, {transform_indices = @transform_1, window_bounds = array<i64: 16, 8, 8>}, {transform_indices = @transform_2, window_bounds = array<i64: 16, 8, 8>}, {transform_indices = @transform_3, window_bounds = array<i64: 16, 8, 8>}, {transform_indices = @transform_4, window_bounds = array<i64: 16, 8, 8>}, {transform_indices = @transform_5, window_bounds = array<i64: 16, 8, 8>}]} {
    %c0 = arith.constant 0 : index
    %c0_0 = arith.constant 0 : index
    %c0_1 = arith.constant 0 : index
    %0 = vector.load %arg1[%c0, %c0_0, %c0_1] : memref<16x8x8xbf16, #tpu.memory_space<vmem>>, vector<16x8x8xbf16>
    %c0_2 = arith.constant 0 : index
    %c0_3 = arith.constant 0 : index
    %c0_4 = arith.constant 0 : index
    %1 = vector.load %arg2[%c0_2, %c0_3, %c0_4] : memref<16x8x8xbf16, #tpu.memory_space<vmem>>, vector<16x8x8xbf16>
    %c0_5 = arith.constant 0 : index
    %c0_6 = arith.constant 0 : index
    %c0_7 = arith.constant 0 : index
    %2 = vector.load %arg3[%c0_5, %c0_6, %c0_7] : memref<16x8x8xbf16, #tpu.memory_space<vmem>>, vector<16x8x8xbf16>
    %c0_8 = arith.constant 0 : index
    %c0_9 = arith.constant 0 : index
    %c0_10 = arith.constant 0 : index
    %3 = vector.load %arg4[%c0_8, %c0_9, %c0_10] : memref<16x8x8xbf16, #tpu.memory_space<vmem>>, vector<16x8x8xbf16>
    %4 = arith.maximumf %0, %1 : vector<16x8x8xbf16>
    %5 = arith.maximumf %2, %3 : vector<16x8x8xbf16>
    %6 = arith.maximumf %4, %5 : vector<16x8x8xbf16>
    %7 = arith.cmpf oge, %1, %6 : vector<16x8x8xbf16>
    %8 = arith.cmpf oge, %2, %6 : vector<16x8x8xbf16>
    %c2_i32 = arith.constant 2 : i32
    %c3_i32 = arith.constant 3 : i32
    %9 = vector.broadcast %c2_i32 : i32 to vector<16x8x8xi32>
    %10 = vector.broadcast %c3_i32 : i32 to vector<16x8x8xi32>
    %11 = arith.select %8, %9, %10 : vector<16x8x8xi1>, vector<16x8x8xi32>
    %c1_i32 = arith.constant 1 : i32
    %12 = vector.broadcast %c1_i32 : i32 to vector<16x8x8xi32>
    %13 = arith.select %7, %12, %11 : vector<16x8x8xi1>, vector<16x8x8xi32>
    %14 = arith.cmpf oge, %0, %6 : vector<16x8x8xbf16>
    %c0_i32 = arith.constant 0 : i32
    %15 = vector.broadcast %c0_i32 : i32 to vector<16x8x8xi32>
    %16 = arith.select %14, %15, %13 : vector<16x8x8xi1>, vector<16x8x8xi32>
    %c0_11 = arith.constant 0 : index
    %c0_12 = arith.constant 0 : index
    %c0_13 = arith.constant 0 : index
    %17 = vector.load %arg5[%c0_11, %c0_12, %c0_13] : memref<16x8x8xbf16, #tpu.memory_space<vmem>>, vector<16x8x8xbf16>
    tpu.vector_store %arg5[%c0_11, %c0_12, %c0_13], %6 {strides = array<i32>} : memref<16x8x8xbf16, #tpu.memory_space<vmem>>, vector<16x8x8xbf16>,
    %18 = arith.trunci %16 : vector<16x8x8xi32> to vector<16x8x8xi8>
    %c0_14 = arith.constant 0 : index
    %c0_15 = arith.constant 0 : index
    %c0_16 = arith.constant 0 : index
    %19 = vector.load %arg6[%c0_14, %c0_15, %c0_16] : memref<16x8x8xi8, #tpu.memory_space<vmem>>, vector<16x8x8xi8>
    tpu.vector_store %arg6[%c0_14, %c0_15, %c0_16], %18 {strides = array<i32>} : memref<16x8x8xi8, #tpu.memory_space<vmem>>, vector<16x8x8xi8>,
    return
  }
  func.func @transform_0(%arg0: i32) -> (i32, i32, i32) {
    %c0_i32 = arith.constant 0 : i32
    %c0_i32_0 = arith.constant 0 : i32
    %c0_i32_1 = arith.constant 0 : i32
    return %arg0, %c0_i32, %c0_i32_0 : i32, i32, i32
  }
  func.func @transform_1(%arg0: i32) -> (i32, i32, i32) {
    %c0_i32 = arith.constant 0 : i32
    %c0_i32_0 = arith.constant 0 : i32
    %c0_i32_1 = arith.constant 0 : i32
    return %arg0, %c0_i32, %c0_i32_0 : i32, i32, i32
  }
  func.func @transform_2(%arg0: i32) -> (i32, i32, i32) {
    %c0_i32 = arith.constant 0 : i32
    %c0_i32_0 = arith.constant 0 : i32
    %c0_i32_1 = arith.constant 0 : i32
    return %arg0, %c0_i32, %c0_i32_0 : i32, i32, i32
  }
  func.func @transform_3(%arg0: i32) -> (i32, i32, i32) {
    %c0_i32 = arith.constant 0 : i32
    %c0_i32_0 = arith.constant 0 : i32
    %c0_i32_1 = arith.constant 0 : i32
    return %arg0, %c0_i32, %c0_i32_0 : i32, i32, i32
  }
  func.func @transform_4(%arg0: i32) -> (i32, i32, i32) {
    %c0_i32 = arith.constant 0 : i32
    %c0_i32_0 = arith.constant 0 : i32
    %c0_i32_1 = arith.constant 0 : i32
    return %arg0, %c0_i32, %c0_i32_0 : i32, i32, i32
  }
  func.func @transform_5(%arg0: i32) -> (i32, i32, i32) {
    %c0_i32 = arith.constant 0 : i32
    %c0_i32_0 = arith.constant 0 : i32
    %c0_i32_1 = arith.constant 0 : i32
    return %arg0, %c0_i32, %c0_i32_0 : i32, i32, i32
  }
}

module attributes {stable_mosaic.version = 11 : i64} {
  func.func @_conv_mm_kernel(%arg0: i32, %arg1: memref<72x72xbf16, #tpu.memory_space<vmem>>, %arg2: memref<72x16xbf16, #tpu.memory_space<vmem>>, %arg3: memref<1x16xf32, #tpu.memory_space<vmem>>, %arg4: memref<1x16xf32, #tpu.memory_space<vmem>>, %arg5: memref<72x16xbf16, #tpu.memory_space<vmem>>) attributes {dimension_semantics = [#tpu.dimension_semantics<parallel>], iteration_bounds = array<i64: 1>, scalar_prefetch = 0 : i64, scratch_operands = 0 : i64, tpu.core_type = #tpu.core_type<tc>, window_params = [{transform_indices = @transform_0, window_bounds = array<i64: 72, 72>}, {pipeline_mode = #tpu.pipeline_mode<synchronous>, transform_indices = @transform_1, window_bounds = array<i64: 72, 16>}, {pipeline_mode = #tpu.pipeline_mode<synchronous>, transform_indices = @transform_2, window_bounds = array<i64: 1, 16>}, {pipeline_mode = #tpu.pipeline_mode<synchronous>, transform_indices = @transform_3, window_bounds = array<i64: 1, 16>}, {transform_indices = @transform_4, window_bounds = array<i64: 72, 16>}]} {
    %c0 = arith.constant 0 : index
    %c0_0 = arith.constant 0 : index
    %0 = vector.load %arg1[%c0, %c0_0] : memref<72x72xbf16, #tpu.memory_space<vmem>>, vector<72x72xbf16>
    %c0_1 = arith.constant 0 : index
    %c0_2 = arith.constant 0 : index
    %1 = vector.load %arg2[%c0_1, %c0_2] : memref<72x16xbf16, #tpu.memory_space<vmem>>, vector<72x16xbf16>
    %cst = arith.constant dense<0.000000e+00> : vector<72x16xf32>
    %2 = tpu.matmul %0, %1, %cst {dimension_numbers = #tpu.dot_dimension_numbers<[1], [0], [0], [1], [0, 0, 1, 1], [], []>} : vector<72x72xbf16>, vector<72x16xbf16>, vector<72x16xf32> -> vector<72x16xf32>
    %c0_3 = arith.constant 0 : index
    %c0_4 = arith.constant 0 : index
    %3 = vector.load %arg3[%c0_3, %c0_4] : memref<1x16xf32, #tpu.memory_space<vmem>>, vector<1x16xf32>
    %4 = vector.broadcast %3 : vector<1x16xf32> to vector<72x16xf32>
    %5 = arith.mulf %2, %4 : vector<72x16xf32>
    %c0_5 = arith.constant 0 : index
    %c0_6 = arith.constant 0 : index
    %6 = vector.load %arg4[%c0_5, %c0_6] : memref<1x16xf32, #tpu.memory_space<vmem>>, vector<1x16xf32>
    %7 = vector.broadcast %6 : vector<1x16xf32> to vector<72x16xf32>
    %8 = arith.addf %5, %7 : vector<72x16xf32>
    %cst_7 = arith.constant 0.000000e+00 : f32
    %9 = vector.broadcast %cst_7 : f32 to vector<72x16xf32>
    %10 = arith.maximumf %8, %9 : vector<72x16xf32>
    %11 = arith.truncf %10 : vector<72x16xf32> to vector<72x16xbf16>
    %c0_8 = arith.constant 0 : index
    %c0_9 = arith.constant 0 : index
    %12 = vector.load %arg5[%c0_8, %c0_9] : memref<72x16xbf16, #tpu.memory_space<vmem>>, vector<72x16xbf16>
    tpu.vector_store %arg5[%c0_8, %c0_9], %11 {strides = array<i32>} : memref<72x16xbf16, #tpu.memory_space<vmem>>, vector<72x16xbf16>,
    return
  }
  func.func @transform_0(%arg0: i32) -> (i32, i32) {
    %c0_i32 = arith.constant 0 : i32
    %c0_i32_0 = arith.constant 0 : i32
    return %arg0, %c0_i32 : i32, i32
  }
  func.func @transform_1(%arg0: i32) -> (i32, i32) {
    %c0_i32 = arith.constant 0 : i32
    %c0_i32_0 = arith.constant 0 : i32
    %c0_i32_1 = arith.constant 0 : i32
    return %c0_i32, %c0_i32_0 : i32, i32
  }
  func.func @transform_2(%arg0: i32) -> (i32, i32) {
    %c0_i32 = arith.constant 0 : i32
    %c0_i32_0 = arith.constant 0 : i32
    %c0_i32_1 = arith.constant 0 : i32
    return %c0_i32, %c0_i32_0 : i32, i32
  }
  func.func @transform_3(%arg0: i32) -> (i32, i32) {
    %c0_i32 = arith.constant 0 : i32
    %c0_i32_0 = arith.constant 0 : i32
    %c0_i32_1 = arith.constant 0 : i32
    return %c0_i32, %c0_i32_0 : i32, i32
  }
  func.func @transform_4(%arg0: i32) -> (i32, i32) {
    %c0_i32 = arith.constant 0 : i32
    %c0_i32_0 = arith.constant 0 : i32
    return %arg0, %c0_i32 : i32, i32
  }
}

module attributes {stable_mosaic.version = 11 : i64} {
  func.func @_conv_mm_kernel(%arg0: i32, %arg1: memref<32x144xbf16, #tpu.memory_space<vmem>>, %arg2: memref<144x16xbf16, #tpu.memory_space<vmem>>, %arg3: memref<1x16xf32, #tpu.memory_space<vmem>>, %arg4: memref<1x16xf32, #tpu.memory_space<vmem>>, %arg5: memref<32x16xbf16, #tpu.memory_space<vmem>>) attributes {dimension_semantics = [#tpu.dimension_semantics<parallel>], iteration_bounds = array<i64: 1>, scalar_prefetch = 0 : i64, scratch_operands = 0 : i64, tpu.core_type = #tpu.core_type<tc>, window_params = [{transform_indices = @transform_0, window_bounds = array<i64: 32, 144>}, {pipeline_mode = #tpu.pipeline_mode<synchronous>, transform_indices = @transform_1, window_bounds = array<i64: 144, 16>}, {pipeline_mode = #tpu.pipeline_mode<synchronous>, transform_indices = @transform_2, window_bounds = array<i64: 1, 16>}, {pipeline_mode = #tpu.pipeline_mode<synchronous>, transform_indices = @transform_3, window_bounds = array<i64: 1, 16>}, {transform_indices = @transform_4, window_bounds = array<i64: 32, 16>}]} {
    %c0 = arith.constant 0 : index
    %c0_0 = arith.constant 0 : index
    %0 = vector.load %arg1[%c0, %c0_0] : memref<32x144xbf16, #tpu.memory_space<vmem>>, vector<32x144xbf16>
    %c0_1 = arith.constant 0 : index
    %c0_2 = arith.constant 0 : index
    %1 = vector.load %arg2[%c0_1, %c0_2] : memref<144x16xbf16, #tpu.memory_space<vmem>>, vector<144x16xbf16>
    %cst = arith.constant dense<0.000000e+00> : vector<32x16xf32>
    %2 = tpu.matmul %0, %1, %cst {dimension_numbers = #tpu.dot_dimension_numbers<[1], [0], [0], [1], [0, 0, 1, 1], [], []>} : vector<32x144xbf16>, vector<144x16xbf16>, vector<32x16xf32> -> vector<32x16xf32>
    %c0_3 = arith.constant 0 : index
    %c0_4 = arith.constant 0 : index
    %3 = vector.load %arg3[%c0_3, %c0_4] : memref<1x16xf32, #tpu.memory_space<vmem>>, vector<1x16xf32>
    %4 = vector.broadcast %3 : vector<1x16xf32> to vector<32x16xf32>
    %5 = arith.mulf %2, %4 : vector<32x16xf32>
    %c0_5 = arith.constant 0 : index
    %c0_6 = arith.constant 0 : index
    %6 = vector.load %arg4[%c0_5, %c0_6] : memref<1x16xf32, #tpu.memory_space<vmem>>, vector<1x16xf32>
    %7 = vector.broadcast %6 : vector<1x16xf32> to vector<32x16xf32>
    %8 = arith.addf %5, %7 : vector<32x16xf32>
    %cst_7 = arith.constant 0.000000e+00 : f32
    %9 = vector.broadcast %cst_7 : f32 to vector<32x16xf32>
    %10 = arith.maximumf %8, %9 : vector<32x16xf32>
    %11 = arith.truncf %10 : vector<32x16xf32> to vector<32x16xbf16>
    %c0_8 = arith.constant 0 : index
    %c0_9 = arith.constant 0 : index
    %12 = vector.load %arg5[%c0_8, %c0_9] : memref<32x16xbf16, #tpu.memory_space<vmem>>, vector<32x16xbf16>
    tpu.vector_store %arg5[%c0_8, %c0_9], %11 {strides = array<i32>} : memref<32x16xbf16, #tpu.memory_space<vmem>>, vector<32x16xbf16>,
    return
  }
  func.func @transform_0(%arg0: i32) -> (i32, i32) {
    %c0_i32 = arith.constant 0 : i32
    %c0_i32_0 = arith.constant 0 : i32
    return %arg0, %c0_i32 : i32, i32
  }
  func.func @transform_1(%arg0: i32) -> (i32, i32) {
    %c0_i32 = arith.constant 0 : i32
    %c0_i32_0 = arith.constant 0 : i32
    %c0_i32_1 = arith.constant 0 : i32
    return %c0_i32, %c0_i32_0 : i32, i32
  }
  func.func @transform_2(%arg0: i32) -> (i32, i32) {
    %c0_i32 = arith.constant 0 : i32
    %c0_i32_0 = arith.constant 0 : i32
    %c0_i32_1 = arith.constant 0 : i32
    return %c0_i32, %c0_i32_0 : i32, i32
  }
  func.func @transform_3(%arg0: i32) -> (i32, i32) {
    %c0_i32 = arith.constant 0 : i32
    %c0_i32_0 = arith.constant 0 : i32
    %c0_i32_1 = arith.constant 0 : i32
    return %c0_i32, %c0_i32_0 : i32, i32
  }
  func.func @transform_4(%arg0: i32) -> (i32, i32) {
    %c0_i32 = arith.constant 0 : i32
    %c0_i32_0 = arith.constant 0 : i32
    return %arg0, %c0_i32 : i32, i32
  }
}

module attributes {stable_mosaic.version = 11 : i64} {
  func.func @_maxpool_kernel(%arg0: i32, %arg1: memref<4x2x16xbf16, #tpu.memory_space<vmem>>, %arg2: memref<4x2x16xbf16, #tpu.memory_space<vmem>>, %arg3: memref<4x2x16xbf16, #tpu.memory_space<vmem>>, %arg4: memref<4x2x16xbf16, #tpu.memory_space<vmem>>, %arg5: memref<4x2x16xbf16, #tpu.memory_space<vmem>>, %arg6: memref<4x2x16xi8, #tpu.memory_space<vmem>>) attributes {dimension_semantics = [#tpu.dimension_semantics<parallel>], iteration_bounds = array<i64: 1>, scalar_prefetch = 0 : i64, scratch_operands = 0 : i64, tpu.core_type = #tpu.core_type<tc>, window_params = [{transform_indices = @transform_0, window_bounds = array<i64: 4, 2, 16>}, {transform_indices = @transform_1, window_bounds = array<i64: 4, 2, 16>}, {transform_indices = @transform_2, window_bounds = array<i64: 4, 2, 16>}, {transform_indices = @transform_3, window_bounds = array<i64: 4, 2, 16>}, {transform_indices = @transform_4, window_bounds = array<i64: 4, 2, 16>}, {transform_indices = @transform_5, window_bounds = array<i64: 4, 2, 16>}]} {
    %c0 = arith.constant 0 : index
    %c0_0 = arith.constant 0 : index
    %c0_1 = arith.constant 0 : index
    %0 = vector.load %arg1[%c0, %c0_0, %c0_1] : memref<4x2x16xbf16, #tpu.memory_space<vmem>>, vector<4x2x16xbf16>
    %c0_2 = arith.constant 0 : index
    %c0_3 = arith.constant 0 : index
    %c0_4 = arith.constant 0 : index
    %1 = vector.load %arg2[%c0_2, %c0_3, %c0_4] : memref<4x2x16xbf16, #tpu.memory_space<vmem>>, vector<4x2x16xbf16>
    %c0_5 = arith.constant 0 : index
    %c0_6 = arith.constant 0 : index
    %c0_7 = arith.constant 0 : index
    %2 = vector.load %arg3[%c0_5, %c0_6, %c0_7] : memref<4x2x16xbf16, #tpu.memory_space<vmem>>, vector<4x2x16xbf16>
    %c0_8 = arith.constant 0 : index
    %c0_9 = arith.constant 0 : index
    %c0_10 = arith.constant 0 : index
    %3 = vector.load %arg4[%c0_8, %c0_9, %c0_10] : memref<4x2x16xbf16, #tpu.memory_space<vmem>>, vector<4x2x16xbf16>
    %4 = arith.maximumf %0, %1 : vector<4x2x16xbf16>
    %5 = arith.maximumf %2, %3 : vector<4x2x16xbf16>
    %6 = arith.maximumf %4, %5 : vector<4x2x16xbf16>
    %7 = arith.cmpf oge, %1, %6 : vector<4x2x16xbf16>
    %8 = arith.cmpf oge, %2, %6 : vector<4x2x16xbf16>
    %c2_i32 = arith.constant 2 : i32
    %c3_i32 = arith.constant 3 : i32
    %9 = vector.broadcast %c2_i32 : i32 to vector<4x2x16xi32>
    %10 = vector.broadcast %c3_i32 : i32 to vector<4x2x16xi32>
    %11 = arith.select %8, %9, %10 : vector<4x2x16xi1>, vector<4x2x16xi32>
    %c1_i32 = arith.constant 1 : i32
    %12 = vector.broadcast %c1_i32 : i32 to vector<4x2x16xi32>
    %13 = arith.select %7, %12, %11 : vector<4x2x16xi1>, vector<4x2x16xi32>
    %14 = arith.cmpf oge, %0, %6 : vector<4x2x16xbf16>
    %c0_i32 = arith.constant 0 : i32
    %15 = vector.broadcast %c0_i32 : i32 to vector<4x2x16xi32>
    %16 = arith.select %14, %15, %13 : vector<4x2x16xi1>, vector<4x2x16xi32>
    %c0_11 = arith.constant 0 : index
    %c0_12 = arith.constant 0 : index
    %c0_13 = arith.constant 0 : index
    %17 = vector.load %arg5[%c0_11, %c0_12, %c0_13] : memref<4x2x16xbf16, #tpu.memory_space<vmem>>, vector<4x2x16xbf16>
    tpu.vector_store %arg5[%c0_11, %c0_12, %c0_13], %6 {strides = array<i32>} : memref<4x2x16xbf16, #tpu.memory_space<vmem>>, vector<4x2x16xbf16>,
    %18 = arith.trunci %16 : vector<4x2x16xi32> to vector<4x2x16xi8>
    %c0_14 = arith.constant 0 : index
    %c0_15 = arith.constant 0 : index
    %c0_16 = arith.constant 0 : index
    %19 = vector.load %arg6[%c0_14, %c0_15, %c0_16] : memref<4x2x16xi8, #tpu.memory_space<vmem>>, vector<4x2x16xi8>
    tpu.vector_store %arg6[%c0_14, %c0_15, %c0_16], %18 {strides = array<i32>} : memref<4x2x16xi8, #tpu.memory_space<vmem>>, vector<4x2x16xi8>,
    return
  }
  func.func @transform_0(%arg0: i32) -> (i32, i32, i32) {
    %c0_i32 = arith.constant 0 : i32
    %c0_i32_0 = arith.constant 0 : i32
    %c0_i32_1 = arith.constant 0 : i32
    return %arg0, %c0_i32, %c0_i32_0 : i32, i32, i32
  }
  func.func @transform_1(%arg0: i32) -> (i32, i32, i32) {
    %c0_i32 = arith.constant 0 : i32
    %c0_i32_0 = arith.constant 0 : i32
    %c0_i32_1 = arith.constant 0 : i32
    return %arg0, %c0_i32, %c0_i32_0 : i32, i32, i32
  }
  func.func @transform_2(%arg0: i32) -> (i32, i32, i32) {
    %c0_i32 = arith.constant 0 : i32
    %c0_i32_0 = arith.constant 0 : i32
    %c0_i32_1 = arith.constant 0 : i32
    return %arg0, %c0_i32, %c0_i32_0 : i32, i32, i32
  }
  func.func @transform_3(%arg0: i32) -> (i32, i32, i32) {
    %c0_i32 = arith.constant 0 : i32
    %c0_i32_0 = arith.constant 0 : i32
    %c0_i32_1 = arith.constant 0 : i32
    return %arg0, %c0_i32, %c0_i32_0 : i32, i32, i32
  }
  func.func @transform_4(%arg0: i32) -> (i32, i32, i32) {
    %c0_i32 = arith.constant 0 : i32
    %c0_i32_0 = arith.constant 0 : i32
    %c0_i32_1 = arith.constant 0 : i32
    return %arg0, %c0_i32, %c0_i32_0 : i32, i32, i32
  }
  func.func @transform_5(%arg0: i32) -> (i32, i32, i32) {
    %c0_i32 = arith.constant 0 : i32
    %c0_i32_0 = arith.constant 0 : i32
    %c0_i32_1 = arith.constant 0 : i32
    return %arg0, %c0_i32, %c0_i32_0 : i32, i32, i32
  }
}

module attributes {stable_mosaic.version = 11 : i64} {
  func.func @_conv_mm_kernel(%arg0: i32, %arg1: memref<8x16xbf16, #tpu.memory_space<vmem>>, %arg2: memref<16x16xbf16, #tpu.memory_space<vmem>>, %arg3: memref<1x16xf32, #tpu.memory_space<vmem>>, %arg4: memref<1x16xf32, #tpu.memory_space<vmem>>, %arg5: memref<8x16xbf16, #tpu.memory_space<vmem>>) attributes {dimension_semantics = [#tpu.dimension_semantics<parallel>], iteration_bounds = array<i64: 1>, scalar_prefetch = 0 : i64, scratch_operands = 0 : i64, tpu.core_type = #tpu.core_type<tc>, window_params = [{transform_indices = @transform_0, window_bounds = array<i64: 8, 16>}, {pipeline_mode = #tpu.pipeline_mode<synchronous>, transform_indices = @transform_1, window_bounds = array<i64: 16, 16>}, {pipeline_mode = #tpu.pipeline_mode<synchronous>, transform_indices = @transform_2, window_bounds = array<i64: 1, 16>}, {pipeline_mode = #tpu.pipeline_mode<synchronous>, transform_indices = @transform_3, window_bounds = array<i64: 1, 16>}, {transform_indices = @transform_4, window_bounds = array<i64: 8, 16>}]} {
    %c0 = arith.constant 0 : index
    %c0_0 = arith.constant 0 : index
    %0 = vector.load %arg1[%c0, %c0_0] : memref<8x16xbf16, #tpu.memory_space<vmem>>, vector<8x16xbf16>
    %c0_1 = arith.constant 0 : index
    %c0_2 = arith.constant 0 : index
    %1 = vector.load %arg2[%c0_1, %c0_2] : memref<16x16xbf16, #tpu.memory_space<vmem>>, vector<16x16xbf16>
    %cst = arith.constant dense<0.000000e+00> : vector<8x16xf32>
    %2 = tpu.matmul %0, %1, %cst {dimension_numbers = #tpu.dot_dimension_numbers<[1], [0], [0], [1], [0, 0, 1, 1], [], []>} : vector<8x16xbf16>, vector<16x16xbf16>, vector<8x16xf32> -> vector<8x16xf32>
    %c0_3 = arith.constant 0 : index
    %c0_4 = arith.constant 0 : index
    %3 = vector.load %arg3[%c0_3, %c0_4] : memref<1x16xf32, #tpu.memory_space<vmem>>, vector<1x16xf32>
    %4 = vector.broadcast %3 : vector<1x16xf32> to vector<8x16xf32>
    %5 = arith.mulf %2, %4 : vector<8x16xf32>
    %c0_5 = arith.constant 0 : index
    %c0_6 = arith.constant 0 : index
    %6 = vector.load %arg4[%c0_5, %c0_6] : memref<1x16xf32, #tpu.memory_space<vmem>>, vector<1x16xf32>
    %7 = vector.broadcast %6 : vector<1x16xf32> to vector<8x16xf32>
    %8 = arith.addf %5, %7 : vector<8x16xf32>
    %9 = arith.truncf %8 : vector<8x16xf32> to vector<8x16xbf16>
    %c0_7 = arith.constant 0 : index
    %c0_8 = arith.constant 0 : index
    %10 = vector.load %arg5[%c0_7, %c0_8] : memref<8x16xbf16, #tpu.memory_space<vmem>>, vector<8x16xbf16>
    tpu.vector_store %arg5[%c0_7, %c0_8], %9 {strides = array<i32>} : memref<8x16xbf16, #tpu.memory_space<vmem>>, vector<8x16xbf16>,
    return
  }
  func.func @transform_0(%arg0: i32) -> (i32, i32) {
    %c0_i32 = arith.constant 0 : i32
    %c0_i32_0 = arith.constant 0 : i32
    return %arg0, %c0_i32 : i32, i32
  }
  func.func @transform_1(%arg0: i32) -> (i32, i32) {
    %c0_i32 = arith.constant 0 : i32
    %c0_i32_0 = arith.constant 0 : i32
    %c0_i32_1 = arith.constant 0 : i32
    return %c0_i32, %c0_i32_0 : i32, i32
  }
  func.func @transform_2(%arg0: i32) -> (i32, i32) {
    %c0_i32 = arith.constant 0 : i32
    %c0_i32_0 = arith.constant 0 : i32
    %c0_i32_1 = arith.constant 0 : i32
    return %c0_i32, %c0_i32_0 : i32, i32
  }
  func.func @transform_3(%arg0: i32) -> (i32, i32) {
    %c0_i32 = arith.constant 0 : i32
    %c0_i32_0 = arith.constant 0 : i32
    %c0_i32_1 = arith.constant 0 : i32
    return %c0_i32, %c0_i32_0 : i32, i32
  }
  func.func @transform_4(%arg0: i32) -> (i32, i32) {
    %c0_i32 = arith.constant 0 : i32
    %c0_i32_0 = arith.constant 0 : i32
    return %arg0, %c0_i32 : i32, i32
  }
}

module attributes {stable_mosaic.version = 11 : i64} {
  func.func @_maxunpool_kernel(%arg0: i32, %arg1: memref<4x2x16xbf16, #tpu.memory_space<vmem>>, %arg2: memref<4x2x16xi8, #tpu.memory_space<vmem>>, %arg3: memref<4x2x16xbf16, #tpu.memory_space<vmem>>, %arg4: memref<4x2x16xbf16, #tpu.memory_space<vmem>>, %arg5: memref<4x2x16xbf16, #tpu.memory_space<vmem>>, %arg6: memref<4x2x16xbf16, #tpu.memory_space<vmem>>) attributes {dimension_semantics = [#tpu.dimension_semantics<parallel>], iteration_bounds = array<i64: 1>, scalar_prefetch = 0 : i64, scratch_operands = 0 : i64, tpu.core_type = #tpu.core_type<tc>, window_params = [{transform_indices = @transform_0, window_bounds = array<i64: 4, 2, 16>}, {transform_indices = @transform_1, window_bounds = array<i64: 4, 2, 16>}, {transform_indices = @transform_2, window_bounds = array<i64: 4, 2, 16>}, {transform_indices = @transform_3, window_bounds = array<i64: 4, 2, 16>}, {transform_indices = @transform_4, window_bounds = array<i64: 4, 2, 16>}, {transform_indices = @transform_5, window_bounds = array<i64: 4, 2, 16>}]} {
    %c0 = arith.constant 0 : index
    %c0_0 = arith.constant 0 : index
    %c0_1 = arith.constant 0 : index
    %0 = vector.load %arg1[%c0, %c0_0, %c0_1] : memref<4x2x16xbf16, #tpu.memory_space<vmem>>, vector<4x2x16xbf16>
    %c0_2 = arith.constant 0 : index
    %c0_3 = arith.constant 0 : index
    %c0_4 = arith.constant 0 : index
    %1 = vector.load %arg2[%c0_2, %c0_3, %c0_4] : memref<4x2x16xi8, #tpu.memory_space<vmem>>, vector<4x2x16xi8>
    %2 = arith.extsi %1 : vector<4x2x16xi8> to vector<4x2x16xi32>
    %cst = arith.constant 0.000000e+00 : bf16
    %3 = vector.broadcast %cst : bf16 to vector<4x2x16xbf16>
    %c0_i32 = arith.constant 0 : i32
    %4 = vector.broadcast %c0_i32 : i32 to vector<4x2x16xi32>
    %5 = arith.cmpi eq, %2, %4 : vector<4x2x16xi32>
    %6 = arith.select %5, %0, %3 : vector<4x2x16xi1>, vector<4x2x16xbf16>
    %c0_5 = arith.constant 0 : index
    %c0_6 = arith.constant 0 : index
    %c0_7 = arith.constant 0 : index
    %7 = vector.load %arg3[%c0_5, %c0_6, %c0_7] : memref<4x2x16xbf16, #tpu.memory_space<vmem>>, vector<4x2x16xbf16>
    tpu.vector_store %arg3[%c0_5, %c0_6, %c0_7], %6 {strides = array<i32>} : memref<4x2x16xbf16, #tpu.memory_space<vmem>>, vector<4x2x16xbf16>,
    %c1_i32 = arith.constant 1 : i32
    %8 = vector.broadcast %c1_i32 : i32 to vector<4x2x16xi32>
    %9 = arith.cmpi eq, %2, %8 : vector<4x2x16xi32>
    %10 = arith.select %9, %0, %3 : vector<4x2x16xi1>, vector<4x2x16xbf16>
    %c0_8 = arith.constant 0 : index
    %c0_9 = arith.constant 0 : index
    %c0_10 = arith.constant 0 : index
    %11 = vector.load %arg4[%c0_8, %c0_9, %c0_10] : memref<4x2x16xbf16, #tpu.memory_space<vmem>>, vector<4x2x16xbf16>
    tpu.vector_store %arg4[%c0_8, %c0_9, %c0_10], %10 {strides = array<i32>} : memref<4x2x16xbf16, #tpu.memory_space<vmem>>, vector<4x2x16xbf16>,
    %c2_i32 = arith.constant 2 : i32
    %12 = vector.broadcast %c2_i32 : i32 to vector<4x2x16xi32>
    %13 = arith.cmpi eq, %2, %12 : vector<4x2x16xi32>
    %14 = arith.select %13, %0, %3 : vector<4x2x16xi1>, vector<4x2x16xbf16>
    %c0_11 = arith.constant 0 : index
    %c0_12 = arith.constant 0 : index
    %c0_13 = arith.constant 0 : index
    %15 = vector.load %arg5[%c0_11, %c0_12, %c0_13] : memref<4x2x16xbf16, #tpu.memory_space<vmem>>, vector<4x2x16xbf16>
    tpu.vector_store %arg5[%c0_11, %c0_12, %c0_13], %14 {strides = array<i32>} : memref<4x2x16xbf16, #tpu.memory_space<vmem>>, vector<4x2x16xbf16>,
    %c3_i32 = arith.constant 3 : i32
    %16 = vector.broadcast %c3_i32 : i32 to vector<4x2x16xi32>
    %17 = arith.cmpi eq, %2, %16 : vector<4x2x16xi32>
    %18 = arith.select %17, %0, %3 : vector<4x2x16xi1>, vector<4x2x16xbf16>
    %c0_14 = arith.constant 0 : index
    %c0_15 = arith.constant 0 : index
    %c0_16 = arith.constant 0 : index
    %19 = vector.load %arg6[%c0_14, %c0_15, %c0_16] : memref<4x2x16xbf16, #tpu.memory_space<vmem>>, vector<4x2x16xbf16>
    tpu.vector_store %arg6[%c0_14, %c0_15, %c0_16], %18 {strides = array<i32>} : memref<4x2x16xbf16, #tpu.memory_space<vmem>>, vector<4x2x16xbf16>,
    return
  }
  func.func @transform_0(%arg0: i32) -> (i32, i32, i32) {
    %c0_i32 = arith.constant 0 : i32
    %c0_i32_0 = arith.constant 0 : i32
    %c0_i32_1 = arith.constant 0 : i32
    return %arg0, %c0_i32, %c0_i32_0 : i32, i32, i32
  }
  func.func @transform_1(%arg0: i32) -> (i32, i32, i32) {
    %c0_i32 = arith.constant 0 : i32
    %c0_i32_0 = arith.constant 0 : i32
    %c0_i32_1 = arith.constant 0 : i32
    return %arg0, %c0_i32, %c0_i32_0 : i32, i32, i32
  }
  func.func @transform_2(%arg0: i32) -> (i32, i32, i32) {
    %c0_i32 = arith.constant 0 : i32
    %c0_i32_0 = arith.constant 0 : i32
    %c0_i32_1 = arith.constant 0 : i32
    return %arg0, %c0_i32, %c0_i32_0 : i32, i32, i32
  }
  func.func @transform_3(%arg0: i32) -> (i32, i32, i32) {
    %c0_i32 = arith.constant 0 : i32
    %c0_i32_0 = arith.constant 0 : i32
    %c0_i32_1 = arith.constant 0 : i32
    return %arg0, %c0_i32, %c0_i32_0 : i32, i32, i32
  }
  func.func @transform_4(%arg0: i32) -> (i32, i32, i32) {
    %c0_i32 = arith.constant 0 : i32
    %c0_i32_0 = arith.constant 0 : i32
    %c0_i32_1 = arith.constant 0 : i32
    return %arg0, %c0_i32, %c0_i32_0 : i32, i32, i32
  }
  func.func @transform_5(%arg0: i32) -> (i32, i32, i32) {
    %c0_i32 = arith.constant 0 : i32
    %c0_i32_0 = arith.constant 0 : i32
    %c0_i32_1 = arith.constant 0 : i32
    return %arg0, %c0_i32, %c0_i32_0 : i32, i32, i32
  }
}

module attributes {stable_mosaic.version = 11 : i64} {
  func.func @_conv_mm_kernel(%arg0: i32, %arg1: memref<72x144xbf16, #tpu.memory_space<vmem>>, %arg2: memref<144x16xbf16, #tpu.memory_space<vmem>>, %arg3: memref<1x16xf32, #tpu.memory_space<vmem>>, %arg4: memref<1x16xf32, #tpu.memory_space<vmem>>, %arg5: memref<72x16xbf16, #tpu.memory_space<vmem>>) attributes {dimension_semantics = [#tpu.dimension_semantics<parallel>], iteration_bounds = array<i64: 1>, scalar_prefetch = 0 : i64, scratch_operands = 0 : i64, tpu.core_type = #tpu.core_type<tc>, window_params = [{transform_indices = @transform_0, window_bounds = array<i64: 72, 144>}, {pipeline_mode = #tpu.pipeline_mode<synchronous>, transform_indices = @transform_1, window_bounds = array<i64: 144, 16>}, {pipeline_mode = #tpu.pipeline_mode<synchronous>, transform_indices = @transform_2, window_bounds = array<i64: 1, 16>}, {pipeline_mode = #tpu.pipeline_mode<synchronous>, transform_indices = @transform_3, window_bounds = array<i64: 1, 16>}, {transform_indices = @transform_4, window_bounds = array<i64: 72, 16>}]} {
    %c0 = arith.constant 0 : index
    %c0_0 = arith.constant 0 : index
    %0 = vector.load %arg1[%c0, %c0_0] : memref<72x144xbf16, #tpu.memory_space<vmem>>, vector<72x144xbf16>
    %c0_1 = arith.constant 0 : index
    %c0_2 = arith.constant 0 : index
    %1 = vector.load %arg2[%c0_1, %c0_2] : memref<144x16xbf16, #tpu.memory_space<vmem>>, vector<144x16xbf16>
    %cst = arith.constant dense<0.000000e+00> : vector<72x16xf32>
    %2 = tpu.matmul %0, %1, %cst {dimension_numbers = #tpu.dot_dimension_numbers<[1], [0], [0], [1], [0, 0, 1, 1], [], []>} : vector<72x144xbf16>, vector<144x16xbf16>, vector<72x16xf32> -> vector<72x16xf32>
    %c0_3 = arith.constant 0 : index
    %c0_4 = arith.constant 0 : index
    %3 = vector.load %arg3[%c0_3, %c0_4] : memref<1x16xf32, #tpu.memory_space<vmem>>, vector<1x16xf32>
    %4 = vector.broadcast %3 : vector<1x16xf32> to vector<72x16xf32>
    %5 = arith.mulf %2, %4 : vector<72x16xf32>
    %c0_5 = arith.constant 0 : index
    %c0_6 = arith.constant 0 : index
    %6 = vector.load %arg4[%c0_5, %c0_6] : memref<1x16xf32, #tpu.memory_space<vmem>>, vector<1x16xf32>
    %7 = vector.broadcast %6 : vector<1x16xf32> to vector<72x16xf32>
    %8 = arith.addf %5, %7 : vector<72x16xf32>
    %cst_7 = arith.constant 0.000000e+00 : f32
    %9 = vector.broadcast %cst_7 : f32 to vector<72x16xf32>
    %10 = arith.maximumf %8, %9 : vector<72x16xf32>
    %11 = arith.truncf %10 : vector<72x16xf32> to vector<72x16xbf16>
    %c0_8 = arith.constant 0 : index
    %c0_9 = arith.constant 0 : index
    %12 = vector.load %arg5[%c0_8, %c0_9] : memref<72x16xbf16, #tpu.memory_space<vmem>>, vector<72x16xbf16>
    tpu.vector_store %arg5[%c0_8, %c0_9], %11 {strides = array<i32>} : memref<72x16xbf16, #tpu.memory_space<vmem>>, vector<72x16xbf16>,
    return
  }
  func.func @transform_0(%arg0: i32) -> (i32, i32) {
    %c0_i32 = arith.constant 0 : i32
    %c0_i32_0 = arith.constant 0 : i32
    return %arg0, %c0_i32 : i32, i32
  }
  func.func @transform_1(%arg0: i32) -> (i32, i32) {
    %c0_i32 = arith.constant 0 : i32
    %c0_i32_0 = arith.constant 0 : i32
    %c0_i32_1 = arith.constant 0 : i32
    return %c0_i32, %c0_i32_0 : i32, i32
  }
  func.func @transform_2(%arg0: i32) -> (i32, i32) {
    %c0_i32 = arith.constant 0 : i32
    %c0_i32_0 = arith.constant 0 : i32
    %c0_i32_1 = arith.constant 0 : i32
    return %c0_i32, %c0_i32_0 : i32, i32
  }
  func.func @transform_3(%arg0: i32) -> (i32, i32) {
    %c0_i32 = arith.constant 0 : i32
    %c0_i32_0 = arith.constant 0 : i32
    %c0_i32_1 = arith.constant 0 : i32
    return %c0_i32, %c0_i32_0 : i32, i32
  }
  func.func @transform_4(%arg0: i32) -> (i32, i32) {
    %c0_i32 = arith.constant 0 : i32
    %c0_i32_0 = arith.constant 0 : i32
    return %arg0, %c0_i32 : i32, i32
  }
}

module attributes {stable_mosaic.version = 11 : i64} {
  func.func @_conv_mm_kernel(%arg0: i32, %arg1: memref<128x144xbf16, #tpu.memory_space<vmem>>, %arg2: memref<144x8xbf16, #tpu.memory_space<vmem>>, %arg3: memref<1x8xf32, #tpu.memory_space<vmem>>, %arg4: memref<1x8xf32, #tpu.memory_space<vmem>>, %arg5: memref<128x8xbf16, #tpu.memory_space<vmem>>) attributes {dimension_semantics = [#tpu.dimension_semantics<parallel>], iteration_bounds = array<i64: 1>, scalar_prefetch = 0 : i64, scratch_operands = 0 : i64, tpu.core_type = #tpu.core_type<tc>, window_params = [{transform_indices = @transform_0, window_bounds = array<i64: 128, 144>}, {pipeline_mode = #tpu.pipeline_mode<synchronous>, transform_indices = @transform_1, window_bounds = array<i64: 144, 8>}, {pipeline_mode = #tpu.pipeline_mode<synchronous>, transform_indices = @transform_2, window_bounds = array<i64: 1, 8>}, {pipeline_mode = #tpu.pipeline_mode<synchronous>, transform_indices = @transform_3, window_bounds = array<i64: 1, 8>}, {transform_indices = @transform_4, window_bounds = array<i64: 128, 8>}]} {
    %c0 = arith.constant 0 : index
    %c0_0 = arith.constant 0 : index
    %0 = vector.load %arg1[%c0, %c0_0] : memref<128x144xbf16, #tpu.memory_space<vmem>>, vector<128x144xbf16>
    %c0_1 = arith.constant 0 : index
    %c0_2 = arith.constant 0 : index
    %1 = vector.load %arg2[%c0_1, %c0_2] : memref<144x8xbf16, #tpu.memory_space<vmem>>, vector<144x8xbf16>
    %cst = arith.constant dense<0.000000e+00> : vector<128x8xf32>
    %2 = tpu.matmul %0, %1, %cst {dimension_numbers = #tpu.dot_dimension_numbers<[1], [0], [0], [1], [0, 0, 1, 1], [], []>} : vector<128x144xbf16>, vector<144x8xbf16>, vector<128x8xf32> -> vector<128x8xf32>
    %c0_3 = arith.constant 0 : index
    %c0_4 = arith.constant 0 : index
    %3 = vector.load %arg3[%c0_3, %c0_4] : memref<1x8xf32, #tpu.memory_space<vmem>>, vector<1x8xf32>
    %4 = vector.broadcast %3 : vector<1x8xf32> to vector<128x8xf32>
    %5 = arith.mulf %2, %4 : vector<128x8xf32>
    %c0_5 = arith.constant 0 : index
    %c0_6 = arith.constant 0 : index
    %6 = vector.load %arg4[%c0_5, %c0_6] : memref<1x8xf32, #tpu.memory_space<vmem>>, vector<1x8xf32>
    %7 = vector.broadcast %6 : vector<1x8xf32> to vector<128x8xf32>
    %8 = arith.addf %5, %7 : vector<128x8xf32>
    %cst_7 = arith.constant 0.000000e+00 : f32
    %9 = vector.broadcast %cst_7 : f32 to vector<128x8xf32>
    %10 = arith.maximumf %8, %9 : vector<128x8xf32>
    %11 = arith.truncf %10 : vector<128x8xf32> to vector<128x8xbf16>
    %c0_8 = arith.constant 0 : index
    %c0_9 = arith.constant 0 : index
    %12 = vector.load %arg5[%c0_8, %c0_9] : memref<128x8xbf16, #tpu.memory_space<vmem>>, vector<128x8xbf16>
    tpu.vector_store %arg5[%c0_8, %c0_9], %11 {strides = array<i32>} : memref<128x8xbf16, #tpu.memory_space<vmem>>, vector<128x8xbf16>,
    return
  }
  func.func @transform_0(%arg0: i32) -> (i32, i32) {
    %c0_i32 = arith.constant 0 : i32
    %c0_i32_0 = arith.constant 0 : i32
    return %arg0, %c0_i32 : i32, i32
  }
  func.func @transform_1(%arg0: i32) -> (i32, i32) {
    %c0_i32 = arith.constant 0 : i32
    %c0_i32_0 = arith.constant 0 : i32
    %c0_i32_1 = arith.constant 0 : i32
    return %c0_i32, %c0_i32_0 : i32, i32
  }
  func.func @transform_2(%arg0: i32) -> (i32, i32) {
    %c0_i32 = arith.constant 0 : i32
    %c0_i32_0 = arith.constant 0 : i32
    %c0_i32_1 = arith.constant 0 : i32
    return %c0_i32, %c0_i32_0 : i32, i32
  }
  func.func @transform_3(%arg0: i32) -> (i32, i32) {
    %c0_i32 = arith.constant 0 : i32
    %c0_i32_0 = arith.constant 0 : i32
    %c0_i32_1 = arith.constant 0 : i32
    return %c0_i32, %c0_i32_0 : i32, i32
  }
  func.func @transform_4(%arg0: i32) -> (i32, i32) {
    %c0_i32 = arith.constant 0 : i32
    %c0_i32_0 = arith.constant 0 : i32
    return %arg0, %c0_i32 : i32, i32
  }
}

module attributes {stable_mosaic.version = 11 : i64} {
  func.func @_maxunpool_kernel(%arg0: i32, %arg1: memref<16x8x8xbf16, #tpu.memory_space<vmem>>, %arg2: memref<16x8x8xi8, #tpu.memory_space<vmem>>, %arg3: memref<16x8x8xbf16, #tpu.memory_space<vmem>>, %arg4: memref<16x8x8xbf16, #tpu.memory_space<vmem>>, %arg5: memref<16x8x8xbf16, #tpu.memory_space<vmem>>, %arg6: memref<16x8x8xbf16, #tpu.memory_space<vmem>>) attributes {dimension_semantics = [#tpu.dimension_semantics<parallel>], iteration_bounds = array<i64: 1>, scalar_prefetch = 0 : i64, scratch_operands = 0 : i64, tpu.core_type = #tpu.core_type<tc>, window_params = [{transform_indices = @transform_0, window_bounds = array<i64: 16, 8, 8>}, {transform_indices = @transform_1, window_bounds = array<i64: 16, 8, 8>}, {transform_indices = @transform_2, window_bounds = array<i64: 16, 8, 8>}, {transform_indices = @transform_3, window_bounds = array<i64: 16, 8, 8>}, {transform_indices = @transform_4, window_bounds = array<i64: 16, 8, 8>}, {transform_indices = @transform_5, window_bounds = array<i64: 16, 8, 8>}]} {
    %c0 = arith.constant 0 : index
    %c0_0 = arith.constant 0 : index
    %c0_1 = arith.constant 0 : index
    %0 = vector.load %arg1[%c0, %c0_0, %c0_1] : memref<16x8x8xbf16, #tpu.memory_space<vmem>>, vector<16x8x8xbf16>
    %c0_2 = arith.constant 0 : index
    %c0_3 = arith.constant 0 : index
    %c0_4 = arith.constant 0 : index
    %1 = vector.load %arg2[%c0_2, %c0_3, %c0_4] : memref<16x8x8xi8, #tpu.memory_space<vmem>>, vector<16x8x8xi8>
    %2 = arith.extsi %1 : vector<16x8x8xi8> to vector<16x8x8xi32>
    %cst = arith.constant 0.000000e+00 : bf16
    %3 = vector.broadcast %cst : bf16 to vector<16x8x8xbf16>
    %c0_i32 = arith.constant 0 : i32
    %4 = vector.broadcast %c0_i32 : i32 to vector<16x8x8xi32>
    %5 = arith.cmpi eq, %2, %4 : vector<16x8x8xi32>
    %6 = arith.select %5, %0, %3 : vector<16x8x8xi1>, vector<16x8x8xbf16>
    %c0_5 = arith.constant 0 : index
    %c0_6 = arith.constant 0 : index
    %c0_7 = arith.constant 0 : index
    %7 = vector.load %arg3[%c0_5, %c0_6, %c0_7] : memref<16x8x8xbf16, #tpu.memory_space<vmem>>, vector<16x8x8xbf16>
    tpu.vector_store %arg3[%c0_5, %c0_6, %c0_7], %6 {strides = array<i32>} : memref<16x8x8xbf16, #tpu.memory_space<vmem>>, vector<16x8x8xbf16>,
    %c1_i32 = arith.constant 1 : i32
    %8 = vector.broadcast %c1_i32 : i32 to vector<16x8x8xi32>
    %9 = arith.cmpi eq, %2, %8 : vector<16x8x8xi32>
    %10 = arith.select %9, %0, %3 : vector<16x8x8xi1>, vector<16x8x8xbf16>
    %c0_8 = arith.constant 0 : index
    %c0_9 = arith.constant 0 : index
    %c0_10 = arith.constant 0 : index
    %11 = vector.load %arg4[%c0_8, %c0_9, %c0_10] : memref<16x8x8xbf16, #tpu.memory_space<vmem>>, vector<16x8x8xbf16>
    tpu.vector_store %arg4[%c0_8, %c0_9, %c0_10], %10 {strides = array<i32>} : memref<16x8x8xbf16, #tpu.memory_space<vmem>>, vector<16x8x8xbf16>,
    %c2_i32 = arith.constant 2 : i32
    %12 = vector.broadcast %c2_i32 : i32 to vector<16x8x8xi32>
    %13 = arith.cmpi eq, %2, %12 : vector<16x8x8xi32>
    %14 = arith.select %13, %0, %3 : vector<16x8x8xi1>, vector<16x8x8xbf16>
    %c0_11 = arith.constant 0 : index
    %c0_12 = arith.constant 0 : index
    %c0_13 = arith.constant 0 : index
    %15 = vector.load %arg5[%c0_11, %c0_12, %c0_13] : memref<16x8x8xbf16, #tpu.memory_space<vmem>>, vector<16x8x8xbf16>
    tpu.vector_store %arg5[%c0_11, %c0_12, %c0_13], %14 {strides = array<i32>} : memref<16x8x8xbf16, #tpu.memory_space<vmem>>, vector<16x8x8xbf16>,
    %c3_i32 = arith.constant 3 : i32
    %16 = vector.broadcast %c3_i32 : i32 to vector<16x8x8xi32>
    %17 = arith.cmpi eq, %2, %16 : vector<16x8x8xi32>
    %18 = arith.select %17, %0, %3 : vector<16x8x8xi1>, vector<16x8x8xbf16>
    %c0_14 = arith.constant 0 : index
    %c0_15 = arith.constant 0 : index
    %c0_16 = arith.constant 0 : index
    %19 = vector.load %arg6[%c0_14, %c0_15, %c0_16] : memref<16x8x8xbf16, #tpu.memory_space<vmem>>, vector<16x8x8xbf16>
    tpu.vector_store %arg6[%c0_14, %c0_15, %c0_16], %18 {strides = array<i32>} : memref<16x8x8xbf16, #tpu.memory_space<vmem>>, vector<16x8x8xbf16>,
    return
  }
  func.func @transform_0(%arg0: i32) -> (i32, i32, i32) {
    %c0_i32 = arith.constant 0 : i32
    %c0_i32_0 = arith.constant 0 : i32
    %c0_i32_1 = arith.constant 0 : i32
    return %arg0, %c0_i32, %c0_i32_0 : i32, i32, i32
  }
  func.func @transform_1(%arg0: i32) -> (i32, i32, i32) {
    %c0_i32 = arith.constant 0 : i32
    %c0_i32_0 = arith.constant 0 : i32
    %c0_i32_1 = arith.constant 0 : i32
    return %arg0, %c0_i32, %c0_i32_0 : i32, i32, i32
  }
  func.func @transform_2(%arg0: i32) -> (i32, i32, i32) {
    %c0_i32 = arith.constant 0 : i32
    %c0_i32_0 = arith.constant 0 : i32
    %c0_i32_1 = arith.constant 0 : i32
    return %arg0, %c0_i32, %c0_i32_0 : i32, i32, i32
  }
  func.func @transform_3(%arg0: i32) -> (i32, i32, i32) {
    %c0_i32 = arith.constant 0 : i32
    %c0_i32_0 = arith.constant 0 : i32
    %c0_i32_1 = arith.constant 0 : i32
    return %arg0, %c0_i32, %c0_i32_0 : i32, i32, i32
  }
  func.func @transform_4(%arg0: i32) -> (i32, i32, i32) {
    %c0_i32 = arith.constant 0 : i32
    %c0_i32_0 = arith.constant 0 : i32
    %c0_i32_1 = arith.constant 0 : i32
    return %arg0, %c0_i32, %c0_i32_0 : i32, i32, i32
  }
  func.func @transform_5(%arg0: i32) -> (i32, i32, i32) {
    %c0_i32 = arith.constant 0 : i32
    %c0_i32_0 = arith.constant 0 : i32
    %c0_i32_1 = arith.constant 0 : i32
    return %arg0, %c0_i32, %c0_i32_0 : i32, i32, i32
  }
}

module attributes {stable_mosaic.version = 11 : i64} {
  func.func @_conv_mm_kernel(%arg0: i32, %arg1: memref<512x72xbf16, #tpu.memory_space<vmem>>, %arg2: memref<72x8xbf16, #tpu.memory_space<vmem>>, %arg3: memref<1x8xf32, #tpu.memory_space<vmem>>, %arg4: memref<1x8xf32, #tpu.memory_space<vmem>>, %arg5: memref<512x8xbf16, #tpu.memory_space<vmem>>) attributes {dimension_semantics = [#tpu.dimension_semantics<parallel>], iteration_bounds = array<i64: 2>, scalar_prefetch = 0 : i64, scratch_operands = 0 : i64, tpu.core_type = #tpu.core_type<tc>, window_params = [{transform_indices = @transform_0, window_bounds = array<i64: 512, 72>}, {pipeline_mode = #tpu.pipeline_mode<synchronous>, transform_indices = @transform_1, window_bounds = array<i64: 72, 8>}, {pipeline_mode = #tpu.pipeline_mode<synchronous>, transform_indices = @transform_2, window_bounds = array<i64: 1, 8>}, {pipeline_mode = #tpu.pipeline_mode<synchronous>, transform_indices = @transform_3, window_bounds = array<i64: 1, 8>}, {transform_indices = @transform_4, window_bounds = array<i64: 512, 8>}]} {
    %c0 = arith.constant 0 : index
    %c0_0 = arith.constant 0 : index
    %0 = vector.load %arg1[%c0, %c0_0] : memref<512x72xbf16, #tpu.memory_space<vmem>>, vector<512x72xbf16>
    %c0_1 = arith.constant 0 : index
    %c0_2 = arith.constant 0 : index
    %1 = vector.load %arg2[%c0_1, %c0_2] : memref<72x8xbf16, #tpu.memory_space<vmem>>, vector<72x8xbf16>
    %cst = arith.constant dense<0.000000e+00> : vector<512x8xf32>
    %2 = tpu.matmul %0, %1, %cst {dimension_numbers = #tpu.dot_dimension_numbers<[1], [0], [0], [1], [0, 0, 1, 1], [], []>} : vector<512x72xbf16>, vector<72x8xbf16>, vector<512x8xf32> -> vector<512x8xf32>
    %c0_3 = arith.constant 0 : index
    %c0_4 = arith.constant 0 : index
    %3 = vector.load %arg3[%c0_3, %c0_4] : memref<1x8xf32, #tpu.memory_space<vmem>>, vector<1x8xf32>
    %4 = vector.broadcast %3 : vector<1x8xf32> to vector<512x8xf32>
    %5 = arith.mulf %2, %4 : vector<512x8xf32>
    %c0_5 = arith.constant 0 : index
    %c0_6 = arith.constant 0 : index
    %6 = vector.load %arg4[%c0_5, %c0_6] : memref<1x8xf32, #tpu.memory_space<vmem>>, vector<1x8xf32>
    %7 = vector.broadcast %6 : vector<1x8xf32> to vector<512x8xf32>
    %8 = arith.addf %5, %7 : vector<512x8xf32>
    %cst_7 = arith.constant 0.000000e+00 : f32
    %9 = vector.broadcast %cst_7 : f32 to vector<512x8xf32>
    %10 = arith.maximumf %8, %9 : vector<512x8xf32>
    %11 = arith.truncf %10 : vector<512x8xf32> to vector<512x8xbf16>
    %c0_8 = arith.constant 0 : index
    %c0_9 = arith.constant 0 : index
    %12 = vector.load %arg5[%c0_8, %c0_9] : memref<512x8xbf16, #tpu.memory_space<vmem>>, vector<512x8xbf16>
    tpu.vector_store %arg5[%c0_8, %c0_9], %11 {strides = array<i32>} : memref<512x8xbf16, #tpu.memory_space<vmem>>, vector<512x8xbf16>,
    return
  }
  func.func @transform_0(%arg0: i32) -> (i32, i32) {
    %c0_i32 = arith.constant 0 : i32
    %c0_i32_0 = arith.constant 0 : i32
    return %arg0, %c0_i32 : i32, i32
  }
  func.func @transform_1(%arg0: i32) -> (i32, i32) {
    %c0_i32 = arith.constant 0 : i32
    %c0_i32_0 = arith.constant 0 : i32
    %c0_i32_1 = arith.constant 0 : i32
    return %c0_i32, %c0_i32_0 : i32, i32
  }
  func.func @transform_2(%arg0: i32) -> (i32, i32) {
    %c0_i32 = arith.constant 0 : i32
    %c0_i32_0 = arith.constant 0 : i32
    %c0_i32_1 = arith.constant 0 : i32
    return %c0_i32, %c0_i32_0 : i32, i32
  }
  func.func @transform_3(%arg0: i32) -> (i32, i32) {
    %c0_i32 = arith.constant 0 : i32
    %c0_i32_0 = arith.constant 0 : i32
    %c0_i32_1 = arith.constant 0 : i32
    return %c0_i32, %c0_i32_0 : i32, i32
  }
  func.func @transform_4(%arg0: i32) -> (i32, i32) {
    %c0_i32 = arith.constant 0 : i32
    %c0_i32_0 = arith.constant 0 : i32
    return %arg0, %c0_i32 : i32, i32
  }
}

module attributes {stable_mosaic.version = 11 : i64} {
  func.func @_conv_mm_kernel(%arg0: i32, %arg1: memref<512x72xbf16, #tpu.memory_space<vmem>>, %arg2: memref<72x2xbf16, #tpu.memory_space<vmem>>, %arg3: memref<1x2xf32, #tpu.memory_space<vmem>>, %arg4: memref<1x2xf32, #tpu.memory_space<vmem>>, %arg5: memref<512x2xbf16, #tpu.memory_space<vmem>>) attributes {dimension_semantics = [#tpu.dimension_semantics<parallel>], iteration_bounds = array<i64: 2>, scalar_prefetch = 0 : i64, scratch_operands = 0 : i64, tpu.core_type = #tpu.core_type<tc>, window_params = [{transform_indices = @transform_0, window_bounds = array<i64: 512, 72>}, {pipeline_mode = #tpu.pipeline_mode<synchronous>, transform_indices = @transform_1, window_bounds = array<i64: 72, 2>}, {pipeline_mode = #tpu.pipeline_mode<synchronous>, transform_indices = @transform_2, window_bounds = array<i64: 1, 2>}, {pipeline_mode = #tpu.pipeline_mode<synchronous>, transform_indices = @transform_3, window_bounds = array<i64: 1, 2>}, {transform_indices = @transform_4, window_bounds = array<i64: 512, 2>}]} {
    %c0 = arith.constant 0 : index
    %c0_0 = arith.constant 0 : index
    %0 = vector.load %arg1[%c0, %c0_0] : memref<512x72xbf16, #tpu.memory_space<vmem>>, vector<512x72xbf16>
    %c0_1 = arith.constant 0 : index
    %c0_2 = arith.constant 0 : index
    %1 = vector.load %arg2[%c0_1, %c0_2] : memref<72x2xbf16, #tpu.memory_space<vmem>>, vector<72x2xbf16>
    %cst = arith.constant dense<0.000000e+00> : vector<512x2xf32>
    %2 = tpu.matmul %0, %1, %cst {dimension_numbers = #tpu.dot_dimension_numbers<[1], [0], [0], [1], [0, 0, 1, 1], [], []>} : vector<512x72xbf16>, vector<72x2xbf16>, vector<512x2xf32> -> vector<512x2xf32>
    %c0_3 = arith.constant 0 : index
    %c0_4 = arith.constant 0 : index
    %3 = vector.load %arg3[%c0_3, %c0_4] : memref<1x2xf32, #tpu.memory_space<vmem>>, vector<1x2xf32>
    %4 = vector.broadcast %3 : vector<1x2xf32> to vector<512x2xf32>
    %5 = arith.mulf %2, %4 : vector<512x2xf32>
    %c0_5 = arith.constant 0 : index
    %c0_6 = arith.constant 0 : index
    %6 = vector.load %arg4[%c0_5, %c0_6] : memref<1x2xf32, #tpu.memory_space<vmem>>, vector<1x2xf32>
    %7 = vector.broadcast %6 : vector<1x2xf32> to vector<512x2xf32>
    %8 = arith.addf %5, %7 : vector<512x2xf32>
    %cst_7 = arith.constant 0.000000e+00 : f32
    %9 = vector.broadcast %cst_7 : f32 to vector<512x2xf32>
    %10 = arith.maximumf %8, %9 : vector<512x2xf32>
    %11 = arith.truncf %10 : vector<512x2xf32> to vector<512x2xbf16>
    %c0_8 = arith.constant 0 : index
    %c0_9 = arith.constant 0 : index
    %12 = vector.load %arg5[%c0_8, %c0_9] : memref<512x2xbf16, #tpu.memory_space<vmem>>, vector<512x2xbf16>
    tpu.vector_store %arg5[%c0_8, %c0_9], %11 {strides = array<i32>} : memref<512x2xbf16, #tpu.memory_space<vmem>>, vector<512x2xbf16>,
    return
  }
  func.func @transform_0(%arg0: i32) -> (i32, i32) {
    %c0_i32 = arith.constant 0 : i32
    %c0_i32_0 = arith.constant 0 : i32
    return %arg0, %c0_i32 : i32, i32
  }
  func.func @transform_1(%arg0: i32) -> (i32, i32) {
    %c0_i32 = arith.constant 0 : i32
    %c0_i32_0 = arith.constant 0 : i32
    %c0_i32_1 = arith.constant 0 : i32
    return %c0_i32, %c0_i32_0 : i32, i32
  }
  func.func @transform_2(%arg0: i32) -> (i32, i32) {
    %c0_i32 = arith.constant 0 : i32
    %c0_i32_0 = arith.constant 0 : i32
    %c0_i32_1 = arith.constant 0 : i32
    return %c0_i32, %c0_i32_0 : i32, i32
  }
  func.func @transform_3(%arg0: i32) -> (i32, i32) {
    %c0_i32 = arith.constant 0 : i32
    %c0_i32_0 = arith.constant 0 : i32
    %c0_i32_1 = arith.constant 0 : i32
    return %c0_i32, %c0_i32_0 : i32, i32
  }
  func.func @transform_4(%arg0: i32) -> (i32, i32) {
    %c0_i32 = arith.constant 0 : i32
    %c0_i32_0 = arith.constant 0 : i32
    return %arg0, %c0_i32 : i32, i32
  }
}

module attributes {stable_mosaic.version = 11 : i64} {
  func.func @_softmax_kernel(%arg0: i32, %arg1: i32, %arg2: memref<1x2x400xbf16, #tpu.memory_space<vmem>>, %arg3: memref<1x2x400xf32, #tpu.memory_space<vmem>>) attributes {dimension_semantics = [#tpu.dimension_semantics<parallel>, #tpu.dimension_semantics<parallel>], iteration_bounds = array<i64: 2, 1>, scalar_prefetch = 0 : i64, scratch_operands = 0 : i64, tpu.core_type = #tpu.core_type<tc>, window_params = [{transform_indices = @transform_0, window_bounds = array<i64: 1, 2, 400>}, {transform_indices = @transform_1, window_bounds = array<i64: 1, 2, 400>}]} {
    %c0 = arith.constant 0 : index
    %c0_0 = arith.constant 0 : index
    %c0_1 = arith.constant 0 : index
    %0 = vector.load %arg2[%c0, %c0_0, %c0_1] : memref<1x2x400xbf16, #tpu.memory_space<vmem>>, vector<1x2x400xbf16>
    %1 = arith.extf %0 : vector<1x2x400xbf16> to vector<1x2x400xf32>
    %cst = arith.constant dense<0xFF800000> : vector<1x400xf32>
    %2 = vector.multi_reduction <maximumf>, %1, %cst [1] : vector<1x2x400xf32> to vector<1x400xf32>
    %3 = vector.shape_cast %2 : vector<1x400xf32> to vector<1x1x400xf32>
    %4 = vector.broadcast %3 : vector<1x1x400xf32> to vector<1x2x400xf32>
    %5 = arith.subf %1, %4 : vector<1x2x400xf32>
    %6 = math.exp %5 : vector<1x2x400xf32>
    %cst_2 = arith.constant dense<0.000000e+00> : vector<1x400xf32>
    %7 = vector.multi_reduction <add>, %6, %cst_2 [1] : vector<1x2x400xf32> to vector<1x400xf32>
    %8 = vector.shape_cast %7 : vector<1x400xf32> to vector<1x1x400xf32>
    %9 = vector.broadcast %8 : vector<1x1x400xf32> to vector<1x2x400xf32>
    %10 = arith.divf %6, %9 : vector<1x2x400xf32>
    %c0_3 = arith.constant 0 : index
    %c0_4 = arith.constant 0 : index
    %c0_5 = arith.constant 0 : index
    %11 = vector.load %arg3[%c0_3, %c0_4, %c0_5] : memref<1x2x400xf32, #tpu.memory_space<vmem>>, vector<1x2x400xf32>
    tpu.vector_store %arg3[%c0_3, %c0_4, %c0_5], %10 {strides = array<i32>} : memref<1x2x400xf32, #tpu.memory_space<vmem>>, vector<1x2x400xf32>,
    return
  }
  func.func @transform_0(%arg0: i32, %arg1: i32) -> (i32, i32, i32) {
    %c0_i32 = arith.constant 0 : i32
    %c0_i32_0 = arith.constant 0 : i32
    return %arg0, %c0_i32, %arg1 : i32, i32, i32
  }
  func.func @transform_1(%arg0: i32, %arg1: i32) -> (i32, i32, i32) {
    %c0_i32 = arith.constant 0 : i32
    %c0_i32_0 = arith.constant 0 : i32
    return %arg0, %c0_i32, %arg1 : i32, i32, i32
  }
}

</mosaic_0001>

<bundles_post_ra>
// kernel: horseshoe_forward.14
= control target key start
LH: loop header
LB: loop body
LE: loop exit
PB: predicated region body
PF: predicated region fallthrough
CT: control target
= control target key end

     0   :  { %s1841_s15 = smov 0   ;;  %s1843_s16 = smov 0   ;;  %s2364_s0 = inlined_call_operand.vmem [shape: bf16[648,27], index: 0, kind: input, shape index: {}]   ;;  %s2365_s1 = inlined_call_operand.vmem [shape: bf16[27,8], index: 1, kind: input, shape index: {}]   ;;  %s2366_s2 = inlined_call_operand.vmem [shape: f32[1,8], index: 2, kind: input, shape index: {}]   ;;  %s2367_s3 = inlined_call_operand.vmem [shape: f32[1,8], index: 3, kind: input, shape index: {}]   ;;  %s2368_s4 = inlined_call_operand.vmem [shape: bf16[648,8], index: 4, kind: output, shape index: {}]  }
   0x1   :  { %s1845_s17 = smov 0  }
   0x2 LB: > { %s1854_s18 = sadd.s32 4294967295, %s1781_s17   ;;  %s1856_s19 = sadd.s32 1, %s1781_s17   ;;  %s1781_s17 = sphi %s1845_s17, %s2377_s17   ;;  %s1777_s16 = sphi %s1843_s16, %s2376_s16   ;;  %s1773_s15 = sphi %s1841_s15, %s2375_s15  }
   0x3   : > { %s107_s20 = ssub.s32 %s1781_s17, %s1856_s19  ;;  %s110_s21 = sadd.s32 1, %s1777_s16 }
   0x4   : > { %p108_p0 = scmp.eq.s32.totalorder %s107_s20, 0  ;;  %p120_p1 = scmp.ne.s32.totalorder %s1777_s16, %s1773_s15 }
   0x5   : > { %p121_p2 = scmp.eq.s32.totalorder %s1854_s18, 1  ;;  %p1404_p3 = scmp.ge.s32.totalorder %s1781_s17, 1 }
   0x6   : > { %s1864_s22 = scalar_select %p108_p0, %s1777_s16, %s110_s21  }
   0x7   : > { %p1866_p4 = por %p121_p2, %p120_p1  ;;  %p171_p5 = scmp.lt.s32.totalorder %s1781_s17, 3 }
   0x9   : > { %p172_p6 = pnand %p1404_p3, %p171_p5 }
   0xa   : > { %s1877_s28 = sshll.u32 (!%p172_p6), %s1854_s18, 6  ;;  %s197_s14 = sand.u32 (!%p172_p6), 1, %s1773_s15  }
   0xb   : > { %175 = sbr.rel (%p172_p6) target bundleno = 356 (0x164), region = 36  ;;  %p205_p7 = scmp.lt.s32.totalorder (!%p172_p6), %s1877_s28, 80 }
   0xc   : > { %s1405_s17 = sshll.u32 (!%p172_p6), %s197_s14, 8 }
   0xd   : > { %s1970_s15 = scalar_lea.vmem (!%p172_p6), [#allocation2], %s1405_s17  }
  0x10   : > { %v1542_v0 = vld [vmem:[%s2365_s1 + $0x8] sm:$0xf]  ;;  %v1626_v1 = vld [vmem:[%s2365_s1 + $0x8] sm:$0x30]  ;;  %vm556_vm0 = vcmask 1044480   ;;  %vm557_vm1 = vcmask 1045504  }
  0x11   : > { %v1543_v2 = vor.u32 %v1626_v1, %v1542_v0  ;;  %v1815_v3 = vmov 65535   ;;  %s206_s29 = scalar_select %p205_p7, %s1877_s28, 80  ;;  %v1625_v7 = vld [vmem:[%s2365_s1] sm:$0xff]  ;;  %vm459_vm2 = vcmask 220160   ;;  %vm996_vm3 = vcmask 60416  }
  0x12   : > { %v558_v4 = vsel %vm556_vm0, 4294967295, %v1815_v3  ;;  %v1956_v40 = vld [vmem:[%s2366_s2] ss:$0 sm:$0xff]  ;;  %s1069_s20 = ssub.s32 (%p1866_p4), 81, %s1877_s28  ;;  %s1627_s21 = sshll.u32 (%p1866_p4), %s1854_s18, 8 }
  0x13   : > { %v559_v5 = vsel %vm557_vm1, %v558_v4, 0  ;;  %s1407_s6 = sshll.u32 %s206_s29, 2  ;;  %v1961_v41 = vld [vmem:[%s2367_s3] ss:$0 sm:$0xff]  ;;  %p1070_p8 = scmp.lt.s32.totalorder (%p1866_p4), %s1069_s20, 64 }
  0x14   : > { %v561_v6 = vand.u32 %v1543_v2, %v559_v5  ;;  %s1887_s9 = scalar_lea.vmem %s2364_s0, %s1407_s6  ;;  %s2229_s26 = scalar_lea.vmem (%p1866_p4), %s2368_s4, %s1627_s21  }
  0x15   : > { %v1593_v8 = vld [vmem:[%s1887_s9] sm:$0xff]  ;;  %v1594_v12 = vld [vmem:[%s1887_s9 + $0x8] sm:$0xff]  ;;  %v1595_v16 = vld [vmem:[%s1887_s9 + $0x10] sm:$0xff] }
  0x16   : > { %569 = vmatpush.bf16.msra.mxu0 %v561_v6  ;;  %1630 = vmatpush.bf16.msra.mxu1 %v561_v6  ;;  %v1601_v9 = vld [vmem:[%s1887_s9 + $0x40] sm:$0xff]  ;;  %v1602_v13 = vld [vmem:[%s1887_s9 + $0x48] sm:$0xff]  ;;  %v1603_v17 = vld [vmem:[%s1887_s9 + $0x50] sm:$0xff] }
  0x17   : > { %1631 = vmatpush.bf16.msra.mxu2 %v561_v6  ;;  %1632 = vmatpush.bf16.msra.mxu3 %v561_v6  ;;  %v1609_v10 = vld [vmem:[%s1887_s9 + $0x80] sm:$0xff]  ;;  %v1610_v14 = vld [vmem:[%s1887_s9 + $0x88] sm:$0xff]  ;;  %v1611_v18 = vld [vmem:[%s1887_s9 + $0x90] sm:$0xff] }
  0x18   : > { %v1617_v11 = vld [vmem:[%s1887_s9 + $0xc0] sm:$0xff]  ;;  %v1618_v15 = vld [vmem:[%s1887_s9 + $0xc8] sm:$0xff]  ;;  %v1619_v19 = vld [vmem:[%s1887_s9 + $0xd0] sm:$0xff] }
  0x19   : > { %v1596_v20 = vld [vmem:[%s1887_s9 + $0x18] sm:$0xff]  ;;  %v1597_v24 = vld [vmem:[%s1887_s9 + $0x20] sm:$0xff]  ;;  %v1598_v28 = vld [vmem:[%s1887_s9 + $0x28] sm:$0xff] }
  0x1a   : > { %570 = vmatpush.bf16.msra.mxu0 %v1625_v7  ;;  %1633 = vmatpush.bf16.msra.mxu1 %v1625_v7  ;;  %v1604_v21 = vld [vmem:[%s1887_s9 + $0x58] sm:$0xff]  ;;  %v1605_v25 = vld [vmem:[%s1887_s9 + $0x60] sm:$0xff]  ;;  %v1606_v29 = vld [vmem:[%s1887_s9 + $0x68] sm:$0xff] }
  0x1b   : > { %1634 = vmatpush.bf16.msra.mxu2 %v1625_v7  ;;  %1635 = vmatpush.bf16.msra.mxu3 %v1625_v7  ;;  %v1612_v22 = vld [vmem:[%s1887_s9 + $0x98] sm:$0xff]  ;;  %v1613_v26 = vld [vmem:[%s1887_s9 + $0xa0] sm:$0xff]  ;;  %v1614_v30 = vld [vmem:[%s1887_s9 + $0xa8] sm:$0xff] }
  0x1c   : > { %v1620_v23 = vld [vmem:[%s1887_s9 + $0xd8] sm:$0xff]  ;;  %v1621_v27 = vld [vmem:[%s1887_s9 + $0xe0] sm:$0xff]  ;;  %v1622_v31 = vld [vmem:[%s1887_s9 + $0xe8] sm:$0xff] }
  0x1d   : > { %1544 = vmatmul.msk.bf16.vlgmr.msra.gmra.mxu0 %vm459_vm2, %v1593_v8  ;;  %1552 = vmatmul.msk.bf16.vlgmr.msra.gmra.mxu1 %vm459_vm2, %v1601_v9  ;;  %v1599_v32 = vld [vmem:[%s1887_s9 + $0x30] sm:$0xff]  ;;  %v1600_v36 = vld [vmem:[%s1887_s9 + $0x38] sm:$0xff] }
  0x1e   : > { %1560 = vmatmul.msk.bf16.vlgmr.msra.gmra.mxu2 %vm459_vm2, %v1609_v10  ;;  %1568 = vmatmul.msk.bf16.vlgmr.msra.gmra.mxu3 %vm459_vm2, %v1617_v11  ;;  %v1607_v33 = vld [vmem:[%s1887_s9 + $0x70] sm:$0xff]  ;;  %v1608_v37 = vld [vmem:[%s1887_s9 + $0x78] sm:$0xff] }
  0x1f   : > { %v1615_v34 = vld [vmem:[%s1887_s9 + $0xb0] sm:$0xff]  ;;  %v1616_v38 = vld [vmem:[%s1887_s9 + $0xb8] sm:$0xff] }
  0x20   : > { %v1623_v35 = vld [vmem:[%s1887_s9 + $0xf0] sm:$0xff]  ;;  %v1624_v39 = vld [vmem:[%s1887_s9 + $0xf8] sm:$0xff] }
  0x2d   : > { %1545 = vmatmul.msk.bf16.gmra.mxu0 %vm459_vm2, %v1594_v12  ;;  %1553 = vmatmul.msk.bf16.gmra.mxu1 %vm459_vm2, %v1602_v13 }
  0x2e   : > { %1561 = vmatmul.msk.bf16.gmra.mxu2 %vm459_vm2, %v1610_v14  ;;  %1569 = vmatmul.msk.bf16.gmra.mxu3 %vm459_vm2, %v1618_v15 }
  0x3d   : > { %1546 = vmatmul.msk.bf16.gmra.mxu0 %vm459_vm2, %v1595_v16  ;;  %1554 = vmatmul.msk.bf16.gmra.mxu1 %vm459_vm2, %v1603_v17 }
  0x3e   : > { %1562 = vmatmul.msk.bf16.gmra.mxu2 %vm459_vm2, %v1611_v18  ;;  %1570 = vmatmul.msk.bf16.gmra.mxu3 %vm459_vm2, %v1619_v19 }
  0x4d   : > { %1547 = vmatmul.msk.bf16.gmra.mxu0 %vm459_vm2, %v1596_v20  ;;  %1555 = vmatmul.msk.bf16.gmra.mxu1 %vm459_vm2, %v1604_v21 }
  0x4e   : > { %1563 = vmatmul.msk.bf16.gmra.mxu2 %vm459_vm2, %v1612_v22  ;;  %1571 = vmatmul.msk.bf16.gmra.mxu3 %vm459_vm2, %v1620_v23 }
  0x5d   : > { %1548 = vmatmul.msk.bf16.gmra.mxu0 %vm459_vm2, %v1597_v24  ;;  %1556 = vmatmul.msk.bf16.gmra.mxu1 %vm459_vm2, %v1605_v25 }
  0x5e   : > { %1564 = vmatmul.msk.bf16.gmra.mxu2 %vm459_vm2, %v1613_v26  ;;  %1572 = vmatmul.msk.bf16.gmra.mxu3 %vm459_vm2, %v1621_v27 }
  0x6d   : > { %1549 = vmatmul.msk.bf16.gmra.mxu0 %vm459_vm2, %v1598_v28  ;;  %1557 = vmatmul.msk.bf16.gmra.mxu1 %vm459_vm2, %v1606_v29 }
  0x6e   : > { %1565 = vmatmul.msk.bf16.gmra.mxu2 %vm459_vm2, %v1614_v30  ;;  %1573 = vmatmul.msk.bf16.gmra.mxu3 %vm459_vm2, %v1622_v31 }
  0x7d   : > { %1550 = vmatmul.msk.bf16.gmra.mxu0 %vm459_vm2, %v1599_v32  ;;  %1558 = vmatmul.msk.bf16.gmra.mxu1 %vm459_vm2, %v1607_v33 }
  0x7e   : > { %1566 = vmatmul.msk.bf16.gmra.mxu2 %vm459_vm2, %v1615_v34  ;;  %1574 = vmatmul.msk.bf16.gmra.mxu3 %vm459_vm2, %v1623_v35 }
  0x8d   : > { %1551 = vmatmul.msk.bf16.gmra.mxu0 %vm459_vm2, %v1600_v36  ;;  %1559 = vmatmul.msk.bf16.gmra.mxu1 %vm459_vm2, %v1608_v37 }
  0x8e   : > { %1567 = vmatmul.msk.bf16.gmra.mxu2 %vm459_vm2, %v1616_v38  ;;  %1575 = vmatmul.msk.bf16.gmra.mxu3 %vm459_vm2, %v1624_v39 }
  0x9a   : > { %v572_v42 = vpop.f32.mrf.mxu0  ;;  %v612_v43 = vpop.f32.mrf.mxu1 }
  0x9b   : > { %v736_v44 = vmul.f32 %v1956_v40, %v572_v42  ;;  %v752_v45 = vmul.f32 %v1956_v40, %v612_v43 }
  0x9d   : > { %v804_v46 = vadd.f32 %v1961_v41, %v736_v44  ;;  %v820_v47 = vadd.f32 %v1961_v41, %v752_v45 }
  0x9f   : > { %v868_v48 = vmax.f32 %v804_v46, 0.0  ;;  %v884_v49 = vmax.f32 %v820_v47, 0.0 }
  0xa1   : > { %v932_v50 = vpack.c.bf16 %v868_v48, %v868_v48  ;;  %v948_v51 = vpack.c.bf16 %v884_v49, %v884_v49  ;;  %v652_v52 = vpop.f32.mrf.mxu2  ;;  %v692_v53 = vpop.f32.mrf.mxu3 }
  0xa2   : > { %v768_v54 = vmul.f32 %v1956_v40, %v652_v52  ;;  %v784_v55 = vmul.f32 %v1956_v40, %v692_v53  ;;  %v574_v56 = vpop.f32.mrf.mxu0  ;;  %v614_v57 = vpop.f32.mrf.mxu1 }
  0xa3   : > { %997 = vst.msk [vmem:[%s1970_s15] sm:$0xf] %vm996_vm3, %v932_v50  ;;  %v737_v58 = vmul.f32 %v1956_v40, %v574_v56  ;;  %v753_v59 = vmul.f32 %v1956_v40, %v614_v57 }
  0xa4   : > { %1013 = vst.msk [vmem:[%s1970_s15 + $0x40] sm:$0xf] %vm996_vm3, %v948_v51  ;;  %v836_v60 = vadd.f32 %v1961_v41, %v768_v54  ;;  %v852_v61 = vadd.f32 %v1961_v41, %v784_v55 }
  0xa5   : > { %v805_v62 = vadd.f32 %v1961_v41, %v737_v58  ;;  %v821_v63 = vadd.f32 %v1961_v41, %v753_v59 }
  0xa6   : > { %v900_v0 = vmax.f32 %v836_v60, 0.0  ;;  %v916_v1 = vmax.f32 %v852_v61, 0.0 }
  0xa7   : > { %v869_v2 = vmax.f32 %v805_v62, 0.0  ;;  %v885_v3 = vmax.f32 %v821_v63, 0.0 }
  0xa8   : > { %v964_v4 = vpack.c.bf16 %v900_v0, %v900_v0  ;;  %v980_v5 = vpack.c.bf16 %v916_v1, %v916_v1 }
  0xa9   : > { %v933_v6 = vpack.c.bf16 %v869_v2, %v869_v2  ;;  %v949_v7 = vpack.c.bf16 %v885_v3, %v885_v3  ;;  %v654_v8 = vpop.f32.mrf.mxu2  ;;  %v694_v9 = vpop.f32.mrf.mxu3 }
  0xaa   : > { %1029 = vst.msk [vmem:[%s1970_s15 + $0x80] sm:$0xf] %vm996_vm3, %v964_v4  ;;  %v769_v10 = vmul.f32 %v1956_v40, %v654_v8  ;;  %v785_v11 = vmul.f32 %v1956_v40, %v694_v9  ;;  %v577_v12 = vpop.f32.mrf.mxu0  ;;  %v617_v13 = vpop.f32.mrf.mxu1 }
  0xab   : > { %1045 = vst.msk [vmem:[%s1970_s15 + $0xc0] sm:$0xf] %vm996_vm3, %v980_v5  ;;  %v738_v14 = vmul.f32 %v1956_v40, %v577_v12  ;;  %v754_v15 = vmul.f32 %v1956_v40, %v617_v13 }
  0xac   : > { %998 = vst.msk [vmem:[%s1970_s15 + $0x4] sm:$0xf] %vm996_vm3, %v933_v6  ;;  %v837_v16 = vadd.f32 %v1961_v41, %v769_v10  ;;  %v853_v17 = vadd.f32 %v1961_v41, %v785_v11 }
  0xad   : > { %1014 = vst.msk [vmem:[%s1970_s15 + $0x44] sm:$0xf] %vm996_vm3, %v949_v7  ;;  %v806_v18 = vadd.f32 %v1961_v41, %v738_v14  ;;  %v822_v19 = vadd.f32 %v1961_v41, %v754_v15 }
  0xae   : > { %v901_v20 = vmax.f32 %v837_v16, 0.0  ;;  %v917_v21 = vmax.f32 %v853_v17, 0.0 }
  0xaf   : > { %v870_v22 = vmax.f32 %v806_v18, 0.0  ;;  %v886_v23 = vmax.f32 %v822_v19, 0.0 }
  0xb0   : > { %v965_v24 = vpack.c.bf16 %v901_v20, %v901_v20  ;;  %v981_v25 = vpack.c.bf16 %v917_v21, %v917_v21 }
  0xb1   : > { %v934_v26 = vpack.c.bf16 %v870_v22, %v870_v22  ;;  %v950_v27 = vpack.c.bf16 %v886_v23, %v886_v23  ;;  %v657_v28 = vpop.f32.mrf.mxu2  ;;  %v697_v29 = vpop.f32.mrf.mxu3 }
  0xb2   : > { %1030 = vst.msk [vmem:[%s1970_s15 + $0x84] sm:$0xf] %vm996_vm3, %v965_v24  ;;  %v770_v30 = vmul.f32 %v1956_v40, %v657_v28  ;;  %v786_v31 = vmul.f32 %v1956_v40, %v697_v29  ;;  %v579_v32 = vpop.f32.mrf.mxu0  ;;  %v619_v33 = vpop.f32.mrf.mxu1 }
  0xb3   : > { %1046 = vst.msk [vmem:[%s1970_s15 + $0xc4] sm:$0xf] %vm996_vm3, %v981_v25  ;;  %v739_v34 = vmul.f32 %v1956_v40, %v579_v32  ;;  %v755_v35 = vmul.f32 %v1956_v40, %v619_v33 }
  0xb4   : > { %999 = vst.msk [vmem:[%s1970_s15 + $0x8] sm:$0xf] %vm996_vm3, %v934_v26  ;;  %v838_v36 = vadd.f32 %v1961_v41, %v770_v30  ;;  %v854_v37 = vadd.f32 %v1961_v41, %v786_v31 }
  0xb5   : > { %1015 = vst.msk [vmem:[%s1970_s15 + $0x48] sm:$0xf] %vm996_vm3, %v950_v27  ;;  %v807_v38 = vadd.f32 %v1961_v41, %v739_v34  ;;  %v823_v39 = vadd.f32 %v1961_v41, %v755_v35 }
  0xb6   : > { %v902_v42 = vmax.f32 %v838_v36, 0.0  ;;  %v918_v43 = vmax.f32 %v854_v37, 0.0 }
  0xb7   : > { %v871_v44 = vmax.f32 %v807_v38, 0.0  ;;  %v887_v45 = vmax.f32 %v823_v39, 0.0 }
  0xb8   : > { %v966_v46 = vpack.c.bf16 %v902_v42, %v902_v42  ;;  %v982_v47 = vpack.c.bf16 %v918_v43, %v918_v43 }
  0xb9   : > { %v935_v48 = vpack.c.bf16 %v871_v44, %v871_v44  ;;  %v951_v49 = vpack.c.bf16 %v887_v45, %v887_v45  ;;  %v659_v50 = vpop.f32.mrf.mxu2  ;;  %v699_v51 = vpop.f32.mrf.mxu3 }
  0xba   : > { %1031 = vst.msk [vmem:[%s1970_s15 + $0x88] sm:$0xf] %vm996_vm3, %v966_v46  ;;  %v771_v52 = vmul.f32 %v1956_v40, %v659_v50  ;;  %v787_v53 = vmul.f32 %v1956_v40, %v699_v51  ;;  %v582_v54 = vpop.f32.mrf.mxu0  ;;  %v622_v55 = vpop.f32.mrf.mxu1 }
  0xbb   : > { %1047 = vst.msk [vmem:[%s1970_s15 + $0xc8] sm:$0xf] %vm996_vm3, %v982_v47  ;;  %v740_v56 = vmul.f32 %v1956_v40, %v582_v54  ;;  %v756_v57 = vmul.f32 %v1956_v40, %v622_v55 }
  0xbc   : > { %1000 = vst.msk [vmem:[%s1970_s15 + $0xc] sm:$0xf] %vm996_vm3, %v935_v48  ;;  %v839_v58 = vadd.f32 %v1961_v41, %v771_v52  ;;  %v855_v59 = vadd.f32 %v1961_v41, %v787_v53 }
  0xbd   : > { %1016 = vst.msk [vmem:[%s1970_s15 + $0x4c] sm:$0xf] %vm996_vm3, %v951_v49  ;;  %v808_v60 = vadd.f32 %v1961_v41, %v740_v56  ;;  %v824_v61 = vadd.f32 %v1961_v41, %v756_v57 }
  0xbe   : > { %v903_v62 = vmax.f32 %v839_v58, 0.0  ;;  %v919_v63 = vmax.f32 %v855_v59, 0.0 }
  0xbf   : > { %v872_v0 = vmax.f32 %v808_v60, 0.0  ;;  %v888_v1 = vmax.f32 %v824_v61, 0.0 }
  0xc0   : > { %v967_v2 = vpack.c.bf16 %v903_v62, %v903_v62  ;;  %v983_v3 = vpack.c.bf16 %v919_v63, %v919_v63 }
  0xc1   : > { %v936_v4 = vpack.c.bf16 %v872_v0, %v872_v0  ;;  %v952_v5 = vpack.c.bf16 %v888_v1, %v888_v1  ;;  %v662_v6 = vpop.f32.mrf.mxu2  ;;  %v702_v7 = vpop.f32.mrf.mxu3 }
  0xc2   : > { %1032 = vst.msk [vmem:[%s1970_s15 + $0x8c] sm:$0xf] %vm996_vm3, %v967_v2  ;;  %v772_v8 = vmul.f32 %v1956_v40, %v662_v6  ;;  %v788_v9 = vmul.f32 %v1956_v40, %v702_v7  ;;  %v584_v10 = vpop.f32.mrf.mxu0  ;;  %v624_v11 = vpop.f32.mrf.mxu1 }
  0xc3   : > { %1048 = vst.msk [vmem:[%s1970_s15 + $0xcc] sm:$0xf] %vm996_vm3, %v983_v3  ;;  %v741_v12 = vmul.f32 %v1956_v40, %v584_v10  ;;  %v757_v13 = vmul.f32 %v1956_v40, %v624_v11 }
  0xc4   : > { %1001 = vst.msk [vmem:[%s1970_s15 + $0x10] sm:$0xf] %vm996_vm3, %v936_v4  ;;  %v840_v14 = vadd.f32 %v1961_v41, %v772_v8  ;;  %v856_v15 = vadd.f32 %v1961_v41, %v788_v9 }
  0xc5   : > { %1017 = vst.msk [vmem:[%s1970_s15 + $0x50] sm:$0xf] %vm996_vm3, %v952_v5  ;;  %v809_v16 = vadd.f32 %v1961_v41, %v741_v12  ;;  %v825_v17 = vadd.f32 %v1961_v41, %v757_v13 }
  0xc6   : > { %v904_v18 = vmax.f32 %v840_v14, 0.0  ;;  %v920_v19 = vmax.f32 %v856_v15, 0.0 }
  0xc7   : > { %v873_v20 = vmax.f32 %v809_v16, 0.0  ;;  %v889_v21 = vmax.f32 %v825_v17, 0.0 }
  0xc8   : > { %v968_v22 = vpack.c.bf16 %v904_v18, %v904_v18  ;;  %v984_v23 = vpack.c.bf16 %v920_v19, %v920_v19 }
  0xc9   : > { %v937_v24 = vpack.c.bf16 %v873_v20, %v873_v20  ;;  %v953_v25 = vpack.c.bf16 %v889_v21, %v889_v21  ;;  %v664_v26 = vpop.f32.mrf.mxu2  ;;  %v704_v27 = vpop.f32.mrf.mxu3 }
  0xca   : > { %1033 = vst.msk [vmem:[%s1970_s15 + $0x90] sm:$0xf] %vm996_vm3, %v968_v22  ;;  %v773_v28 = vmul.f32 %v1956_v40, %v664_v26  ;;  %v789_v29 = vmul.f32 %v1956_v40, %v704_v27  ;;  %v587_v30 = vpop.f32.mrf.mxu0  ;;  %v627_v31 = vpop.f32.mrf.mxu1 }
  0xcb   : > { %1049 = vst.msk [vmem:[%s1970_s15 + $0xd0] sm:$0xf] %vm996_vm3, %v984_v23  ;;  %v742_v32 = vmul.f32 %v1956_v40, %v587_v30  ;;  %v758_v33 = vmul.f32 %v1956_v40, %v627_v31 }
  0xcc   : > { %1002 = vst.msk [vmem:[%s1970_s15 + $0x14] sm:$0xf] %vm996_vm3, %v937_v24  ;;  %v841_v34 = vadd.f32 %v1961_v41, %v773_v28  ;;  %v857_v35 = vadd.f32 %v1961_v41, %v789_v29 }
  0xcd   : > { %1018 = vst.msk [vmem:[%s1970_s15 + $0x54] sm:$0xf] %vm996_vm3, %v953_v25  ;;  %v810_v36 = vadd.f32 %v1961_v41, %v742_v32  ;;  %v826_v37 = vadd.f32 %v1961_v41, %v758_v33 }
  0xce   : > { %v905_v38 = vmax.f32 %v841_v34, 0.0  ;;  %v921_v39 = vmax.f32 %v857_v35, 0.0 }
  0xcf   : > { %v874_v42 = vmax.f32 %v810_v36, 0.0  ;;  %v890_v43 = vmax.f32 %v826_v37, 0.0 }
  0xd0   : > { %v969_v44 = vpack.c.bf16 %v905_v38, %v905_v38  ;;  %v985_v45 = vpack.c.bf16 %v921_v39, %v921_v39 }
  0xd1   : > { %v938_v46 = vpack.c.bf16 %v874_v42, %v874_v42  ;;  %v954_v47 = vpack.c.bf16 %v890_v43, %v890_v43  ;;  %v667_v48 = vpop.f32.mrf.mxu2  ;;  %v707_v49 = vpop.f32.mrf.mxu3 }
  0xd2   : > { %1034 = vst.msk [vmem:[%s1970_s15 + $0x94] sm:$0xf] %vm996_vm3, %v969_v44  ;;  %v774_v50 = vmul.f32 %v1956_v40, %v667_v48  ;;  %v790_v51 = vmul.f32 %v1956_v40, %v707_v49  ;;  %v589_v52 = vpop.f32.mrf.mxu0  ;;  %v629_v53 = vpop.f32.mrf.mxu1 }
  0xd3   : > { %1050 = vst.msk [vmem:[%s1970_s15 + $0xd4] sm:$0xf] %vm996_vm3, %v985_v45  ;;  %v743_v54 = vmul.f32 %v1956_v40, %v589_v52  ;;  %v759_v55 = vmul.f32 %v1956_v40, %v629_v53 }
  0xd4   : > { %1003 = vst.msk [vmem:[%s1970_s15 + $0x18] sm:$0xf] %vm996_vm3, %v938_v46  ;;  %v842_v56 = vadd.f32 %v1961_v41, %v774_v50  ;;  %v858_v57 = vadd.f32 %v1961_v41, %v790_v51 }
  0xd5   : > { %1019 = vst.msk [vmem:[%s1970_s15 + $0x58] sm:$0xf] %vm996_vm3, %v954_v47  ;;  %v811_v58 = vadd.f32 %v1961_v41, %v743_v54  ;;  %v827_v59 = vadd.f32 %v1961_v41, %v759_v55 }
  0xd6   : > { %v906_v60 = vmax.f32 %v842_v56, 0.0  ;;  %v922_v61 = vmax.f32 %v858_v57, 0.0 }
  0xd7   : > { %v875_v62 = vmax.f32 %v811_v58, 0.0  ;;  %v891_v63 = vmax.f32 %v827_v59, 0.0 }
  0xd8   : > { %v970_v0 = vpack.c.bf16 %v906_v60, %v906_v60  ;;  %v986_v1 = vpack.c.bf16 %v922_v61, %v922_v61 }
  0xd9   : > { %v939_v2 = vpack.c.bf16 %v875_v62, %v875_v62  ;;  %v955_v3 = vpack.c.bf16 %v891_v63, %v891_v63  ;;  %v669_v4 = vpop.f32.mrf.mxu2  ;;  %v709_v5 = vpop.f32.mrf.mxu3 }
  0xda   : > { %1035 = vst.msk [vmem:[%s1970_s15 + $0x98] sm:$0xf] %vm996_vm3, %v970_v0  ;;  %v775_v6 = vmul.f32 %v1956_v40, %v669_v4  ;;  %v791_v7 = vmul.f32 %v1956_v40, %v709_v5  ;;  %v592_v8 = vpop.f32.mrf.mxu0  ;;  %v632_v9 = vpop.f32.mrf.mxu1 }
  0xdb   : > { %1051 = vst.msk [vmem:[%s1970_s15 + $0xd8] sm:$0xf] %vm996_vm3, %v986_v1  ;;  %v744_v10 = vmul.f32 %v1956_v40, %v592_v8  ;;  %v760_v11 = vmul.f32 %v1956_v40, %v632_v9 }
  0xdc   : > { %1004 = vst.msk [vmem:[%s1970_s15 + $0x1c] sm:$0xf] %vm996_vm3, %v939_v2  ;;  %v843_v12 = vadd.f32 %v1961_v41, %v775_v6  ;;  %v859_v13 = vadd.f32 %v1961_v41, %v791_v7 }
  0xdd   : > { %1020 = vst.msk [vmem:[%s1970_s15 + $0x5c] sm:$0xf] %vm996_vm3, %v955_v3  ;;  %v812_v14 = vadd.f32 %v1961_v41, %v744_v10  ;;  %v828_v15 = vadd.f32 %v1961_v41, %v760_v11 }
  0xde   : > { %v907_v16 = vmax.f32 %v843_v12, 0.0  ;;  %v923_v17 = vmax.f32 %v859_v13, 0.0 }
  0xdf   : > { %v876_v18 = vmax.f32 %v812_v14, 0.0  ;;  %v892_v19 = vmax.f32 %v828_v15, 0.0 }
  0xe0   : > { %v971_v20 = vpack.c.bf16 %v907_v16, %v907_v16  ;;  %v987_v21 = vpack.c.bf16 %v923_v17, %v923_v17 }
  0xe1   : > { %v940_v22 = vpack.c.bf16 %v876_v18, %v876_v18  ;;  %v956_v23 = vpack.c.bf16 %v892_v19, %v892_v19  ;;  %v672_v24 = vpop.f32.mrf.mxu2  ;;  %v712_v25 = vpop.f32.mrf.mxu3 }
  0xe2   : > { %1036 = vst.msk [vmem:[%s1970_s15 + $0x9c] sm:$0xf] %vm996_vm3, %v971_v20  ;;  %v776_v26 = vmul.f32 %v1956_v40, %v672_v24  ;;  %v792_v27 = vmul.f32 %v1956_v40, %v712_v25  ;;  %v594_v28 = vpop.f32.mrf.mxu0  ;;  %v634_v29 = vpop.f32.mrf.mxu1 }
  0xe3   : > { %1052 = vst.msk [vmem:[%s1970_s15 + $0xdc] sm:$0xf] %vm996_vm3, %v987_v21  ;;  %v745_v30 = vmul.f32 %v1956_v40, %v594_v28  ;;  %v761_v31 = vmul.f32 %v1956_v40, %v634_v29 }
  0xe4   : > { %1005 = vst.msk [vmem:[%s1970_s15 + $0x20] sm:$0xf] %vm996_vm3, %v940_v22  ;;  %v844_v32 = vadd.f32 %v1961_v41, %v776_v26  ;;  %v860_v33 = vadd.f32 %v1961_v41, %v792_v27 }
  0xe5   : > { %1021 = vst.msk [vmem:[%s1970_s15 + $0x60] sm:$0xf] %vm996_vm3, %v956_v23  ;;  %v813_v34 = vadd.f32 %v1961_v41, %v745_v30  ;;  %v829_v35 = vadd.f32 %v1961_v41, %v761_v31 }
  0xe6   : > { %v908_v36 = vmax.f32 %v844_v32, 0.0  ;;  %v924_v37 = vmax.f32 %v860_v33, 0.0 }
  0xe7   : > { %v877_v38 = vmax.f32 %v813_v34, 0.0  ;;  %v893_v39 = vmax.f32 %v829_v35, 0.0 }
  0xe8   : > { %v972_v42 = vpack.c.bf16 %v908_v36, %v908_v36  ;;  %v988_v43 = vpack.c.bf16 %v924_v37, %v924_v37 }
  0xe9   : > { %v941_v44 = vpack.c.bf16 %v877_v38, %v877_v38  ;;  %v957_v45 = vpack.c.bf16 %v893_v39, %v893_v39  ;;  %v674_v46 = vpop.f32.mrf.mxu2  ;;  %v714_v47 = vpop.f32.mrf.mxu3 }
  0xea   : > { %1037 = vst.msk [vmem:[%s1970_s15 + $0xa0] sm:$0xf] %vm996_vm3, %v972_v42  ;;  %v777_v48 = vmul.f32 %v1956_v40, %v674_v46  ;;  %v793_v49 = vmul.f32 %v1956_v40, %v714_v47  ;;  %v597_v50 = vpop.f32.mrf.mxu0  ;;  %v637_v51 = vpop.f32.mrf.mxu1 }
  0xeb   : > { %1053 = vst.msk [vmem:[%s1970_s15 + $0xe0] sm:$0xf] %vm996_vm3, %v988_v43  ;;  %v746_v52 = vmul.f32 %v1956_v40, %v597_v50  ;;  %v762_v53 = vmul.f32 %v1956_v40, %v637_v51 }
  0xec   : > { %1006 = vst.msk [vmem:[%s1970_s15 + $0x24] sm:$0xf] %vm996_vm3, %v941_v44  ;;  %v845_v54 = vadd.f32 %v1961_v41, %v777_v48  ;;  %v861_v55 = vadd.f32 %v1961_v41, %v793_v49 }
  0xed   : > { %1022 = vst.msk [vmem:[%s1970_s15 + $0x64] sm:$0xf] %vm996_vm3, %v957_v45  ;;  %v814_v56 = vadd.f32 %v1961_v41, %v746_v52  ;;  %v830_v57 = vadd.f32 %v1961_v41, %v762_v53 }
  0xee   : > { %v909_v58 = vmax.f32 %v845_v54, 0.0  ;;  %v925_v59 = vmax.f32 %v861_v55, 0.0 }
  0xef   : > { %v878_v60 = vmax.f32 %v814_v56, 0.0  ;;  %v894_v61 = vmax.f32 %v830_v57, 0.0 }
  0xf0   : > { %v973_v62 = vpack.c.bf16 %v909_v58, %v909_v58  ;;  %v989_v63 = vpack.c.bf16 %v925_v59, %v925_v59 }
  0xf1   : > { %v942_v0 = vpack.c.bf16 %v878_v60, %v878_v60  ;;  %v958_v1 = vpack.c.bf16 %v894_v61, %v894_v61  ;;  %v677_v2 = vpop.f32.mrf.mxu2  ;;  %v717_v3 = vpop.f32.mrf.mxu3 }
  0xf2   : > { %1038 = vst.msk [vmem:[%s1970_s15 + $0xa4] sm:$0xf] %vm996_vm3, %v973_v62  ;;  %v778_v4 = vmul.f32 %v1956_v40, %v677_v2  ;;  %v794_v5 = vmul.f32 %v1956_v40, %v717_v3  ;;  %v599_v6 = vpop.f32.mrf.mxu0  ;;  %v639_v7 = vpop.f32.mrf.mxu1 }
  0xf3   : > { %1054 = vst.msk [vmem:[%s1970_s15 + $0xe4] sm:$0xf] %vm996_vm3, %v989_v63  ;;  %v747_v8 = vmul.f32 %v1956_v40, %v599_v6  ;;  %v763_v9 = vmul.f32 %v1956_v40, %v639_v7 }
  0xf4   : > { %1007 = vst.msk [vmem:[%s1970_s15 + $0x28] sm:$0xf] %vm996_vm3, %v942_v0  ;;  %v846_v10 = vadd.f32 %v1961_v41, %v778_v4  ;;  %v862_v11 = vadd.f32 %v1961_v41, %v794_v5 }
  0xf5   : > { %1023 = vst.msk [vmem:[%s1970_s15 + $0x68] sm:$0xf] %vm996_vm3, %v958_v1  ;;  %v815_v12 = vadd.f32 %v1961_v41, %v747_v8  ;;  %v831_v13 = vadd.f32 %v1961_v41, %v763_v9 }
  0xf6   : > { %v910_v14 = vmax.f32 %v846_v10, 0.0  ;;  %v926_v15 = vmax.f32 %v862_v11, 0.0 }
  0xf7   : > { %v879_v16 = vmax.f32 %v815_v12, 0.0  ;;  %v895_v17 = vmax.f32 %v831_v13, 0.0 }
  0xf8   : > { %v974_v18 = vpack.c.bf16 %v910_v14, %v910_v14  ;;  %v990_v19 = vpack.c.bf16 %v926_v15, %v926_v15 }
  0xf9   : > { %v943_v20 = vpack.c.bf16 %v879_v16, %v879_v16  ;;  %v959_v21 = vpack.c.bf16 %v895_v17, %v895_v17  ;;  %v679_v22 = vpop.f32.mrf.mxu2  ;;  %v719_v23 = vpop.f32.mrf.mxu3 }
  0xfa   : > { %1039 = vst.msk [vmem:[%s1970_s15 + $0xa8] sm:$0xf] %vm996_vm3, %v974_v18  ;;  %v779_v24 = vmul.f32 %v1956_v40, %v679_v22  ;;  %v795_v25 = vmul.f32 %v1956_v40, %v719_v23  ;;  %v602_v26 = vpop.f32.mrf.mxu0  ;;  %v642_v27 = vpop.f32.mrf.mxu1 }
  0xfb   : > { %1055 = vst.msk [vmem:[%s1970_s15 + $0xe8] sm:$0xf] %vm996_vm3, %v990_v19  ;;  %v748_v28 = vmul.f32 %v1956_v40, %v602_v26  ;;  %v764_v29 = vmul.f32 %v1956_v40, %v642_v27 }
  0xfc   : > { %1008 = vst.msk [vmem:[%s1970_s15 + $0x2c] sm:$0xf] %vm996_vm3, %v943_v20  ;;  %v847_v30 = vadd.f32 %v1961_v41, %v779_v24  ;;  %v863_v31 = vadd.f32 %v1961_v41, %v795_v25 }
  0xfd   : > { %1024 = vst.msk [vmem:[%s1970_s15 + $0x6c] sm:$0xf] %vm996_vm3, %v959_v21  ;;  %v816_v32 = vadd.f32 %v1961_v41, %v748_v28  ;;  %v832_v33 = vadd.f32 %v1961_v41, %v764_v29 }
  0xfe   : > { %v911_v34 = vmax.f32 %v847_v30, 0.0  ;;  %v927_v35 = vmax.f32 %v863_v31, 0.0 }
  0xff   : > { %v880_v36 = vmax.f32 %v816_v32, 0.0  ;;  %v896_v37 = vmax.f32 %v832_v33, 0.0 }
 0x100   : > { %v975_v38 = vpack.c.bf16 %v911_v34, %v911_v34  ;;  %v991_v39 = vpack.c.bf16 %v927_v35, %v927_v35 }
 0x101   : > { %v944_v42 = vpack.c.bf16 %v880_v36, %v880_v36  ;;  %v960_v43 = vpack.c.bf16 %v896_v37, %v896_v37  ;;  %v682_v44 = vpop.f32.mrf.mxu2  ;;  %v722_v45 = vpop.f32.mrf.mxu3 }
 0x102   : > { %1040 = vst.msk [vmem:[%s1970_s15 + $0xac] sm:$0xf] %vm996_vm3, %v975_v38  ;;  %v780_v46 = vmul.f32 %v1956_v40, %v682_v44  ;;  %v796_v47 = vmul.f32 %v1956_v40, %v722_v45  ;;  %v604_v48 = vpop.f32.mrf.mxu0  ;;  %v644_v49 = vpop.f32.mrf.mxu1 }
 0x103   : > { %1056 = vst.msk [vmem:[%s1970_s15 + $0xec] sm:$0xf] %vm996_vm3, %v991_v39  ;;  %v749_v50 = vmul.f32 %v1956_v40, %v604_v48  ;;  %v765_v51 = vmul.f32 %v1956_v40, %v644_v49 }
 0x104   : > { %1009 = vst.msk [vmem:[%s1970_s15 + $0x30] sm:$0xf] %vm996_vm3, %v944_v42  ;;  %v848_v52 = vadd.f32 %v1961_v41, %v780_v46  ;;  %v864_v53 = vadd.f32 %v1961_v41, %v796_v47 }
 0x105   : > { %1025 = vst.msk [vmem:[%s1970_s15 + $0x70] sm:$0xf] %vm996_vm3, %v960_v43  ;;  %v817_v54 = vadd.f32 %v1961_v41, %v749_v50  ;;  %v833_v55 = vadd.f32 %v1961_v41, %v765_v51 }
 0x106   : > { %v912_v56 = vmax.f32 %v848_v52, 0.0  ;;  %v928_v57 = vmax.f32 %v864_v53, 0.0 }
 0x107   : > { %v881_v58 = vmax.f32 %v817_v54, 0.0  ;;  %v897_v59 = vmax.f32 %v833_v55, 0.0 }
 0x108   : > { %v976_v60 = vpack.c.bf16 %v912_v56, %v912_v56  ;;  %v992_v61 = vpack.c.bf16 %v928_v57, %v928_v57 }
 0x109   : > { %v945_v62 = vpack.c.bf16 %v881_v58, %v881_v58  ;;  %v961_v63 = vpack.c.bf16 %v897_v59, %v897_v59  ;;  %v684_v0 = vpop.f32.mrf.mxu2  ;;  %v724_v1 = vpop.f32.mrf.mxu3 }
 0x10a   : > { %1041 = vst.msk [vmem:[%s1970_s15 + $0xb0] sm:$0xf] %vm996_vm3, %v976_v60  ;;  %v781_v2 = vmul.f32 %v1956_v40, %v684_v0  ;;  %v797_v3 = vmul.f32 %v1956_v40, %v724_v1  ;;  %v607_v4 = vpop.f32.mrf.mxu0  ;;  %v647_v5 = vpop.f32.mrf.mxu1 }
 0x10b   : > { %1057 = vst.msk [vmem:[%s1970_s15 + $0xf0] sm:$0xf] %vm996_vm3, %v992_v61  ;;  %v750_v6 = vmul.f32 %v1956_v40, %v607_v4  ;;  %v766_v7 = vmul.f32 %v1956_v40, %v647_v5 }
 0x10c   : > { %1010 = vst.msk [vmem:[%s1970_s15 + $0x34] sm:$0xf] %vm996_vm3, %v945_v62  ;;  %v849_v8 = vadd.f32 %v1961_v41, %v781_v2  ;;  %v865_v9 = vadd.f32 %v1961_v41, %v797_v3 }
 0x10d   : > { %1026 = vst.msk [vmem:[%s1970_s15 + $0x74] sm:$0xf] %vm996_vm3, %v961_v63  ;;  %v818_v10 = vadd.f32 %v1961_v41, %v750_v6  ;;  %v834_v11 = vadd.f32 %v1961_v41, %v766_v7 }
 0x10e   : > { %v913_v12 = vmax.f32 %v849_v8, 0.0  ;;  %v929_v13 = vmax.f32 %v865_v9, 0.0 }
 0x10f   : > { %v882_v14 = vmax.f32 %v818_v10, 0.0  ;;  %v898_v15 = vmax.f32 %v834_v11, 0.0 }
 0x110   : > { %v977_v16 = vpack.c.bf16 %v913_v12, %v913_v12  ;;  %v993_v17 = vpack.c.bf16 %v929_v13, %v929_v13 }
 0x111   : > { %v946_v18 = vpack.c.bf16 %v882_v14, %v882_v14  ;;  %v962_v19 = vpack.c.bf16 %v898_v15, %v898_v15  ;;  %v687_v20 = vpop.f32.mrf.mxu2  ;;  %v727_v21 = vpop.f32.mrf.mxu3 }
 0x112   : > { %1042 = vst.msk [vmem:[%s1970_s15 + $0xb4] sm:$0xf] %vm996_vm3, %v977_v16  ;;  %v782_v22 = vmul.f32 %v1956_v40, %v687_v20  ;;  %v798_v23 = vmul.f32 %v1956_v40, %v727_v21  ;;  %v609_v24 = vpop.f32.mrf.mxu0  ;;  %v649_v25 = vpop.f32.mrf.mxu1 }
 0x113   : > { %1058 = vst.msk [vmem:[%s1970_s15 + $0xf4] sm:$0xf] %vm996_vm3, %v993_v17  ;;  %v751_v26 = vmul.f32 %v1956_v40, %v609_v24  ;;  %v767_v27 = vmul.f32 %v1956_v40, %v649_v25 }
 0x114   : > { %1011 = vst.msk [vmem:[%s1970_s15 + $0x38] sm:$0xf] %vm996_vm3, %v946_v18  ;;  %v850_v28 = vadd.f32 %v1961_v41, %v782_v22  ;;  %v866_v29 = vadd.f32 %v1961_v41, %v798_v23 }
 0x115   : > { %1027 = vst.msk [vmem:[%s1970_s15 + $0x78] sm:$0xf] %vm996_vm3, %v962_v19  ;;  %v819_v30 = vadd.f32 %v1961_v41, %v751_v26  ;;  %v835_v31 = vadd.f32 %v1961_v41, %v767_v27 }
 0x116   : > { %v914_v32 = vmax.f32 %v850_v28, 0.0  ;;  %v930_v33 = vmax.f32 %v866_v29, 0.0 }
 0x117   : > { %v883_v34 = vmax.f32 %v819_v30, 0.0  ;;  %v899_v35 = vmax.f32 %v835_v31, 0.0 }
 0x118   : > { %v978_v36 = vpack.c.bf16 %v914_v32, %v914_v32  ;;  %v994_v37 = vpack.c.bf16 %v930_v33, %v930_v33 }
 0x119   : > { %v947_v38 = vpack.c.bf16 %v883_v34, %v883_v34  ;;  %v963_v39 = vpack.c.bf16 %v899_v35, %v899_v35  ;;  %v689_v42 = vpop.f32.mrf.mxu2  ;;  %v729_v43 = vpop.f32.mrf.mxu3 }
 0x11a   : > { %1043 = vst.msk [vmem:[%s1970_s15 + $0xb8] sm:$0xf] %vm996_vm3, %v978_v36  ;;  %v783_v44 = vmul.f32 %v1956_v40, %v689_v42  ;;  %v799_v45 = vmul.f32 %v1956_v40, %v729_v43 }
 0x11b   : > { %1059 = vst.msk [vmem:[%s1970_s15 + $0xf8] sm:$0xf] %vm996_vm3, %v994_v37 }
 0x11c   : > { %1012 = vst.msk [vmem:[%s1970_s15 + $0x3c] sm:$0xf] %vm996_vm3, %v947_v38  ;;  %v851_v46 = vadd.f32 %v1961_v41, %v783_v44  ;;  %v867_v47 = vadd.f32 %v1961_v41, %v799_v45 }
 0x11d   : > { %1028 = vst.msk [vmem:[%s1970_s15 + $0x7c] sm:$0xf] %vm996_vm3, %v963_v39 }
 0x11e   : > { %v915_v48 = vmax.f32 %v851_v46, 0.0  ;;  %v931_v49 = vmax.f32 %v867_v47, 0.0 }
 0x11f   : > { %1067 = sbr.rel (!%p1866_p4) target bundleno = 356 (0x164), region = 40 }
 0x120   : > { %v979_v50 = vpack.c.bf16 %v915_v48, %v915_v48  ;;  %v995_v51 = vpack.c.bf16 %v931_v49, %v931_v49 }
 0x122   : > { %1044 = vst.msk [vmem:[%s1970_s15 + $0xbc] sm:$0xf] %vm996_vm3, %v979_v50 }
 0x123   : > { %1060 = vst.msk [vmem:[%s1970_s15 + $0xfc] sm:$0xf] %vm996_vm3, %v995_v51 }
 0x124   : > { %s2379_s20 = smov (!%p1070_p8, %s1069_s20), 64 }
 0x125   : > { %s1578_s27 = sshll.u32 %s2379_s20, 2 }
 0x126   : > { %p1581_p9 = scmp.eq.s32.totalorder %s1578_s27, 0 }
 0x127   : > { %s2235_s29 = sshrl.u32 (!%p1581_p9), %s2379_s20, 5 }
 0x128   : > { %1078 = sbr.rel (%p1581_p9) target bundleno = 356 (0x164), region = 44  ;;  %p1582_p10 = scmp.le.s32.totalorder (!%p1581_p9), %s2235_s29, 0 }
 0x12d   : > { %1357 = sbr.rel (%p1582_p10) target bundleno = 339 (0x153), region = 116  ;;  %s2370_s18 = smov (!%p1582_p10), %s2229_s26 }
 0x12e   : > { %s2371_s23 = smov (!%p1582_p10), %s1970_s15  ;;  %s2244_s28 = smov (!%p1582_p10), 0  }
 0x12f   : > { %s2246_s30 = smov (!%p1582_p10), 0  }
 0x132 LB: >> { %v1095_v40 = vld [vmem:[%s1789_s23] sm:$0xf]  ;;  %v1097_v41 = vld [vmem:[%s1789_s23 + $0x4] sm:$0xf]  ;;  %v1099_v52 = vld [vmem:[%s1789_s23 + $0x8] sm:$0xf]  ;;  %s1797_s30 = sphi %s2246_s30, %s1089_s30   ;;  %s1793_s28 = sphi %s2244_s28, %s2374_s28   ;;  %s1789_s23 = sphi %s2371_s23, %s2373_s23   ;;  %s1785_s18 = sphi %s2370_s18, %s2372_s18  }
 0x133   : >> { %1096 = vst [vmem:[%s1785_s18] sm:$0xf] %v1095_v40  ;;  %v1101_v53 = vld [vmem:[%s1789_s23 + $0xc] sm:$0xf]  ;;  %v1103_v54 = vld [vmem:[%s1789_s23 + $0x10] sm:$0xf]  ;;  %s1159_s5 = sadd.s32 1, %s1793_s28 }
 0x134   : >> { %1098 = vst [vmem:[%s1785_s18 + $0x4] sm:$0xf] %v1097_v41  ;;  %v1105_v55 = vld [vmem:[%s1789_s23 + $0x14] sm:$0xf]  ;;  %v1107_v56 = vld [vmem:[%s1789_s23 + $0x18] sm:$0xf]  ;;  %p1160_p11 = scmp.ge.s32.totalorder %s1159_s5, %s2235_s29 }
 0x135   : >> { %1100 = vst [vmem:[%s1785_s18 + $0x8] sm:$0xf] %v1099_v52  ;;  %v1109_v57 = vld [vmem:[%s1789_s23 + $0x1c] sm:$0xf]  ;;  %v1111_v58 = vld [vmem:[%s1789_s23 + $0x20] sm:$0xf] }
 0x136   : >> { %1102 = vst [vmem:[%s1785_s18 + $0xc] sm:$0xf] %v1101_v53  ;;  %v1113_v59 = vld [vmem:[%s1789_s23 + $0x24] sm:$0xf]  ;;  %v1115_v60 = vld [vmem:[%s1789_s23 + $0x28] sm:$0xf] }
 0x137   : >> { %1104 = vst [vmem:[%s1785_s18 + $0x10] sm:$0xf] %v1103_v54  ;;  %v1117_v61 = vld [vmem:[%s1789_s23 + $0x2c] sm:$0xf]  ;;  %v1119_v62 = vld [vmem:[%s1789_s23 + $0x30] sm:$0xf] }
 0x138   : >> { %1106 = vst [vmem:[%s1785_s18 + $0x14] sm:$0xf] %v1105_v55  ;;  %v1121_v63 = vld [vmem:[%s1789_s23 + $0x34] sm:$0xf]  ;;  %v1123_v0 = vld [vmem:[%s1789_s23 + $0x38] sm:$0xf] }
 0x139   : >> { %1108 = vst [vmem:[%s1785_s18 + $0x18] sm:$0xf] %v1107_v56  ;;  %v1125_v1 = vld [vmem:[%s1789_s23 + $0x3c] sm:$0xf]  ;;  %v1127_v2 = vld [vmem:[%s1789_s23 + $0x40] sm:$0xf] }
 0x13a   : >> { %1110 = vst [vmem:[%s1785_s18 + $0x1c] sm:$0xf] %v1109_v57  ;;  %v1129_v3 = vld [vmem:[%s1789_s23 + $0x44] sm:$0xf]  ;;  %s2381_s5 = smov (%p1160_p11, %s1159_s5), 0  ;;  %s1089_s30 = sadd.s32 1, %s1797_s30  }
 0x13b   : >> { %1112 = vst [vmem:[%s1785_s18 + $0x20] sm:$0xf] %v1111_v58  ;;  %v1131_v4 = vld [vmem:[%s1789_s23 + $0x48] sm:$0xf]  ;;  %v1133_v5 = vld [vmem:[%s1789_s23 + $0x4c] sm:$0xf]  ;;  %p1088_p12 = scmp.ge.s32.totalorder %s1089_s30, %s2235_s29  ;;  %s2374_s28 = smov %s2381_s5 }
 0x13c   : >> { %1114 = vst [vmem:[%s1785_s18 + $0x24] sm:$0xf] %v1113_v59  ;;  %s1583_s6 = sshll.u32 %s2381_s5, 7  ;;  %v1135_v6 = vld [vmem:[%s1789_s23 + $0x50] sm:$0xf] }
 0x13d   : >> { %1116 = vst [vmem:[%s1785_s18 + $0x28] sm:$0xf] %v1115_v60  ;;  %s2305_s7 = scalar_lea.vmem %s1970_s15, %s1583_s6 [#allocation2]   ;;  %s1165_s8 = scalar_lea.vmem %s2229_s26, %s1583_s6   ;;  %v1137_v7 = vld [vmem:[%s1789_s23 + $0x54] sm:$0xf]  ;;  %v1139_v8 = vld [vmem:[%s1789_s23 + $0x58] sm:$0xf] }
 0x13e   : >> { %1118 = vst [vmem:[%s1785_s18 + $0x2c] sm:$0xf] %v1117_v61  ;;  %v1141_v9 = vld [vmem:[%s1789_s23 + $0x5c] sm:$0xf]  ;;  %v1143_v10 = vld [vmem:[%s1789_s23 + $0x60] sm:$0xf] }
 0x13f   : >> { %1120 = vst [vmem:[%s1785_s18 + $0x30] sm:$0xf] %v1119_v62  ;;  %v1145_v11 = vld [vmem:[%s1789_s23 + $0x64] sm:$0xf]  ;;  %v1147_v12 = vld [vmem:[%s1789_s23 + $0x68] sm:$0xf] }
 0x140   : >> { %1122 = vst [vmem:[%s1785_s18 + $0x34] sm:$0xf] %v1121_v63  ;;  %v1149_v13 = vld [vmem:[%s1789_s23 + $0x6c] sm:$0xf]  ;;  %v1151_v14 = vld [vmem:[%s1789_s23 + $0x70] sm:$0xf] }
 0x141   : >> { %1124 = vst [vmem:[%s1785_s18 + $0x38] sm:$0xf] %v1123_v0  ;;  %v1153_v15 = vld [vmem:[%s1789_s23 + $0x74] sm:$0xf]  ;;  %v1155_v16 = vld [vmem:[%s1789_s23 + $0x78] sm:$0xf] }
 0x142   : >> { %1126 = vst [vmem:[%s1785_s18 + $0x3c] sm:$0xf] %v1125_v1  ;;  %v1157_v17 = vld [vmem:[%s1789_s23 + $0x7c] sm:$0xf]  ;;  %s2373_s23 = smov %s2305_s7 }
 0x143   : >> { %1128 = vst [vmem:[%s1785_s18 + $0x40] sm:$0xf] %v1127_v2 }
 0x144   : >> { %1130 = vst [vmem:[%s1785_s18 + $0x44] sm:$0xf] %v1129_v3 }
 0x145   : >> { %1132 = vst [vmem:[%s1785_s18 + $0x48] sm:$0xf] %v1131_v4 }
 0x146   : >> { %1134 = vst [vmem:[%s1785_s18 + $0x4c] sm:$0xf] %v1133_v5 }
 0x147   : >> { %1136 = vst [vmem:[%s1785_s18 + $0x50] sm:$0xf] %v1135_v6 }
 0x148   : >> { %1138 = vst [vmem:[%s1785_s18 + $0x54] sm:$0xf] %v1137_v7 }
 0x149   : >> { %1140 = vst [vmem:[%s1785_s18 + $0x58] sm:$0xf] %v1139_v8 }
 0x14a   : >> { %1142 = vst [vmem:[%s1785_s18 + $0x5c] sm:$0xf] %v1141_v9 }
 0x14b   : >> { %1144 = vst [vmem:[%s1785_s18 + $0x60] sm:$0xf] %v1143_v10 }
 0x14c   : >> { %1146 = vst [vmem:[%s1785_s18 + $0x64] sm:$0xf] %v1145_v11 }
 0x14d   : >> { %1148 = vst [vmem:[%s1785_s18 + $0x68] sm:$0xf] %v1147_v12 }
 0x14e   : >> { %1150 = vst [vmem:[%s1785_s18 + $0x6c] sm:$0xf] %v1149_v13  ;;  %1091 = sbr.rel (!%p1088_p12) target bundleno = 306 (0x132), region = 122 }
 0x14f   : >> { %1152 = vst [vmem:[%s1785_s18 + $0x70] sm:$0xf] %v1151_v14 }
 0x150   : >> { %1154 = vst [vmem:[%s1785_s18 + $0x74] sm:$0xf] %v1153_v15 }
 0x151   : >> { %1156 = vst [vmem:[%s1785_s18 + $0x78] sm:$0xf] %v1155_v16 }
 0x152   : >> { %1158 = vst [vmem:[%s1785_s18 + $0x7c] sm:$0xf] %v1157_v17  ;;  %s2372_s18 = smov %s1165_s8 }
 0x153 PF: > { %s2346_s9 = sand.u32 31, %s2379_s20   ;;  %s1628_s10 = sshll.u32 %s2235_s29, 7 }
 0x154   : > { %s1170_s11 = scalar_lea.vmem %s1970_s15, %s1628_s10 [#allocation2]   ;;  %s1172_s12 = scalar_lea.vmem %s2229_s26, %s1628_s10  }
 0x155   : > { %p1588_p13 = scmp.le.s32.totalorder %s2346_s9, 0 }
 0x156   : > { %s1799_s13 = smov (!%p1588_p13), %s1172_s12   ;;  %s1803_s14 = smov (!%p1588_p13), %s1170_s11  }
 0x157   : > { %1371 = sbr.rel (%p1588_p13) target bundleno = 356 (0x164), region = 127  ;;  %s1807_s17 = smov (!%p1588_p13), 0  }
 0x158   : > { %s1811_s21 = smov (!%p1588_p13), 0  }
 0x15c LB: >> { %v1182_v18 = vld [vmem:[%s1805_s14] sm:$0xf]  ;;  %s1184_s20 = sadd.s32 1, %s1809_s17  ;;  %s1176_s21 = sadd.s32 1, %s1813_s21   ;;  %s1813_s21 = sphi %s1811_s21, %s1176_s21   ;;  %s1809_s17 = sphi %s1807_s17, %s1808_s17   ;;  %s1805_s14 = sphi %s1803_s14, %s1189_s14   ;;  %s1801_s13 = sphi %s1799_s13, %s1190_s13  }
 0x15d   : >> { %1183 = vst [vmem:[%s1801_s13] sm:$0xf] %v1182_v18  ;;  %p1185_p0 = scmp.ge.s32.totalorder %s1184_s20, %s2346_s9  ;;  %p1175_p1 = scmp.ge.s32.totalorder %s1176_s21, %s2346_s9 }
 0x15f   : >> { %s2383_s20 = smov (%p1185_p0, %s1184_s20), 0  ;;  %1178 = sbr.rel (!%p1175_p1) target bundleno = 348 (0x15c), region = 133 }
 0x160   : >> { %s1589_s15 = sshll.u32 %s2383_s20, 2  ;;  %s1808_s17 = smov %s2383_s20  }
 0x161   : >> { %s1189_s14 = scalar_lea.vmem %s1170_s11, %s1589_s15 [#allocation2]   ;;  %s1190_s13 = scalar_lea.vmem %s1172_s12, %s1589_s15  }
 0x164 PF: > { %p11_p2 = scmp.ge.s32.totalorder %s1856_s19, 4   ;;  %s2375_s15 = smov %s1777_s16 }
 0x165   : > { %s2376_s16 = smov %s1864_s22  ;;  %s2377_s17 = smov %s1856_s19 }
 0x166   :  { %13 = sbr.rel (!%p11_p2) target bundleno = 2 (0x2), region = 144 }

// kernel: horseshoe_forward.15
= control target key start
LH: loop header
LB: loop body
LE: loop exit
PB: predicated region body
PF: predicated region fallthrough
CT: control target
= control target key end

     0   :  { %vm375_vm0 = vcmask 1043456   ;;  %vm278_vm1 = vcmask 588800   ;;  %vm812_vm2 = vcmask 60416   ;;  %s1672_s1 = inlined_call_operand.vmem [shape: bf16[72,8], index: 1, kind: input, shape index: {}]   ;;  %s1673_s2 = inlined_call_operand.vmem [shape: f32[1,8], index: 2, kind: input, shape index: {}]   ;;  %s1674_s3 = inlined_call_operand.vmem [shape: f32[1,8], index: 3, kind: input, shape index: {}]   ;;  %s1675_s0 = inlined_call_operand.vmem [shape: bf16[512,72], index: 0, kind: input, shape index: {}]   ;;  %s1676_s4 = inlined_call_operand.vmem [shape: bf16[512,8], index: 4, kind: output, shape index: {}]  }
   0x1   :  { %v90_v0 = vld [vmem:[%s1672_s1 + $0x20] sm:$0xf]  ;;  %v1092_v4 = vld [vmem:[%s1672_s1 + $0x18] sm:$0xff]  ;;  %v1091_v5 = vld [vmem:[%s1672_s1 + $0x10] sm:$0xff] }
   0x2   :  { %v268_v1 = vunpack.c.l.b16 %v90_v0  ;;  %v1090_v6 = vld [vmem:[%s1672_s1 + $0x8] sm:$0xff]  ;;  %v1089_v7 = vld [vmem:[%s1672_s1] sm:$0xff]  ;;  %v1059_v16 = vld [vmem:[%s1675_s0 + $0x10] sm:$0xff] }
   0x3   :  { %v1057_v8 = vld [vmem:[%s1675_s0] sm:$0xff]  ;;  %v1058_v12 = vld [vmem:[%s1675_s0 + $0x8] sm:$0xff]  ;;  %v1067_v17 = vld [vmem:[%s1675_s0 + $0x50] sm:$0xff] }
   0x4   :  { %v273_v2 = vpack.c.b16 %v268_v1, %v268_v1  ;;  %v1065_v9 = vld [vmem:[%s1675_s0 + $0x40] sm:$0xff]  ;;  %v1066_v13 = vld [vmem:[%s1675_s0 + $0x48] sm:$0xff]  ;;  %v1075_v18 = vld [vmem:[%s1675_s0 + $0x90] sm:$0xff] }
   0x5   :  { %v1073_v10 = vld [vmem:[%s1675_s0 + $0x80] sm:$0xff]  ;;  %v1074_v14 = vld [vmem:[%s1675_s0 + $0x88] sm:$0xff]  ;;  %v1083_v19 = vld [vmem:[%s1675_s0 + $0xd0] sm:$0xff] }
   0x6   :  { %v377_v3 = vsel %vm375_vm0, %v273_v2, 0  ;;  %v1081_v11 = vld [vmem:[%s1675_s0 + $0xc0] sm:$0xff]  ;;  %v1082_v15 = vld [vmem:[%s1675_s0 + $0xc8] sm:$0xff]  ;;  %v1060_v20 = vld [vmem:[%s1675_s0 + $0x18] sm:$0xff] }
   0x7   :  { %382 = vmatpush.bf16.msra.mxu0 %v377_v3  ;;  %1093 = vmatpush.bf16.msra.mxu1 %v377_v3  ;;  %v1068_v21 = vld [vmem:[%s1675_s0 + $0x58] sm:$0xff]  ;;  %v1061_v24 = vld [vmem:[%s1675_s0 + $0x20] sm:$0xff]  ;;  %v1062_v28 = vld [vmem:[%s1675_s0 + $0x28] sm:$0xff] }
   0x8   :  { %1094 = vmatpush.bf16.msra.mxu2 %v377_v3  ;;  %1095 = vmatpush.bf16.msra.mxu3 %v377_v3  ;;  %v1076_v22 = vld [vmem:[%s1675_s0 + $0x98] sm:$0xff]  ;;  %v1069_v25 = vld [vmem:[%s1675_s0 + $0x60] sm:$0xff]  ;;  %v1070_v29 = vld [vmem:[%s1675_s0 + $0x68] sm:$0xff] }
   0x9   :  { %v1084_v23 = vld [vmem:[%s1675_s0 + $0xd8] sm:$0xff]  ;;  %v1077_v26 = vld [vmem:[%s1675_s0 + $0xa0] sm:$0xff]  ;;  %v1078_v30 = vld [vmem:[%s1675_s0 + $0xa8] sm:$0xff] }
   0xa   :  { %v1085_v27 = vld [vmem:[%s1675_s0 + $0xe0] sm:$0xff]  ;;  %v1086_v31 = vld [vmem:[%s1675_s0 + $0xe8] sm:$0xff]  ;;  %v1063_v32 = vld [vmem:[%s1675_s0 + $0x30] sm:$0xff] }
   0xb   :  { %383 = vmatpush.bf16.msra.mxu0 %v1092_v4  ;;  %1096 = vmatpush.bf16.msra.mxu1 %v1092_v4  ;;  %v1071_v33 = vld [vmem:[%s1675_s0 + $0x70] sm:$0xff]  ;;  %v1064_v36 = vld [vmem:[%s1675_s0 + $0x38] sm:$0xff]  ;;  %v1281_v40 = vld [vmem:[%s1673_s2] ss:$0 sm:$0xff] }
   0xc   :  { %1097 = vmatpush.bf16.msra.mxu2 %v1092_v4  ;;  %1098 = vmatpush.bf16.msra.mxu3 %v1092_v4  ;;  %v1079_v34 = vld [vmem:[%s1675_s0 + $0xb0] sm:$0xff]  ;;  %v1072_v37 = vld [vmem:[%s1675_s0 + $0x78] sm:$0xff]  ;;  %v1286_v41 = vld [vmem:[%s1674_s3] ss:$0 sm:$0xff] }
   0xd   :  { %v1087_v35 = vld [vmem:[%s1675_s0 + $0xf0] sm:$0xff]  ;;  %v1080_v38 = vld [vmem:[%s1675_s0 + $0xb8] sm:$0xff] }
   0xe   :  { %v1088_v39 = vld [vmem:[%s1675_s0 + $0xf8] sm:$0xff] }
   0xf   :  { %384 = vmatpush.bf16.msra.mxu0 %v1091_v5  ;;  %1099 = vmatpush.bf16.msra.mxu1 %v1091_v5 }
  0x10   :  { %1100 = vmatpush.bf16.msra.mxu2 %v1091_v5  ;;  %1101 = vmatpush.bf16.msra.mxu3 %v1091_v5 }
  0x13   :  { %385 = vmatpush.bf16.msra.mxu0 %v1090_v6  ;;  %1102 = vmatpush.bf16.msra.mxu1 %v1090_v6 }
  0x14   :  { %1103 = vmatpush.bf16.msra.mxu2 %v1090_v6  ;;  %1104 = vmatpush.bf16.msra.mxu3 %v1090_v6 }
  0x17   :  { %386 = vmatpush.bf16.msra.mxu0 %v1089_v7  ;;  %1105 = vmatpush.bf16.msra.mxu1 %v1089_v7 }
  0x18   :  { %1106 = vmatpush.bf16.msra.mxu2 %v1089_v7  ;;  %1107 = vmatpush.bf16.msra.mxu3 %v1089_v7 }
  0x1a   :  { %1025 = vmatmul.msk.bf16.vlgmr.msra.gmra.mxu0 %vm278_vm1, %v1057_v8  ;;  %1033 = vmatmul.msk.bf16.vlgmr.msra.gmra.mxu1 %vm278_vm1, %v1065_v9 }
  0x1b   :  { %1041 = vmatmul.msk.bf16.vlgmr.msra.gmra.mxu2 %vm278_vm1, %v1073_v10  ;;  %1049 = vmatmul.msk.bf16.vlgmr.msra.gmra.mxu3 %vm278_vm1, %v1081_v11 }
  0x2a   :  { %1026 = vmatmul.msk.bf16.gmra.mxu0 %vm278_vm1, %v1058_v12  ;;  %1034 = vmatmul.msk.bf16.gmra.mxu1 %vm278_vm1, %v1066_v13 }
  0x2b   :  { %1042 = vmatmul.msk.bf16.gmra.mxu2 %vm278_vm1, %v1074_v14  ;;  %1050 = vmatmul.msk.bf16.gmra.mxu3 %vm278_vm1, %v1082_v15 }
  0x3a   :  { %1027 = vmatmul.msk.bf16.gmra.mxu0 %vm278_vm1, %v1059_v16  ;;  %1035 = vmatmul.msk.bf16.gmra.mxu1 %vm278_vm1, %v1067_v17 }
  0x3b   :  { %1043 = vmatmul.msk.bf16.gmra.mxu2 %vm278_vm1, %v1075_v18  ;;  %1051 = vmatmul.msk.bf16.gmra.mxu3 %vm278_vm1, %v1083_v19 }
  0x4a   :  { %1028 = vmatmul.msk.bf16.gmra.mxu0 %vm278_vm1, %v1060_v20  ;;  %1036 = vmatmul.msk.bf16.gmra.mxu1 %vm278_vm1, %v1068_v21 }
  0x4b   :  { %1044 = vmatmul.msk.bf16.gmra.mxu2 %vm278_vm1, %v1076_v22  ;;  %1052 = vmatmul.msk.bf16.gmra.mxu3 %vm278_vm1, %v1084_v23 }
  0x5a   :  { %1029 = vmatmul.msk.bf16.gmra.mxu0 %vm278_vm1, %v1061_v24  ;;  %1037 = vmatmul.msk.bf16.gmra.mxu1 %vm278_vm1, %v1069_v25 }
  0x5b   :  { %1045 = vmatmul.msk.bf16.gmra.mxu2 %vm278_vm1, %v1077_v26  ;;  %1053 = vmatmul.msk.bf16.gmra.mxu3 %vm278_vm1, %v1085_v27 }
  0x6a   :  { %1030 = vmatmul.msk.bf16.gmra.mxu0 %vm278_vm1, %v1062_v28  ;;  %1038 = vmatmul.msk.bf16.gmra.mxu1 %vm278_vm1, %v1070_v29 }
  0x6b   :  { %1046 = vmatmul.msk.bf16.gmra.mxu2 %vm278_vm1, %v1078_v30  ;;  %1054 = vmatmul.msk.bf16.gmra.mxu3 %vm278_vm1, %v1086_v31 }
  0x7a   :  { %1031 = vmatmul.msk.bf16.gmra.mxu0 %vm278_vm1, %v1063_v32  ;;  %1039 = vmatmul.msk.bf16.gmra.mxu1 %vm278_vm1, %v1071_v33 }
  0x7b   :  { %1047 = vmatmul.msk.bf16.gmra.mxu2 %vm278_vm1, %v1079_v34  ;;  %1055 = vmatmul.msk.bf16.gmra.mxu3 %vm278_vm1, %v1087_v35 }
  0x8a   :  { %1032 = vmatmul.msk.bf16.gmra.mxu0 %vm278_vm1, %v1064_v36  ;;  %1040 = vmatmul.msk.bf16.gmra.mxu1 %vm278_vm1, %v1072_v37 }
  0x8b   :  { %1048 = vmatmul.msk.bf16.gmra.mxu2 %vm278_vm1, %v1080_v38  ;;  %1056 = vmatmul.msk.bf16.gmra.mxu3 %vm278_vm1, %v1088_v39 }
  0x97   :  { %v388_v42 = vpop.f32.mrf.mxu0  ;;  %v428_v43 = vpop.f32.mrf.mxu1 }
  0x98   :  { %v552_v44 = vmul.f32 %v1281_v40, %v388_v42  ;;  %v568_v45 = vmul.f32 %v1281_v40, %v428_v43 }
  0x9a   :  { %v620_v46 = vadd.f32 %v1286_v41, %v552_v44  ;;  %v636_v47 = vadd.f32 %v1286_v41, %v568_v45 }
  0x9c   :  { %v684_v48 = vmax.f32 %v620_v46, 0.0  ;;  %v700_v49 = vmax.f32 %v636_v47, 0.0 }
  0x9e   :  { %v748_v50 = vpack.c.bf16 %v684_v48, %v684_v48  ;;  %v764_v51 = vpack.c.bf16 %v700_v49, %v700_v49  ;;  %v468_v52 = vpop.f32.mrf.mxu2  ;;  %v508_v53 = vpop.f32.mrf.mxu3 }
  0x9f   :  { %v584_v54 = vmul.f32 %v1281_v40, %v468_v52  ;;  %v600_v55 = vmul.f32 %v1281_v40, %v508_v53  ;;  %v390_v56 = vpop.f32.mrf.mxu0  ;;  %v430_v57 = vpop.f32.mrf.mxu1 }
  0xa0   :  { %813 = vst.msk [vmem:[%s1676_s4] sm:$0xf] %vm812_vm2, %v748_v50  ;;  %v553_v58 = vmul.f32 %v1281_v40, %v390_v56  ;;  %v569_v59 = vmul.f32 %v1281_v40, %v430_v57 }
  0xa1   :  { %829 = vst.msk [vmem:[%s1676_s4 + $0x40] sm:$0xf] %vm812_vm2, %v764_v51  ;;  %v652_v60 = vadd.f32 %v1286_v41, %v584_v54  ;;  %v668_v61 = vadd.f32 %v1286_v41, %v600_v55 }
  0xa2   :  { %v621_v62 = vadd.f32 %v1286_v41, %v553_v58  ;;  %v637_v63 = vadd.f32 %v1286_v41, %v569_v59 }
  0xa3   :  { %v716_v0 = vmax.f32 %v652_v60, 0.0  ;;  %v732_v1 = vmax.f32 %v668_v61, 0.0 }
  0xa4   :  { %v685_v2 = vmax.f32 %v621_v62, 0.0  ;;  %v701_v3 = vmax.f32 %v637_v63, 0.0 }
  0xa5   :  { %v780_v4 = vpack.c.bf16 %v716_v0, %v716_v0  ;;  %v796_v5 = vpack.c.bf16 %v732_v1, %v732_v1 }
  0xa6   :  { %v749_v6 = vpack.c.bf16 %v685_v2, %v685_v2  ;;  %v765_v7 = vpack.c.bf16 %v701_v3, %v701_v3  ;;  %v470_v8 = vpop.f32.mrf.mxu2  ;;  %v510_v9 = vpop.f32.mrf.mxu3 }
  0xa7   :  { %845 = vst.msk [vmem:[%s1676_s4 + $0x80] sm:$0xf] %vm812_vm2, %v780_v4  ;;  %v585_v10 = vmul.f32 %v1281_v40, %v470_v8  ;;  %v601_v11 = vmul.f32 %v1281_v40, %v510_v9  ;;  %v393_v12 = vpop.f32.mrf.mxu0  ;;  %v433_v13 = vpop.f32.mrf.mxu1 }
  0xa8   :  { %861 = vst.msk [vmem:[%s1676_s4 + $0xc0] sm:$0xf] %vm812_vm2, %v796_v5  ;;  %v554_v14 = vmul.f32 %v1281_v40, %v393_v12  ;;  %v570_v15 = vmul.f32 %v1281_v40, %v433_v13 }
  0xa9   :  { %814 = vst.msk [vmem:[%s1676_s4 + $0x4] sm:$0xf] %vm812_vm2, %v749_v6  ;;  %v653_v16 = vadd.f32 %v1286_v41, %v585_v10  ;;  %v669_v17 = vadd.f32 %v1286_v41, %v601_v11 }
  0xaa   :  { %830 = vst.msk [vmem:[%s1676_s4 + $0x44] sm:$0xf] %vm812_vm2, %v765_v7  ;;  %v622_v18 = vadd.f32 %v1286_v41, %v554_v14  ;;  %v638_v19 = vadd.f32 %v1286_v41, %v570_v15 }
  0xab   :  { %v717_v20 = vmax.f32 %v653_v16, 0.0  ;;  %v733_v21 = vmax.f32 %v669_v17, 0.0 }
  0xac   :  { %v686_v22 = vmax.f32 %v622_v18, 0.0  ;;  %v702_v23 = vmax.f32 %v638_v19, 0.0 }
  0xad   :  { %v781_v24 = vpack.c.bf16 %v717_v20, %v717_v20  ;;  %v797_v25 = vpack.c.bf16 %v733_v21, %v733_v21 }
  0xae   :  { %v750_v26 = vpack.c.bf16 %v686_v22, %v686_v22  ;;  %v766_v27 = vpack.c.bf16 %v702_v23, %v702_v23  ;;  %v473_v28 = vpop.f32.mrf.mxu2  ;;  %v513_v29 = vpop.f32.mrf.mxu3 }
  0xaf   :  { %846 = vst.msk [vmem:[%s1676_s4 + $0x84] sm:$0xf] %vm812_vm2, %v781_v24  ;;  %v586_v30 = vmul.f32 %v1281_v40, %v473_v28  ;;  %v602_v31 = vmul.f32 %v1281_v40, %v513_v29  ;;  %v395_v32 = vpop.f32.mrf.mxu0  ;;  %v435_v33 = vpop.f32.mrf.mxu1 }
  0xb0   :  { %862 = vst.msk [vmem:[%s1676_s4 + $0xc4] sm:$0xf] %vm812_vm2, %v797_v25  ;;  %v555_v34 = vmul.f32 %v1281_v40, %v395_v32  ;;  %v571_v35 = vmul.f32 %v1281_v40, %v435_v33 }
  0xb1   :  { %815 = vst.msk [vmem:[%s1676_s4 + $0x8] sm:$0xf] %vm812_vm2, %v750_v26  ;;  %v654_v36 = vadd.f32 %v1286_v41, %v586_v30  ;;  %v670_v37 = vadd.f32 %v1286_v41, %v602_v31 }
  0xb2   :  { %831 = vst.msk [vmem:[%s1676_s4 + $0x48] sm:$0xf] %vm812_vm2, %v766_v27  ;;  %v623_v38 = vadd.f32 %v1286_v41, %v555_v34  ;;  %v639_v39 = vadd.f32 %v1286_v41, %v571_v35 }
  0xb3   :  { %v718_v42 = vmax.f32 %v654_v36, 0.0  ;;  %v734_v43 = vmax.f32 %v670_v37, 0.0 }
  0xb4   :  { %v687_v44 = vmax.f32 %v623_v38, 0.0  ;;  %v703_v45 = vmax.f32 %v639_v39, 0.0 }
  0xb5   :  { %v782_v46 = vpack.c.bf16 %v718_v42, %v718_v42  ;;  %v798_v47 = vpack.c.bf16 %v734_v43, %v734_v43 }
  0xb6   :  { %v751_v48 = vpack.c.bf16 %v687_v44, %v687_v44  ;;  %v767_v49 = vpack.c.bf16 %v703_v45, %v703_v45  ;;  %v475_v50 = vpop.f32.mrf.mxu2  ;;  %v515_v51 = vpop.f32.mrf.mxu3 }
  0xb7   :  { %847 = vst.msk [vmem:[%s1676_s4 + $0x88] sm:$0xf] %vm812_vm2, %v782_v46  ;;  %v587_v52 = vmul.f32 %v1281_v40, %v475_v50  ;;  %v603_v53 = vmul.f32 %v1281_v40, %v515_v51  ;;  %v398_v54 = vpop.f32.mrf.mxu0  ;;  %v438_v55 = vpop.f32.mrf.mxu1 }
  0xb8   :  { %863 = vst.msk [vmem:[%s1676_s4 + $0xc8] sm:$0xf] %vm812_vm2, %v798_v47  ;;  %v556_v56 = vmul.f32 %v1281_v40, %v398_v54  ;;  %v572_v57 = vmul.f32 %v1281_v40, %v438_v55 }
  0xb9   :  { %816 = vst.msk [vmem:[%s1676_s4 + $0xc] sm:$0xf] %vm812_vm2, %v751_v48  ;;  %v655_v58 = vadd.f32 %v1286_v41, %v587_v52  ;;  %v671_v59 = vadd.f32 %v1286_v41, %v603_v53 }
  0xba   :  { %832 = vst.msk [vmem:[%s1676_s4 + $0x4c] sm:$0xf] %vm812_vm2, %v767_v49  ;;  %v624_v60 = vadd.f32 %v1286_v41, %v556_v56  ;;  %v640_v61 = vadd.f32 %v1286_v41, %v572_v57 }
  0xbb   :  { %v719_v62 = vmax.f32 %v655_v58, 0.0  ;;  %v735_v63 = vmax.f32 %v671_v59, 0.0 }
  0xbc   :  { %v688_v0 = vmax.f32 %v624_v60, 0.0  ;;  %v704_v1 = vmax.f32 %v640_v61, 0.0 }
  0xbd   :  { %v783_v2 = vpack.c.bf16 %v719_v62, %v719_v62  ;;  %v799_v3 = vpack.c.bf16 %v735_v63, %v735_v63 }
  0xbe   :  { %v752_v4 = vpack.c.bf16 %v688_v0, %v688_v0  ;;  %v768_v5 = vpack.c.bf16 %v704_v1, %v704_v1  ;;  %v478_v6 = vpop.f32.mrf.mxu2  ;;  %v518_v7 = vpop.f32.mrf.mxu3 }
  0xbf   :  { %848 = vst.msk [vmem:[%s1676_s4 + $0x8c] sm:$0xf] %vm812_vm2, %v783_v2  ;;  %v588_v8 = vmul.f32 %v1281_v40, %v478_v6  ;;  %v604_v9 = vmul.f32 %v1281_v40, %v518_v7  ;;  %v400_v10 = vpop.f32.mrf.mxu0  ;;  %v440_v11 = vpop.f32.mrf.mxu1 }
  0xc0   :  { %864 = vst.msk [vmem:[%s1676_s4 + $0xcc] sm:$0xf] %vm812_vm2, %v799_v3  ;;  %v557_v12 = vmul.f32 %v1281_v40, %v400_v10  ;;  %v573_v13 = vmul.f32 %v1281_v40, %v440_v11 }
  0xc1   :  { %817 = vst.msk [vmem:[%s1676_s4 + $0x10] sm:$0xf] %vm812_vm2, %v752_v4  ;;  %v656_v14 = vadd.f32 %v1286_v41, %v588_v8  ;;  %v672_v15 = vadd.f32 %v1286_v41, %v604_v9 }
  0xc2   :  { %833 = vst.msk [vmem:[%s1676_s4 + $0x50] sm:$0xf] %vm812_vm2, %v768_v5  ;;  %v625_v16 = vadd.f32 %v1286_v41, %v557_v12  ;;  %v641_v17 = vadd.f32 %v1286_v41, %v573_v13 }
  0xc3   :  { %v720_v18 = vmax.f32 %v656_v14, 0.0  ;;  %v736_v19 = vmax.f32 %v672_v15, 0.0 }
  0xc4   :  { %v689_v20 = vmax.f32 %v625_v16, 0.0  ;;  %v705_v21 = vmax.f32 %v641_v17, 0.0 }
  0xc5   :  { %v784_v22 = vpack.c.bf16 %v720_v18, %v720_v18  ;;  %v800_v23 = vpack.c.bf16 %v736_v19, %v736_v19 }
  0xc6   :  { %v753_v24 = vpack.c.bf16 %v689_v20, %v689_v20  ;;  %v769_v25 = vpack.c.bf16 %v705_v21, %v705_v21  ;;  %v480_v26 = vpop.f32.mrf.mxu2  ;;  %v520_v27 = vpop.f32.mrf.mxu3 }
  0xc7   :  { %849 = vst.msk [vmem:[%s1676_s4 + $0x90] sm:$0xf] %vm812_vm2, %v784_v22  ;;  %v589_v28 = vmul.f32 %v1281_v40, %v480_v26  ;;  %v605_v29 = vmul.f32 %v1281_v40, %v520_v27  ;;  %v403_v30 = vpop.f32.mrf.mxu0  ;;  %v443_v31 = vpop.f32.mrf.mxu1 }
  0xc8   :  { %865 = vst.msk [vmem:[%s1676_s4 + $0xd0] sm:$0xf] %vm812_vm2, %v800_v23  ;;  %v558_v32 = vmul.f32 %v1281_v40, %v403_v30  ;;  %v574_v33 = vmul.f32 %v1281_v40, %v443_v31 }
  0xc9   :  { %818 = vst.msk [vmem:[%s1676_s4 + $0x14] sm:$0xf] %vm812_vm2, %v753_v24  ;;  %v657_v34 = vadd.f32 %v1286_v41, %v589_v28  ;;  %v673_v35 = vadd.f32 %v1286_v41, %v605_v29 }
  0xca   :  { %834 = vst.msk [vmem:[%s1676_s4 + $0x54] sm:$0xf] %vm812_vm2, %v769_v25  ;;  %v626_v36 = vadd.f32 %v1286_v41, %v558_v32  ;;  %v642_v37 = vadd.f32 %v1286_v41, %v574_v33 }
  0xcb   :  { %v721_v38 = vmax.f32 %v657_v34, 0.0  ;;  %v737_v39 = vmax.f32 %v673_v35, 0.0 }
  0xcc   :  { %v690_v42 = vmax.f32 %v626_v36, 0.0  ;;  %v706_v43 = vmax.f32 %v642_v37, 0.0 }
  0xcd   :  { %v785_v44 = vpack.c.bf16 %v721_v38, %v721_v38  ;;  %v801_v45 = vpack.c.bf16 %v737_v39, %v737_v39 }
  0xce   :  { %v754_v46 = vpack.c.bf16 %v690_v42, %v690_v42  ;;  %v770_v47 = vpack.c.bf16 %v706_v43, %v706_v43  ;;  %v483_v48 = vpop.f32.mrf.mxu2  ;;  %v523_v49 = vpop.f32.mrf.mxu3 }
  0xcf   :  { %850 = vst.msk [vmem:[%s1676_s4 + $0x94] sm:$0xf] %vm812_vm2, %v785_v44  ;;  %v590_v50 = vmul.f32 %v1281_v40, %v483_v48  ;;  %v606_v51 = vmul.f32 %v1281_v40, %v523_v49  ;;  %v405_v52 = vpop.f32.mrf.mxu0  ;;  %v445_v53 = vpop.f32.mrf.mxu1 }
  0xd0   :  { %866 = vst.msk [vmem:[%s1676_s4 + $0xd4] sm:$0xf] %vm812_vm2, %v801_v45  ;;  %v559_v54 = vmul.f32 %v1281_v40, %v405_v52  ;;  %v575_v55 = vmul.f32 %v1281_v40, %v445_v53 }
  0xd1   :  { %819 = vst.msk [vmem:[%s1676_s4 + $0x18] sm:$0xf] %vm812_vm2, %v754_v46  ;;  %v658_v56 = vadd.f32 %v1286_v41, %v590_v50  ;;  %v674_v57 = vadd.f32 %v1286_v41, %v606_v51 }
  0xd2   :  { %835 = vst.msk [vmem:[%s1676_s4 + $0x58] sm:$0xf] %vm812_vm2, %v770_v47  ;;  %v627_v58 = vadd.f32 %v1286_v41, %v559_v54  ;;  %v643_v59 = vadd.f32 %v1286_v41, %v575_v55 }
  0xd3   :  { %v722_v60 = vmax.f32 %v658_v56, 0.0  ;;  %v738_v61 = vmax.f32 %v674_v57, 0.0 }
  0xd4   :  { %v691_v62 = vmax.f32 %v627_v58, 0.0  ;;  %v707_v63 = vmax.f32 %v643_v59, 0.0 }
  0xd5   :  { %v786_v0 = vpack.c.bf16 %v722_v60, %v722_v60  ;;  %v802_v1 = vpack.c.bf16 %v738_v61, %v738_v61 }
  0xd6   :  { %v755_v2 = vpack.c.bf16 %v691_v62, %v691_v62  ;;  %v771_v3 = vpack.c.bf16 %v707_v63, %v707_v63  ;;  %v485_v4 = vpop.f32.mrf.mxu2  ;;  %v525_v5 = vpop.f32.mrf.mxu3 }
  0xd7   :  { %851 = vst.msk [vmem:[%s1676_s4 + $0x98] sm:$0xf] %vm812_vm2, %v786_v0  ;;  %v591_v6 = vmul.f32 %v1281_v40, %v485_v4  ;;  %v607_v7 = vmul.f32 %v1281_v40, %v525_v5  ;;  %v408_v8 = vpop.f32.mrf.mxu0  ;;  %v448_v9 = vpop.f32.mrf.mxu1 }
  0xd8   :  { %867 = vst.msk [vmem:[%s1676_s4 + $0xd8] sm:$0xf] %vm812_vm2, %v802_v1  ;;  %v560_v10 = vmul.f32 %v1281_v40, %v408_v8  ;;  %v576_v11 = vmul.f32 %v1281_v40, %v448_v9 }
  0xd9   :  { %820 = vst.msk [vmem:[%s1676_s4 + $0x1c] sm:$0xf] %vm812_vm2, %v755_v2  ;;  %v659_v12 = vadd.f32 %v1286_v41, %v591_v6  ;;  %v675_v13 = vadd.f32 %v1286_v41, %v607_v7 }
  0xda   :  { %836 = vst.msk [vmem:[%s1676_s4 + $0x5c] sm:$0xf] %vm812_vm2, %v771_v3  ;;  %v628_v14 = vadd.f32 %v1286_v41, %v560_v10  ;;  %v644_v15 = vadd.f32 %v1286_v41, %v576_v11 }
  0xdb   :  { %v723_v16 = vmax.f32 %v659_v12, 0.0  ;;  %v739_v17 = vmax.f32 %v675_v13, 0.0 }
  0xdc   :  { %v692_v18 = vmax.f32 %v628_v14, 0.0  ;;  %v708_v19 = vmax.f32 %v644_v15, 0.0 }
  0xdd   :  { %v787_v20 = vpack.c.bf16 %v723_v16, %v723_v16  ;;  %v803_v21 = vpack.c.bf16 %v739_v17, %v739_v17 }
  0xde   :  { %v756_v22 = vpack.c.bf16 %v692_v18, %v692_v18  ;;  %v772_v23 = vpack.c.bf16 %v708_v19, %v708_v19  ;;  %v488_v24 = vpop.f32.mrf.mxu2  ;;  %v528_v25 = vpop.f32.mrf.mxu3 }
  0xdf   :  { %852 = vst.msk [vmem:[%s1676_s4 + $0x9c] sm:$0xf] %vm812_vm2, %v787_v20  ;;  %v592_v26 = vmul.f32 %v1281_v40, %v488_v24  ;;  %v608_v27 = vmul.f32 %v1281_v40, %v528_v25  ;;  %v410_v28 = vpop.f32.mrf.mxu0  ;;  %v450_v29 = vpop.f32.mrf.mxu1 }
  0xe0   :  { %868 = vst.msk [vmem:[%s1676_s4 + $0xdc] sm:$0xf] %vm812_vm2, %v803_v21  ;;  %v561_v30 = vmul.f32 %v1281_v40, %v410_v28  ;;  %v577_v31 = vmul.f32 %v1281_v40, %v450_v29 }
  0xe1   :  { %821 = vst.msk [vmem:[%s1676_s4 + $0x20] sm:$0xf] %vm812_vm2, %v756_v22  ;;  %v660_v32 = vadd.f32 %v1286_v41, %v592_v26  ;;  %v676_v33 = vadd.f32 %v1286_v41, %v608_v27 }
  0xe2   :  { %837 = vst.msk [vmem:[%s1676_s4 + $0x60] sm:$0xf] %vm812_vm2, %v772_v23  ;;  %v629_v34 = vadd.f32 %v1286_v41, %v561_v30  ;;  %v645_v35 = vadd.f32 %v1286_v41, %v577_v31 }
  0xe3   :  { %v724_v36 = vmax.f32 %v660_v32, 0.0  ;;  %v740_v37 = vmax.f32 %v676_v33, 0.0 }
  0xe4   :  { %v693_v38 = vmax.f32 %v629_v34, 0.0  ;;  %v709_v39 = vmax.f32 %v645_v35, 0.0 }
  0xe5   :  { %v788_v42 = vpack.c.bf16 %v724_v36, %v724_v36  ;;  %v804_v43 = vpack.c.bf16 %v740_v37, %v740_v37 }
  0xe6   :  { %v757_v44 = vpack.c.bf16 %v693_v38, %v693_v38  ;;  %v773_v45 = vpack.c.bf16 %v709_v39, %v709_v39  ;;  %v490_v46 = vpop.f32.mrf.mxu2  ;;  %v530_v47 = vpop.f32.mrf.mxu3 }
  0xe7   :  { %853 = vst.msk [vmem:[%s1676_s4 + $0xa0] sm:$0xf] %vm812_vm2, %v788_v42  ;;  %v593_v48 = vmul.f32 %v1281_v40, %v490_v46  ;;  %v609_v49 = vmul.f32 %v1281_v40, %v530_v47  ;;  %v413_v50 = vpop.f32.mrf.mxu0  ;;  %v453_v51 = vpop.f32.mrf.mxu1 }
  0xe8   :  { %869 = vst.msk [vmem:[%s1676_s4 + $0xe0] sm:$0xf] %vm812_vm2, %v804_v43  ;;  %v562_v52 = vmul.f32 %v1281_v40, %v413_v50  ;;  %v578_v53 = vmul.f32 %v1281_v40, %v453_v51 }
  0xe9   :  { %822 = vst.msk [vmem:[%s1676_s4 + $0x24] sm:$0xf] %vm812_vm2, %v757_v44  ;;  %v661_v54 = vadd.f32 %v1286_v41, %v593_v48  ;;  %v677_v55 = vadd.f32 %v1286_v41, %v609_v49 }
  0xea   :  { %838 = vst.msk [vmem:[%s1676_s4 + $0x64] sm:$0xf] %vm812_vm2, %v773_v45  ;;  %v630_v56 = vadd.f32 %v1286_v41, %v562_v52  ;;  %v646_v57 = vadd.f32 %v1286_v41, %v578_v53 }
  0xeb   :  { %v725_v58 = vmax.f32 %v661_v54, 0.0  ;;  %v741_v59 = vmax.f32 %v677_v55, 0.0 }
  0xec   :  { %v694_v60 = vmax.f32 %v630_v56, 0.0  ;;  %v710_v61 = vmax.f32 %v646_v57, 0.0 }
  0xed   :  { %v789_v62 = vpack.c.bf16 %v725_v58, %v725_v58  ;;  %v805_v63 = vpack.c.bf16 %v741_v59, %v741_v59 }
  0xee   :  { %v758_v0 = vpack.c.bf16 %v694_v60, %v694_v60  ;;  %v774_v1 = vpack.c.bf16 %v710_v61, %v710_v61  ;;  %v493_v2 = vpop.f32.mrf.mxu2  ;;  %v533_v3 = vpop.f32.mrf.mxu3 }
  0xef   :  { %854 = vst.msk [vmem:[%s1676_s4 + $0xa4] sm:$0xf] %vm812_vm2, %v789_v62  ;;  %v594_v4 = vmul.f32 %v1281_v40, %v493_v2  ;;  %v610_v5 = vmul.f32 %v1281_v40, %v533_v3  ;;  %v415_v6 = vpop.f32.mrf.mxu0  ;;  %v455_v7 = vpop.f32.mrf.mxu1 }
  0xf0   :  { %870 = vst.msk [vmem:[%s1676_s4 + $0xe4] sm:$0xf] %vm812_vm2, %v805_v63  ;;  %v563_v8 = vmul.f32 %v1281_v40, %v415_v6  ;;  %v579_v9 = vmul.f32 %v1281_v40, %v455_v7 }
  0xf1   :  { %823 = vst.msk [vmem:[%s1676_s4 + $0x28] sm:$0xf] %vm812_vm2, %v758_v0  ;;  %v662_v10 = vadd.f32 %v1286_v41, %v594_v4  ;;  %v678_v11 = vadd.f32 %v1286_v41, %v610_v5 }
  0xf2   :  { %839 = vst.msk [vmem:[%s1676_s4 + $0x68] sm:$0xf] %vm812_vm2, %v774_v1  ;;  %v631_v12 = vadd.f32 %v1286_v41, %v563_v8  ;;  %v647_v13 = vadd.f32 %v1286_v41, %v579_v9 }
  0xf3   :  { %v726_v14 = vmax.f32 %v662_v10, 0.0  ;;  %v742_v15 = vmax.f32 %v678_v11, 0.0 }
  0xf4   :  { %v695_v16 = vmax.f32 %v631_v12, 0.0  ;;  %v711_v17 = vmax.f32 %v647_v13, 0.0 }
  0xf5   :  { %v790_v18 = vpack.c.bf16 %v726_v14, %v726_v14  ;;  %v806_v19 = vpack.c.bf16 %v742_v15, %v742_v15 }
  0xf6   :  { %v759_v20 = vpack.c.bf16 %v695_v16, %v695_v16  ;;  %v775_v21 = vpack.c.bf16 %v711_v17, %v711_v17  ;;  %v495_v22 = vpop.f32.mrf.mxu2  ;;  %v535_v23 = vpop.f32.mrf.mxu3 }
  0xf7   :  { %855 = vst.msk [vmem:[%s1676_s4 + $0xa8] sm:$0xf] %vm812_vm2, %v790_v18  ;;  %v595_v24 = vmul.f32 %v1281_v40, %v495_v22  ;;  %v611_v25 = vmul.f32 %v1281_v40, %v535_v23  ;;  %v418_v26 = vpop.f32.mrf.mxu0  ;;  %v458_v27 = vpop.f32.mrf.mxu1 }
  0xf8   :  { %871 = vst.msk [vmem:[%s1676_s4 + $0xe8] sm:$0xf] %vm812_vm2, %v806_v19  ;;  %v564_v28 = vmul.f32 %v1281_v40, %v418_v26  ;;  %v580_v29 = vmul.f32 %v1281_v40, %v458_v27 }
  0xf9   :  { %824 = vst.msk [vmem:[%s1676_s4 + $0x2c] sm:$0xf] %vm812_vm2, %v759_v20  ;;  %v663_v30 = vadd.f32 %v1286_v41, %v595_v24  ;;  %v679_v31 = vadd.f32 %v1286_v41, %v611_v25 }
  0xfa   :  { %840 = vst.msk [vmem:[%s1676_s4 + $0x6c] sm:$0xf] %vm812_vm2, %v775_v21  ;;  %v632_v32 = vadd.f32 %v1286_v41, %v564_v28  ;;  %v648_v33 = vadd.f32 %v1286_v41, %v580_v29 }
  0xfb   :  { %v727_v34 = vmax.f32 %v663_v30, 0.0  ;;  %v743_v35 = vmax.f32 %v679_v31, 0.0 }
  0xfc   :  { %v696_v36 = vmax.f32 %v632_v32, 0.0  ;;  %v712_v37 = vmax.f32 %v648_v33, 0.0 }
  0xfd   :  { %v791_v38 = vpack.c.bf16 %v727_v34, %v727_v34  ;;  %v807_v39 = vpack.c.bf16 %v743_v35, %v743_v35 }
  0xfe   :  { %v760_v42 = vpack.c.bf16 %v696_v36, %v696_v36  ;;  %v776_v43 = vpack.c.bf16 %v712_v37, %v712_v37  ;;  %v498_v44 = vpop.f32.mrf.mxu2  ;;  %v538_v45 = vpop.f32.mrf.mxu3 }
  0xff   :  { %856 = vst.msk [vmem:[%s1676_s4 + $0xac] sm:$0xf] %vm812_vm2, %v791_v38  ;;  %v596_v46 = vmul.f32 %v1281_v40, %v498_v44  ;;  %v612_v47 = vmul.f32 %v1281_v40, %v538_v45  ;;  %v420_v48 = vpop.f32.mrf.mxu0  ;;  %v460_v49 = vpop.f32.mrf.mxu1 }
 0x100   :  { %872 = vst.msk [vmem:[%s1676_s4 + $0xec] sm:$0xf] %vm812_vm2, %v807_v39  ;;  %v565_v50 = vmul.f32 %v1281_v40, %v420_v48  ;;  %v581_v51 = vmul.f32 %v1281_v40, %v460_v49 }
 0x101   :  { %825 = vst.msk [vmem:[%s1676_s4 + $0x30] sm:$0xf] %vm812_vm2, %v760_v42  ;;  %v664_v52 = vadd.f32 %v1286_v41, %v596_v46  ;;  %v680_v53 = vadd.f32 %v1286_v41, %v612_v47 }
 0x102   :  { %841 = vst.msk [vmem:[%s1676_s4 + $0x70] sm:$0xf] %vm812_vm2, %v776_v43  ;;  %v633_v54 = vadd.f32 %v1286_v41, %v565_v50  ;;  %v649_v55 = vadd.f32 %v1286_v41, %v581_v51 }
 0x103   :  { %v728_v56 = vmax.f32 %v664_v52, 0.0  ;;  %v744_v57 = vmax.f32 %v680_v53, 0.0 }
 0x104   :  { %v697_v58 = vmax.f32 %v633_v54, 0.0  ;;  %v713_v59 = vmax.f32 %v649_v55, 0.0 }
 0x105   :  { %v792_v60 = vpack.c.bf16 %v728_v56, %v728_v56  ;;  %v808_v61 = vpack.c.bf16 %v744_v57, %v744_v57 }
 0x106   :  { %v761_v62 = vpack.c.bf16 %v697_v58, %v697_v58  ;;  %v777_v63 = vpack.c.bf16 %v713_v59, %v713_v59  ;;  %v500_v0 = vpop.f32.mrf.mxu2  ;;  %v540_v1 = vpop.f32.mrf.mxu3 }
 0x107   :  { %857 = vst.msk [vmem:[%s1676_s4 + $0xb0] sm:$0xf] %vm812_vm2, %v792_v60  ;;  %v597_v2 = vmul.f32 %v1281_v40, %v500_v0  ;;  %v613_v3 = vmul.f32 %v1281_v40, %v540_v1  ;;  %v423_v4 = vpop.f32.mrf.mxu0  ;;  %v463_v5 = vpop.f32.mrf.mxu1 }
 0x108   :  { %873 = vst.msk [vmem:[%s1676_s4 + $0xf0] sm:$0xf] %vm812_vm2, %v808_v61  ;;  %v566_v6 = vmul.f32 %v1281_v40, %v423_v4  ;;  %v582_v7 = vmul.f32 %v1281_v40, %v463_v5 }
 0x109   :  { %826 = vst.msk [vmem:[%s1676_s4 + $0x34] sm:$0xf] %vm812_vm2, %v761_v62  ;;  %v665_v8 = vadd.f32 %v1286_v41, %v597_v2  ;;  %v681_v9 = vadd.f32 %v1286_v41, %v613_v3 }
 0x10a   :  { %842 = vst.msk [vmem:[%s1676_s4 + $0x74] sm:$0xf] %vm812_vm2, %v777_v63  ;;  %v634_v10 = vadd.f32 %v1286_v41, %v566_v6  ;;  %v650_v11 = vadd.f32 %v1286_v41, %v582_v7 }
 0x10b   :  { %v729_v12 = vmax.f32 %v665_v8, 0.0  ;;  %v745_v13 = vmax.f32 %v681_v9, 0.0 }
 0x10c   :  { %v698_v14 = vmax.f32 %v634_v10, 0.0  ;;  %v714_v15 = vmax.f32 %v650_v11, 0.0 }
 0x10d   :  { %v793_v16 = vpack.c.bf16 %v729_v12, %v729_v12  ;;  %v809_v17 = vpack.c.bf16 %v745_v13, %v745_v13 }
 0x10e   :  { %v762_v18 = vpack.c.bf16 %v698_v14, %v698_v14  ;;  %v778_v19 = vpack.c.bf16 %v714_v15, %v714_v15  ;;  %v503_v20 = vpop.f32.mrf.mxu2  ;;  %v543_v21 = vpop.f32.mrf.mxu3 }
 0x10f   :  { %858 = vst.msk [vmem:[%s1676_s4 + $0xb4] sm:$0xf] %vm812_vm2, %v793_v16  ;;  %v598_v22 = vmul.f32 %v1281_v40, %v503_v20  ;;  %v614_v23 = vmul.f32 %v1281_v40, %v543_v21  ;;  %v425_v24 = vpop.f32.mrf.mxu0  ;;  %v465_v25 = vpop.f32.mrf.mxu1 }
 0x110   :  { %874 = vst.msk [vmem:[%s1676_s4 + $0xf4] sm:$0xf] %vm812_vm2, %v809_v17  ;;  %v567_v26 = vmul.f32 %v1281_v40, %v425_v24  ;;  %v583_v27 = vmul.f32 %v1281_v40, %v465_v25 }
 0x111   :  { %827 = vst.msk [vmem:[%s1676_s4 + $0x38] sm:$0xf] %vm812_vm2, %v762_v18  ;;  %v666_v28 = vadd.f32 %v1286_v41, %v598_v22  ;;  %v682_v29 = vadd.f32 %v1286_v41, %v614_v23 }
 0x112   :  { %843 = vst.msk [vmem:[%s1676_s4 + $0x78] sm:$0xf] %vm812_vm2, %v778_v19  ;;  %v635_v30 = vadd.f32 %v1286_v41, %v567_v26  ;;  %v651_v31 = vadd.f32 %v1286_v41, %v583_v27 }
 0x113   :  { %v730_v32 = vmax.f32 %v666_v28, 0.0  ;;  %v746_v33 = vmax.f32 %v682_v29, 0.0 }
 0x114   :  { %v699_v34 = vmax.f32 %v635_v30, 0.0  ;;  %v715_v35 = vmax.f32 %v651_v31, 0.0 }
 0x115   :  { %v794_v36 = vpack.c.bf16 %v730_v32, %v730_v32  ;;  %v810_v37 = vpack.c.bf16 %v746_v33, %v746_v33 }
 0x116   :  { %v763_v38 = vpack.c.bf16 %v699_v34, %v699_v34  ;;  %v779_v39 = vpack.c.bf16 %v715_v35, %v715_v35  ;;  %v505_v42 = vpop.f32.mrf.mxu2  ;;  %v545_v43 = vpop.f32.mrf.mxu3 }
 0x117   :  { %859 = vst.msk [vmem:[%s1676_s4 + $0xb8] sm:$0xf] %vm812_vm2, %v794_v36  ;;  %v599_v44 = vmul.f32 %v1281_v40, %v505_v42  ;;  %v615_v45 = vmul.f32 %v1281_v40, %v545_v43 }
 0x118   :  { %875 = vst.msk [vmem:[%s1676_s4 + $0xf8] sm:$0xf] %vm812_vm2, %v810_v37 }
 0x119   :  { %828 = vst.msk [vmem:[%s1676_s4 + $0x3c] sm:$0xf] %vm812_vm2, %v763_v38  ;;  %v667_v46 = vadd.f32 %v1286_v41, %v599_v44  ;;  %v683_v47 = vadd.f32 %v1286_v41, %v615_v45 }
 0x11a   :  { %844 = vst.msk [vmem:[%s1676_s4 + $0x7c] sm:$0xf] %vm812_vm2, %v779_v39 }
 0x11b   :  { %v731_v40 = vmax.f32 %v667_v46, 0.0  ;;  %v747_v48 = vmax.f32 %v683_v47, 0.0 }
 0x11d   :  { %v795_v49 = vpack.c.bf16 %v731_v40, %v731_v40  ;;  %v811_v50 = vpack.c.bf16 %v747_v48, %v747_v48 }
 0x11f   :  { %860 = vst.msk [vmem:[%s1676_s4 + $0xbc] sm:$0xf] %vm812_vm2, %v795_v49 }
 0x120   :  { %876 = vst.msk [vmem:[%s1676_s4 + $0xfc] sm:$0xf] %vm812_vm2, %v811_v50 }

// kernel: horseshoe_forward.16
= control target key start
LH: loop header
LB: loop body
LE: loop exit
PB: predicated region body
PF: predicated region fallthrough
CT: control target
= control target key end

     0   :  { %vm387_vm0 = vcmask 60416   ;;  %vm436_vm4 = vcmask 58368   ;;  %s1341_s0 = inlined_call_operand.vmem [shape: bf16[16,8,8], index: 0, kind: input, shape index: {}]   ;;  %s1342_s1 = inlined_call_operand.vmem [shape: bf16[16,8,8], index: 1, kind: input, shape index: {}]   ;;  %s1343_s2 = inlined_call_operand.vmem [shape: bf16[16,8,8], index: 2, kind: input, shape index: {}]   ;;  %s1344_s3 = inlined_call_operand.vmem [shape: bf16[16,8,8], index: 3, kind: input, shape index: {}]   ;;  %s1345_s4 = inlined_call_operand.vmem [shape: bf16[16,8,8], index: 4, kind: output, shape index: {0}]   ;;  %s1346_s5 = inlined_call_operand.vmem [shape: s8[16,8,8], index: 5, kind: output, shape index: {1}]  }
   0x1   :  { %v652_v0 = vld [vmem:[%s1341_s0] sm:$0xff]   ;;  %v674_v8 = vld [vmem:[%s1341_s0 + $0x8] sm:$0xff]   ;;  %v709_v24 = vld [vmem:[%s1341_s0 + $0x10] sm:$0xff]  }
   0x2   :  { %v657_v1 = vld [vmem:[%s1342_s1] sm:$0xff]   ;;  %v463_v3 = vunpack.c.l.bf16 %v652_v0  ;;  %v464_v7 = vunpack.c.h.bf16 %v652_v0  ;;  %v679_v9 = vld [vmem:[%s1342_s1 + $0x8] sm:$0xff]   ;;  %v467_v17 = vunpack.c.l.bf16 %v674_v8  ;;  %v714_v25 = vld [vmem:[%s1342_s1 + $0x10] sm:$0xff]   ;;  %v1374_v28 = vunpack.c.h.bf16 %v674_v8 }
   0x3   :  { %v662_v2 = vld [vmem:[%s1343_s2] sm:$0xff]   ;;  %v495_v4 = vunpack.c.l.bf16 %v657_v1  ;;  %v496_v11 = vunpack.c.h.bf16 %v657_v1  ;;  %v686_v14 = vld [vmem:[%s1343_s2 + $0x8] sm:$0xff]   ;;  %v499_v18 = vunpack.c.l.bf16 %v679_v9  ;;  %v719_v26 = vld [vmem:[%s1343_s2 + $0x10] sm:$0xff]   ;;  %v500_v29 = vunpack.c.h.bf16 %v679_v9 }
   0x4   :  { %v527_v5 = vunpack.c.l.bf16 %v662_v2  ;;  %v558_v6 = vld [vmem:[%s1344_s3] sm:$0xff]   ;;  %v528_v12 = vunpack.c.h.bf16 %v662_v2  ;;  %v610_v15 = vld [vmem:[%s1344_s3 + $0x8] sm:$0xff]   ;;  %v531_v19 = vunpack.c.l.bf16 %v686_v14  ;;  %v1375_v30 = vunpack.c.h.bf16 %v686_v14  ;;  %v611_v35 = vld [vmem:[%s1344_s3 + $0x10] sm:$0xff]  }
   0x5   :  { %v559_v10 = vunpack.c.l.bf16 %v558_v6  ;;  %v560_v13 = vunpack.c.h.bf16 %v558_v6  ;;  %v115_v16 = vmax.f32 %v463_v3, %v495_v4  ;;  %v116_v21 = vmax.f32 %v464_v7, %v496_v11  ;;  %v751_v48 = vld [vmem:[%s1341_s0 + $0x18] sm:$0xff]  }
   0x6   :  { %v563_v23 = vunpack.c.l.bf16 %v610_v15  ;;  %v117_v27 = vmax.f32 %v467_v17, %v499_v18  ;;  %v564_v34 = vunpack.c.h.bf16 %v610_v15  ;;  %v118_v36 = vmax.f32 %v1374_v28, %v500_v29  ;;  %v756_v49 = vld [vmem:[%s1342_s1 + $0x18] sm:$0xff]  }
   0x7   :  { %v179_v20 = vmax.f32 %v527_v5, %v559_v10  ;;  %v180_v22 = vmax.f32 %v528_v12, %v560_v13  ;;  %v1370_v37 = vunpack.c.l.bf16 %v709_v24  ;;  %v1372_v38 = vunpack.c.l.bf16 %v714_v25  ;;  %v769_v54 = vld [vmem:[%s1343_s2 + $0x18] sm:$0xff]  }
   0x8   :  { %v181_v33 = vmax.f32 %v531_v19, %v563_v23  ;;  %v1371_v39 = vunpack.c.l.bf16 %v719_v26  ;;  %v182_v43 = vmax.f32 %v1375_v30, %v564_v34  ;;  %v567_v44 = vunpack.c.l.bf16 %v611_v35  ;;  %v612_v55 = vld [vmem:[%s1344_s3 + $0x18] sm:$0xff]  }
   0x9   :  { %v243_v31 = vmax.f32 %v115_v16, %v179_v20  ;;  %v244_v32 = vmax.f32 %v116_v21, %v180_v22  ;;  %v119_v45 = vmax.f32 %v1370_v37, %v1372_v38  ;;  %v1361_v46 = vunpack.c.h.bf16 %v709_v24  ;;  %v799_v16 = vld [vmem:[%s1341_s0 + $0x20] sm:$0xff]  }
   0xa   :  { %v245_v42 = vmax.f32 %v117_v27, %v181_v33  ;;  %v1369_v47 = vunpack.c.h.bf16 %v714_v25  ;;  %v246_v53 = vmax.f32 %v118_v36, %v182_v43  ;;  %v183_v56 = vmax.f32 %v1371_v39, %v567_v44  ;;  %v804_v20 = vld [vmem:[%s1342_s1 + $0x20] sm:$0xff]  }
   0xb   :  { %v259_v40 = vpack.c.bf16 %v243_v31, %v243_v31  ;;  %v260_v41 = vpack.c.bf16 %v244_v32, %v244_v32  ;;  %v1362_v57 = vunpack.c.h.bf16 %v719_v26  ;;  %v568_v58 = vunpack.c.h.bf16 %v611_v35  ;;  %v821_v31 = vld [vmem:[%s1343_s2 + $0x20] sm:$0xff]  }
   0xc   :  { %v261_v52 = vpack.c.bf16 %v245_v42, %v245_v42  ;;  %v120_v59 = vmax.f32 %v1361_v46, %v1369_v47  ;;  %v262_v61 = vpack.c.bf16 %v246_v53, %v246_v53  ;;  %v1358_v62 = vunpack.c.l.bf16 %v751_v48  ;;  %v613_v36 = vld [vmem:[%s1344_s3 + $0x20] sm:$0xff]  }
   0xd   :  { %v758_v50 = vunpack.c.l.bf16 %v259_v40  ;;  %388 = vst.msk [vmem:[%s1345_s4] sm:$0xf] %vm387_vm0, %v259_v40  ;;  %v764_v51 = vunpack.c.l.bf16 %v260_v41  ;;  %v1360_v63 = vunpack.c.l.bf16 %v756_v49  ;;  %v247_v6 = vmax.f32 %v119_v45, %v183_v56 }
   0xe   :  { %389 = vst.msk [vmem:[%s1345_s4 + $0x4] sm:$0xf] %vm387_vm0, %v260_v41  ;;  %v785_v60 = vunpack.c.l.bf16 %v261_v52  ;;  %v184_v10 = vmax.f32 %v1362_v57, %v568_v58  ;;  %v1359_v13 = vunpack.c.l.bf16 %v769_v54  ;;  %v571_v15 = vunpack.c.l.bf16 %v612_v55 }
   0xf   :  { %390 = vst.msk [vmem:[%s1345_s4 + $0x8] sm:$0xf] %vm387_vm0, %v261_v52  ;;  %v806_v21 = vunpack.c.l.bf16 %v262_v61  ;;  %v121_v22 = vmax.f32 %v1358_v62, %v1360_v63  ;;  %v1349_v23 = vunpack.c.h.bf16 %v751_v48  ;;  %v1352_v27 = vunpack.c.h.bf16 %v756_v49  ;;  %v615_v62 = vld [vmem:[%s1344_s3 + $0x30] sm:$0xff]  }
  0x10   :  { %391 = vst.msk [vmem:[%s1345_s4 + $0xc] sm:$0xf] %vm387_vm0, %v262_v61  ;;  %v263_v32 = vpack.c.bf16 %v247_v6, %v247_v6  ;;  %v248_v33 = vmax.f32 %v120_v59, %v184_v10  ;;  %v185_v34 = vmax.f32 %v1359_v13, %v571_v15  ;;  %v1350_v35 = vunpack.c.h.bf16 %v769_v54  ;;  %v857_v6 = vld [vmem:[%s1342_s1 + $0x28] sm:$0xff]  }
  0x11   :  { %v572_v40 = vunpack.c.h.bf16 %v612_v55  ;;  %v122_v41 = vmax.f32 %v1349_v23, %v1352_v27  ;;  %v1347_v42 = vunpack.c.l.bf16 %v799_v16  ;;  %v1348_v43 = vunpack.c.l.bf16 %v804_v20  ;;  %v845_v55 = vld [vmem:[%s1341_s0 + $0x28] sm:$0xff]   ;;  %v895_v27 = vld [vmem:[%s1341_s0 + $0x30] sm:$0xff]  }
  0x12   :  { %v835_v44 = vunpack.c.l.bf16 %v263_v32  ;;  %392 = vst.msk [vmem:[%s1345_s4 + $0x10] sm:$0xf] %vm387_vm0, %v263_v32  ;;  %v264_v45 = vpack.c.bf16 %v248_v33, %v248_v33  ;;  %v249_v52 = vmax.f32 %v121_v22, %v185_v34  ;;  %v1351_v53 = vunpack.c.l.bf16 %v821_v31  ;;  %v862_v10 = vld [vmem:[%s1343_s2 + $0x28] sm:$0xff]  }
  0x13   :  { %v186_v56 = vmax.f32 %v1350_v35, %v572_v40  ;;  %v575_v58 = vunpack.c.l.bf16 %v613_v36  ;;  %v123_v59 = vmax.f32 %v1347_v42, %v1348_v43  ;;  %v1353_v61 = vunpack.c.h.bf16 %v799_v16  ;;  %v614_v34 = vld [vmem:[%s1344_s3 + $0x28] sm:$0xff]  }
  0x14   :  { %v864_v15 = vunpack.c.l.bf16 %v264_v45  ;;  %393 = vst.msk [vmem:[%s1345_s4 + $0x14] sm:$0xf] %vm387_vm0, %v264_v45  ;;  %v265_v22 = vpack.c.bf16 %v249_v52, %v249_v52  ;;  %v1355_v32 = vunpack.c.h.bf16 %v804_v20  ;;  %v1354_v33 = vunpack.c.h.bf16 %v821_v31 }
  0x15   :  { %v250_v40 = vmax.f32 %v122_v41, %v186_v56  ;;  %v187_v42 = vmax.f32 %v1351_v53, %v575_v58  ;;  %v576_v43 = vunpack.c.h.bf16 %v613_v36  ;;  %v1356_v23 = vunpack.c.l.bf16 %v845_v55 }
  0x16   :  { %v878_v35 = vunpack.c.l.bf16 %v265_v22  ;;  %394 = vst.msk [vmem:[%s1345_s4 + $0x18] sm:$0xf] %vm387_vm0, %v265_v22  ;;  %v124_v45 = vmax.f32 %v1353_v61, %v1355_v32  ;;  %v1357_v41 = vunpack.c.l.bf16 %v857_v6  ;;  %v1368_v52 = vunpack.c.l.bf16 %v862_v10  ;;  %v900_v22 = vld [vmem:[%s1342_s1 + $0x30] sm:$0xff]  }
  0x17   :  { %v266_v56 = vpack.c.bf16 %v250_v40, %v250_v40  ;;  %v251_v36 = vmax.f32 %v123_v59, %v187_v42  ;;  %v188_v58 = vmax.f32 %v1354_v33, %v576_v43  ;;  %v579_v53 = vunpack.c.l.bf16 %v614_v34  ;;  %v912_v61 = vld [vmem:[%s1343_s2 + $0x30] sm:$0xff]  }
  0x18   :  { %v125_v40 = vmax.f32 %v1356_v23, %v1357_v41  ;;  %v1363_v42 = vunpack.c.h.bf16 %v845_v55  ;;  %v1364_v43 = vunpack.c.h.bf16 %v857_v6  ;;  %v1367_v59 = vunpack.c.h.bf16 %v862_v10 }
  0x19   :  { %v914_v33 = vunpack.c.l.bf16 %v266_v56  ;;  %395 = vst.msk [vmem:[%s1345_s4 + $0x1c] sm:$0xf] %vm387_vm0, %v266_v56  ;;  %v267_v32 = vpack.c.bf16 %v251_v36, %v251_v36  ;;  %v252_v23 = vmax.f32 %v124_v45, %v188_v58  ;;  %v189_v41 = vmax.f32 %v1368_v52, %v579_v53  ;;  %v941_v36 = vld [vmem:[%s1341_s0 + $0x38] sm:$0xff]  }
  0x1a   :  { %v580_v13 = vunpack.c.h.bf16 %v614_v34  ;;  %v126_v63 = vmax.f32 %v1363_v42, %v1364_v43  ;;  %v1365_v46 = vunpack.c.l.bf16 %v895_v27  ;;  %v1366_v57 = vunpack.c.l.bf16 %v900_v22 }
  0x1b   :  { %v931_v56 = vunpack.c.l.bf16 %v267_v32  ;;  %396 = vst.msk [vmem:[%s1345_s4 + $0x20] sm:$0xf] %vm387_vm0, %v267_v32  ;;  %v268_v53 = vpack.c.bf16 %v252_v23, %v252_v23  ;;  %v253_v45 = vmax.f32 %v125_v40, %v189_v41  ;;  %v1373_v34 = vunpack.c.l.bf16 %v912_v61  ;;  %v953_v23 = vld [vmem:[%s1342_s1 + $0x38] sm:$0xff]  }
  0x1c   :  { %v190_v58 = vmax.f32 %v1367_v59, %v580_v13  ;;  %v583_v42 = vunpack.c.l.bf16 %v615_v62  ;;  %v127_v43 = vmax.f32 %v1365_v46, %v1366_v57  ;;  %v1376_v32 = vunpack.c.h.bf16 %v895_v27  ;;  %v958_v41 = vld [vmem:[%s1343_s2 + $0x38] sm:$0xff]  }
  0x1d   :  { %v960_v40 = vunpack.c.l.bf16 %v268_v53  ;;  %397 = vst.msk [vmem:[%s1345_s4 + $0x24] sm:$0xf] %vm387_vm0, %v268_v53  ;;  %v269_v13 = vpack.c.bf16 %v253_v45, %v253_v45  ;;  %v1377_v46 = vunpack.c.h.bf16 %v900_v22  ;;  %v552_v57 = vunpack.c.h.bf16 %v912_v61  ;;  %v616_v59 = vld [vmem:[%s1344_s3 + $0x38] sm:$0xff]  }
  0x1e   :  { %v254_v52 = vmax.f32 %v126_v63, %v190_v58  ;;  %v191_v47 = vmax.f32 %v1373_v34, %v583_v42  ;;  %v584_v37 = vunpack.c.h.bf16 %v615_v62  ;;  %v1378_v39 = vunpack.c.l.bf16 %v941_v36 }
  0x1f   :  { %v974_v38 = vunpack.c.l.bf16 %v269_v13  ;;  %398 = vst.msk [vmem:[%s1345_s4 + $0x28] sm:$0xf] %vm387_vm0, %v269_v13  ;;  %v128_v53 = vmax.f32 %v1376_v32, %v1377_v46  ;;  %v1379_v63 = vunpack.c.l.bf16 %v953_v23  ;;  %v555_v45 = vunpack.c.l.bf16 %v958_v41 }
  0x20   :  { %v270_v42 = vpack.c.bf16 %v254_v52, %v254_v52  ;;  %v255_v62 = vmax.f32 %v127_v43, %v191_v47  ;;  %v192_v58 = vmax.f32 %v552_v57, %v584_v37  ;;  %v587_v34 = vunpack.c.l.bf16 %v616_v59 }
  0x21   :  { %v129_v13 = vmax.f32 %v1378_v39, %v1379_v63  ;;  %v492_v28 = vunpack.c.h.bf16 %v941_v36  ;;  %v524_v30 = vunpack.c.h.bf16 %v953_v23  ;;  %v556_v32 = vunpack.c.h.bf16 %v958_v41 }
  0x22   :  { %v995_v46 = vunpack.c.l.bf16 %v270_v42  ;;  %399 = vst.msk [vmem:[%s1345_s4 + $0x2c] sm:$0xf] %vm387_vm0, %v270_v42  ;;  %v271_v37 = vpack.c.bf16 %v255_v62, %v255_v62  ;;  %v256_v47 = vmax.f32 %v128_v53, %v192_v58  ;;  %v193_v52 = vmax.f32 %v555_v45, %v587_v34 }
  0x23   :  { %v588_v43 = vunpack.c.h.bf16 %v616_v59  ;;  %v130_v39 = vmax.f32 %v492_v28, %v524_v30  ;;  %vm1010_vm1 = vcmp.ge.f32.partialorder %v495_v4, %v758_v50  ;;  %vm307_vm2 = vcmp.ge.f32.partialorder %v527_v5, %v758_v50 }
  0x24   :  { %v1017_v53 = vunpack.c.l.bf16 %v271_v37  ;;  %400 = vst.msk [vmem:[%s1345_s4 + $0x30] sm:$0xf] %vm387_vm0, %v271_v37  ;;  %v272_v59 = vpack.c.bf16 %v256_v47, %v256_v47  ;;  %v257_v34 = vmax.f32 %v129_v13, %v193_v52  ;;  %v618_v4 = vmov 3  }
  0x25   :  { %v194_v42 = vmax.f32 %v556_v32, %v588_v43  ;;  %v323_v62 = vsel %vm307_vm2, 2, %v618_v4  ;;  %vm355_vm3 = vcmp.ge.f32.partialorder %v463_v3, %v758_v50  ;;  %vm1040_vm5 = vcmp.ge.f32.partialorder %v496_v11, %v764_v51 }
  0x26   :  { %v1029_v5 = vunpack.c.l.bf16 %v272_v59  ;;  %401 = vst.msk [vmem:[%s1345_s4 + $0x34] sm:$0xf] %vm387_vm0, %v272_v59  ;;  %v273_v58 = vpack.c.bf16 %v257_v34, %v257_v34  ;;  %v339_v13 = vsel %vm1010_vm1, 1, %v323_v62  ;;  %vm308_vm6 = vcmp.ge.f32.partialorder %v528_v12, %v764_v51 }
  0x27   :  { %v258_v3 = vmax.f32 %v130_v39, %v194_v42  ;;  %v371_v50 = vsel %vm355_vm3, 0, %v339_v13  ;;  %vm356_vm7 = vcmp.ge.f32.partialorder %v464_v7, %v764_v51  ;;  %v324_v11 = vsel %vm308_vm6, 2, %v618_v4 }
  0x28   :  { %v1050_v47 = vunpack.c.l.bf16 %v273_v58  ;;  %402 = vst.msk [vmem:[%s1345_s4 + $0x38] sm:$0xf] %vm387_vm0, %v273_v58  ;;  %v404_v1 = vpack.c.b16 %v371_v50, %v371_v50  ;;  %vm1060_vm8 = vcmp.ge.f32.partialorder %v499_v18, %v785_v60  ;;  %v340_v0 = vsel %vm1040_vm5, 1, %v324_v11 }
  0x29   :  { %v274_v12 = vpack.c.bf16 %v258_v3, %v258_v3  ;;  %vm309_vm9 = vcmp.ge.f32.partialorder %v531_v19, %v785_v60  ;;  %vm357_vm10 = vcmp.ge.f32.partialorder %v467_v17, %v785_v60  ;;  %v372_v39 = vsel %vm356_vm7, 0, %v340_v0 }
  0x2a   :  { %v405_v7 = vpack.c.b8 %v404_v1, %v404_v1  ;;  %v325_v51 = vsel %vm309_vm9, 2, %v618_v4  ;;  %vm1076_vm11 = vcmp.ge.f32.partialorder %v500_v29, %v806_v21  ;;  %v406_v19 = vpack.c.b16 %v372_v39, %v372_v39 }
  0x2b   :  { %v1080_v63 = vunpack.c.l.bf16 %v274_v12  ;;  %403 = vst.msk [vmem:[%s1345_s4 + $0x3c] sm:$0xf] %vm387_vm0, %v274_v12  ;;  %v341_v17 = vsel %vm1060_vm8, 1, %v325_v51  ;;  %v1388_v60 = vunpack.c.h.bf16 %v686_v14  ;;  %v1389_v52 = vunpack.c.h.bf16 %v674_v8 }
  0x2c   :  { %437 = vst.msk [vmem:[%s1346_s5] sm:$0x3] %vm436_vm4, %v405_v7  ;;  %v373_v9 = vsel %vm357_vm10, 0, %v341_v17  ;;  %v1390_v43 = vunpack.c.l.bf16 %v714_v25  ;;  %v407_v59 = vpack.c.b8 %v406_v19, %v406_v19  ;;  %v1391_v42 = vunpack.c.l.bf16 %v719_v26 }
  0x2d   :  { %vm310_vm12 = vcmp.ge.f32.partialorder %v1388_v60, %v806_v21  ;;  %vm358_vm13 = vcmp.ge.f32.partialorder %v1389_v52, %v806_v21  ;;  %v408_v34 = vpack.c.b16 %v373_v9, %v373_v9  ;;  %v1392_v8 = vunpack.c.l.bf16 %v709_v24 }
  0x2e   :  { %v326_v29 = vsel %vm310_vm12, 2, %v618_v4  ;;  %vm295_vm14 = vcmp.ge.f32.partialorder %v1390_v43, %v835_v44  ;;  %vm311_vm15 = vcmp.ge.f32.partialorder %v1391_v42, %v835_v44  ;;  %v1393_v21 = vunpack.c.h.bf16 %v714_v25  ;;  %438 = vst.msk [vmem:[%s1346_s5 + $0x2] sm:$0x3] %vm436_vm4, %v407_v59 }
  0x2f   :  { %v342_v14 = vsel %vm1076_vm11, 1, %v326_v29  ;;  %v327_v58 = vsel %vm311_vm15, 2, %v618_v4  ;;  %vm359_vm0 = vcmp.ge.f32.partialorder %v1392_v8, %v835_v44  ;;  %v409_v37 = vpack.c.b8 %v408_v34, %v408_v34 }
  0x30   :  { %v374_v62 = vsel %vm358_vm13, 0, %v342_v14  ;;  %vm1114_vm1 = vcmp.ge.f32.partialorder %v1393_v21, %v864_v15  ;;  %v343_v50 = vsel %vm295_vm14, 1, %v327_v58  ;;  %v1396_v1 = vunpack.c.h.bf16 %v719_v26 }
  0x31   :  { %v410_v3 = vpack.c.b16 %v374_v62, %v374_v62  ;;  %v375_v44 = vsel %vm359_vm0, 0, %v343_v50  ;;  %v1397_v25 = vunpack.c.h.bf16 %v709_v24  ;;  %v1398_v2 = vunpack.c.l.bf16 %v756_v49  ;;  %439 = vst.msk [vmem:[%s1346_s5 + $0x4] sm:$0x3] %vm436_vm4, %v409_v37 }
  0x32   :  { %vm312_vm2 = vcmp.ge.f32.partialorder %v1396_v1, %v864_v15  ;;  %v412_v0 = vpack.c.b16 %v375_v44, %v375_v44  ;;  %v1401_v24 = vunpack.c.l.bf16 %v769_v54  ;;  %v1402_v51 = vunpack.c.l.bf16 %v751_v48 }
  0x33   :  { %v328_v11 = vsel %vm312_vm2, 2, %v618_v4  ;;  %vm360_vm3 = vcmp.ge.f32.partialorder %v1397_v25, %v864_v15  ;;  %vm1132_vm5 = vcmp.ge.f32.partialorder %v1398_v2, %v878_v35  ;;  %v411_v26 = vpack.c.b8 %v410_v3, %v410_v3 }
  0x34   :  { %v344_v7 = vsel %vm1114_vm1, 1, %v328_v11  ;;  %vm313_vm6 = vcmp.ge.f32.partialorder %v1401_v24, %v878_v35  ;;  %vm361_vm7 = vcmp.ge.f32.partialorder %v1402_v51, %v878_v35  ;;  %v1403_v18 = vunpack.c.h.bf16 %v756_v49 }
  0x35   :  { %v376_v15 = vsel %vm360_vm3, 0, %v344_v7  ;;  %v329_v39 = vsel %vm313_vm6, 2, %v618_v4  ;;  %440 = vst.msk [vmem:[%s1346_s5 + $0x6] sm:$0x3] %vm436_vm4, %v411_v26  ;;  %v413_v17 = vpack.c.b8 %v412_v0, %v412_v0  ;;  %v1406_v35 = vunpack.c.h.bf16 %v769_v54 }
  0x36   :  { %vm1152_vm8 = vcmp.ge.f32.partialorder %v1403_v18, %v914_v33  ;;  %v414_v60 = vpack.c.b16 %v376_v15, %v376_v15  ;;  %v345_v9 = vsel %vm1132_vm5, 1, %v329_v39  ;;  %v1407_v52 = vunpack.c.h.bf16 %v751_v48 }
  0x37   :  { %vm314_vm9 = vcmp.ge.f32.partialorder %v1406_v35, %v914_v33  ;;  %v377_v29 = vsel %vm361_vm7, 0, %v345_v9  ;;  %v1408_v43 = vunpack.c.l.bf16 %v804_v20  ;;  %441 = vst.msk [vmem:[%s1346_s5 + $0x8] sm:$0x3] %vm436_vm4, %v413_v17  ;;  %v1411_v48 = vunpack.c.l.bf16 %v821_v31 }
  0x38   :  { %v330_v49 = vsel %vm314_vm9, 2, %v618_v4  ;;  %vm362_vm10 = vcmp.ge.f32.partialorder %v1407_v52, %v914_v33  ;;  %v415_v54 = vpack.c.b8 %v414_v60, %v414_v60  ;;  %v416_v34 = vpack.c.b16 %v377_v29, %v377_v29 }
  0x39   :  { %vm1172_vm11 = vcmp.ge.f32.partialorder %v1408_v43, %v931_v56  ;;  %v346_v14 = vsel %vm1152_vm8, 1, %v330_v49  ;;  %vm315_vm12 = vcmp.ge.f32.partialorder %v1411_v48, %v931_v56  ;;  %v1412_v62 = vunpack.c.l.bf16 %v799_v16 }
  0x3a   :  { %v378_v33 = vsel %vm362_vm10, 0, %v346_v14  ;;  %v331_v42 = vsel %vm315_vm12, 2, %v618_v4  ;;  %v1413_v58 = vunpack.c.h.bf16 %v804_v20  ;;  %442 = vst.msk [vmem:[%s1346_s5 + $0xa] sm:$0x3] %vm436_vm4, %v415_v54  ;;  %v417_v21 = vpack.c.b8 %v416_v34, %v416_v34 }
  0x3b   :  { %vm363_vm13 = vcmp.ge.f32.partialorder %v1412_v62, %v931_v56  ;;  %v418_v13 = vpack.c.b16 %v378_v33, %v378_v33  ;;  %v347_v37 = vsel %vm1172_vm11, 1, %v331_v42  ;;  %v1416_v56 = vunpack.c.h.bf16 %v821_v31 }
  0x3c   :  { %vm1192_vm14 = vcmp.ge.f32.partialorder %v1413_v58, %v960_v40  ;;  %v379_v3 = vsel %vm363_vm13, 0, %v347_v37  ;;  %v1417_v50 = vunpack.c.h.bf16 %v799_v16  ;;  %v1418_v1 = vunpack.c.l.bf16 %v857_v6  ;;  %443 = vst.msk [vmem:[%s1346_s5 + $0xc] sm:$0x3] %vm436_vm4, %v417_v21 }
  0x3d   :  { %vm316_vm15 = vcmp.ge.f32.partialorder %v1416_v56, %v960_v40  ;;  %v419_v31 = vpack.c.b8 %v418_v13, %v418_v13  ;;  %v420_v11 = vpack.c.b16 %v379_v3, %v379_v3  ;;  %v1421_v16 = vunpack.c.l.bf16 %v862_v10 }
  0x3e   :  { %v332_v20 = vsel %vm316_vm15, 2, %v618_v4  ;;  %vm364_vm0 = vcmp.ge.f32.partialorder %v1417_v50, %v960_v40  ;;  %vm1212_vm1 = vcmp.ge.f32.partialorder %v1418_v1, %v974_v38  ;;  %v1422_v12 = vunpack.c.l.bf16 %v845_v55 }
  0x3f   :  { %v348_v25 = vsel %vm1192_vm14, 1, %v332_v20  ;;  %vm317_vm2 = vcmp.ge.f32.partialorder %v1421_v16, %v974_v38  ;;  %v1423_v26 = vunpack.c.h.bf16 %v857_v6  ;;  %444 = vst.msk [vmem:[%s1346_s5 + $0xe] sm:$0x3] %vm436_vm4, %v419_v31  ;;  %v421_v7 = vpack.c.b8 %v420_v11, %v420_v11 }
  0x40   :  { %v380_v40 = vsel %vm364_vm0, 0, %v348_v25  ;;  %v333_v2 = vsel %vm317_vm2, 2, %v618_v4  ;;  %vm365_vm3 = vcmp.ge.f32.partialorder %v1422_v12, %v974_v38  ;;  %v1426_v38 = vunpack.c.h.bf16 %v862_v10 }
  0x41   :  { %vm1232_vm5 = vcmp.ge.f32.partialorder %v1423_v26, %v995_v46  ;;  %v422_v24 = vpack.c.b16 %v380_v40, %v380_v40  ;;  %v349_v15 = vsel %vm1212_vm1, 1, %v333_v2  ;;  %v1427_v51 = vunpack.c.h.bf16 %v845_v55  ;;  %445 = vst.msk [vmem:[%s1346_s5 + $0x10] sm:$0x3] %vm436_vm4, %v421_v7 }
  0x42   :  { %vm318_vm6 = vcmp.ge.f32.partialorder %v1426_v38, %v995_v46  ;;  %v381_v39 = vsel %vm365_vm3, 0, %v349_v15  ;;  %v1428_v18 = vunpack.c.l.bf16 %v900_v22  ;;  %v1432_v35 = vunpack.c.l.bf16 %v895_v27 }
  0x43   :  { %v334_v6 = vsel %vm318_vm6, 2, %v618_v4  ;;  %vm366_vm7 = vcmp.ge.f32.partialorder %v1427_v51, %v995_v46  ;;  %v423_v10 = vpack.c.b8 %v422_v24, %v422_v24  ;;  %v424_v17 = vpack.c.b16 %v381_v39, %v381_v39 }
  0x44   :  { %vm1252_vm8 = vcmp.ge.f32.partialorder %v1428_v18, %v1017_v53  ;;  %v350_v60 = vsel %vm1232_vm5, 1, %v334_v6  ;;  %v1431_v46 = vunpack.c.l.bf16 %v912_v61  ;;  %vm367_vm10 = vcmp.ge.f32.partialorder %v1432_v35, %v1017_v53 }
  0x45   :  { %v382_v55 = vsel %vm366_vm7, 0, %v350_v60  ;;  %v1433_v29 = vunpack.c.h.bf16 %v900_v22  ;;  %446 = vst.msk [vmem:[%s1346_s5 + $0x12] sm:$0x3] %vm436_vm4, %v423_v10  ;;  %v425_v52 = vpack.c.b8 %v424_v17, %v424_v17  ;;  %vm320_vm12 = vcmp.ge.f32.partialorder %v552_v57, %v1029_v5 }
  0x46   :  { %vm319_vm9 = vcmp.ge.f32.partialorder %v1431_v46, %v1017_v53  ;;  %v426_v43 = vpack.c.b16 %v382_v55, %v382_v55  ;;  %v336_v22 = vsel %vm320_vm12, 2, %v618_v4  ;;  %v1436_v54 = vunpack.c.h.bf16 %v895_v27 }
  0x47   :  { %v335_v9 = vsel %vm319_vm9, 2, %v618_v4  ;;  %vm1272_vm11 = vcmp.ge.f32.partialorder %v1433_v29, %v1029_v5  ;;  %v1437_v34 = vunpack.c.l.bf16 %v953_v23  ;;  %447 = vst.msk [vmem:[%s1346_s5 + $0x14] sm:$0x3] %vm436_vm4, %v425_v52  ;;  %vm321_vm15 = vcmp.ge.f32.partialorder %v555_v45, %v1050_v47 }
  0x48   :  { %v351_v59 = vsel %vm1252_vm8, 1, %v335_v9  ;;  %vm368_vm13 = vcmp.ge.f32.partialorder %v1436_v54, %v1029_v5  ;;  %v427_v57 = vpack.c.b8 %v426_v43, %v426_v43  ;;  %v352_v48 = vsel %vm1272_vm11, 1, %v336_v22 }
  0x49   :  { %v383_v53 = vsel %vm367_vm10, 0, %v351_v59  ;;  %vm1292_vm14 = vcmp.ge.f32.partialorder %v1437_v34, %v1050_v47  ;;  %v384_v27 = vsel %vm368_vm13, 0, %v352_v48  ;;  %v337_v5 = vsel %vm321_vm15, 2, %v618_v4 }
  0x4a   :  { %v428_v61 = vpack.c.b16 %v383_v53, %v383_v53  ;;  %v1440_v33 = vunpack.c.l.bf16 %v941_v36  ;;  %vm306_vm1 = vcmp.ge.f32.partialorder %v524_v30, %v1080_v63  ;;  %448 = vst.msk [vmem:[%s1346_s5 + $0x16] sm:$0x3] %vm436_vm4, %v427_v57  ;;  %v430_v62 = vpack.c.b16 %v384_v27, %v384_v27 }
  0x4b   :  { %v353_v45 = vsel %vm1292_vm14, 1, %v337_v5  ;;  %vm322_vm2 = vcmp.ge.f32.partialorder %v556_v32, %v1080_v63  ;;  %vm370_vm3 = vcmp.ge.f32.partialorder %v492_v28, %v1080_v63 }
  0x4c   :  { %vm369_vm0 = vcmp.ge.f32.partialorder %v1440_v33, %v1050_v47  ;;  %v429_v42 = vpack.c.b8 %v428_v61, %v428_v61  ;;  %v338_v47 = vsel %vm322_vm2, 2, %v618_v4  ;;  %v431_v30 = vpack.c.b8 %v430_v62, %v430_v62 }
  0x4d   :  { %v385_v58 = vsel %vm369_vm0, 0, %v353_v45  ;;  %v354_v8 = vsel %vm306_vm1, 1, %v338_v47 }
  0x4e   :  { %449 = vst.msk [vmem:[%s1346_s5 + $0x18] sm:$0x3] %vm436_vm4, %v429_v42  ;;  %v432_v23 = vpack.c.b16 %v385_v58, %v385_v58  ;;  %v386_v21 = vsel %vm370_vm3, 0, %v354_v8 }
  0x4f   :  { %450 = vst.msk [vmem:[%s1346_s5 + $0x1a] sm:$0x3] %vm436_vm4, %v431_v30  ;;  %v434_v41 = vpack.c.b16 %v386_v21, %v386_v21 }
  0x50   :  { %v433_v32 = vpack.c.b8 %v432_v23, %v432_v23 }
  0x51   :  { %v435_v28 = vpack.c.b8 %v434_v41, %v434_v41 }
  0x52   :  { %451 = vst.msk [vmem:[%s1346_s5 + $0x1c] sm:$0x3] %vm436_vm4, %v433_v32 }
  0x53   :  { %452 = vst.msk [vmem:[%s1346_s5 + $0x1e] sm:$0x3] %vm436_vm4, %v435_v28 }

// kernel: horseshoe_forward.17
= control target key start
LH: loop header
LB: loop body
LE: loop exit
PB: predicated region body
PF: predicated region fallthrough
CT: control target
= control target key end

     0   :  { %vm102_vm0 = vcmask 1043456   ;;  %vm86_vm1 = vcmask 588800   ;;  %vm183_vm2 = vcmask 125952   ;;  %s356_s1 = inlined_call_operand.vmem [shape: bf16[72,16], index: 1, kind: input, shape index: {}]   ;;  %s357_s2 = inlined_call_operand.vmem [shape: f32[1,16], index: 2, kind: input, shape index: {}]   ;;  %s358_s3 = inlined_call_operand.vmem [shape: f32[1,16], index: 3, kind: input, shape index: {}]   ;;  %s359_s0 = inlined_call_operand.vmem [shape: bf16[72,72], index: 0, kind: input, shape index: {}]   ;;  %s360_s4 = inlined_call_operand.vmem [shape: bf16[72,16], index: 4, kind: output, shape index: {}]  }
   0x1   :  { %v35_v0 = vld [vmem:[%s356_s1 + $0x20] sm:$0xf]  ;;  %v241_v4 = vld [vmem:[%s356_s1 + $0x18] sm:$0xff]  ;;  %v240_v5 = vld [vmem:[%s356_s1 + $0x10] sm:$0xff] }
   0x2   :  { %v76_v1 = vunpack.c.l.b16 %v35_v0  ;;  %v239_v6 = vld [vmem:[%s356_s1 + $0x8] sm:$0xff]  ;;  %v238_v7 = vld [vmem:[%s356_s1] sm:$0xff]  ;;  %v236_v8 = vld [vmem:[%s359_s0 + $0x10] sm:$0xff] }
   0x3   :  { %v237_v9 = vld [vmem:[%s359_s0 + $0x18] sm:$0xff]  ;;  %v234_v10 = vld [vmem:[%s359_s0] sm:$0xff]  ;;  %v235_v11 = vld [vmem:[%s359_s0 + $0x8] sm:$0xff] }
   0x4   :  { %v81_v2 = vpack.c.b16 %v76_v1, %v76_v1  ;;  %v26_v12 = vld [vmem:[%s359_s0 + $0x20] sm:$0xf] }
   0x5   :  { %v53_v13 = vunpack.c.l.b16 %v26_v12  ;;  %v257_v15 = vld [vmem:[%s357_s2] ss:$0 sm:$0xff] }
   0x6   :  { %v104_v3 = vsel %vm102_vm0, %v81_v2, 0  ;;  %v258_v19 = vld [vmem:[%s358_s3] ss:$0 sm:$0xff] }
   0x7   :  { %243 = vmatpush.bf16.msra.mxu2 %v104_v3  ;;  %244 = vmatpush.bf16.msra.mxu3 %v104_v3  ;;  %v58_v14 = vpack.c.b16 %v53_v13, %v53_v13 }
   0x8   :  { %109 = vmatpush.bf16.msra.mxu0 %v104_v3  ;;  %242 = vmatpush.bf16.msra.mxu1 %v104_v3 }
   0xb   :  { %246 = vmatpush.bf16.msra.mxu2 %v241_v4  ;;  %247 = vmatpush.bf16.msra.mxu3 %v241_v4 }
   0xc   :  { %110 = vmatpush.bf16.msra.mxu0 %v241_v4  ;;  %245 = vmatpush.bf16.msra.mxu1 %v241_v4 }
   0xf   :  { %249 = vmatpush.bf16.msra.mxu2 %v240_v5  ;;  %250 = vmatpush.bf16.msra.mxu3 %v240_v5 }
  0x10   :  { %111 = vmatpush.bf16.msra.mxu0 %v240_v5  ;;  %248 = vmatpush.bf16.msra.mxu1 %v240_v5 }
  0x13   :  { %252 = vmatpush.bf16.msra.mxu2 %v239_v6  ;;  %253 = vmatpush.bf16.msra.mxu3 %v239_v6 }
  0x14   :  { %112 = vmatpush.bf16.msra.mxu0 %v239_v6  ;;  %251 = vmatpush.bf16.msra.mxu1 %v239_v6 }
  0x17   :  { %255 = vmatpush.bf16.msra.mxu2 %v238_v7  ;;  %256 = vmatpush.bf16.msra.mxu3 %v238_v7 }
  0x18   :  { %113 = vmatpush.bf16.msra.mxu0 %v238_v7  ;;  %254 = vmatpush.bf16.msra.mxu1 %v238_v7 }
  0x1a   :  { %231 = vmatmul.msk.bf16.vlgmr.msra.gmra.mxu2 %vm86_vm1, %v236_v8  ;;  %232 = vmatmul.msk.bf16.vlgmr.msra.gmra.mxu3 %vm86_vm1, %v237_v9 }
  0x1b   :  { %229 = vmatmul.msk.bf16.vlgmr.msra.gmra.mxu0 %vm86_vm1, %v234_v10  ;;  %230 = vmatmul.msk.bf16.vlgmr.msra.gmra.mxu1 %vm86_vm1, %v235_v11 }
  0x2a   :  { %233 = vmatmul.msk.bf16.gmra.mxu3 %vm86_vm1, %v58_v14 }
  0x98   :  { %v115_v16 = vpop.f32.mrf.mxu0  ;;  %v120_v17 = vpop.f32.mrf.mxu1 }
  0x99   :  { %v143_v18 = vmul.f32 %v257_v15, %v115_v16  ;;  %v145_v20 = vmul.f32 %v257_v15, %v120_v17 }
  0x9b   :  { %v156_v21 = vadd.f32 %v258_v19, %v143_v18  ;;  %v158_v22 = vadd.f32 %v258_v19, %v145_v20 }
  0x9d   :  { %v165_v23 = vmax.f32 %v156_v21, 0.0  ;;  %v167_v24 = vmax.f32 %v158_v22, 0.0  ;;  %v125_v25 = vpop.f32.mrf.mxu2  ;;  %v130_v26 = vpop.f32.mrf.mxu3 }
  0x9e   :  { %v147_v27 = vmul.f32 %v257_v15, %v125_v25  ;;  %v149_v28 = vmul.f32 %v257_v15, %v130_v26 }
  0x9f   :  { %v174_v29 = vpack.c.bf16 %v165_v23, %v165_v23  ;;  %v176_v30 = vpack.c.bf16 %v167_v24, %v167_v24 }
  0xa0   :  { %v160_v31 = vadd.f32 %v258_v19, %v147_v27  ;;  %v162_v32 = vadd.f32 %v258_v19, %v149_v28  ;;  %v117_v33 = vpop.f32.mrf.mxu0  ;;  %v122_v34 = vpop.f32.mrf.mxu1 }
  0xa1   :  { %184 = vst.msk [vmem:[%s360_s4] sm:$0xf] %vm183_vm2, %v174_v29  ;;  %v144_v35 = vmul.f32 %v257_v15, %v117_v33  ;;  %v146_v36 = vmul.f32 %v257_v15, %v122_v34 }
  0xa2   :  { %186 = vst.msk [vmem:[%s360_s4 + $0x8] sm:$0xf] %vm183_vm2, %v176_v30  ;;  %v169_v37 = vmax.f32 %v160_v31, 0.0  ;;  %v171_v38 = vmax.f32 %v162_v32, 0.0 }
  0xa3   :  { %v157_v39 = vadd.f32 %v258_v19, %v144_v35  ;;  %v159_v40 = vadd.f32 %v258_v19, %v146_v36 }
  0xa4   :  { %v178_v41 = vpack.c.bf16 %v169_v37, %v169_v37  ;;  %v180_v42 = vpack.c.bf16 %v171_v38, %v171_v38 }
  0xa5   :  { %v166_v43 = vmax.f32 %v157_v39, 0.0  ;;  %v168_v44 = vmax.f32 %v159_v40, 0.0  ;;  %v127_v45 = vpop.f32.mrf.mxu2  ;;  %v132_v46 = vpop.f32.mrf.mxu3 }
  0xa6   :  { %188 = vst.msk [vmem:[%s360_s4 + $0x10] sm:$0xf] %vm183_vm2, %v178_v41  ;;  %v148_v47 = vmul.f32 %v257_v15, %v127_v45  ;;  %v150_v48 = vmul.f32 %v257_v15, %v132_v46 }
  0xa7   :  { %190 = vst.msk [vmem:[%s360_s4 + $0x18] sm:$0xf] %vm183_vm2, %v180_v42  ;;  %v175_v49 = vpack.c.bf16 %v166_v43, %v166_v43  ;;  %v177_v50 = vpack.c.bf16 %v168_v44, %v168_v44 }
  0xa8   :  { %v161_v51 = vadd.f32 %v258_v19, %v148_v47  ;;  %v163_v52 = vadd.f32 %v258_v19, %v150_v48 }
  0xa9   :  { %185 = vst.msk [vmem:[%s360_s4 + $0x4] sm:$0xf] %vm183_vm2, %v175_v49 }
  0xaa   :  { %187 = vst.msk [vmem:[%s360_s4 + $0xc] sm:$0xf] %vm183_vm2, %v177_v50  ;;  %v170_v53 = vmax.f32 %v161_v51, 0.0  ;;  %v172_v54 = vmax.f32 %v163_v52, 0.0 }
  0xac   :  { %v179_v55 = vpack.c.bf16 %v170_v53, %v170_v53  ;;  %v181_v56 = vpack.c.bf16 %v172_v54, %v172_v54 }
  0xad   :  { %v135_v57 = vpop.f32.mrf.mxu3 }
  0xae   :  { %189 = vst.msk [vmem:[%s360_s4 + $0x14] sm:$0xf] %vm183_vm2, %v179_v55  ;;  %v151_v58 = vmul.f32 %v257_v15, %v135_v57 }
  0xaf   :  { %191 = vst.msk [vmem:[%s360_s4 + $0x1c] sm:$0xf] %vm183_vm2, %v181_v56 }
  0xb0   :  { %v164_v59 = vadd.f32 %v258_v19, %v151_v58 }
  0xb2   :  { %v173_v60 = vmax.f32 %v164_v59, 0.0 }
  0xb4   :  { %v182_v61 = vpack.c.bf16 %v173_v60, %v173_v60 }
  0xb5   :  { %v137_v62 = vpop.f32.mrf.mxu3 }
  0xb6   :  { %192 = vst.msk [vmem:[%s360_s4 + $0x20] sm:$0xf] %vm183_vm2, %v182_v61 }

// kernel: horseshoe_forward.18
= control target key start
LH: loop header
LB: loop body
LE: loop exit
PB: predicated region body
PF: predicated region fallthrough
CT: control target
= control target key end

     0   :  { %vm112_vm0 = vcmask 130048   ;;  %vm181_vm1 = vcmask 125952   ;;  %s367_s1 = inlined_call_operand.vmem [shape: bf16[144,16], index: 1, kind: input, shape index: {}]   ;;  %s368_s0 = inlined_call_operand.vmem [shape: bf16[32,144], index: 0, kind: input, shape index: {}]   ;;  %s369_s2 = inlined_call_operand.vmem [shape: f32[1,16], index: 2, kind: input, shape index: {}]   ;;  %s370_s3 = inlined_call_operand.vmem [shape: f32[1,16], index: 3, kind: input, shape index: {}]   ;;  %s371_s4 = inlined_call_operand.vmem [shape: bf16[32,16], index: 4, kind: output, shape index: {}]  }
   0x1   :  { %v255_v0 = vld [vmem:[%s367_s1 + $0x38] sm:$0xff]  ;;  %v256_v1 = vld [vmem:[%s367_s1 + $0x40] sm:$0xff]  ;;  %v254_v3 = vld [vmem:[%s367_s1 + $0x30] sm:$0xff] }
   0x2   :  { %v244_v2 = vld [vmem:[%s368_s0 + $0x4] sm:$0xf]  ;;  %119 = vmatpush.bf16.msra.mxu0 %v255_v0  ;;  %257 = vmatpush.bf16.msra.mxu2 %v255_v0  ;;  %v194_v4 = vld [vmem:[%s368_s0 + $0x8] sm:$0xf0]  ;;  %v251_v8 = vld [vmem:[%s367_s1 + $0x18] sm:$0xff] }
   0x3   :  { %145 = vmatpush.bf16.msra.mxu1 %v256_v1  ;;  %v197_v5 = vor.u32 %v244_v2, %v194_v4  ;;  %v253_v6 = vld [vmem:[%s367_s1 + $0x28] sm:$0xff]  ;;  %v252_v7 = vld [vmem:[%s367_s1 + $0x20] sm:$0xff]  ;;  %v246_v9 = vld [vmem:[%s368_s0 + $0x14] sm:$0xf] }
   0x4   :  { %v202_v10 = vld [vmem:[%s368_s0 + $0x18] sm:$0xf0]  ;;  %v250_v11 = vld [vmem:[%s367_s1 + $0x10] sm:$0xff]  ;;  %v249_v13 = vld [vmem:[%s367_s1 + $0x8] sm:$0xff] }
   0x5   :  { %v205_v12 = vor.u32 %v246_v9, %v202_v10  ;;  %v248_v14 = vld [vmem:[%s367_s1] sm:$0xff]  ;;  %v245_v16 = vld [vmem:[%s368_s0 + $0x4] sm:$0xf0]  ;;  %v200_v17 = vld [vmem:[%s368_s0 + $0x10] sm:$0xf] }
   0x6   :  { %120 = vmatpush.bf16.msra.mxu0 %v254_v3  ;;  %258 = vmatpush.bf16.msra.mxu2 %v254_v3  ;;  %v192_v15 = vld [vmem:[%s368_s0] sm:$0xf]  ;;  %v247_v18 = vld [vmem:[%s368_s0 + $0x14] sm:$0xf0] }
   0x7   :  { %242 = vmatmul.msk.bf16.vlgmr.msra.gmra.mxu1 %vm112_vm0, %v197_v5  ;;  %v193_v19 = vor.u32 %v245_v16, %v192_v15  ;;  %v201_v20 = vor.u32 %v247_v18, %v200_v17  ;;  %v265_v23 = vld [vmem:[%s369_s2] ss:$0 sm:$0xff] }
   0x8   :  { %v266_v26 = vld [vmem:[%s370_s3] ss:$0 sm:$0xff] }
   0xa   :  { %121 = vmatpush.bf16.msra.mxu0 %v253_v6  ;;  %259 = vmatpush.bf16.msra.mxu2 %v253_v6 }
   0xe   :  { %122 = vmatpush.bf16.msra.mxu0 %v252_v7  ;;  %260 = vmatpush.bf16.msra.mxu2 %v252_v7 }
  0x12   :  { %123 = vmatpush.bf16.msra.mxu0 %v251_v8  ;;  %261 = vmatpush.bf16.msra.mxu2 %v251_v8 }
  0x16   :  { %124 = vmatpush.bf16.msra.mxu0 %v250_v11  ;;  %262 = vmatpush.bf16.msra.mxu2 %v250_v11 }
  0x17   :  { %243 = vmatmul.msk.bf16.gmra.mxu1 %vm112_vm0, %v205_v12 }
  0x1a   :  { %125 = vmatpush.bf16.msra.mxu0 %v249_v13  ;;  %263 = vmatpush.bf16.msra.mxu2 %v249_v13 }
  0x1e   :  { %126 = vmatpush.bf16.msra.mxu0 %v248_v14  ;;  %264 = vmatpush.bf16.msra.mxu2 %v248_v14 }
  0x21   :  { %127 = vmatmul.bf16.vlgmr.msra.gmra.mxu0 %v193_v19  ;;  %132 = vmatmul.bf16.vlgmr.msra.gmra.mxu2 %v201_v20 }
  0x84   :  { %v147_v21 = vpop.f32.mrf.mxu1 }
  0x8c   :  { %v149_v22 = vpop.f32.mrf.mxu1 }
  0x94   :  { %v152_v28 = vpop.f32.mrf.mxu1 }
  0x9c   :  { %v154_v41 = vpop.f32.mrf.mxu1 }
  0x9e   :  { %v128_v24 = vpop.f32.mrf.mxu0 }
  0x9f   :  { %v148_v25 = vadd.f32 %v147_v21, %v128_v24 }
  0xa1   :  { %v161_v27 = vmul.f32 %v265_v23, %v148_v25 }
  0xa3   :  { %v169_v29 = vadd.f32 %v266_v26, %v161_v27 }
  0xa4   :  { %v133_v30 = vpop.f32.mrf.mxu2 }
  0xa5   :  { %v173_v31 = vmax.f32 %v169_v29, 0.0  ;;  %v153_v32 = vadd.f32 %v152_v28, %v133_v30 }
  0xa6   :  { %v130_v33 = vpop.f32.mrf.mxu0 }
  0xa7   :  { %v177_v34 = vpack.c.bf16 %v173_v31, %v173_v31  ;;  %v163_v35 = vmul.f32 %v265_v23, %v153_v32  ;;  %v150_v36 = vadd.f32 %v149_v22, %v130_v33 }
  0xa9   :  { %182 = vst.msk [vmem:[%s371_s4] sm:$0xf] %vm181_vm1, %v177_v34  ;;  %v171_v37 = vadd.f32 %v266_v26, %v163_v35  ;;  %v162_v38 = vmul.f32 %v265_v23, %v150_v36 }
  0xab   :  { %v175_v39 = vmax.f32 %v171_v37, 0.0  ;;  %v170_v40 = vadd.f32 %v266_v26, %v162_v38 }
  0xac   :  { %v135_v42 = vpop.f32.mrf.mxu2 }
  0xad   :  { %v179_v43 = vpack.c.bf16 %v175_v39, %v175_v39  ;;  %v174_v44 = vmax.f32 %v170_v40, 0.0  ;;  %v155_v45 = vadd.f32 %v154_v41, %v135_v42 }
  0xaf   :  { %184 = vst.msk [vmem:[%s371_s4 + $0x8] sm:$0xf] %vm181_vm1, %v179_v43  ;;  %v178_v46 = vpack.c.bf16 %v174_v44, %v174_v44  ;;  %v164_v47 = vmul.f32 %v265_v23, %v155_v45 }
  0xb1   :  { %183 = vst.msk [vmem:[%s371_s4 + $0x4] sm:$0xf] %vm181_vm1, %v178_v46  ;;  %v172_v48 = vadd.f32 %v266_v26, %v164_v47 }
  0xb3   :  { %v176_v49 = vmax.f32 %v172_v48, 0.0 }
  0xb5   :  { %v180_v50 = vpack.c.bf16 %v176_v49, %v176_v49 }
  0xb7   :  { %185 = vst.msk [vmem:[%s371_s4 + $0xc] sm:$0xf] %vm181_vm1, %v180_v50 }

// kernel: horseshoe_forward.19
= control target key start
LH: loop header
LB: loop body
LE: loop exit
PB: predicated region body
PF: predicated region fallthrough
CT: control target
= control target key end

     0   :  { %vm111_vm0 = vcmask 122880   ;;  %vm125_vm1 = vsmask.f32 256  ;;  %v148_v52 = vmov 3   ;;  %s296_s0 = inlined_call_operand.vmem [shape: bf16[4,2,16], index: 0, kind: input, shape index: {}]   ;;  %s297_s1 = inlined_call_operand.vmem [shape: bf16[4,2,16], index: 1, kind: input, shape index: {}]   ;;  %s298_s2 = inlined_call_operand.vmem [shape: bf16[4,2,16], index: 2, kind: input, shape index: {}]   ;;  %s299_s3 = inlined_call_operand.vmem [shape: bf16[4,2,16], index: 3, kind: input, shape index: {}]   ;;  %s300_s4 = inlined_call_operand.vmem [shape: bf16[4,2,16], index: 4, kind: output, shape index: {0}]   ;;  %s301_s5 = inlined_call_operand.vmem [shape: s8[4,2,16], index: 5, kind: output, shape index: {1}]  }
   0x1   :  { %v19_v0 = vld [vmem:[%s296_s0] sm:$0x1]  ;;  %v194_v7 = vld [vmem:[%s296_s0 + $0x1] sm:$0x1]  ;;  %v209_v14 = vld [vmem:[%s296_s0 + $0x2] sm:$0x1] }
   0x2   :  { %v23_v1 = vld [vmem:[%s297_s1] sm:$0x1]  ;;  %v35_v4 = vunpack.c.l.bf16 %v19_v0  ;;  %v24_v8 = vld [vmem:[%s297_s1 + $0x1] sm:$0x1]  ;;  %v36_v12 = vunpack.c.l.bf16 %v194_v7  ;;  %v25_v18 = vld [vmem:[%s297_s1 + $0x2] sm:$0x1]  ;;  %v37_v21 = vunpack.c.l.bf16 %v209_v14 }
   0x3   :  { %v27_v2 = vld [vmem:[%s298_s2] sm:$0x1]  ;;  %v39_v5 = vunpack.c.l.bf16 %v23_v1  ;;  %v28_v10 = vld [vmem:[%s298_s2 + $0x1] sm:$0x1]  ;;  %v40_v13 = vunpack.c.l.bf16 %v24_v8  ;;  %v29_v19 = vld [vmem:[%s298_s2 + $0x2] sm:$0x1]  ;;  %v41_v24 = vunpack.c.l.bf16 %v25_v18 }
   0x4   :  { %v31_v3 = vld [vmem:[%s299_s3] sm:$0x1]  ;;  %v51_v6 = vunpack.c.l.bf16 %v27_v2  ;;  %v32_v11 = vld [vmem:[%s299_s3 + $0x1] sm:$0x1]  ;;  %v52_v16 = vunpack.c.l.bf16 %v28_v10  ;;  %v33_v20 = vld [vmem:[%s299_s3 + $0x2] sm:$0x1]  ;;  %v53_v25 = vunpack.c.l.bf16 %v29_v19 }
   0x5   :  { %v55_v9 = vunpack.c.l.bf16 %v31_v3  ;;  %v43_v15 = vmax.f32 %v35_v4, %v39_v5  ;;  %v56_v17 = vunpack.c.l.bf16 %v32_v11  ;;  %v44_v23 = vmax.f32 %v36_v12, %v40_v13  ;;  %v224_v26 = vld [vmem:[%s296_s0 + $0x3] sm:$0x1]  ;;  %vm260_vm11 = vmand %vm111_vm0, %vm125_vm1  ;;  %v127_v63 = vld [vmem:[%s301_s5] sm:$0x1] }
   0x6   :  { %v26_v27 = vld [vmem:[%s297_s1 + $0x3] sm:$0x1]  ;;  %v57_v30 = vunpack.c.l.bf16 %v33_v20  ;;  %v38_v32 = vunpack.c.l.bf16 %v224_v26  ;;  %v45_v35 = vmax.f32 %v37_v21, %v41_v24  ;;  %v130_v3 = vld [vmem:[%s301_s5 + $0x1] sm:$0x1]  ;;  %v133_v10 = vld [vmem:[%s301_s5 + $0x2] sm:$0x1] }
   0x7   :  { %v59_v22 = vmax.f32 %v51_v6, %v55_v9  ;;  %v30_v28 = vld [vmem:[%s298_s2 + $0x3] sm:$0x1]  ;;  %v60_v29 = vmax.f32 %v52_v16, %v56_v17  ;;  %v42_v33 = vunpack.c.l.bf16 %v26_v27 }
   0x8   :  { %v34_v31 = vld [vmem:[%s299_s3 + $0x3] sm:$0x1]  ;;  %v54_v36 = vunpack.c.l.bf16 %v30_v28  ;;  %v61_v39 = vmax.f32 %v53_v25, %v57_v30 }
   0x9   :  { %v75_v34 = vmax.f32 %v43_v15, %v59_v22  ;;  %v58_v37 = vunpack.c.l.bf16 %v34_v31  ;;  %v76_v38 = vmax.f32 %v44_v23, %v60_v29  ;;  %v46_v40 = vmax.f32 %v38_v32, %v42_v33  ;;  %v136_v15 = vld [vmem:[%s301_s5 + $0x3] sm:$0x1] }
   0xa   :  { %v77_v44 = vmax.f32 %v45_v35, %v61_v39 }
   0xb   :  { %v79_v41 = vpack.c.bf16 %v75_v34, %v75_v34  ;;  %v62_v42 = vmax.f32 %v54_v36, %v58_v37  ;;  %v80_v43 = vpack.c.bf16 %v76_v38, %v76_v38 }
   0xc   :  { %v81_v48 = vpack.c.bf16 %v77_v44, %v77_v44 }
   0xd   :  { %v83_v45 = vunpack.c.l.bf16 %v79_v41  ;;  %112 = vst.msk [vmem:[%s300_s4] sm:$0x1] %vm111_vm0, %v79_v41  ;;  %v78_v46 = vmax.f32 %v46_v40, %v62_v42  ;;  %v84_v47 = vunpack.c.l.bf16 %v80_v43 }
   0xe   :  { %113 = vst.msk [vmem:[%s300_s4 + $0x1] sm:$0x1] %vm111_vm0, %v80_v43  ;;  %v85_v51 = vunpack.c.l.bf16 %v81_v48 }
   0xf   :  { %v82_v49 = vpack.c.bf16 %v78_v46, %v78_v46  ;;  %vm244_vm2 = vcmp.ge.f32.partialorder %v39_v5, %v83_v45  ;;  %vm91_vm3 = vcmp.ge.f32.partialorder %v51_v6, %v83_v45  ;;  %vm103_vm4 = vcmp.ge.f32.partialorder %v35_v4, %v83_v45  ;;  %114 = vst.msk [vmem:[%s300_s4 + $0x2] sm:$0x1] %vm111_vm0, %v81_v48 }
  0x10   :  { %v95_v53 = vsel %vm91_vm3, 2, %v148_v52  ;;  %vm88_vm5 = vcmp.ge.f32.partialorder %v40_v13, %v84_v47  ;;  %vm92_vm6 = vcmp.ge.f32.partialorder %v52_v16, %v84_v47  ;;  %vm104_vm7 = vcmp.ge.f32.partialorder %v36_v12, %v84_v47 }
  0x11   :  { %v86_v54 = vunpack.c.l.bf16 %v82_v49  ;;  %115 = vst.msk [vmem:[%s300_s4 + $0x3] sm:$0x1] %vm111_vm0, %v82_v49  ;;  %v99_v55 = vsel %vm244_vm2, 1, %v95_v53  ;;  %v96_v56 = vsel %vm92_vm6, 2, %v148_v52  ;;  %vm89_vm8 = vcmp.ge.f32.partialorder %v41_v24, %v85_v51 }
  0x12   :  { %v107_v57 = vsel %vm103_vm4, 0, %v99_v55  ;;  %v100_v58 = vsel %vm88_vm5, 1, %v96_v56  ;;  %vm93_vm9 = vcmp.ge.f32.partialorder %v53_v25, %v85_v51  ;;  %vm105_vm10 = vcmp.ge.f32.partialorder %v37_v21, %v85_v51 }
  0x13   :  { %v116_v59 = vpack.c.b16 %v107_v57, %v107_v57  ;;  %v108_v60 = vsel %vm104_vm7, 0, %v100_v58  ;;  %v97_v61 = vsel %vm93_vm9, 2, %v148_v52  ;;  %vm90_vm12 = vcmp.ge.f32.partialorder %v42_v33, %v86_v54 }
  0x14   :  { %v118_v0 = vpack.c.b16 %v108_v60, %v108_v60  ;;  %v101_v1 = vsel %vm89_vm8, 1, %v97_v61  ;;  %vm94_vm13 = vcmp.ge.f32.partialorder %v54_v36, %v86_v54  ;;  %vm106_vm14 = vcmp.ge.f32.partialorder %v38_v32, %v86_v54 }
  0x15   :  { %v117_v2 = vpack.c.b8 %v116_v59, %v116_v59  ;;  %v109_v4 = vsel %vm105_vm10, 0, %v101_v1  ;;  %v98_v5 = vsel %vm94_vm13, 2, %v148_v52 }
  0x16   :  { %v119_v6 = vpack.c.b8 %v118_v0, %v118_v0  ;;  %v120_v7 = vpack.c.b16 %v109_v4, %v109_v4  ;;  %v102_v8 = vsel %vm90_vm12, 1, %v98_v5 }
  0x17   :  { %v128_v9 = vsel %vm260_vm11, %v117_v2, %v127_v63  ;;  %v110_v11 = vsel %vm106_vm14, 0, %v102_v8 }
  0x18   :  { %129 = vst [vmem:[%s301_s5] sm:$0x1] %v128_v9  ;;  %v131_v12 = vsel %vm260_vm11, %v119_v6, %v130_v3  ;;  %v121_v13 = vpack.c.b8 %v120_v7, %v120_v7  ;;  %v122_v14 = vpack.c.b16 %v110_v11, %v110_v11 }
  0x19   :  { %132 = vst [vmem:[%s301_s5 + $0x1] sm:$0x1] %v131_v12 }
  0x1a   :  { %v134_v16 = vsel %vm260_vm11, %v121_v13, %v133_v10  ;;  %v123_v17 = vpack.c.b8 %v122_v14, %v122_v14 }
  0x1b   :  { %135 = vst [vmem:[%s301_s5 + $0x2] sm:$0x1] %v134_v16 }
  0x1c   :  { %v137_v18 = vsel %vm260_vm11, %v123_v17, %v136_v15 }
  0x1d   :  { %138 = vst [vmem:[%s301_s5 + $0x3] sm:$0x1] %v137_v18 }

// kernel: horseshoe_forward.20
= control target key start
LH: loop header
LB: loop body
LE: loop exit
PB: predicated region body
PF: predicated region fallthrough
CT: control target
= control target key end

     0   :  { %vm27_vm0 = vcmask 130048   ;;  %vm55_vm1 = vcmask 125952   ;;  %s109_s1 = inlined_call_operand.vmem [shape: bf16[16,16], index: 1, kind: input, shape index: {}]   ;;  %s110_s0 = inlined_call_operand.vmem [shape: bf16[8,16], index: 0, kind: input, shape index: {}]   ;;  %s111_s2 = inlined_call_operand.vmem [shape: f32[1,16], index: 2, kind: input, shape index: {}]   ;;  %s112_s3 = inlined_call_operand.vmem [shape: f32[1,16], index: 3, kind: input, shape index: {}]   ;;  %s113_s4 = inlined_call_operand.vmem [shape: bf16[8,16], index: 4, kind: output, shape index: {}]  }
   0x1   :  { %v66_v0 = vld [vmem:[%s109_s1] sm:$0xff] }
   0x2   :  { %38 = vmatpush.bf16.msra.mxu0 %v66_v0  ;;  %v18_v1 = vld [vmem:[%s110_s0] sm:$0xf] }
   0x3   :  { %v67_v2 = vld [vmem:[%s111_s2] ss:$0 sm:$0xff] }
   0x4   :  { %v68_v3 = vld [vmem:[%s112_s3] ss:$0 sm:$0xff] }
   0x5   :  { %65 = vmatmul.msk.bf16.vlgmr.msra.gmra.mxu0 %vm27_vm0, %v18_v1 }
  0x82   :  { %v40_v4 = vpop.f32.mrf.mxu0 }
  0x83   :  { %v48_v5 = vmul.f32 %v67_v2, %v40_v4 }
  0x85   :  { %v53_v6 = vadd.f32 %v68_v3, %v48_v5 }
  0x87   :  { %v54_v7 = vpack.c.bf16 %v53_v6, %v53_v6 }
  0x89   :  { %56 = vst.msk [vmem:[%s113_s4] sm:$0xf] %vm55_vm1, %v54_v7 }
  0x8a   :  { %v42_v8 = vpop.f32.mrf.mxu0 }

// kernel: horseshoe_forward.21
= control target key start
LH: loop header
LB: loop body
LE: loop exit
PB: predicated region body
PF: predicated region fallthrough
CT: control target
= control target key end

     0   :  { %vm73_vm0 = vcmask 122880   ;;  %v271_v4 = vmov 0   ;;  %s526_s1 = inlined_call_operand.vmem [shape: s8[4,2,16], index: 1, kind: input, shape index: {}]   ;;  %s527_s0 = inlined_call_operand.vmem [shape: bf16[4,2,16], index: 0, kind: input, shape index: {}]   ;;  %s528_s2 = inlined_call_operand.vmem [shape: bf16[4,2,16], index: 2, kind: output, shape index: {0}]   ;;  %s529_s3 = inlined_call_operand.vmem [shape: bf16[4,2,16], index: 3, kind: output, shape index: {1}]   ;;  %s530_s4 = inlined_call_operand.vmem [shape: bf16[4,2,16], index: 4, kind: output, shape index: {2}]   ;;  %s531_s5 = inlined_call_operand.vmem [shape: bf16[4,2,16], index: 5, kind: output, shape index: {3}]  }
   0x1   :  { %v21_v0 = vld [vmem:[%s526_s1] sm:$0x1]  ;;  %v22_v2 = vld [vmem:[%s526_s1 + $0x1] sm:$0x1]  ;;  %v23_v3 = vld [vmem:[%s526_s1 + $0x2] sm:$0x1]  ;;  %v314_v5 = vunpack.c.l.b16 %v271_v4  ;;  %v317_v6 = vunpack.c.h.b16 %v271_v4 }
   0x2   :  { %v305_v1 = vunpack.c.0.s8 %v21_v0  ;;  %v319_v7 = vunpack.c.0.s8 %v22_v2  ;;  %v321_v8 = vunpack.c.0.s8 %v23_v3  ;;  %v24_v9 = vld [vmem:[%s526_s1 + $0x3] sm:$0x1]  ;;  %v341_v16 = vld [vmem:[%s527_s0] sm:$0x1]  ;;  %v349_v21 = vld [vmem:[%s527_s0 + $0x1] sm:$0x1] }
   0x3   :  { %v327_v10 = vunpack.c.0.s8 %v24_v9  ;;  %v357_v23 = vld [vmem:[%s527_s0 + $0x2] sm:$0x1]  ;;  %v369_v26 = vld [vmem:[%s527_s0 + $0x3] sm:$0x1] }
   0x4   :  { %vm29_vm1 = vcmp.eq.s32.totalorder %v305_v1, 0  ;;  %vm78_vm2 = vcmp.eq.s32.totalorder %v305_v1, 1  ;;  %vm126_vm3 = vcmp.eq.s32.totalorder %v305_v1, 2  ;;  %vm30_vm4 = vcmp.eq.s32.totalorder %v319_v7, 0 }
   0x5   :  { %v33_v11 = vsel %vm29_vm1, 1, %v271_v4  ;;  %vm31_vm5 = vcmp.eq.s32.totalorder %v321_v8, 0  ;;  %v82_v12 = vsel %vm78_vm2, 1, %v271_v4  ;;  %v34_v14 = vsel %vm30_vm4, 1, %v271_v4 }
   0x6   :  { %v238_v13 = vunpack.i.l.s16 %v33_v11  ;;  %v35_v15 = vsel %vm31_vm5, 1, %v271_v4  ;;  %vm32_vm6 = vcmp.eq.s32.totalorder %v327_v10, 0  ;;  %v240_v17 = vunpack.i.l.s16 %v34_v14 }
   0x7   :  { %v242_v18 = vunpack.i.l.s16 %v35_v15  ;;  %v36_v19 = vsel %vm32_vm6, 1, %v271_v4  ;;  %v246_v20 = vunpack.i.l.s16 %v82_v12  ;;  %vm79_vm9 = vcmp.eq.s32.totalorder %v319_v7, 1 }
   0x8   :  { %vm45_vm7 = vcmp.ne.s32.totalorder %v238_v13, %v314_v5  ;;  %vm46_vm8 = vcmp.ne.s32.totalorder %v238_v13, %v317_v6  ;;  %v244_v22 = vunpack.i.l.s16 %v36_v19  ;;  %vm52_vm11 = vcmp.ne.s32.totalorder %v240_v17, %v314_v5 }
   0x9   :  { %vm47_vm10 = vmpackc.low %vm46_vm8, %vm45_vm7  ;;  %vm53_vm12 = vcmp.ne.s32.totalorder %v240_v17, %v317_v6  ;;  %vm360_vm13 = vcmp.ne.s32.totalorder %v242_v18, %v314_v5  ;;  %vm60_vm14 = vcmp.ne.s32.totalorder %v242_v18, %v317_v6  ;;  %vm382_vm4 = vcmp.ne.s32.totalorder %v246_v20, %v314_v5 }
   0xa   :  { %v69_v25 = vsel %vm47_vm10, %v341_v16, 0  ;;  %vm54_vm15 = vmpackc.low %vm53_vm12, %vm52_vm11  ;;  %vm372_vm1 = vcmp.ne.s32.totalorder %v244_v22, %v314_v5  ;;  %vm377_vm2 = vcmp.ne.s32.totalorder %v244_v22, %v317_v6  ;;  %vm394_vm6 = vcmp.ne.s32.totalorder %v246_v20, %v317_v6 }
   0xb   :  { %74 = vst.msk [vmem:[%s528_s2] sm:$0x1] %vm73_vm0, %v69_v25  ;;  %v70_v30 = vsel %vm54_vm15, %v349_v21, 0  ;;  %vm61_vm5 = vmpackc.low %vm60_vm14, %vm360_vm13  ;;  %v83_v32 = vsel %vm79_vm9, 1, %v271_v4  ;;  %vm80_vm7 = vcmp.eq.s32.totalorder %v321_v8, 1  ;;  %vm81_vm10 = vcmp.eq.s32.totalorder %v327_v10, 1 }
   0xc   :  { %75 = vst.msk [vmem:[%s528_s2 + $0x1] sm:$0x1] %vm73_vm0, %v70_v30  ;;  %v71_v33 = vsel %vm61_vm5, %v357_v23, 0  ;;  %vm68_vm8 = vmpackc.low %vm377_vm2, %vm372_vm1  ;;  %v248_v34 = vunpack.i.l.s16 %v83_v32  ;;  %v84_v35 = vsel %vm80_vm7, 1, %v271_v4  ;;  %v85_v38 = vsel %vm81_vm10, 1, %v271_v4 }
   0xd   :  { %76 = vst.msk [vmem:[%s528_s2 + $0x2] sm:$0x1] %vm73_vm0, %v71_v33  ;;  %v72_v36 = vsel %vm68_vm8, %v369_v26, 0  ;;  %vm96_vm9 = vmpackc.low %vm394_vm6, %vm382_vm4  ;;  %v250_v37 = vunpack.i.l.s16 %v84_v35  ;;  %v130_v39 = vsel %vm126_vm3, 1, %v271_v4  ;;  %v252_v41 = vunpack.i.l.s16 %v85_v38 }
   0xe   :  { %77 = vst.msk [vmem:[%s528_s2 + $0x3] sm:$0x1] %vm73_vm0, %v72_v36  ;;  %v118_v40 = vsel %vm96_vm9, %v341_v16, 0  ;;  %vm101_vm11 = vcmp.ne.s32.totalorder %v248_v34, %v314_v5  ;;  %vm102_vm12 = vcmp.ne.s32.totalorder %v248_v34, %v317_v6  ;;  %v254_v42 = vunpack.i.l.s16 %v130_v39 }
   0xf   :  { %122 = vst.msk [vmem:[%s529_s3] sm:$0x1] %vm73_vm0, %v118_v40  ;;  %vm103_vm13 = vmpackc.low %vm102_vm12, %vm101_vm11  ;;  %vm108_vm3 = vcmp.ne.s32.totalorder %v250_v37, %v314_v5  ;;  %vm109_vm14 = vcmp.ne.s32.totalorder %v250_v37, %v317_v6  ;;  %vm127_vm15 = vcmp.eq.s32.totalorder %v319_v7, 2  ;;  %vm115_vm2 = vcmp.ne.s32.totalorder %v252_v41, %v314_v5 }
  0x10   :  { %v119_v43 = vsel %vm103_vm13, %v349_v21, 0  ;;  %vm110_vm1 = vmpackc.low %vm109_vm14, %vm108_vm3  ;;  %vm116_vm4 = vcmp.ne.s32.totalorder %v252_v41, %v317_v6  ;;  %v131_v44 = vsel %vm127_vm15, 1, %v271_v4  ;;  %vm142_vm6 = vcmp.ne.s32.totalorder %v254_v42, %v314_v5 }
  0x11   :  { %123 = vst.msk [vmem:[%s529_s3 + $0x1] sm:$0x1] %vm73_vm0, %v119_v43  ;;  %v120_v45 = vsel %vm110_vm1, %v357_v23, 0  ;;  %vm117_vm5 = vmpackc.low %vm116_vm4, %vm115_vm2  ;;  %vm143_vm7 = vcmp.ne.s32.totalorder %v254_v42, %v317_v6  ;;  %v256_v46 = vunpack.i.l.s16 %v131_v44  ;;  %vm128_vm10 = vcmp.eq.s32.totalorder %v321_v8, 2 }
  0x12   :  { %124 = vst.msk [vmem:[%s529_s3 + $0x2] sm:$0x1] %vm73_vm0, %v120_v45  ;;  %v121_v47 = vsel %vm117_vm5, %v369_v26, 0  ;;  %vm144_vm8 = vmpackc.low %vm143_vm7, %vm142_vm6  ;;  %vm129_vm9 = vcmp.eq.s32.totalorder %v327_v10, 2  ;;  %vm174_vm11 = vcmp.eq.s32.totalorder %v305_v1, 3  ;;  %v132_v49 = vsel %vm128_vm10, 1, %v271_v4 }
  0x13   :  { %125 = vst.msk [vmem:[%s529_s3 + $0x3] sm:$0x1] %vm73_vm0, %v121_v47  ;;  %v166_v48 = vsel %vm144_vm8, %v341_v16, 0  ;;  %vm149_vm12 = vcmp.ne.s32.totalorder %v256_v46, %v314_v5  ;;  %vm150_vm13 = vcmp.ne.s32.totalorder %v256_v46, %v317_v6  ;;  %v258_v50 = vunpack.i.l.s16 %v132_v49 }
  0x14   :  { %170 = vst.msk [vmem:[%s530_s4] sm:$0x1] %vm73_vm0, %v166_v48  ;;  %vm151_vm3 = vmpackc.low %vm150_vm13, %vm149_vm12  ;;  %v133_v51 = vsel %vm129_vm9, 1, %v271_v4  ;;  %v178_v52 = vsel %vm174_vm11, 1, %v271_v4  ;;  %vm175_vm14 = vcmp.eq.s32.totalorder %v319_v7, 3  ;;  %vm176_vm2 = vcmp.eq.s32.totalorder %v321_v8, 3 }
  0x15   :  { %v167_v53 = vsel %vm151_vm3, %v349_v21, 0  ;;  %v260_v54 = vunpack.i.l.s16 %v133_v51  ;;  %v262_v55 = vunpack.i.l.s16 %v178_v52  ;;  %v179_v56 = vsel %vm175_vm14, 1, %v271_v4 }
  0x16   :  { %171 = vst.msk [vmem:[%s530_s4 + $0x1] sm:$0x1] %vm73_vm0, %v167_v53  ;;  %vm156_vm15 = vcmp.ne.s32.totalorder %v258_v50, %v314_v5  ;;  %vm157_vm1 = vcmp.ne.s32.totalorder %v258_v50, %v317_v6  ;;  %v264_v57 = vunpack.i.l.s16 %v179_v56  ;;  %v180_v59 = vsel %vm176_vm2, 1, %v271_v4 }
  0x17   :  { %vm158_vm4 = vmpackc.low %vm157_vm1, %vm156_vm15  ;;  %vm163_vm5 = vcmp.ne.s32.totalorder %v260_v54, %v314_v5  ;;  %vm164_vm6 = vcmp.ne.s32.totalorder %v260_v54, %v317_v6  ;;  %vm190_vm7 = vcmp.ne.s32.totalorder %v262_v55, %v314_v5  ;;  %vm191_vm8 = vcmp.ne.s32.totalorder %v262_v55, %v317_v6 }
  0x18   :  { %v168_v58 = vsel %vm158_vm4, %v357_v23, 0  ;;  %vm165_vm10 = vmpackc.low %vm164_vm6, %vm163_vm5  ;;  %vm197_vm9 = vcmp.ne.s32.totalorder %v264_v57, %v314_v5  ;;  %vm198_vm11 = vcmp.ne.s32.totalorder %v264_v57, %v317_v6  ;;  %v266_v61 = vunpack.i.l.s16 %v180_v59 }
  0x19   :  { %172 = vst.msk [vmem:[%s530_s4 + $0x2] sm:$0x1] %vm73_vm0, %v168_v58  ;;  %v169_v60 = vsel %vm165_vm10, %v369_v26, 0  ;;  %vm192_vm12 = vmpackc.low %vm191_vm8, %vm190_vm7  ;;  %vm177_vm13 = vcmp.eq.s32.totalorder %v327_v10, 3 }
  0x1a   :  { %173 = vst.msk [vmem:[%s530_s4 + $0x3] sm:$0x1] %vm73_vm0, %v169_v60  ;;  %v214_v62 = vsel %vm192_vm12, %v341_v16, 0  ;;  %vm199_vm3 = vmpackc.low %vm198_vm11, %vm197_vm9  ;;  %v181_v63 = vsel %vm177_vm13, 1, %v271_v4  ;;  %vm204_vm14 = vcmp.ne.s32.totalorder %v266_v61, %v314_v5  ;;  %vm205_vm15 = vcmp.ne.s32.totalorder %v266_v61, %v317_v6 }
  0x1b   :  { %218 = vst.msk [vmem:[%s531_s5] sm:$0x1] %vm73_vm0, %v214_v62  ;;  %v215_v0 = vsel %vm199_vm3, %v349_v21, 0  ;;  %v268_v1 = vunpack.i.l.s16 %v181_v63  ;;  %vm206_vm1 = vmpackc.low %vm205_vm15, %vm204_vm14 }
  0x1c   :  { %219 = vst.msk [vmem:[%s531_s5 + $0x1] sm:$0x1] %vm73_vm0, %v215_v0  ;;  %v216_v2 = vsel %vm206_vm1, %v357_v23, 0 }
  0x1d   :  { %vm211_vm2 = vcmp.ne.s32.totalorder %v268_v1, %v314_v5  ;;  %vm212_vm4 = vcmp.ne.s32.totalorder %v268_v1, %v317_v6  ;;  %220 = vst.msk [vmem:[%s531_s5 + $0x2] sm:$0x1] %vm73_vm0, %v216_v2 }
  0x1e   :  { %vm213_vm5 = vmpackc.low %vm212_vm4, %vm211_vm2 }
  0x1f   :  { %v217_v3 = vsel %vm213_vm5, %v369_v26, 0 }
  0x20   :  { %221 = vst.msk [vmem:[%s531_s5 + $0x3] sm:$0x1] %vm73_vm0, %v217_v3 }

// kernel: horseshoe_forward.22
= control target key start
LH: loop header
LB: loop body
LE: loop exit
PB: predicated region body
PF: predicated region fallthrough
CT: control target
= control target key end

     0   :  { %vm141_vm0 = vcmask 130048   ;;  %vm267_vm1 = vcmask 125952   ;;  %s554_s1 = inlined_call_operand.vmem [shape: bf16[144,16], index: 1, kind: input, shape index: {}]   ;;  %s555_s0 = inlined_call_operand.vmem [shape: bf16[72,144], index: 0, kind: input, shape index: {}]   ;;  %s556_s2 = inlined_call_operand.vmem [shape: f32[1,16], index: 2, kind: input, shape index: {}]   ;;  %s557_s3 = inlined_call_operand.vmem [shape: f32[1,16], index: 3, kind: input, shape index: {}]   ;;  %s558_s4 = inlined_call_operand.vmem [shape: bf16[72,16], index: 4, kind: output, shape index: {}]  }
   0x1   :  { %v369_v0 = vld [vmem:[%s554_s1 + $0x38] sm:$0xff]  ;;  %v370_v1 = vld [vmem:[%s554_s1 + $0x40] sm:$0xff]  ;;  %v356_v2 = vld [vmem:[%s555_s0 + $0x14] sm:$0xf] }
   0x2   :  { %v293_v3 = vld [vmem:[%s555_s0 + $0x18] sm:$0xf0]  ;;  %157 = vmatpush.bf16.msra.mxu0 %v369_v0  ;;  %371 = vmatpush.bf16.msra.mxu2 %v369_v0  ;;  %v368_v4 = vld [vmem:[%s554_s1 + $0x30] sm:$0xff]  ;;  %v354_v6 = vld [vmem:[%s555_s0 + $0x4] sm:$0xf] }
   0x3   :  { %379 = vmatpush.bf16.msra.mxu3 %v370_v1  ;;  %v296_v5 = vor.u32 %v356_v2, %v293_v3  ;;  %197 = vmatpush.bf16.msra.mxu1 %v370_v1  ;;  %v367_v7 = vld [vmem:[%s554_s1 + $0x28] sm:$0xff]  ;;  %v366_v10 = vld [vmem:[%s554_s1 + $0x20] sm:$0xff]  ;;  %v365_v11 = vld [vmem:[%s554_s1 + $0x18] sm:$0xff] }
   0x4   :  { %v285_v8 = vld [vmem:[%s555_s0 + $0x8] sm:$0xf0]  ;;  %v358_v12 = vld [vmem:[%s555_s0 + $0x24] sm:$0xf]  ;;  %v364_v14 = vld [vmem:[%s554_s1 + $0x10] sm:$0xff] }
   0x5   :  { %v288_v9 = vor.u32 %v354_v6, %v285_v8  ;;  %v301_v13 = vld [vmem:[%s555_s0 + $0x28] sm:$0xf0]  ;;  %v362_v17 = vld [vmem:[%s554_s1] sm:$0xff]  ;;  %v355_v19 = vld [vmem:[%s555_s0 + $0x4] sm:$0xf0] }
   0x6   :  { %158 = vmatpush.bf16.msra.mxu0 %v368_v4  ;;  %372 = vmatpush.bf16.msra.mxu2 %v368_v4  ;;  %v304_v15 = vor.u32 %v358_v12, %v301_v13  ;;  %v363_v16 = vld [vmem:[%s554_s1 + $0x8] sm:$0xff]  ;;  %v283_v18 = vld [vmem:[%s555_s0] sm:$0xf]  ;;  %v360_v24 = vld [vmem:[%s555_s0 + $0x34] sm:$0xf] }
   0x7   :  { %350 = vmatmul.msk.bf16.vlgmr.msra.gmra.mxu3 %vm141_vm0, %v296_v5  ;;  %349 = vmatmul.msk.bf16.vlgmr.msra.gmra.mxu1 %vm141_vm0, %v288_v9  ;;  %v299_v20 = vld [vmem:[%s555_s0 + $0x20] sm:$0xf]  ;;  %v359_v21 = vld [vmem:[%s555_s0 + $0x24] sm:$0xf0]  ;;  %v284_v22 = vor.u32 %v355_v19, %v283_v18  ;;  %v309_v25 = vld [vmem:[%s555_s0 + $0x38] sm:$0xf0] }
   0x8   :  { %v300_v23 = vor.u32 %v359_v21, %v299_v20  ;;  %v312_v26 = vor.u32 %v360_v24, %v309_v25  ;;  %v291_v27 = vld [vmem:[%s555_s0 + $0x10] sm:$0xf]  ;;  %v357_v28 = vld [vmem:[%s555_s0 + $0x14] sm:$0xf0]  ;;  %v26_v31 = vld [vmem:[%s555_s0 + $0x40] sm:$0xff] }
   0x9   :  { %v307_v29 = vld [vmem:[%s555_s0 + $0x30] sm:$0xf]  ;;  %v361_v30 = vld [vmem:[%s555_s0 + $0x34] sm:$0xf0]  ;;  %v292_v32 = vor.u32 %v357_v28, %v291_v27  ;;  %v71_v34 = vunpack.c.h.b16 %v26_v31  ;;  %v70_v36 = vunpack.c.l.b16 %v26_v31  ;;  %v493_v43 = vld [vmem:[%s556_s2] ss:$0 sm:$0xff] }
   0xa   :  { %159 = vmatpush.bf16.msra.mxu0 %v367_v7  ;;  %373 = vmatpush.bf16.msra.mxu2 %v367_v7  ;;  %v308_v33 = vor.u32 %v361_v30, %v307_v29  ;;  %v498_v45 = vld [vmem:[%s557_s3] ss:$0 sm:$0xff] }
   0xb   :  { %v81_v35 = vpack.c.b16 %v71_v34, %v71_v34  ;;  %v80_v37 = vpack.c.b16 %v70_v36, %v70_v36 }
   0xe   :  { %160 = vmatpush.bf16.msra.mxu0 %v366_v10  ;;  %374 = vmatpush.bf16.msra.mxu2 %v366_v10 }
  0x12   :  { %161 = vmatpush.bf16.msra.mxu0 %v365_v11  ;;  %375 = vmatpush.bf16.msra.mxu2 %v365_v11 }
  0x16   :  { %162 = vmatpush.bf16.msra.mxu0 %v364_v14  ;;  %376 = vmatpush.bf16.msra.mxu2 %v364_v14 }
  0x17   :  { %351 = vmatmul.msk.bf16.gmra.mxu3 %vm141_vm0, %v304_v15 }
  0x1a   :  { %163 = vmatpush.bf16.msra.mxu0 %v363_v16  ;;  %377 = vmatpush.bf16.msra.mxu2 %v363_v16 }
  0x1e   :  { %164 = vmatpush.bf16.msra.mxu0 %v362_v17  ;;  %378 = vmatpush.bf16.msra.mxu2 %v362_v17 }
  0x21   :  { %165 = vmatmul.bf16.vlgmr.msra.gmra.mxu0 %v284_v22  ;;  %175 = vmatmul.bf16.vlgmr.msra.gmra.mxu2 %v300_v23 }
  0x27   :  { %352 = vmatmul.msk.bf16.gmra.mxu3 %vm141_vm0, %v312_v26 }
  0x31   :  { %170 = vmatmul.bf16.gmra.mxu0 %v292_v32  ;;  %180 = vmatmul.bf16.gmra.mxu2 %v308_v33 }
  0x37   :  { %353 = vmatmul.msk.bf16.gmra.mxu3 %vm141_vm0, %v81_v35 }
  0x41   :  { %185 = vmatmul.bf16.gmra.mxu2 %v80_v37 }
  0x84   :  { %v199_v41 = vpop.f32.mrf.mxu1 }
  0x8a   :  { %v204_v38 = vpop.f32.mrf.mxu3 }
  0x8c   :  { %v201_v50 = vpop.f32.mrf.mxu1 }
  0x92   :  { %v206_v39 = vpop.f32.mrf.mxu3 }
  0x9a   :  { %v209_v40 = vpop.f32.mrf.mxu3 }
  0x9e   :  { %v166_v42 = vpop.f32.mrf.mxu0 }
  0x9f   :  { %v200_v44 = vadd.f32 %v199_v41, %v166_v42 }
  0xa1   :  { %v227_v46 = vmul.f32 %v493_v43, %v200_v44 }
  0xa2   :  { %v211_v47 = vpop.f32.mrf.mxu3 }
  0xa3   :  { %v240_v48 = vadd.f32 %v498_v45, %v227_v46 }
  0xa4   :  { %v176_v49 = vpop.f32.mrf.mxu2 }
  0xa5   :  { %v210_v51 = vadd.f32 %v209_v40, %v176_v49  ;;  %v249_v52 = vmax.f32 %v240_v48, 0.0 }
  0xa6   :  { %v168_v53 = vpop.f32.mrf.mxu0 }
  0xa7   :  { %v231_v54 = vmul.f32 %v493_v43, %v210_v51  ;;  %v258_v55 = vpack.c.bf16 %v249_v52, %v249_v52  ;;  %v202_v56 = vadd.f32 %v201_v50, %v168_v53 }
  0xa9   :  { %v244_v57 = vadd.f32 %v498_v45, %v231_v54  ;;  %268 = vst.msk [vmem:[%s558_s4] sm:$0xf] %vm267_vm1, %v258_v55  ;;  %v228_v58 = vmul.f32 %v493_v43, %v202_v56 }
  0xaa   :  { %v214_v59 = vpop.f32.mrf.mxu3 }
  0xab   :  { %v253_v60 = vmax.f32 %v244_v57, 0.0  ;;  %v241_v61 = vadd.f32 %v498_v45, %v228_v58 }
  0xac   :  { %v178_v62 = vpop.f32.mrf.mxu2 }
  0xad   :  { %v262_v63 = vpack.c.bf16 %v253_v60, %v253_v60  ;;  %v212_v0 = vadd.f32 %v211_v47, %v178_v62  ;;  %v250_v1 = vmax.f32 %v241_v61, 0.0 }
  0xae   :  { %v171_v2 = vpop.f32.mrf.mxu0 }
  0xaf   :  { %272 = vst.msk [vmem:[%s558_s4 + $0x10] sm:$0xf] %vm267_vm1, %v262_v63  ;;  %v232_v3 = vmul.f32 %v493_v43, %v212_v0  ;;  %v259_v4 = vpack.c.bf16 %v250_v1, %v250_v1  ;;  %v205_v5 = vadd.f32 %v204_v38, %v171_v2 }
  0xb1   :  { %v245_v6 = vadd.f32 %v498_v45, %v232_v3  ;;  %269 = vst.msk [vmem:[%s558_s4 + $0x4] sm:$0xf] %vm267_vm1, %v259_v4  ;;  %v229_v7 = vmul.f32 %v493_v43, %v205_v5 }
  0xb2   :  { %v216_v8 = vpop.f32.mrf.mxu3 }
  0xb3   :  { %v254_v9 = vmax.f32 %v245_v6, 0.0  ;;  %v242_v10 = vadd.f32 %v498_v45, %v229_v7 }
  0xb4   :  { %v181_v11 = vpop.f32.mrf.mxu2 }
  0xb5   :  { %v263_v12 = vpack.c.bf16 %v254_v9, %v254_v9  ;;  %v251_v13 = vmax.f32 %v242_v10, 0.0  ;;  %v215_v14 = vadd.f32 %v214_v59, %v181_v11 }
  0xb6   :  { %v173_v15 = vpop.f32.mrf.mxu0 }
  0xb7   :  { %273 = vst.msk [vmem:[%s558_s4 + $0x14] sm:$0xf] %vm267_vm1, %v263_v12  ;;  %v260_v16 = vpack.c.bf16 %v251_v13, %v251_v13  ;;  %v233_v17 = vmul.f32 %v493_v43, %v215_v14  ;;  %v207_v18 = vadd.f32 %v206_v39, %v173_v15 }
  0xb9   :  { %270 = vst.msk [vmem:[%s558_s4 + $0x8] sm:$0xf] %vm267_vm1, %v260_v16  ;;  %v246_v19 = vadd.f32 %v498_v45, %v233_v17  ;;  %v230_v20 = vmul.f32 %v493_v43, %v207_v18 }
  0xba   :  { %v219_v21 = vpop.f32.mrf.mxu3 }
  0xbb   :  { %v255_v22 = vmax.f32 %v246_v19, 0.0  ;;  %v243_v23 = vadd.f32 %v498_v45, %v230_v20 }
  0xbc   :  { %v183_v24 = vpop.f32.mrf.mxu2 }
  0xbd   :  { %v264_v25 = vpack.c.bf16 %v255_v22, %v255_v22  ;;  %v252_v26 = vmax.f32 %v243_v23, 0.0  ;;  %v217_v27 = vadd.f32 %v216_v8, %v183_v24 }
  0xbf   :  { %274 = vst.msk [vmem:[%s558_s4 + $0x18] sm:$0xf] %vm267_vm1, %v264_v25  ;;  %v261_v28 = vpack.c.bf16 %v252_v26, %v252_v26  ;;  %v234_v29 = vmul.f32 %v493_v43, %v217_v27 }
  0xc1   :  { %271 = vst.msk [vmem:[%s558_s4 + $0xc] sm:$0xf] %vm267_vm1, %v261_v28  ;;  %v247_v30 = vadd.f32 %v498_v45, %v234_v29 }
  0xc2   :  { %v221_v31 = vpop.f32.mrf.mxu3 }
  0xc3   :  { %v256_v32 = vmax.f32 %v247_v30, 0.0 }
  0xc4   :  { %v186_v33 = vpop.f32.mrf.mxu2 }
  0xc5   :  { %v265_v34 = vpack.c.bf16 %v256_v32, %v256_v32  ;;  %v220_v35 = vadd.f32 %v219_v21, %v186_v33 }
  0xc7   :  { %275 = vst.msk [vmem:[%s558_s4 + $0x1c] sm:$0xf] %vm267_vm1, %v265_v34  ;;  %v235_v36 = vmul.f32 %v493_v43, %v220_v35 }
  0xc9   :  { %v248_v37 = vadd.f32 %v498_v45, %v235_v36 }
  0xcb   :  { %v257_v38 = vmax.f32 %v248_v37, 0.0 }
  0xcc   :  { %v188_v39 = vpop.f32.mrf.mxu2 }
  0xcd   :  { %v266_v40 = vpack.c.bf16 %v257_v38, %v257_v38 }
  0xcf   :  { %276 = vst.msk [vmem:[%s558_s4 + $0x20] sm:$0xf] %vm267_vm1, %v266_v40 }

// kernel: horseshoe_forward.23
= control target key start
LH: loop header
LB: loop body
LE: loop exit
PB: predicated region body
PF: predicated region fallthrough
CT: control target
= control target key end

     0   :  { %vm178_vm0 = vcmask 130048   ;;  %vm373_vm1 = vcmask 60416   ;;  %s803_s1 = inlined_call_operand.vmem [shape: bf16[144,8], index: 1, kind: input, shape index: {}]   ;;  %s804_s0 = inlined_call_operand.vmem [shape: bf16[128,144], index: 0, kind: input, shape index: {}]   ;;  %s805_s2 = inlined_call_operand.vmem [shape: f32[1,8], index: 2, kind: input, shape index: {}]   ;;  %s806_s3 = inlined_call_operand.vmem [shape: f32[1,8], index: 3, kind: input, shape index: {}]   ;;  %s807_s4 = inlined_call_operand.vmem [shape: bf16[128,8], index: 4, kind: output, shape index: {}]  }
   0x1   :  { %v525_v0 = vld [vmem:[%s803_s1 + $0x38] sm:$0xff]  ;;  %v526_v1 = vld [vmem:[%s803_s1 + $0x40] sm:$0xff]  ;;  %v398_v3 = vld [vmem:[%s804_s0 + $0x8] sm:$0xf0] }
   0x2   :  { %v502_v2 = vld [vmem:[%s804_s0 + $0x4] sm:$0xf]  ;;  %203 = vmatpush.bf16.msra.mxu0 %v525_v0  ;;  %527 = vmatpush.bf16.msra.mxu2 %v525_v0  ;;  %v524_v5 = vld [vmem:[%s803_s1 + $0x30] sm:$0xff]  ;;  %v523_v6 = vld [vmem:[%s803_s1 + $0x28] sm:$0xff] }
   0x3   :  { %v401_v4 = vor.u32 %v502_v2, %v398_v3  ;;  %259 = vmatpush.bf16.msra.mxu1 %v526_v1  ;;  %535 = vmatpush.bf16.msra.mxu3 %v526_v1  ;;  %v512_v7 = vld [vmem:[%s804_s0 + $0x54] sm:$0xf]  ;;  %v438_v8 = vld [vmem:[%s804_s0 + $0x58] sm:$0xf0]  ;;  %v522_v10 = vld [vmem:[%s803_s1 + $0x20] sm:$0xff] }
   0x4   :  { %v441_v9 = vor.u32 %v512_v7, %v438_v8  ;;  %v521_v11 = vld [vmem:[%s803_s1 + $0x18] sm:$0xff]  ;;  %v504_v12 = vld [vmem:[%s804_s0 + $0x14] sm:$0xf]  ;;  %v519_v16 = vld [vmem:[%s803_s1 + $0x8] sm:$0xff] }
   0x5   :  { %v406_v13 = vld [vmem:[%s804_s0 + $0x18] sm:$0xf0]  ;;  %v520_v15 = vld [vmem:[%s803_s1 + $0x10] sm:$0xff]  ;;  %v514_v17 = vld [vmem:[%s804_s0 + $0x64] sm:$0xf] }
   0x6   :  { %494 = vmatmul.msk.bf16.vlgmr.msra.gmra.mxu1 %vm178_vm0, %v401_v4  ;;  %204 = vmatpush.bf16.msra.mxu0 %v524_v5  ;;  %v409_v14 = vor.u32 %v504_v12, %v406_v13  ;;  %v446_v18 = vld [vmem:[%s804_s0 + $0x68] sm:$0xf0]  ;;  %v518_v20 = vld [vmem:[%s803_s1] sm:$0xff]  ;;  %v503_v22 = vld [vmem:[%s804_s0 + $0x4] sm:$0xf0] }
   0x7   :  { %528 = vmatpush.bf16.msra.mxu2 %v524_v5  ;;  %499 = vmatmul.msk.bf16.vlgmr.msra.gmra.mxu3 %vm178_vm0, %v441_v9  ;;  %v449_v19 = vor.u32 %v514_v17, %v446_v18  ;;  %v396_v21 = vld [vmem:[%s804_s0] sm:$0xf]  ;;  %v511_v24 = vld [vmem:[%s804_s0 + $0x44] sm:$0xf0]  ;;  %v506_v27 = vld [vmem:[%s804_s0 + $0x24] sm:$0xf] }
   0x8   :  { %v428_v23 = vld [vmem:[%s804_s0 + $0x40] sm:$0xf]  ;;  %v397_v25 = vor.u32 %v503_v22, %v396_v21  ;;  %v414_v28 = vld [vmem:[%s804_s0 + $0x28] sm:$0xf0]  ;;  %v516_v30 = vld [vmem:[%s804_s0 + $0x74] sm:$0xf] }
   0x9   :  { %v429_v26 = vor.u32 %v511_v24, %v428_v23  ;;  %v417_v29 = vor.u32 %v506_v27, %v414_v28  ;;  %v454_v31 = vld [vmem:[%s804_s0 + $0x78] sm:$0xf0]  ;;  %v404_v33 = vld [vmem:[%s804_s0 + $0x10] sm:$0xf]  ;;  %v505_v34 = vld [vmem:[%s804_s0 + $0x14] sm:$0xf0] }
   0xa   :  { %205 = vmatpush.bf16.msra.mxu0 %v523_v6  ;;  %v457_v32 = vor.u32 %v516_v30, %v454_v31  ;;  %v436_v35 = vld [vmem:[%s804_s0 + $0x50] sm:$0xf]  ;;  %v513_v36 = vld [vmem:[%s804_s0 + $0x54] sm:$0xf0]  ;;  %v405_v37 = vor.u32 %v505_v34, %v404_v33  ;;  %v508_v39 = vld [vmem:[%s804_s0 + $0x34] sm:$0xf] }
   0xb   :  { %529 = vmatpush.bf16.msra.mxu2 %v523_v6  ;;  %v437_v38 = vor.u32 %v513_v36, %v436_v35  ;;  %v422_v40 = vld [vmem:[%s804_s0 + $0x38] sm:$0xf0]  ;;  %v412_v42 = vld [vmem:[%s804_s0 + $0x20] sm:$0xf]  ;;  %v507_v43 = vld [vmem:[%s804_s0 + $0x24] sm:$0xf0] }
   0xc   :  { %v425_v41 = vor.u32 %v508_v39, %v422_v40  ;;  %v444_v44 = vld [vmem:[%s804_s0 + $0x60] sm:$0xf]  ;;  %v515_v45 = vld [vmem:[%s804_s0 + $0x64] sm:$0xf0]  ;;  %v413_v46 = vor.u32 %v507_v43, %v412_v42  ;;  %v510_v48 = vld [vmem:[%s804_s0 + $0x44] sm:$0xf] }
   0xd   :  { %v445_v47 = vor.u32 %v515_v45, %v444_v44  ;;  %v430_v49 = vld [vmem:[%s804_s0 + $0x48] sm:$0xf0]  ;;  %v420_v51 = vld [vmem:[%s804_s0 + $0x30] sm:$0xf]  ;;  %v509_v52 = vld [vmem:[%s804_s0 + $0x34] sm:$0xf0] }
   0xe   :  { %206 = vmatpush.bf16.msra.mxu0 %v522_v10  ;;  %v433_v50 = vor.u32 %v510_v48, %v430_v49  ;;  %v452_v53 = vld [vmem:[%s804_s0 + $0x70] sm:$0xf]  ;;  %v517_v54 = vld [vmem:[%s804_s0 + $0x74] sm:$0xf0]  ;;  %v421_v55 = vor.u32 %v509_v52, %v420_v51  ;;  %v697_v61 = vld [vmem:[%s805_s2] ss:$0 sm:$0xff] }
   0xf   :  { %530 = vmatpush.bf16.msra.mxu2 %v522_v10  ;;  %v453_v56 = vor.u32 %v517_v54, %v452_v53  ;;  %v702_v0 = vld [vmem:[%s806_s3] ss:$0 sm:$0xff] }
  0x12   :  { %207 = vmatpush.bf16.msra.mxu0 %v521_v11 }
  0x13   :  { %531 = vmatpush.bf16.msra.mxu2 %v521_v11 }
  0x16   :  { %495 = vmatmul.msk.bf16.gmra.mxu1 %vm178_vm0, %v409_v14  ;;  %208 = vmatpush.bf16.msra.mxu0 %v520_v15 }
  0x17   :  { %532 = vmatpush.bf16.msra.mxu2 %v520_v15  ;;  %500 = vmatmul.msk.bf16.gmra.mxu3 %vm178_vm0, %v449_v19 }
  0x1a   :  { %209 = vmatpush.bf16.msra.mxu0 %v519_v16 }
  0x1b   :  { %533 = vmatpush.bf16.msra.mxu2 %v519_v16 }
  0x1e   :  { %210 = vmatpush.bf16.msra.mxu0 %v518_v20 }
  0x1f   :  { %534 = vmatpush.bf16.msra.mxu2 %v518_v20 }
  0x21   :  { %211 = vmatmul.bf16.vlgmr.msra.gmra.mxu0 %v397_v25 }
  0x22   :  { %231 = vmatmul.bf16.vlgmr.msra.gmra.mxu2 %v429_v26 }
  0x26   :  { %496 = vmatmul.msk.bf16.gmra.mxu1 %vm178_vm0, %v417_v29 }
  0x27   :  { %501 = vmatmul.msk.bf16.gmra.mxu3 %vm178_vm0, %v457_v32 }
  0x31   :  { %216 = vmatmul.bf16.gmra.mxu0 %v405_v37 }
  0x32   :  { %236 = vmatmul.bf16.gmra.mxu2 %v437_v38 }
  0x36   :  { %497 = vmatmul.msk.bf16.gmra.mxu1 %vm178_vm0, %v425_v41 }
  0x41   :  { %221 = vmatmul.bf16.gmra.mxu0 %v413_v46 }
  0x42   :  { %241 = vmatmul.bf16.gmra.mxu2 %v445_v47 }
  0x46   :  { %498 = vmatmul.msk.bf16.gmra.mxu1 %vm178_vm0, %v433_v50 }
  0x51   :  { %226 = vmatmul.bf16.gmra.mxu0 %v421_v55 }
  0x52   :  { %246 = vmatmul.bf16.gmra.mxu2 %v453_v56 }
  0x83   :  { %v261_v57 = vpop.f32.mrf.mxu1 }
  0x8a   :  { %v286_v12 = vpop.f32.mrf.mxu3 }
  0x8b   :  { %v263_v58 = vpop.f32.mrf.mxu1 }
  0x92   :  { %v288_v23 = vpop.f32.mrf.mxu3 }
  0x93   :  { %v266_v59 = vpop.f32.mrf.mxu1 }
  0x9a   :  { %v291_v40 = vpop.f32.mrf.mxu3 }
  0x9b   :  { %v268_v60 = vpop.f32.mrf.mxu1 }
  0x9e   :  { %v212_v62 = vpop.f32.mrf.mxu0 }
  0x9f   :  { %v262_v63 = vadd.f32 %v261_v57, %v212_v62 }
  0xa1   :  { %v305_v1 = vmul.f32 %v697_v61, %v262_v63 }
  0xa3   :  { %v325_v2 = vadd.f32 %v702_v0, %v305_v1  ;;  %v271_v3 = vpop.f32.mrf.mxu1 }
  0xa5   :  { %v341_v4 = vmax.f32 %v325_v2, 0.0  ;;  %v232_v5 = vpop.f32.mrf.mxu2 }
  0xa6   :  { %v214_v6 = vpop.f32.mrf.mxu0 }
  0xa7   :  { %v357_v7 = vpack.c.bf16 %v341_v4, %v341_v4  ;;  %v264_v8 = vadd.f32 %v263_v58, %v214_v6 }
  0xa9   :  { %374 = vst.msk [vmem:[%s807_s4] sm:$0xf] %vm373_vm1, %v357_v7  ;;  %v306_v9 = vmul.f32 %v697_v61, %v264_v8 }
  0xab   :  { %v326_v10 = vadd.f32 %v702_v0, %v306_v9  ;;  %v273_v11 = vpop.f32.mrf.mxu1 }
  0xad   :  { %v342_v13 = vmax.f32 %v326_v10, 0.0  ;;  %v234_v14 = vpop.f32.mrf.mxu2 }
  0xae   :  { %v217_v15 = vpop.f32.mrf.mxu0 }
  0xaf   :  { %v358_v16 = vpack.c.bf16 %v342_v13, %v342_v13  ;;  %v267_v17 = vadd.f32 %v266_v59, %v217_v15  ;;  %v293_v59 = vpop.f32.mrf.mxu3 }
  0xb1   :  { %375 = vst.msk [vmem:[%s807_s4 + $0x4] sm:$0xf] %vm373_vm1, %v358_v16  ;;  %v307_v18 = vmul.f32 %v697_v61, %v267_v17 }
  0xb3   :  { %v327_v19 = vadd.f32 %v702_v0, %v307_v18  ;;  %v276_v20 = vpop.f32.mrf.mxu1 }
  0xb5   :  { %v343_v21 = vmax.f32 %v327_v19, 0.0  ;;  %v237_v22 = vpop.f32.mrf.mxu2 }
  0xb6   :  { %v287_v24 = vadd.f32 %v286_v12, %v237_v22  ;;  %v219_v25 = vpop.f32.mrf.mxu0 }
  0xb7   :  { %v359_v26 = vpack.c.bf16 %v343_v21, %v343_v21  ;;  %v269_v27 = vadd.f32 %v268_v60, %v219_v25  ;;  %v296_v19 = vpop.f32.mrf.mxu3 }
  0xb8   :  { %v315_v28 = vmul.f32 %v697_v61, %v287_v24 }
  0xb9   :  { %376 = vst.msk [vmem:[%s807_s4 + $0x8] sm:$0xf] %vm373_vm1, %v359_v26  ;;  %v308_v29 = vmul.f32 %v697_v61, %v269_v27 }
  0xba   :  { %v335_v30 = vadd.f32 %v702_v0, %v315_v28 }
  0xbb   :  { %v328_v31 = vadd.f32 %v702_v0, %v308_v29  ;;  %v726_v32 = vpop.f32.mrf.mxu1 }
  0xbc   :  { %v351_v33 = vmax.f32 %v335_v30, 0.0 }
  0xbd   :  { %v344_v34 = vmax.f32 %v328_v31, 0.0  ;;  %v239_v35 = vpop.f32.mrf.mxu2 }
  0xbe   :  { %v367_v36 = vpack.c.bf16 %v351_v33, %v351_v33  ;;  %v289_v37 = vadd.f32 %v288_v23, %v239_v35  ;;  %v222_v38 = vpop.f32.mrf.mxu0 }
  0xbf   :  { %v360_v39 = vpack.c.bf16 %v344_v34, %v344_v34  ;;  %v272_v41 = vadd.f32 %v271_v3, %v222_v38 }
  0xc0   :  { %384 = vst.msk [vmem:[%s807_s4 + $0x28] sm:$0xf] %vm373_vm1, %v367_v36  ;;  %v316_v42 = vmul.f32 %v697_v61, %v289_v37 }
  0xc1   :  { %377 = vst.msk [vmem:[%s807_s4 + $0xc] sm:$0xf] %vm373_vm1, %v360_v39  ;;  %v309_v43 = vmul.f32 %v697_v61, %v272_v41 }
  0xc2   :  { %v336_v44 = vadd.f32 %v702_v0, %v316_v42 }
  0xc3   :  { %v329_v45 = vadd.f32 %v702_v0, %v309_v43  ;;  %v281_v46 = vpop.f32.mrf.mxu1 }
  0xc4   :  { %v352_v47 = vmax.f32 %v336_v44, 0.0  ;;  %v282_v48 = vadd.f32 %v281_v46, %v232_v5 }
  0xc5   :  { %v345_v49 = vmax.f32 %v329_v45, 0.0  ;;  %v242_v50 = vpop.f32.mrf.mxu2 }
  0xc6   :  { %v368_v51 = vpack.c.bf16 %v352_v47, %v352_v47  ;;  %v313_v52 = vmul.f32 %v697_v61, %v282_v48  ;;  %v292_v53 = vadd.f32 %v291_v40, %v242_v50  ;;  %v224_v54 = vpop.f32.mrf.mxu0 }
  0xc7   :  { %v361_v55 = vpack.c.bf16 %v345_v49, %v345_v49  ;;  %v274_v56 = vadd.f32 %v273_v11, %v224_v54 }
  0xc8   :  { %385 = vst.msk [vmem:[%s807_s4 + $0x2c] sm:$0xf] %vm373_vm1, %v368_v51  ;;  %v333_v57 = vadd.f32 %v702_v0, %v313_v52  ;;  %v317_v58 = vmul.f32 %v697_v61, %v292_v53 }
  0xc9   :  { %378 = vst.msk [vmem:[%s807_s4 + $0x10] sm:$0xf] %vm373_vm1, %v361_v55  ;;  %v310_v60 = vmul.f32 %v697_v61, %v274_v56 }
  0xca   :  { %v349_v62 = vmax.f32 %v333_v57, 0.0  ;;  %v337_v63 = vadd.f32 %v702_v0, %v317_v58 }
  0xcb   :  { %v330_v1 = vadd.f32 %v702_v0, %v310_v60  ;;  %v283_v2 = vpop.f32.mrf.mxu1 }
  0xcc   :  { %v365_v3 = vpack.c.bf16 %v349_v62, %v349_v62  ;;  %v353_v4 = vmax.f32 %v337_v63, 0.0  ;;  %v284_v5 = vadd.f32 %v283_v2, %v234_v14 }
  0xcd   :  { %v346_v6 = vmax.f32 %v330_v1, 0.0  ;;  %v244_v7 = vpop.f32.mrf.mxu2 }
  0xce   :  { %382 = vst.msk [vmem:[%s807_s4 + $0x20] sm:$0xf] %vm373_vm1, %v365_v3  ;;  %v369_v8 = vpack.c.bf16 %v353_v4, %v353_v4  ;;  %v314_v9 = vmul.f32 %v697_v61, %v284_v5  ;;  %v294_v10 = vadd.f32 %v293_v59, %v244_v7  ;;  %v227_v11 = vpop.f32.mrf.mxu0 }
  0xcf   :  { %v362_v12 = vpack.c.bf16 %v346_v6, %v346_v6  ;;  %v277_v13 = vadd.f32 %v276_v20, %v227_v11 }
  0xd0   :  { %386 = vst.msk [vmem:[%s807_s4 + $0x30] sm:$0xf] %vm373_vm1, %v369_v8  ;;  %v334_v14 = vadd.f32 %v702_v0, %v314_v9  ;;  %v318_v15 = vmul.f32 %v697_v61, %v294_v10 }
  0xd1   :  { %379 = vst.msk [vmem:[%s807_s4 + $0x14] sm:$0xf] %vm373_vm1, %v362_v12  ;;  %v311_v16 = vmul.f32 %v697_v61, %v277_v13 }
  0xd2   :  { %v350_v17 = vmax.f32 %v334_v14, 0.0  ;;  %v338_v18 = vadd.f32 %v702_v0, %v318_v15 }
  0xd3   :  { %v331_v20 = vadd.f32 %v702_v0, %v311_v16 }
  0xd4   :  { %v366_v21 = vpack.c.bf16 %v350_v17, %v350_v17  ;;  %v354_v22 = vmax.f32 %v338_v18, 0.0 }
  0xd5   :  { %v347_v23 = vmax.f32 %v331_v20, 0.0  ;;  %v247_v24 = vpop.f32.mrf.mxu2 }
  0xd6   :  { %383 = vst.msk [vmem:[%s807_s4 + $0x24] sm:$0xf] %vm373_vm1, %v366_v21  ;;  %v370_v25 = vpack.c.bf16 %v354_v22, %v354_v22  ;;  %v297_v26 = vadd.f32 %v296_v19, %v247_v24  ;;  %v229_v27 = vpop.f32.mrf.mxu0 }
  0xd7   :  { %v363_v28 = vpack.c.bf16 %v347_v23, %v347_v23  ;;  %v279_v29 = vadd.f32 %v726_v32, %v229_v27  ;;  %v298_v32 = vpop.f32.mrf.mxu3 }
  0xd8   :  { %387 = vst.msk [vmem:[%s807_s4 + $0x34] sm:$0xf] %vm373_vm1, %v370_v25  ;;  %v319_v30 = vmul.f32 %v697_v61, %v297_v26 }
  0xd9   :  { %380 = vst.msk [vmem:[%s807_s4 + $0x18] sm:$0xf] %vm373_vm1, %v363_v28  ;;  %v312_v31 = vmul.f32 %v697_v61, %v279_v29 }
  0xda   :  { %v339_v33 = vadd.f32 %v702_v0, %v319_v30 }
  0xdb   :  { %v332_v34 = vadd.f32 %v702_v0, %v312_v31 }
  0xdc   :  { %v355_v35 = vmax.f32 %v339_v33, 0.0 }
  0xdd   :  { %v348_v36 = vmax.f32 %v332_v34, 0.0  ;;  %v249_v37 = vpop.f32.mrf.mxu2 }
  0xde   :  { %v371_v38 = vpack.c.bf16 %v355_v35, %v355_v35  ;;  %v299_v39 = vadd.f32 %v298_v32, %v249_v37 }
  0xdf   :  { %v364_v40 = vpack.c.bf16 %v348_v36, %v348_v36 }
  0xe0   :  { %388 = vst.msk [vmem:[%s807_s4 + $0x38] sm:$0xf] %vm373_vm1, %v371_v38  ;;  %v320_v41 = vmul.f32 %v697_v61, %v299_v39 }
  0xe1   :  { %381 = vst.msk [vmem:[%s807_s4 + $0x1c] sm:$0xf] %vm373_vm1, %v364_v40 }
  0xe2   :  { %v340_v42 = vadd.f32 %v702_v0, %v320_v41 }
  0xe4   :  { %v356_v43 = vmax.f32 %v340_v42, 0.0 }
  0xe6   :  { %v372_v44 = vpack.c.bf16 %v356_v43, %v356_v43 }
  0xe8   :  { %389 = vst.msk [vmem:[%s807_s4 + $0x3c] sm:$0xf] %vm373_vm1, %v372_v44 }

// kernel: horseshoe_forward.24
= control target key start
LH: loop header
LB: loop body
LE: loop exit
PB: predicated region body
PF: predicated region fallthrough
CT: control target
= control target key end

     0   :  { %vm112_vm0 = vcmask 60416   ;;  %s932_s0 = inlined_call_operand.vmem [shape: bf16[16,8,8], index: 0, kind: input, shape index: {}]   ;;  %s933_s1 = inlined_call_operand.vmem [shape: s8[16,8,8], index: 1, kind: input, shape index: {}]   ;;  %s934_s2 = inlined_call_operand.vmem [shape: bf16[16,8,8], index: 2, kind: output, shape index: {0}]   ;;  %s935_s3 = inlined_call_operand.vmem [shape: bf16[16,8,8], index: 3, kind: output, shape index: {1}]   ;;  %s936_s4 = inlined_call_operand.vmem [shape: bf16[16,8,8], index: 4, kind: output, shape index: {2}]   ;;  %s937_s5 = inlined_call_operand.vmem [shape: bf16[16,8,8], index: 5, kind: output, shape index: {3}]  }
   0x1   :  { %v338_v0 = vld [vmem:[%s933_s1] sm:$0xff]   ;;  %v370_v7 = vld [vmem:[%s933_s1 + $0x8] sm:$0xff]   ;;  %v372_v14 = vld [vmem:[%s933_s1 + $0x10] sm:$0xff]  }
   0x2   :  { %v409_v1 = vunpack.c.0.s8 %v338_v0  ;;  %v411_v2 = vunpack.c.1.s8 %v338_v0  ;;  %v413_v3 = vunpack.c.2.s8 %v338_v0  ;;  %v415_v4 = vunpack.c.3.s8 %v338_v0  ;;  %v420_v5 = vld [vmem:[%s932_s0] sm:$0xf]  ;;  %v425_v6 = vld [vmem:[%s932_s0 + $0x4] sm:$0xf]  ;;  %v435_v8 = vld [vmem:[%s932_s0 + $0x8] sm:$0xf] }
   0x3   :  { %v442_v9 = vld [vmem:[%s932_s0 + $0xc] sm:$0xf]  ;;  %v444_v10 = vunpack.c.0.s8 %v370_v7  ;;  %v446_v11 = vunpack.c.1.s8 %v370_v7  ;;  %v448_v12 = vunpack.c.2.s8 %v370_v7  ;;  %v450_v13 = vunpack.c.3.s8 %v370_v7  ;;  %v459_v16 = vld [vmem:[%s932_s0 + $0x10] sm:$0xf]  ;;  %v464_v17 = vld [vmem:[%s932_s0 + $0x14] sm:$0xf] }
   0x4   :  { %vm64_vm1 = vcmp.eq.s32.totalorder %v409_v1, 0  ;;  %vm65_vm2 = vcmp.eq.s32.totalorder %v411_v2, 0  ;;  %vm66_vm3 = vcmp.eq.s32.totalorder %v413_v3, 0  ;;  %vm67_vm4 = vcmp.eq.s32.totalorder %v415_v4, 0  ;;  %v491_v22 = vld [vmem:[%s932_s0 + $0x18] sm:$0xf] }
   0x5   :  { %vm80_vm5 = vmpackc.low %vm64_vm1, %vm64_vm1  ;;  %v466_v18 = vunpack.c.0.s8 %v372_v14  ;;  %vm68_vm8 = vcmp.eq.s32.totalorder %v444_v10, 0  ;;  %vm69_vm9 = vcmp.eq.s32.totalorder %v446_v11, 0  ;;  %v478_v20 = vunpack.c.1.s8 %v372_v14  ;;  %v504_v25 = vld [vmem:[%s932_s0 + $0x1c] sm:$0xf]  ;;  %v529_v30 = vld [vmem:[%s932_s0 + $0x20] sm:$0xf] }
   0x6   :  { %v96_v15 = vsel %vm80_vm5, %v420_v5, 0  ;;  %vm81_vm6 = vmpackc.low %vm65_vm2, %vm65_vm2  ;;  %vm70_vm11 = vcmp.eq.s32.totalorder %v448_v12, 0  ;;  %v494_v23 = vunpack.c.2.s8 %v372_v14  ;;  %vm71_vm13 = vcmp.eq.s32.totalorder %v450_v13, 0  ;;  %v374_v28 = vld [vmem:[%s933_s1 + $0x18] sm:$0xff]   ;;  %v547_v34 = vld [vmem:[%s932_s0 + $0x24] sm:$0xf] }
   0x7   :  { %113 = vst.msk [vmem:[%s934_s2] sm:$0xf] %vm112_vm0, %v96_v15  ;;  %v97_v19 = vsel %vm81_vm6, %v425_v6, 0  ;;  %vm82_vm7 = vmpackc.low %vm66_vm3, %vm66_vm3  ;;  %v507_v26 = vunpack.c.3.s8 %v372_v14  ;;  %vm72_vm15 = vcmp.eq.s32.totalorder %v466_v18, 0  ;;  %vm73_vm2 = vcmp.eq.s32.totalorder %v478_v20, 0 }
   0x8   :  { %114 = vst.msk [vmem:[%s934_s2 + $0x4] sm:$0xf] %vm112_vm0, %v97_v19  ;;  %v98_v21 = vsel %vm82_vm7, %v435_v8, 0  ;;  %vm83_vm10 = vmpackc.low %vm67_vm4, %vm67_vm4  ;;  %v532_v31 = vunpack.c.0.s8 %v374_v28  ;;  %v534_v32 = vunpack.c.1.s8 %v374_v28  ;;  %vm74_vm4 = vcmp.eq.s32.totalorder %v494_v23, 0  ;;  %v563_v37 = vld [vmem:[%s932_s0 + $0x28] sm:$0xf] }
   0x9   :  { %115 = vst.msk [vmem:[%s934_s2 + $0x8] sm:$0xf] %vm112_vm0, %v98_v21  ;;  %v99_v24 = vsel %vm83_vm10, %v442_v9, 0  ;;  %vm84_vm12 = vmpackc.low %vm68_vm8, %vm68_vm8  ;;  %v550_v35 = vunpack.c.2.s8 %v374_v28  ;;  %vm75_vm6 = vcmp.eq.s32.totalorder %v507_v26, 0  ;;  %v566_v38 = vunpack.c.3.s8 %v374_v28  ;;  %v579_v40 = vld [vmem:[%s932_s0 + $0x2c] sm:$0xf] }
   0xa   :  { %116 = vst.msk [vmem:[%s934_s2 + $0xc] sm:$0xf] %vm112_vm0, %v99_v24  ;;  %v100_v27 = vsel %vm84_vm12, %v459_v16, 0  ;;  %vm85_vm14 = vmpackc.low %vm69_vm9, %vm69_vm9  ;;  %vm76_vm8 = vcmp.eq.s32.totalorder %v532_v31, 0  ;;  %v590_v42 = vld [vmem:[%s932_s0 + $0x30] sm:$0xf] }
   0xb   :  { %117 = vst.msk [vmem:[%s934_s2 + $0x10] sm:$0xf] %vm112_vm0, %v100_v27  ;;  %v101_v29 = vsel %vm85_vm14, %v464_v17, 0  ;;  %vm86_vm1 = vmpackc.low %vm70_vm11, %vm70_vm11  ;;  %vm77_vm10 = vcmp.eq.s32.totalorder %v534_v32, 0  ;;  %v601_v44 = vld [vmem:[%s932_s0 + $0x34] sm:$0xf] }
   0xc   :  { %118 = vst.msk [vmem:[%s934_s2 + $0x14] sm:$0xf] %vm112_vm0, %v101_v29  ;;  %v102_v33 = vsel %vm86_vm1, %v491_v22, 0  ;;  %vm87_vm3 = vmpackc.low %vm71_vm13, %vm71_vm13  ;;  %vm78_vm12 = vcmp.eq.s32.totalorder %v550_v35, 0  ;;  %v612_v46 = vld [vmem:[%s932_s0 + $0x38] sm:$0xf] }
   0xd   :  { %119 = vst.msk [vmem:[%s934_s2 + $0x18] sm:$0xf] %vm112_vm0, %v102_v33  ;;  %v103_v36 = vsel %vm87_vm3, %v504_v25, 0  ;;  %vm88_vm5 = vmpackc.low %vm72_vm15, %vm72_vm15  ;;  %vm79_vm14 = vcmp.eq.s32.totalorder %v566_v38, 0  ;;  %v623_v48 = vld [vmem:[%s932_s0 + $0x3c] sm:$0xf] }
   0xe   :  { %120 = vst.msk [vmem:[%s934_s2 + $0x1c] sm:$0xf] %vm112_vm0, %v103_v36  ;;  %v104_v39 = vsel %vm88_vm5, %v529_v30, 0  ;;  %vm89_vm7 = vmpackc.low %vm73_vm2, %vm73_vm2  ;;  %vm129_vm1 = vcmp.eq.s32.totalorder %v409_v1, 1  ;;  %vm130_vm3 = vcmp.eq.s32.totalorder %v411_v2, 1  ;;  %vm131_vm5 = vcmp.eq.s32.totalorder %v413_v3, 1 }
   0xf   :  { %121 = vst.msk [vmem:[%s934_s2 + $0x20] sm:$0xf] %vm112_vm0, %v104_v39  ;;  %v105_v41 = vsel %vm89_vm7, %v547_v34, 0  ;;  %vm90_vm9 = vmpackc.low %vm74_vm4, %vm74_vm4  ;;  %vm132_vm7 = vcmp.eq.s32.totalorder %v415_v4, 1 }
  0x10   :  { %122 = vst.msk [vmem:[%s934_s2 + $0x24] sm:$0xf] %vm112_vm0, %v105_v41  ;;  %v106_v43 = vsel %vm90_vm9, %v563_v37, 0  ;;  %vm91_vm11 = vmpackc.low %vm75_vm6, %vm75_vm6  ;;  %vm133_vm9 = vcmp.eq.s32.totalorder %v444_v10, 1 }
  0x11   :  { %123 = vst.msk [vmem:[%s934_s2 + $0x28] sm:$0xf] %vm112_vm0, %v106_v43  ;;  %v107_v45 = vsel %vm91_vm11, %v579_v40, 0  ;;  %vm92_vm13 = vmpackc.low %vm76_vm8, %vm76_vm8  ;;  %vm134_vm11 = vcmp.eq.s32.totalorder %v446_v11, 1 }
  0x12   :  { %124 = vst.msk [vmem:[%s934_s2 + $0x2c] sm:$0xf] %vm112_vm0, %v107_v45  ;;  %v108_v47 = vsel %vm92_vm13, %v590_v42, 0  ;;  %vm93_vm15 = vmpackc.low %vm77_vm10, %vm77_vm10  ;;  %vm135_vm13 = vcmp.eq.s32.totalorder %v448_v12, 1 }
  0x13   :  { %125 = vst.msk [vmem:[%s934_s2 + $0x30] sm:$0xf] %vm112_vm0, %v108_v47  ;;  %v109_v49 = vsel %vm93_vm15, %v601_v44, 0  ;;  %vm94_vm2 = vmpackc.low %vm78_vm12, %vm78_vm12  ;;  %vm136_vm15 = vcmp.eq.s32.totalorder %v450_v13, 1 }
  0x14   :  { %126 = vst.msk [vmem:[%s934_s2 + $0x34] sm:$0xf] %vm112_vm0, %v109_v49  ;;  %v110_v50 = vsel %vm94_vm2, %v612_v46, 0  ;;  %vm95_vm4 = vmpackc.low %vm79_vm14, %vm79_vm14  ;;  %vm137_vm2 = vcmp.eq.s32.totalorder %v466_v18, 1 }
  0x15   :  { %127 = vst.msk [vmem:[%s934_s2 + $0x38] sm:$0xf] %vm112_vm0, %v110_v50  ;;  %v111_v51 = vsel %vm95_vm4, %v623_v48, 0  ;;  %vm145_vm6 = vmpackc.low %vm129_vm1, %vm129_vm1  ;;  %vm138_vm4 = vcmp.eq.s32.totalorder %v478_v20, 1 }
  0x16   :  { %128 = vst.msk [vmem:[%s934_s2 + $0x3c] sm:$0xf] %vm112_vm0, %v111_v51  ;;  %v161_v52 = vsel %vm145_vm6, %v420_v5, 0  ;;  %vm146_vm8 = vmpackc.low %vm130_vm3, %vm130_vm3  ;;  %vm139_vm6 = vcmp.eq.s32.totalorder %v494_v23, 1 }
  0x17   :  { %177 = vst.msk [vmem:[%s935_s3] sm:$0xf] %vm112_vm0, %v161_v52  ;;  %v162_v53 = vsel %vm146_vm8, %v425_v6, 0  ;;  %vm147_vm10 = vmpackc.low %vm131_vm5, %vm131_vm5  ;;  %vm140_vm8 = vcmp.eq.s32.totalorder %v507_v26, 1 }
  0x18   :  { %178 = vst.msk [vmem:[%s935_s3 + $0x4] sm:$0xf] %vm112_vm0, %v162_v53  ;;  %v163_v54 = vsel %vm147_vm10, %v435_v8, 0  ;;  %vm148_vm12 = vmpackc.low %vm132_vm7, %vm132_vm7  ;;  %vm141_vm10 = vcmp.eq.s32.totalorder %v532_v31, 1 }
  0x19   :  { %179 = vst.msk [vmem:[%s935_s3 + $0x8] sm:$0xf] %vm112_vm0, %v163_v54  ;;  %v164_v55 = vsel %vm148_vm12, %v442_v9, 0  ;;  %vm149_vm14 = vmpackc.low %vm133_vm9, %vm133_vm9  ;;  %vm142_vm12 = vcmp.eq.s32.totalorder %v534_v32, 1 }
  0x1a   :  { %180 = vst.msk [vmem:[%s935_s3 + $0xc] sm:$0xf] %vm112_vm0, %v164_v55  ;;  %v165_v56 = vsel %vm149_vm14, %v459_v16, 0  ;;  %vm150_vm1 = vmpackc.low %vm134_vm11, %vm134_vm11  ;;  %vm143_vm14 = vcmp.eq.s32.totalorder %v550_v35, 1 }
  0x1b   :  { %181 = vst.msk [vmem:[%s935_s3 + $0x10] sm:$0xf] %vm112_vm0, %v165_v56  ;;  %v166_v57 = vsel %vm150_vm1, %v464_v17, 0  ;;  %vm151_vm3 = vmpackc.low %vm135_vm13, %vm135_vm13  ;;  %vm144_vm1 = vcmp.eq.s32.totalorder %v566_v38, 1 }
  0x1c   :  { %182 = vst.msk [vmem:[%s935_s3 + $0x14] sm:$0xf] %vm112_vm0, %v166_v57  ;;  %v167_v58 = vsel %vm151_vm3, %v491_v22, 0  ;;  %vm152_vm5 = vmpackc.low %vm136_vm15, %vm136_vm15  ;;  %vm193_vm3 = vcmp.eq.s32.totalorder %v409_v1, 2 }
  0x1d   :  { %183 = vst.msk [vmem:[%s935_s3 + $0x18] sm:$0xf] %vm112_vm0, %v167_v58  ;;  %v168_v59 = vsel %vm152_vm5, %v504_v25, 0  ;;  %vm153_vm7 = vmpackc.low %vm137_vm2, %vm137_vm2  ;;  %vm194_vm5 = vcmp.eq.s32.totalorder %v411_v2, 2 }
  0x1e   :  { %184 = vst.msk [vmem:[%s935_s3 + $0x1c] sm:$0xf] %vm112_vm0, %v168_v59  ;;  %v169_v60 = vsel %vm153_vm7, %v529_v30, 0  ;;  %vm154_vm9 = vmpackc.low %vm138_vm4, %vm138_vm4  ;;  %vm195_vm7 = vcmp.eq.s32.totalorder %v413_v3, 2 }
  0x1f   :  { %185 = vst.msk [vmem:[%s935_s3 + $0x20] sm:$0xf] %vm112_vm0, %v169_v60  ;;  %v170_v61 = vsel %vm154_vm9, %v547_v34, 0  ;;  %vm155_vm11 = vmpackc.low %vm139_vm6, %vm139_vm6  ;;  %vm196_vm9 = vcmp.eq.s32.totalorder %v415_v4, 2 }
  0x20   :  { %186 = vst.msk [vmem:[%s935_s3 + $0x24] sm:$0xf] %vm112_vm0, %v170_v61  ;;  %v171_v62 = vsel %vm155_vm11, %v563_v37, 0  ;;  %vm156_vm13 = vmpackc.low %vm140_vm8, %vm140_vm8  ;;  %vm197_vm11 = vcmp.eq.s32.totalorder %v444_v10, 2 }
  0x21   :  { %187 = vst.msk [vmem:[%s935_s3 + $0x28] sm:$0xf] %vm112_vm0, %v171_v62  ;;  %v172_v63 = vsel %vm156_vm13, %v579_v40, 0  ;;  %vm157_vm15 = vmpackc.low %vm141_vm10, %vm141_vm10  ;;  %vm198_vm13 = vcmp.eq.s32.totalorder %v446_v11, 2 }
  0x22   :  { %188 = vst.msk [vmem:[%s935_s3 + $0x2c] sm:$0xf] %vm112_vm0, %v172_v63  ;;  %v173_v0 = vsel %vm157_vm15, %v590_v42, 0  ;;  %vm158_vm2 = vmpackc.low %vm142_vm12, %vm142_vm12  ;;  %vm199_vm15 = vcmp.eq.s32.totalorder %v448_v12, 2 }
  0x23   :  { %189 = vst.msk [vmem:[%s935_s3 + $0x30] sm:$0xf] %vm112_vm0, %v173_v0  ;;  %v174_v7 = vsel %vm158_vm2, %v601_v44, 0  ;;  %vm159_vm4 = vmpackc.low %vm143_vm14, %vm143_vm14  ;;  %vm200_vm2 = vcmp.eq.s32.totalorder %v450_v13, 2 }
  0x24   :  { %190 = vst.msk [vmem:[%s935_s3 + $0x34] sm:$0xf] %vm112_vm0, %v174_v7  ;;  %v175_v14 = vsel %vm159_vm4, %v612_v46, 0  ;;  %vm160_vm6 = vmpackc.low %vm144_vm1, %vm144_vm1  ;;  %vm201_vm4 = vcmp.eq.s32.totalorder %v466_v18, 2 }
  0x25   :  { %191 = vst.msk [vmem:[%s935_s3 + $0x38] sm:$0xf] %vm112_vm0, %v175_v14  ;;  %v176_v15 = vsel %vm160_vm6, %v623_v48, 0  ;;  %vm209_vm8 = vmpackc.low %vm193_vm3, %vm193_vm3  ;;  %vm202_vm6 = vcmp.eq.s32.totalorder %v478_v20, 2 }
  0x26   :  { %192 = vst.msk [vmem:[%s935_s3 + $0x3c] sm:$0xf] %vm112_vm0, %v176_v15  ;;  %v225_v19 = vsel %vm209_vm8, %v420_v5, 0  ;;  %vm210_vm10 = vmpackc.low %vm194_vm5, %vm194_vm5  ;;  %vm203_vm8 = vcmp.eq.s32.totalorder %v494_v23, 2 }
  0x27   :  { %241 = vst.msk [vmem:[%s936_s4] sm:$0xf] %vm112_vm0, %v225_v19  ;;  %v226_v21 = vsel %vm210_vm10, %v425_v6, 0  ;;  %vm211_vm12 = vmpackc.low %vm195_vm7, %vm195_vm7  ;;  %vm204_vm10 = vcmp.eq.s32.totalorder %v507_v26, 2 }
  0x28   :  { %242 = vst.msk [vmem:[%s936_s4 + $0x4] sm:$0xf] %vm112_vm0, %v226_v21  ;;  %v227_v24 = vsel %vm211_vm12, %v435_v8, 0  ;;  %vm212_vm14 = vmpackc.low %vm196_vm9, %vm196_vm9  ;;  %vm205_vm12 = vcmp.eq.s32.totalorder %v532_v31, 2 }
  0x29   :  { %243 = vst.msk [vmem:[%s936_s4 + $0x8] sm:$0xf] %vm112_vm0, %v227_v24  ;;  %v228_v27 = vsel %vm212_vm14, %v442_v9, 0  ;;  %vm213_vm1 = vmpackc.low %vm197_vm11, %vm197_vm11  ;;  %vm206_vm14 = vcmp.eq.s32.totalorder %v534_v32, 2 }
  0x2a   :  { %244 = vst.msk [vmem:[%s936_s4 + $0xc] sm:$0xf] %vm112_vm0, %v228_v27  ;;  %v229_v28 = vsel %vm213_vm1, %v459_v16, 0  ;;  %vm214_vm3 = vmpackc.low %vm198_vm13, %vm198_vm13  ;;  %vm207_vm1 = vcmp.eq.s32.totalorder %v550_v35, 2 }
  0x2b   :  { %245 = vst.msk [vmem:[%s936_s4 + $0x10] sm:$0xf] %vm112_vm0, %v229_v28  ;;  %v230_v29 = vsel %vm214_vm3, %v464_v17, 0  ;;  %vm215_vm5 = vmpackc.low %vm199_vm15, %vm199_vm15  ;;  %vm208_vm3 = vcmp.eq.s32.totalorder %v566_v38, 2 }
  0x2c   :  { %246 = vst.msk [vmem:[%s936_s4 + $0x14] sm:$0xf] %vm112_vm0, %v230_v29  ;;  %v231_v33 = vsel %vm215_vm5, %v491_v22, 0  ;;  %vm216_vm7 = vmpackc.low %vm200_vm2, %vm200_vm2  ;;  %vm257_vm5 = vcmp.eq.s32.totalorder %v409_v1, 3 }
  0x2d   :  { %247 = vst.msk [vmem:[%s936_s4 + $0x18] sm:$0xf] %vm112_vm0, %v231_v33  ;;  %v232_v36 = vsel %vm216_vm7, %v504_v25, 0  ;;  %vm217_vm9 = vmpackc.low %vm201_vm4, %vm201_vm4  ;;  %vm258_vm7 = vcmp.eq.s32.totalorder %v411_v2, 3 }
  0x2e   :  { %248 = vst.msk [vmem:[%s936_s4 + $0x1c] sm:$0xf] %vm112_vm0, %v232_v36  ;;  %v233_v39 = vsel %vm217_vm9, %v529_v30, 0  ;;  %vm218_vm11 = vmpackc.low %vm202_vm6, %vm202_vm6  ;;  %vm259_vm9 = vcmp.eq.s32.totalorder %v413_v3, 3 }
  0x2f   :  { %249 = vst.msk [vmem:[%s936_s4 + $0x20] sm:$0xf] %vm112_vm0, %v233_v39  ;;  %v234_v41 = vsel %vm218_vm11, %v547_v34, 0  ;;  %vm219_vm13 = vmpackc.low %vm203_vm8, %vm203_vm8  ;;  %vm260_vm11 = vcmp.eq.s32.totalorder %v415_v4, 3 }
  0x30   :  { %250 = vst.msk [vmem:[%s936_s4 + $0x24] sm:$0xf] %vm112_vm0, %v234_v41  ;;  %v235_v43 = vsel %vm219_vm13, %v563_v37, 0  ;;  %vm220_vm15 = vmpackc.low %vm204_vm10, %vm204_vm10  ;;  %vm261_vm13 = vcmp.eq.s32.totalorder %v444_v10, 3 }
  0x31   :  { %251 = vst.msk [vmem:[%s936_s4 + $0x28] sm:$0xf] %vm112_vm0, %v235_v43  ;;  %v236_v45 = vsel %vm220_vm15, %v579_v40, 0  ;;  %vm221_vm2 = vmpackc.low %vm205_vm12, %vm205_vm12  ;;  %vm262_vm15 = vcmp.eq.s32.totalorder %v446_v11, 3 }
  0x32   :  { %252 = vst.msk [vmem:[%s936_s4 + $0x2c] sm:$0xf] %vm112_vm0, %v236_v45  ;;  %v237_v47 = vsel %vm221_vm2, %v590_v42, 0  ;;  %vm222_vm4 = vmpackc.low %vm206_vm14, %vm206_vm14  ;;  %vm263_vm2 = vcmp.eq.s32.totalorder %v448_v12, 3 }
  0x33   :  { %253 = vst.msk [vmem:[%s936_s4 + $0x30] sm:$0xf] %vm112_vm0, %v237_v47  ;;  %v238_v49 = vsel %vm222_vm4, %v601_v44, 0  ;;  %vm223_vm6 = vmpackc.low %vm207_vm1, %vm207_vm1  ;;  %vm264_vm4 = vcmp.eq.s32.totalorder %v450_v13, 3 }
  0x34   :  { %254 = vst.msk [vmem:[%s936_s4 + $0x34] sm:$0xf] %vm112_vm0, %v238_v49  ;;  %v239_v50 = vsel %vm223_vm6, %v612_v46, 0  ;;  %vm224_vm8 = vmpackc.low %vm208_vm3, %vm208_vm3  ;;  %vm265_vm6 = vcmp.eq.s32.totalorder %v466_v18, 3 }
  0x35   :  { %255 = vst.msk [vmem:[%s936_s4 + $0x38] sm:$0xf] %vm112_vm0, %v239_v50  ;;  %v240_v1 = vsel %vm224_vm8, %v623_v48, 0  ;;  %vm273_vm10 = vmpackc.low %vm257_vm5, %vm257_vm5  ;;  %vm266_vm8 = vcmp.eq.s32.totalorder %v478_v20, 3 }
  0x36   :  { %256 = vst.msk [vmem:[%s936_s4 + $0x3c] sm:$0xf] %vm112_vm0, %v240_v1  ;;  %v289_v2 = vsel %vm273_vm10, %v420_v5, 0  ;;  %vm274_vm12 = vmpackc.low %vm258_vm7, %vm258_vm7  ;;  %vm267_vm10 = vcmp.eq.s32.totalorder %v494_v23, 3 }
  0x37   :  { %305 = vst.msk [vmem:[%s937_s5] sm:$0xf] %vm112_vm0, %v289_v2  ;;  %v290_v3 = vsel %vm274_vm12, %v425_v6, 0  ;;  %vm275_vm14 = vmpackc.low %vm259_vm9, %vm259_vm9  ;;  %vm268_vm12 = vcmp.eq.s32.totalorder %v507_v26, 3 }
  0x38   :  { %306 = vst.msk [vmem:[%s937_s5 + $0x4] sm:$0xf] %vm112_vm0, %v290_v3  ;;  %v291_v4 = vsel %vm275_vm14, %v435_v8, 0  ;;  %vm276_vm1 = vmpackc.low %vm260_vm11, %vm260_vm11  ;;  %vm269_vm14 = vcmp.eq.s32.totalorder %v532_v31, 3 }
  0x39   :  { %307 = vst.msk [vmem:[%s937_s5 + $0x8] sm:$0xf] %vm112_vm0, %v291_v4  ;;  %v292_v5 = vsel %vm276_vm1, %v442_v9, 0  ;;  %vm277_vm3 = vmpackc.low %vm261_vm13, %vm261_vm13  ;;  %vm270_vm1 = vcmp.eq.s32.totalorder %v534_v32, 3 }
  0x3a   :  { %308 = vst.msk [vmem:[%s937_s5 + $0xc] sm:$0xf] %vm112_vm0, %v292_v5  ;;  %v293_v6 = vsel %vm277_vm3, %v459_v16, 0  ;;  %vm278_vm5 = vmpackc.low %vm262_vm15, %vm262_vm15  ;;  %vm271_vm3 = vcmp.eq.s32.totalorder %v550_v35, 3 }
  0x3b   :  { %309 = vst.msk [vmem:[%s937_s5 + $0x10] sm:$0xf] %vm112_vm0, %v293_v6  ;;  %v294_v8 = vsel %vm278_vm5, %v464_v17, 0  ;;  %vm279_vm7 = vmpackc.low %vm263_vm2, %vm263_vm2  ;;  %vm272_vm5 = vcmp.eq.s32.totalorder %v566_v38, 3 }
  0x3c   :  { %310 = vst.msk [vmem:[%s937_s5 + $0x14] sm:$0xf] %vm112_vm0, %v294_v8  ;;  %v295_v9 = vsel %vm279_vm7, %v491_v22, 0  ;;  %vm280_vm9 = vmpackc.low %vm264_vm4, %vm264_vm4 }
  0x3d   :  { %311 = vst.msk [vmem:[%s937_s5 + $0x18] sm:$0xf] %vm112_vm0, %v295_v9  ;;  %v296_v10 = vsel %vm280_vm9, %v504_v25, 0  ;;  %vm281_vm11 = vmpackc.low %vm265_vm6, %vm265_vm6 }
  0x3e   :  { %312 = vst.msk [vmem:[%s937_s5 + $0x1c] sm:$0xf] %vm112_vm0, %v296_v10  ;;  %v297_v11 = vsel %vm281_vm11, %v529_v30, 0  ;;  %vm282_vm13 = vmpackc.low %vm266_vm8, %vm266_vm8 }
  0x3f   :  { %313 = vst.msk [vmem:[%s937_s5 + $0x20] sm:$0xf] %vm112_vm0, %v297_v11  ;;  %v298_v12 = vsel %vm282_vm13, %v547_v34, 0  ;;  %vm283_vm15 = vmpackc.low %vm267_vm10, %vm267_vm10 }
  0x40   :  { %314 = vst.msk [vmem:[%s937_s5 + $0x24] sm:$0xf] %vm112_vm0, %v298_v12  ;;  %v299_v13 = vsel %vm283_vm15, %v563_v37, 0  ;;  %vm284_vm2 = vmpackc.low %vm268_vm12, %vm268_vm12 }
  0x41   :  { %315 = vst.msk [vmem:[%s937_s5 + $0x28] sm:$0xf] %vm112_vm0, %v299_v13  ;;  %v300_v16 = vsel %vm284_vm2, %v579_v40, 0  ;;  %vm285_vm4 = vmpackc.low %vm269_vm14, %vm269_vm14 }
  0x42   :  { %316 = vst.msk [vmem:[%s937_s5 + $0x2c] sm:$0xf] %vm112_vm0, %v300_v16  ;;  %v301_v17 = vsel %vm285_vm4, %v590_v42, 0  ;;  %vm286_vm6 = vmpackc.low %vm270_vm1, %vm270_vm1 }
  0x43   :  { %317 = vst.msk [vmem:[%s937_s5 + $0x30] sm:$0xf] %vm112_vm0, %v301_v17  ;;  %v302_v18 = vsel %vm286_vm6, %v601_v44, 0  ;;  %vm287_vm7 = vmpackc.low %vm271_vm3, %vm271_vm3 }
  0x44   :  { %318 = vst.msk [vmem:[%s937_s5 + $0x34] sm:$0xf] %vm112_vm0, %v302_v18  ;;  %v303_v20 = vsel %vm287_vm7, %v612_v46, 0  ;;  %vm288_vm8 = vmpackc.low %vm272_vm5, %vm272_vm5 }
  0x45   :  { %319 = vst.msk [vmem:[%s937_s5 + $0x38] sm:$0xf] %vm112_vm0, %v303_v20  ;;  %v304_v22 = vsel %vm288_vm8, %v623_v48, 0 }
  0x46   :  { %320 = vst.msk [vmem:[%s937_s5 + $0x3c] sm:$0xf] %vm112_vm0, %v304_v22 }

// kernel: horseshoe_forward.25
= control target key start
LH: loop header
LB: loop body
LE: loop exit
PB: predicated region body
PF: predicated region fallthrough
CT: control target
= control target key end

     0   :  { %s1876_s15 = smov 0   ;;  %s1878_s16 = smov 0   ;;  %s2405_s0 = inlined_call_operand.vmem [shape: bf16[648,72], index: 0, kind: input, shape index: {}]   ;;  %s2406_s1 = inlined_call_operand.vmem [shape: bf16[72,8], index: 1, kind: input, shape index: {}]   ;;  %s2407_s2 = inlined_call_operand.vmem [shape: f32[1,8], index: 2, kind: input, shape index: {}]   ;;  %s2408_s3 = inlined_call_operand.vmem [shape: f32[1,8], index: 3, kind: input, shape index: {}]   ;;  %s2409_s4 = inlined_call_operand.vmem [shape: bf16[648,8], index: 4, kind: output, shape index: {}]  }
   0x1   :  { %s1880_s17 = smov 0  }
   0x2 LB: > { %s1889_s18 = sadd.s32 4294967295, %s1817_s17   ;;  %s1891_s19 = sadd.s32 1, %s1817_s17   ;;  %s1817_s17 = sphi %s1880_s17, %s2418_s17   ;;  %s1813_s16 = sphi %s1878_s16, %s2417_s16   ;;  %s1809_s15 = sphi %s1876_s15, %s2416_s15  }
   0x3   : > { %s107_s20 = ssub.s32 %s1817_s17, %s1891_s19  ;;  %s110_s21 = sadd.s32 1, %s1813_s16 }
   0x4   : > { %p108_p0 = scmp.eq.s32.totalorder %s107_s20, 0  ;;  %p120_p1 = scmp.ne.s32.totalorder %s1813_s16, %s1809_s15 }
   0x5   : > { %p121_p2 = scmp.eq.s32.totalorder %s1889_s18, 1  ;;  %p1422_p3 = scmp.ge.s32.totalorder %s1817_s17, 1 }
   0x6   : > { %s1899_s22 = scalar_select %p108_p0, %s1813_s16, %s110_s21  }
   0x7   : > { %p1901_p4 = por %p121_p2, %p120_p1  ;;  %p171_p5 = scmp.lt.s32.totalorder %s1817_s17, 3 }
   0x9   : > { %p172_p6 = pnand %p1422_p3, %p171_p5 }
   0xa   : > { %s1909_s26 = sshll.u32 (!%p172_p6), %s1889_s18, 6  ;;  %s197_s24 = sand.u32 (!%p172_p6), 1, %s1809_s15  }
   0xb   : > { %175 = sbr.rel (%p172_p6) target bundleno = 368 (0x170), region = 36  ;;  %p205_p7 = scmp.lt.s32.totalorder (!%p172_p6), %s1909_s26, 80 }
   0xc   : > { %s1423_s25 = sshll.u32 (!%p172_p6), %s197_s24, 8 }
   0xd   : > { %s2011_s15 = scalar_lea.vmem (!%p172_p6), [#allocation2], %s1423_s25  }
  0x10   : > { %v292_v0 = vld [vmem:[%s2406_s1 + $0x20] sm:$0xf]  ;;  %vm577_vm0 = vcmask 1043456   ;;  %v1654_v4 = vld [vmem:[%s2406_s1 + $0x18] sm:$0xff]  ;;  %v1653_v5 = vld [vmem:[%s2406_s1 + $0x10] sm:$0xff]  ;;  %s206_s5 = scalar_select %p205_p7, %s1909_s26, 80 }
  0x11   : > { %v470_v1 = vunpack.c.l.b16 %v292_v0  ;;  %v1652_v6 = vld [vmem:[%s2406_s1 + $0x8] sm:$0xff]  ;;  %v1651_v7 = vld [vmem:[%s2406_s1] sm:$0xff]  ;;  %vm480_vm1 = vcmask 588800   ;;  %vm1014_vm2 = vcmask 60416   ;;  %s1087_s27 = ssub.s32 (%p1901_p4), 81, %s1909_s26  ;;  %s1655_s28 = sshll.u32 (%p1901_p4), %s1889_s18, 8 }
  0x12   : > { %s1425_s8 = sshll.u32 %s206_s5, 2  ;;  %v1997_v40 = vld [vmem:[%s2407_s2] ss:$0 sm:$0xff]  ;;  %p1088_p8 = scmp.lt.s32.totalorder (%p1901_p4), %s1087_s27, 64 }
  0x13   : > { %v475_v2 = vpack.c.b16 %v470_v1, %v470_v1  ;;  %s1928_s13 = scalar_lea.vmem %s2405_s0, %s1425_s8  ;;  %v2002_v41 = vld [vmem:[%s2408_s3] ss:$0 sm:$0xff]  ;;  %s2270_s5 = scalar_lea.vmem (%p1901_p4), %s2409_s4, %s1655_s28  }
  0x14   : > { %v1619_v8 = vld [vmem:[%s1928_s13] sm:$0xff]  ;;  %v1620_v12 = vld [vmem:[%s1928_s13 + $0x8] sm:$0xff]  ;;  %v1621_v16 = vld [vmem:[%s1928_s13 + $0x10] sm:$0xff] }
  0x15   : > { %v579_v3 = vsel %vm577_vm0, %v475_v2, 0  ;;  %v1627_v9 = vld [vmem:[%s1928_s13 + $0x40] sm:$0xff]  ;;  %v1628_v13 = vld [vmem:[%s1928_s13 + $0x48] sm:$0xff]  ;;  %v1629_v17 = vld [vmem:[%s1928_s13 + $0x50] sm:$0xff] }
  0x16   : > { %584 = vmatpush.bf16.msra.mxu0 %v579_v3  ;;  %1658 = vmatpush.bf16.msra.mxu1 %v579_v3  ;;  %v1635_v10 = vld [vmem:[%s1928_s13 + $0x80] sm:$0xff]  ;;  %v1636_v14 = vld [vmem:[%s1928_s13 + $0x88] sm:$0xff]  ;;  %v1637_v18 = vld [vmem:[%s1928_s13 + $0x90] sm:$0xff] }
  0x17   : > { %1659 = vmatpush.bf16.msra.mxu2 %v579_v3  ;;  %1660 = vmatpush.bf16.msra.mxu3 %v579_v3  ;;  %v1643_v11 = vld [vmem:[%s1928_s13 + $0xc0] sm:$0xff]  ;;  %v1644_v15 = vld [vmem:[%s1928_s13 + $0xc8] sm:$0xff]  ;;  %v1645_v19 = vld [vmem:[%s1928_s13 + $0xd0] sm:$0xff] }
  0x18   : > { %v1622_v20 = vld [vmem:[%s1928_s13 + $0x18] sm:$0xff]  ;;  %v1623_v24 = vld [vmem:[%s1928_s13 + $0x20] sm:$0xff]  ;;  %v1624_v28 = vld [vmem:[%s1928_s13 + $0x28] sm:$0xff] }
  0x19   : > { %v1630_v21 = vld [vmem:[%s1928_s13 + $0x58] sm:$0xff]  ;;  %v1631_v25 = vld [vmem:[%s1928_s13 + $0x60] sm:$0xff]  ;;  %v1632_v29 = vld [vmem:[%s1928_s13 + $0x68] sm:$0xff] }
  0x1a   : > { %585 = vmatpush.bf16.msra.mxu0 %v1654_v4  ;;  %1661 = vmatpush.bf16.msra.mxu1 %v1654_v4  ;;  %v1638_v22 = vld [vmem:[%s1928_s13 + $0x98] sm:$0xff]  ;;  %v1639_v26 = vld [vmem:[%s1928_s13 + $0xa0] sm:$0xff]  ;;  %v1640_v30 = vld [vmem:[%s1928_s13 + $0xa8] sm:$0xff] }
  0x1b   : > { %1662 = vmatpush.bf16.msra.mxu2 %v1654_v4  ;;  %1663 = vmatpush.bf16.msra.mxu3 %v1654_v4  ;;  %v1646_v23 = vld [vmem:[%s1928_s13 + $0xd8] sm:$0xff]  ;;  %v1647_v27 = vld [vmem:[%s1928_s13 + $0xe0] sm:$0xff]  ;;  %v1648_v31 = vld [vmem:[%s1928_s13 + $0xe8] sm:$0xff] }
  0x1c   : > { %v1625_v32 = vld [vmem:[%s1928_s13 + $0x30] sm:$0xff]  ;;  %v1626_v36 = vld [vmem:[%s1928_s13 + $0x38] sm:$0xff] }
  0x1d   : > { %v1633_v33 = vld [vmem:[%s1928_s13 + $0x70] sm:$0xff]  ;;  %v1634_v37 = vld [vmem:[%s1928_s13 + $0x78] sm:$0xff] }
  0x1e   : > { %586 = vmatpush.bf16.msra.mxu0 %v1653_v5  ;;  %1664 = vmatpush.bf16.msra.mxu1 %v1653_v5  ;;  %v1641_v34 = vld [vmem:[%s1928_s13 + $0xb0] sm:$0xff]  ;;  %v1642_v38 = vld [vmem:[%s1928_s13 + $0xb8] sm:$0xff] }
  0x1f   : > { %1665 = vmatpush.bf16.msra.mxu2 %v1653_v5  ;;  %1666 = vmatpush.bf16.msra.mxu3 %v1653_v5  ;;  %v1649_v35 = vld [vmem:[%s1928_s13 + $0xf0] sm:$0xff]  ;;  %v1650_v39 = vld [vmem:[%s1928_s13 + $0xf8] sm:$0xff] }
  0x22   : > { %587 = vmatpush.bf16.msra.mxu0 %v1652_v6  ;;  %1667 = vmatpush.bf16.msra.mxu1 %v1652_v6 }
  0x23   : > { %1668 = vmatpush.bf16.msra.mxu2 %v1652_v6  ;;  %1669 = vmatpush.bf16.msra.mxu3 %v1652_v6 }
  0x26   : > { %588 = vmatpush.bf16.msra.mxu0 %v1651_v7  ;;  %1670 = vmatpush.bf16.msra.mxu1 %v1651_v7 }
  0x27   : > { %1671 = vmatpush.bf16.msra.mxu2 %v1651_v7  ;;  %1672 = vmatpush.bf16.msra.mxu3 %v1651_v7 }
  0x29   : > { %1570 = vmatmul.msk.bf16.vlgmr.msra.gmra.mxu0 %vm480_vm1, %v1619_v8  ;;  %1578 = vmatmul.msk.bf16.vlgmr.msra.gmra.mxu1 %vm480_vm1, %v1627_v9 }
  0x2a   : > { %1586 = vmatmul.msk.bf16.vlgmr.msra.gmra.mxu2 %vm480_vm1, %v1635_v10  ;;  %1594 = vmatmul.msk.bf16.vlgmr.msra.gmra.mxu3 %vm480_vm1, %v1643_v11 }
  0x39   : > { %1571 = vmatmul.msk.bf16.gmra.mxu0 %vm480_vm1, %v1620_v12  ;;  %1579 = vmatmul.msk.bf16.gmra.mxu1 %vm480_vm1, %v1628_v13 }
  0x3a   : > { %1587 = vmatmul.msk.bf16.gmra.mxu2 %vm480_vm1, %v1636_v14  ;;  %1595 = vmatmul.msk.bf16.gmra.mxu3 %vm480_vm1, %v1644_v15 }
  0x49   : > { %1572 = vmatmul.msk.bf16.gmra.mxu0 %vm480_vm1, %v1621_v16  ;;  %1580 = vmatmul.msk.bf16.gmra.mxu1 %vm480_vm1, %v1629_v17 }
  0x4a   : > { %1588 = vmatmul.msk.bf16.gmra.mxu2 %vm480_vm1, %v1637_v18  ;;  %1596 = vmatmul.msk.bf16.gmra.mxu3 %vm480_vm1, %v1645_v19 }
  0x59   : > { %1573 = vmatmul.msk.bf16.gmra.mxu0 %vm480_vm1, %v1622_v20  ;;  %1581 = vmatmul.msk.bf16.gmra.mxu1 %vm480_vm1, %v1630_v21 }
  0x5a   : > { %1589 = vmatmul.msk.bf16.gmra.mxu2 %vm480_vm1, %v1638_v22  ;;  %1597 = vmatmul.msk.bf16.gmra.mxu3 %vm480_vm1, %v1646_v23 }
  0x69   : > { %1574 = vmatmul.msk.bf16.gmra.mxu0 %vm480_vm1, %v1623_v24  ;;  %1582 = vmatmul.msk.bf16.gmra.mxu1 %vm480_vm1, %v1631_v25 }
  0x6a   : > { %1590 = vmatmul.msk.bf16.gmra.mxu2 %vm480_vm1, %v1639_v26  ;;  %1598 = vmatmul.msk.bf16.gmra.mxu3 %vm480_vm1, %v1647_v27 }
  0x79   : > { %1575 = vmatmul.msk.bf16.gmra.mxu0 %vm480_vm1, %v1624_v28  ;;  %1583 = vmatmul.msk.bf16.gmra.mxu1 %vm480_vm1, %v1632_v29 }
  0x7a   : > { %1591 = vmatmul.msk.bf16.gmra.mxu2 %vm480_vm1, %v1640_v30  ;;  %1599 = vmatmul.msk.bf16.gmra.mxu3 %vm480_vm1, %v1648_v31 }
  0x89   : > { %1576 = vmatmul.msk.bf16.gmra.mxu0 %vm480_vm1, %v1625_v32  ;;  %1584 = vmatmul.msk.bf16.gmra.mxu1 %vm480_vm1, %v1633_v33 }
  0x8a   : > { %1592 = vmatmul.msk.bf16.gmra.mxu2 %vm480_vm1, %v1641_v34  ;;  %1600 = vmatmul.msk.bf16.gmra.mxu3 %vm480_vm1, %v1649_v35 }
  0x99   : > { %1577 = vmatmul.msk.bf16.gmra.mxu0 %vm480_vm1, %v1626_v36  ;;  %1585 = vmatmul.msk.bf16.gmra.mxu1 %vm480_vm1, %v1634_v37 }
  0x9a   : > { %1593 = vmatmul.msk.bf16.gmra.mxu2 %vm480_vm1, %v1642_v38  ;;  %1601 = vmatmul.msk.bf16.gmra.mxu3 %vm480_vm1, %v1650_v39 }
  0xa6   : > { %v590_v42 = vpop.f32.mrf.mxu0  ;;  %v630_v43 = vpop.f32.mrf.mxu1 }
  0xa7   : > { %v754_v44 = vmul.f32 %v1997_v40, %v590_v42  ;;  %v770_v45 = vmul.f32 %v1997_v40, %v630_v43 }
  0xa9   : > { %v822_v46 = vadd.f32 %v2002_v41, %v754_v44  ;;  %v838_v47 = vadd.f32 %v2002_v41, %v770_v45 }
  0xab   : > { %v886_v48 = vmax.f32 %v822_v46, 0.0  ;;  %v902_v49 = vmax.f32 %v838_v47, 0.0 }
  0xad   : > { %v950_v50 = vpack.c.bf16 %v886_v48, %v886_v48  ;;  %v966_v51 = vpack.c.bf16 %v902_v49, %v902_v49  ;;  %v670_v52 = vpop.f32.mrf.mxu2  ;;  %v710_v53 = vpop.f32.mrf.mxu3 }
  0xae   : > { %v786_v54 = vmul.f32 %v1997_v40, %v670_v52  ;;  %v802_v55 = vmul.f32 %v1997_v40, %v710_v53  ;;  %v592_v56 = vpop.f32.mrf.mxu0  ;;  %v632_v57 = vpop.f32.mrf.mxu1 }
  0xaf   : > { %1015 = vst.msk [vmem:[%s2011_s15] sm:$0xf] %vm1014_vm2, %v950_v50  ;;  %v755_v58 = vmul.f32 %v1997_v40, %v592_v56  ;;  %v771_v59 = vmul.f32 %v1997_v40, %v632_v57 }
  0xb0   : > { %1031 = vst.msk [vmem:[%s2011_s15 + $0x40] sm:$0xf] %vm1014_vm2, %v966_v51  ;;  %v854_v60 = vadd.f32 %v2002_v41, %v786_v54  ;;  %v870_v61 = vadd.f32 %v2002_v41, %v802_v55 }
  0xb1   : > { %v823_v62 = vadd.f32 %v2002_v41, %v755_v58  ;;  %v839_v63 = vadd.f32 %v2002_v41, %v771_v59 }
  0xb2   : > { %v918_v0 = vmax.f32 %v854_v60, 0.0  ;;  %v934_v1 = vmax.f32 %v870_v61, 0.0 }
  0xb3   : > { %v887_v2 = vmax.f32 %v823_v62, 0.0  ;;  %v903_v3 = vmax.f32 %v839_v63, 0.0 }
  0xb4   : > { %v982_v4 = vpack.c.bf16 %v918_v0, %v918_v0  ;;  %v998_v5 = vpack.c.bf16 %v934_v1, %v934_v1 }
  0xb5   : > { %v951_v6 = vpack.c.bf16 %v887_v2, %v887_v2  ;;  %v967_v7 = vpack.c.bf16 %v903_v3, %v903_v3  ;;  %v672_v8 = vpop.f32.mrf.mxu2  ;;  %v712_v9 = vpop.f32.mrf.mxu3 }
  0xb6   : > { %1047 = vst.msk [vmem:[%s2011_s15 + $0x80] sm:$0xf] %vm1014_vm2, %v982_v4  ;;  %v787_v10 = vmul.f32 %v1997_v40, %v672_v8  ;;  %v803_v11 = vmul.f32 %v1997_v40, %v712_v9  ;;  %v595_v12 = vpop.f32.mrf.mxu0  ;;  %v635_v13 = vpop.f32.mrf.mxu1 }
  0xb7   : > { %1063 = vst.msk [vmem:[%s2011_s15 + $0xc0] sm:$0xf] %vm1014_vm2, %v998_v5  ;;  %v756_v14 = vmul.f32 %v1997_v40, %v595_v12  ;;  %v772_v15 = vmul.f32 %v1997_v40, %v635_v13 }
  0xb8   : > { %1016 = vst.msk [vmem:[%s2011_s15 + $0x4] sm:$0xf] %vm1014_vm2, %v951_v6  ;;  %v855_v16 = vadd.f32 %v2002_v41, %v787_v10  ;;  %v871_v17 = vadd.f32 %v2002_v41, %v803_v11 }
  0xb9   : > { %1032 = vst.msk [vmem:[%s2011_s15 + $0x44] sm:$0xf] %vm1014_vm2, %v967_v7  ;;  %v824_v18 = vadd.f32 %v2002_v41, %v756_v14  ;;  %v840_v19 = vadd.f32 %v2002_v41, %v772_v15 }
  0xba   : > { %v919_v20 = vmax.f32 %v855_v16, 0.0  ;;  %v935_v21 = vmax.f32 %v871_v17, 0.0 }
  0xbb   : > { %v888_v22 = vmax.f32 %v824_v18, 0.0  ;;  %v904_v23 = vmax.f32 %v840_v19, 0.0 }
  0xbc   : > { %v983_v24 = vpack.c.bf16 %v919_v20, %v919_v20  ;;  %v999_v25 = vpack.c.bf16 %v935_v21, %v935_v21 }
  0xbd   : > { %v952_v26 = vpack.c.bf16 %v888_v22, %v888_v22  ;;  %v968_v27 = vpack.c.bf16 %v904_v23, %v904_v23  ;;  %v675_v28 = vpop.f32.mrf.mxu2  ;;  %v715_v29 = vpop.f32.mrf.mxu3 }
  0xbe   : > { %1048 = vst.msk [vmem:[%s2011_s15 + $0x84] sm:$0xf] %vm1014_vm2, %v983_v24  ;;  %v788_v30 = vmul.f32 %v1997_v40, %v675_v28  ;;  %v804_v31 = vmul.f32 %v1997_v40, %v715_v29  ;;  %v597_v32 = vpop.f32.mrf.mxu0  ;;  %v637_v33 = vpop.f32.mrf.mxu1 }
  0xbf   : > { %1064 = vst.msk [vmem:[%s2011_s15 + $0xc4] sm:$0xf] %vm1014_vm2, %v999_v25  ;;  %v757_v34 = vmul.f32 %v1997_v40, %v597_v32  ;;  %v773_v35 = vmul.f32 %v1997_v40, %v637_v33 }
  0xc0   : > { %1017 = vst.msk [vmem:[%s2011_s15 + $0x8] sm:$0xf] %vm1014_vm2, %v952_v26  ;;  %v856_v36 = vadd.f32 %v2002_v41, %v788_v30  ;;  %v872_v37 = vadd.f32 %v2002_v41, %v804_v31 }
  0xc1   : > { %1033 = vst.msk [vmem:[%s2011_s15 + $0x48] sm:$0xf] %vm1014_vm2, %v968_v27  ;;  %v825_v38 = vadd.f32 %v2002_v41, %v757_v34  ;;  %v841_v39 = vadd.f32 %v2002_v41, %v773_v35 }
  0xc2   : > { %v920_v42 = vmax.f32 %v856_v36, 0.0  ;;  %v936_v43 = vmax.f32 %v872_v37, 0.0 }
  0xc3   : > { %v889_v44 = vmax.f32 %v825_v38, 0.0  ;;  %v905_v45 = vmax.f32 %v841_v39, 0.0 }
  0xc4   : > { %v984_v46 = vpack.c.bf16 %v920_v42, %v920_v42  ;;  %v1000_v47 = vpack.c.bf16 %v936_v43, %v936_v43 }
  0xc5   : > { %v953_v48 = vpack.c.bf16 %v889_v44, %v889_v44  ;;  %v969_v49 = vpack.c.bf16 %v905_v45, %v905_v45  ;;  %v677_v50 = vpop.f32.mrf.mxu2  ;;  %v717_v51 = vpop.f32.mrf.mxu3 }
  0xc6   : > { %1049 = vst.msk [vmem:[%s2011_s15 + $0x88] sm:$0xf] %vm1014_vm2, %v984_v46  ;;  %v789_v52 = vmul.f32 %v1997_v40, %v677_v50  ;;  %v805_v53 = vmul.f32 %v1997_v40, %v717_v51  ;;  %v600_v54 = vpop.f32.mrf.mxu0  ;;  %v640_v55 = vpop.f32.mrf.mxu1 }
  0xc7   : > { %1065 = vst.msk [vmem:[%s2011_s15 + $0xc8] sm:$0xf] %vm1014_vm2, %v1000_v47  ;;  %v758_v56 = vmul.f32 %v1997_v40, %v600_v54  ;;  %v774_v57 = vmul.f32 %v1997_v40, %v640_v55 }
  0xc8   : > { %1018 = vst.msk [vmem:[%s2011_s15 + $0xc] sm:$0xf] %vm1014_vm2, %v953_v48  ;;  %v857_v58 = vadd.f32 %v2002_v41, %v789_v52  ;;  %v873_v59 = vadd.f32 %v2002_v41, %v805_v53 }
  0xc9   : > { %1034 = vst.msk [vmem:[%s2011_s15 + $0x4c] sm:$0xf] %vm1014_vm2, %v969_v49  ;;  %v826_v60 = vadd.f32 %v2002_v41, %v758_v56  ;;  %v842_v61 = vadd.f32 %v2002_v41, %v774_v57 }
  0xca   : > { %v921_v62 = vmax.f32 %v857_v58, 0.0  ;;  %v937_v63 = vmax.f32 %v873_v59, 0.0 }
  0xcb   : > { %v890_v0 = vmax.f32 %v826_v60, 0.0  ;;  %v906_v1 = vmax.f32 %v842_v61, 0.0 }
  0xcc   : > { %v985_v2 = vpack.c.bf16 %v921_v62, %v921_v62  ;;  %v1001_v3 = vpack.c.bf16 %v937_v63, %v937_v63 }
  0xcd   : > { %v954_v4 = vpack.c.bf16 %v890_v0, %v890_v0  ;;  %v970_v5 = vpack.c.bf16 %v906_v1, %v906_v1  ;;  %v680_v6 = vpop.f32.mrf.mxu2  ;;  %v720_v7 = vpop.f32.mrf.mxu3 }
  0xce   : > { %1050 = vst.msk [vmem:[%s2011_s15 + $0x8c] sm:$0xf] %vm1014_vm2, %v985_v2  ;;  %v790_v8 = vmul.f32 %v1997_v40, %v680_v6  ;;  %v806_v9 = vmul.f32 %v1997_v40, %v720_v7  ;;  %v602_v10 = vpop.f32.mrf.mxu0  ;;  %v642_v11 = vpop.f32.mrf.mxu1 }
  0xcf   : > { %1066 = vst.msk [vmem:[%s2011_s15 + $0xcc] sm:$0xf] %vm1014_vm2, %v1001_v3  ;;  %v759_v12 = vmul.f32 %v1997_v40, %v602_v10  ;;  %v775_v13 = vmul.f32 %v1997_v40, %v642_v11 }
  0xd0   : > { %1019 = vst.msk [vmem:[%s2011_s15 + $0x10] sm:$0xf] %vm1014_vm2, %v954_v4  ;;  %v858_v14 = vadd.f32 %v2002_v41, %v790_v8  ;;  %v874_v15 = vadd.f32 %v2002_v41, %v806_v9 }
  0xd1   : > { %1035 = vst.msk [vmem:[%s2011_s15 + $0x50] sm:$0xf] %vm1014_vm2, %v970_v5  ;;  %v827_v16 = vadd.f32 %v2002_v41, %v759_v12  ;;  %v843_v17 = vadd.f32 %v2002_v41, %v775_v13 }
  0xd2   : > { %v922_v18 = vmax.f32 %v858_v14, 0.0  ;;  %v938_v19 = vmax.f32 %v874_v15, 0.0 }
  0xd3   : > { %v891_v20 = vmax.f32 %v827_v16, 0.0  ;;  %v907_v21 = vmax.f32 %v843_v17, 0.0 }
  0xd4   : > { %v986_v22 = vpack.c.bf16 %v922_v18, %v922_v18  ;;  %v1002_v23 = vpack.c.bf16 %v938_v19, %v938_v19 }
  0xd5   : > { %v955_v24 = vpack.c.bf16 %v891_v20, %v891_v20  ;;  %v971_v25 = vpack.c.bf16 %v907_v21, %v907_v21  ;;  %v682_v26 = vpop.f32.mrf.mxu2  ;;  %v722_v27 = vpop.f32.mrf.mxu3 }
  0xd6   : > { %1051 = vst.msk [vmem:[%s2011_s15 + $0x90] sm:$0xf] %vm1014_vm2, %v986_v22  ;;  %v791_v28 = vmul.f32 %v1997_v40, %v682_v26  ;;  %v807_v29 = vmul.f32 %v1997_v40, %v722_v27  ;;  %v605_v30 = vpop.f32.mrf.mxu0  ;;  %v645_v31 = vpop.f32.mrf.mxu1 }
  0xd7   : > { %1067 = vst.msk [vmem:[%s2011_s15 + $0xd0] sm:$0xf] %vm1014_vm2, %v1002_v23  ;;  %v760_v32 = vmul.f32 %v1997_v40, %v605_v30  ;;  %v776_v33 = vmul.f32 %v1997_v40, %v645_v31 }
  0xd8   : > { %1020 = vst.msk [vmem:[%s2011_s15 + $0x14] sm:$0xf] %vm1014_vm2, %v955_v24  ;;  %v859_v34 = vadd.f32 %v2002_v41, %v791_v28  ;;  %v875_v35 = vadd.f32 %v2002_v41, %v807_v29 }
  0xd9   : > { %1036 = vst.msk [vmem:[%s2011_s15 + $0x54] sm:$0xf] %vm1014_vm2, %v971_v25  ;;  %v828_v36 = vadd.f32 %v2002_v41, %v760_v32  ;;  %v844_v37 = vadd.f32 %v2002_v41, %v776_v33 }
  0xda   : > { %v923_v38 = vmax.f32 %v859_v34, 0.0  ;;  %v939_v39 = vmax.f32 %v875_v35, 0.0 }
  0xdb   : > { %v892_v42 = vmax.f32 %v828_v36, 0.0  ;;  %v908_v43 = vmax.f32 %v844_v37, 0.0 }
  0xdc   : > { %v987_v44 = vpack.c.bf16 %v923_v38, %v923_v38  ;;  %v1003_v45 = vpack.c.bf16 %v939_v39, %v939_v39 }
  0xdd   : > { %v956_v46 = vpack.c.bf16 %v892_v42, %v892_v42  ;;  %v972_v47 = vpack.c.bf16 %v908_v43, %v908_v43  ;;  %v685_v48 = vpop.f32.mrf.mxu2  ;;  %v725_v49 = vpop.f32.mrf.mxu3 }
  0xde   : > { %1052 = vst.msk [vmem:[%s2011_s15 + $0x94] sm:$0xf] %vm1014_vm2, %v987_v44  ;;  %v792_v50 = vmul.f32 %v1997_v40, %v685_v48  ;;  %v808_v51 = vmul.f32 %v1997_v40, %v725_v49  ;;  %v607_v52 = vpop.f32.mrf.mxu0  ;;  %v647_v53 = vpop.f32.mrf.mxu1 }
  0xdf   : > { %1068 = vst.msk [vmem:[%s2011_s15 + $0xd4] sm:$0xf] %vm1014_vm2, %v1003_v45  ;;  %v761_v54 = vmul.f32 %v1997_v40, %v607_v52  ;;  %v777_v55 = vmul.f32 %v1997_v40, %v647_v53 }
  0xe0   : > { %1021 = vst.msk [vmem:[%s2011_s15 + $0x18] sm:$0xf] %vm1014_vm2, %v956_v46  ;;  %v860_v56 = vadd.f32 %v2002_v41, %v792_v50  ;;  %v876_v57 = vadd.f32 %v2002_v41, %v808_v51 }
  0xe1   : > { %1037 = vst.msk [vmem:[%s2011_s15 + $0x58] sm:$0xf] %vm1014_vm2, %v972_v47  ;;  %v829_v58 = vadd.f32 %v2002_v41, %v761_v54  ;;  %v845_v59 = vadd.f32 %v2002_v41, %v777_v55 }
  0xe2   : > { %v924_v60 = vmax.f32 %v860_v56, 0.0  ;;  %v940_v61 = vmax.f32 %v876_v57, 0.0 }
  0xe3   : > { %v893_v62 = vmax.f32 %v829_v58, 0.0  ;;  %v909_v63 = vmax.f32 %v845_v59, 0.0 }
  0xe4   : > { %v988_v0 = vpack.c.bf16 %v924_v60, %v924_v60  ;;  %v1004_v1 = vpack.c.bf16 %v940_v61, %v940_v61 }
  0xe5   : > { %v957_v2 = vpack.c.bf16 %v893_v62, %v893_v62  ;;  %v973_v3 = vpack.c.bf16 %v909_v63, %v909_v63  ;;  %v687_v4 = vpop.f32.mrf.mxu2  ;;  %v727_v5 = vpop.f32.mrf.mxu3 }
  0xe6   : > { %1053 = vst.msk [vmem:[%s2011_s15 + $0x98] sm:$0xf] %vm1014_vm2, %v988_v0  ;;  %v793_v6 = vmul.f32 %v1997_v40, %v687_v4  ;;  %v809_v7 = vmul.f32 %v1997_v40, %v727_v5  ;;  %v610_v8 = vpop.f32.mrf.mxu0  ;;  %v650_v9 = vpop.f32.mrf.mxu1 }
  0xe7   : > { %1069 = vst.msk [vmem:[%s2011_s15 + $0xd8] sm:$0xf] %vm1014_vm2, %v1004_v1  ;;  %v762_v10 = vmul.f32 %v1997_v40, %v610_v8  ;;  %v778_v11 = vmul.f32 %v1997_v40, %v650_v9 }
  0xe8   : > { %1022 = vst.msk [vmem:[%s2011_s15 + $0x1c] sm:$0xf] %vm1014_vm2, %v957_v2  ;;  %v861_v12 = vadd.f32 %v2002_v41, %v793_v6  ;;  %v877_v13 = vadd.f32 %v2002_v41, %v809_v7 }
  0xe9   : > { %1038 = vst.msk [vmem:[%s2011_s15 + $0x5c] sm:$0xf] %vm1014_vm2, %v973_v3  ;;  %v830_v14 = vadd.f32 %v2002_v41, %v762_v10  ;;  %v846_v15 = vadd.f32 %v2002_v41, %v778_v11 }
  0xea   : > { %v925_v16 = vmax.f32 %v861_v12, 0.0  ;;  %v941_v17 = vmax.f32 %v877_v13, 0.0 }
  0xeb   : > { %v894_v18 = vmax.f32 %v830_v14, 0.0  ;;  %v910_v19 = vmax.f32 %v846_v15, 0.0 }
  0xec   : > { %v989_v20 = vpack.c.bf16 %v925_v16, %v925_v16  ;;  %v1005_v21 = vpack.c.bf16 %v941_v17, %v941_v17 }
  0xed   : > { %v958_v22 = vpack.c.bf16 %v894_v18, %v894_v18  ;;  %v974_v23 = vpack.c.bf16 %v910_v19, %v910_v19  ;;  %v690_v24 = vpop.f32.mrf.mxu2  ;;  %v730_v25 = vpop.f32.mrf.mxu3 }
  0xee   : > { %1054 = vst.msk [vmem:[%s2011_s15 + $0x9c] sm:$0xf] %vm1014_vm2, %v989_v20  ;;  %v794_v26 = vmul.f32 %v1997_v40, %v690_v24  ;;  %v810_v27 = vmul.f32 %v1997_v40, %v730_v25  ;;  %v612_v28 = vpop.f32.mrf.mxu0  ;;  %v652_v29 = vpop.f32.mrf.mxu1 }
  0xef   : > { %1070 = vst.msk [vmem:[%s2011_s15 + $0xdc] sm:$0xf] %vm1014_vm2, %v1005_v21  ;;  %v763_v30 = vmul.f32 %v1997_v40, %v612_v28  ;;  %v779_v31 = vmul.f32 %v1997_v40, %v652_v29 }
  0xf0   : > { %1023 = vst.msk [vmem:[%s2011_s15 + $0x20] sm:$0xf] %vm1014_vm2, %v958_v22  ;;  %v862_v32 = vadd.f32 %v2002_v41, %v794_v26  ;;  %v878_v33 = vadd.f32 %v2002_v41, %v810_v27 }
  0xf1   : > { %1039 = vst.msk [vmem:[%s2011_s15 + $0x60] sm:$0xf] %vm1014_vm2, %v974_v23  ;;  %v831_v34 = vadd.f32 %v2002_v41, %v763_v30  ;;  %v847_v35 = vadd.f32 %v2002_v41, %v779_v31 }
  0xf2   : > { %v926_v36 = vmax.f32 %v862_v32, 0.0  ;;  %v942_v37 = vmax.f32 %v878_v33, 0.0 }
  0xf3   : > { %v895_v38 = vmax.f32 %v831_v34, 0.0  ;;  %v911_v39 = vmax.f32 %v847_v35, 0.0 }
  0xf4   : > { %v990_v42 = vpack.c.bf16 %v926_v36, %v926_v36  ;;  %v1006_v43 = vpack.c.bf16 %v942_v37, %v942_v37 }
  0xf5   : > { %v959_v44 = vpack.c.bf16 %v895_v38, %v895_v38  ;;  %v975_v45 = vpack.c.bf16 %v911_v39, %v911_v39  ;;  %v692_v46 = vpop.f32.mrf.mxu2  ;;  %v732_v47 = vpop.f32.mrf.mxu3 }
  0xf6   : > { %1055 = vst.msk [vmem:[%s2011_s15 + $0xa0] sm:$0xf] %vm1014_vm2, %v990_v42  ;;  %v795_v48 = vmul.f32 %v1997_v40, %v692_v46  ;;  %v811_v49 = vmul.f32 %v1997_v40, %v732_v47  ;;  %v615_v50 = vpop.f32.mrf.mxu0  ;;  %v655_v51 = vpop.f32.mrf.mxu1 }
  0xf7   : > { %1071 = vst.msk [vmem:[%s2011_s15 + $0xe0] sm:$0xf] %vm1014_vm2, %v1006_v43  ;;  %v764_v52 = vmul.f32 %v1997_v40, %v615_v50  ;;  %v780_v53 = vmul.f32 %v1997_v40, %v655_v51 }
  0xf8   : > { %1024 = vst.msk [vmem:[%s2011_s15 + $0x24] sm:$0xf] %vm1014_vm2, %v959_v44  ;;  %v863_v54 = vadd.f32 %v2002_v41, %v795_v48  ;;  %v879_v55 = vadd.f32 %v2002_v41, %v811_v49 }
  0xf9   : > { %1040 = vst.msk [vmem:[%s2011_s15 + $0x64] sm:$0xf] %vm1014_vm2, %v975_v45  ;;  %v832_v56 = vadd.f32 %v2002_v41, %v764_v52  ;;  %v848_v57 = vadd.f32 %v2002_v41, %v780_v53 }
  0xfa   : > { %v927_v58 = vmax.f32 %v863_v54, 0.0  ;;  %v943_v59 = vmax.f32 %v879_v55, 0.0 }
  0xfb   : > { %v896_v60 = vmax.f32 %v832_v56, 0.0  ;;  %v912_v61 = vmax.f32 %v848_v57, 0.0 }
  0xfc   : > { %v991_v62 = vpack.c.bf16 %v927_v58, %v927_v58  ;;  %v1007_v63 = vpack.c.bf16 %v943_v59, %v943_v59 }
  0xfd   : > { %v960_v0 = vpack.c.bf16 %v896_v60, %v896_v60  ;;  %v976_v1 = vpack.c.bf16 %v912_v61, %v912_v61  ;;  %v695_v2 = vpop.f32.mrf.mxu2  ;;  %v735_v3 = vpop.f32.mrf.mxu3 }
  0xfe   : > { %1056 = vst.msk [vmem:[%s2011_s15 + $0xa4] sm:$0xf] %vm1014_vm2, %v991_v62  ;;  %v796_v4 = vmul.f32 %v1997_v40, %v695_v2  ;;  %v812_v5 = vmul.f32 %v1997_v40, %v735_v3  ;;  %v617_v6 = vpop.f32.mrf.mxu0  ;;  %v657_v7 = vpop.f32.mrf.mxu1 }
  0xff   : > { %1072 = vst.msk [vmem:[%s2011_s15 + $0xe4] sm:$0xf] %vm1014_vm2, %v1007_v63  ;;  %v765_v8 = vmul.f32 %v1997_v40, %v617_v6  ;;  %v781_v9 = vmul.f32 %v1997_v40, %v657_v7 }
 0x100   : > { %1025 = vst.msk [vmem:[%s2011_s15 + $0x28] sm:$0xf] %vm1014_vm2, %v960_v0  ;;  %v864_v10 = vadd.f32 %v2002_v41, %v796_v4  ;;  %v880_v11 = vadd.f32 %v2002_v41, %v812_v5 }
 0x101   : > { %1041 = vst.msk [vmem:[%s2011_s15 + $0x68] sm:$0xf] %vm1014_vm2, %v976_v1  ;;  %v833_v12 = vadd.f32 %v2002_v41, %v765_v8  ;;  %v849_v13 = vadd.f32 %v2002_v41, %v781_v9 }
 0x102   : > { %v928_v14 = vmax.f32 %v864_v10, 0.0  ;;  %v944_v15 = vmax.f32 %v880_v11, 0.0 }
 0x103   : > { %v897_v16 = vmax.f32 %v833_v12, 0.0  ;;  %v913_v17 = vmax.f32 %v849_v13, 0.0 }
 0x104   : > { %v992_v18 = vpack.c.bf16 %v928_v14, %v928_v14  ;;  %v1008_v19 = vpack.c.bf16 %v944_v15, %v944_v15 }
 0x105   : > { %v961_v20 = vpack.c.bf16 %v897_v16, %v897_v16  ;;  %v977_v21 = vpack.c.bf16 %v913_v17, %v913_v17  ;;  %v697_v22 = vpop.f32.mrf.mxu2  ;;  %v737_v23 = vpop.f32.mrf.mxu3 }
 0x106   : > { %1057 = vst.msk [vmem:[%s2011_s15 + $0xa8] sm:$0xf] %vm1014_vm2, %v992_v18  ;;  %v797_v24 = vmul.f32 %v1997_v40, %v697_v22  ;;  %v813_v25 = vmul.f32 %v1997_v40, %v737_v23  ;;  %v620_v26 = vpop.f32.mrf.mxu0  ;;  %v660_v27 = vpop.f32.mrf.mxu1 }
 0x107   : > { %1073 = vst.msk [vmem:[%s2011_s15 + $0xe8] sm:$0xf] %vm1014_vm2, %v1008_v19  ;;  %v766_v28 = vmul.f32 %v1997_v40, %v620_v26  ;;  %v782_v29 = vmul.f32 %v1997_v40, %v660_v27 }
 0x108   : > { %1026 = vst.msk [vmem:[%s2011_s15 + $0x2c] sm:$0xf] %vm1014_vm2, %v961_v20  ;;  %v865_v30 = vadd.f32 %v2002_v41, %v797_v24  ;;  %v881_v31 = vadd.f32 %v2002_v41, %v813_v25 }
 0x109   : > { %1042 = vst.msk [vmem:[%s2011_s15 + $0x6c] sm:$0xf] %vm1014_vm2, %v977_v21  ;;  %v834_v32 = vadd.f32 %v2002_v41, %v766_v28  ;;  %v850_v33 = vadd.f32 %v2002_v41, %v782_v29 }
 0x10a   : > { %v929_v34 = vmax.f32 %v865_v30, 0.0  ;;  %v945_v35 = vmax.f32 %v881_v31, 0.0 }
 0x10b   : > { %v898_v36 = vmax.f32 %v834_v32, 0.0  ;;  %v914_v37 = vmax.f32 %v850_v33, 0.0 }
 0x10c   : > { %v993_v38 = vpack.c.bf16 %v929_v34, %v929_v34  ;;  %v1009_v39 = vpack.c.bf16 %v945_v35, %v945_v35 }
 0x10d   : > { %v962_v42 = vpack.c.bf16 %v898_v36, %v898_v36  ;;  %v978_v43 = vpack.c.bf16 %v914_v37, %v914_v37  ;;  %v700_v44 = vpop.f32.mrf.mxu2  ;;  %v740_v45 = vpop.f32.mrf.mxu3 }
 0x10e   : > { %1058 = vst.msk [vmem:[%s2011_s15 + $0xac] sm:$0xf] %vm1014_vm2, %v993_v38  ;;  %v798_v46 = vmul.f32 %v1997_v40, %v700_v44  ;;  %v814_v47 = vmul.f32 %v1997_v40, %v740_v45  ;;  %v622_v48 = vpop.f32.mrf.mxu0  ;;  %v662_v49 = vpop.f32.mrf.mxu1 }
 0x10f   : > { %1074 = vst.msk [vmem:[%s2011_s15 + $0xec] sm:$0xf] %vm1014_vm2, %v1009_v39  ;;  %v767_v50 = vmul.f32 %v1997_v40, %v622_v48  ;;  %v783_v51 = vmul.f32 %v1997_v40, %v662_v49 }
 0x110   : > { %1027 = vst.msk [vmem:[%s2011_s15 + $0x30] sm:$0xf] %vm1014_vm2, %v962_v42  ;;  %v866_v52 = vadd.f32 %v2002_v41, %v798_v46  ;;  %v882_v53 = vadd.f32 %v2002_v41, %v814_v47 }
 0x111   : > { %1043 = vst.msk [vmem:[%s2011_s15 + $0x70] sm:$0xf] %vm1014_vm2, %v978_v43  ;;  %v835_v54 = vadd.f32 %v2002_v41, %v767_v50  ;;  %v851_v55 = vadd.f32 %v2002_v41, %v783_v51 }
 0x112   : > { %v930_v56 = vmax.f32 %v866_v52, 0.0  ;;  %v946_v57 = vmax.f32 %v882_v53, 0.0 }
 0x113   : > { %v899_v58 = vmax.f32 %v835_v54, 0.0  ;;  %v915_v59 = vmax.f32 %v851_v55, 0.0 }
 0x114   : > { %v994_v60 = vpack.c.bf16 %v930_v56, %v930_v56  ;;  %v1010_v61 = vpack.c.bf16 %v946_v57, %v946_v57 }
 0x115   : > { %v963_v62 = vpack.c.bf16 %v899_v58, %v899_v58  ;;  %v979_v63 = vpack.c.bf16 %v915_v59, %v915_v59  ;;  %v702_v0 = vpop.f32.mrf.mxu2  ;;  %v742_v1 = vpop.f32.mrf.mxu3 }
 0x116   : > { %1059 = vst.msk [vmem:[%s2011_s15 + $0xb0] sm:$0xf] %vm1014_vm2, %v994_v60  ;;  %v799_v2 = vmul.f32 %v1997_v40, %v702_v0  ;;  %v815_v3 = vmul.f32 %v1997_v40, %v742_v1  ;;  %v625_v4 = vpop.f32.mrf.mxu0  ;;  %v665_v5 = vpop.f32.mrf.mxu1 }
 0x117   : > { %1075 = vst.msk [vmem:[%s2011_s15 + $0xf0] sm:$0xf] %vm1014_vm2, %v1010_v61  ;;  %v768_v6 = vmul.f32 %v1997_v40, %v625_v4  ;;  %v784_v7 = vmul.f32 %v1997_v40, %v665_v5 }
 0x118   : > { %1028 = vst.msk [vmem:[%s2011_s15 + $0x34] sm:$0xf] %vm1014_vm2, %v963_v62  ;;  %v867_v8 = vadd.f32 %v2002_v41, %v799_v2  ;;  %v883_v9 = vadd.f32 %v2002_v41, %v815_v3 }
 0x119   : > { %1044 = vst.msk [vmem:[%s2011_s15 + $0x74] sm:$0xf] %vm1014_vm2, %v979_v63  ;;  %v836_v10 = vadd.f32 %v2002_v41, %v768_v6  ;;  %v852_v11 = vadd.f32 %v2002_v41, %v784_v7 }
 0x11a   : > { %v931_v12 = vmax.f32 %v867_v8, 0.0  ;;  %v947_v13 = vmax.f32 %v883_v9, 0.0 }
 0x11b   : > { %v900_v14 = vmax.f32 %v836_v10, 0.0  ;;  %v916_v15 = vmax.f32 %v852_v11, 0.0 }
 0x11c   : > { %v995_v16 = vpack.c.bf16 %v931_v12, %v931_v12  ;;  %v1011_v17 = vpack.c.bf16 %v947_v13, %v947_v13 }
 0x11d   : > { %v964_v18 = vpack.c.bf16 %v900_v14, %v900_v14  ;;  %v980_v19 = vpack.c.bf16 %v916_v15, %v916_v15  ;;  %v705_v20 = vpop.f32.mrf.mxu2  ;;  %v745_v21 = vpop.f32.mrf.mxu3 }
 0x11e   : > { %1060 = vst.msk [vmem:[%s2011_s15 + $0xb4] sm:$0xf] %vm1014_vm2, %v995_v16  ;;  %v800_v22 = vmul.f32 %v1997_v40, %v705_v20  ;;  %v816_v23 = vmul.f32 %v1997_v40, %v745_v21  ;;  %v627_v24 = vpop.f32.mrf.mxu0  ;;  %v667_v25 = vpop.f32.mrf.mxu1 }
 0x11f   : > { %1076 = vst.msk [vmem:[%s2011_s15 + $0xf4] sm:$0xf] %vm1014_vm2, %v1011_v17  ;;  %v769_v26 = vmul.f32 %v1997_v40, %v627_v24  ;;  %v785_v27 = vmul.f32 %v1997_v40, %v667_v25 }
 0x120   : > { %1029 = vst.msk [vmem:[%s2011_s15 + $0x38] sm:$0xf] %vm1014_vm2, %v964_v18  ;;  %v868_v28 = vadd.f32 %v2002_v41, %v800_v22  ;;  %v884_v29 = vadd.f32 %v2002_v41, %v816_v23 }
 0x121   : > { %1045 = vst.msk [vmem:[%s2011_s15 + $0x78] sm:$0xf] %vm1014_vm2, %v980_v19  ;;  %v837_v30 = vadd.f32 %v2002_v41, %v769_v26  ;;  %v853_v31 = vadd.f32 %v2002_v41, %v785_v27 }
 0x122   : > { %v932_v32 = vmax.f32 %v868_v28, 0.0  ;;  %v948_v33 = vmax.f32 %v884_v29, 0.0 }
 0x123   : > { %v901_v34 = vmax.f32 %v837_v30, 0.0  ;;  %v917_v35 = vmax.f32 %v853_v31, 0.0 }
 0x124   : > { %v996_v36 = vpack.c.bf16 %v932_v32, %v932_v32  ;;  %v1012_v37 = vpack.c.bf16 %v948_v33, %v948_v33 }
 0x125   : > { %v965_v38 = vpack.c.bf16 %v901_v34, %v901_v34  ;;  %v981_v39 = vpack.c.bf16 %v917_v35, %v917_v35  ;;  %v707_v42 = vpop.f32.mrf.mxu2  ;;  %v747_v43 = vpop.f32.mrf.mxu3 }
 0x126   : > { %1061 = vst.msk [vmem:[%s2011_s15 + $0xb8] sm:$0xf] %vm1014_vm2, %v996_v36  ;;  %v801_v44 = vmul.f32 %v1997_v40, %v707_v42  ;;  %v817_v45 = vmul.f32 %v1997_v40, %v747_v43 }
 0x127   : > { %1077 = vst.msk [vmem:[%s2011_s15 + $0xf8] sm:$0xf] %vm1014_vm2, %v1012_v37 }
 0x128   : > { %1030 = vst.msk [vmem:[%s2011_s15 + $0x3c] sm:$0xf] %vm1014_vm2, %v965_v38  ;;  %v869_v46 = vadd.f32 %v2002_v41, %v801_v44  ;;  %v885_v47 = vadd.f32 %v2002_v41, %v817_v45 }
 0x129   : > { %1046 = vst.msk [vmem:[%s2011_s15 + $0x7c] sm:$0xf] %vm1014_vm2, %v981_v39 }
 0x12a   : > { %v933_v48 = vmax.f32 %v869_v46, 0.0  ;;  %v949_v49 = vmax.f32 %v885_v47, 0.0 }
 0x12b   : > { %1085 = sbr.rel (!%p1901_p4) target bundleno = 368 (0x170), region = 40 }
 0x12c   : > { %v997_v50 = vpack.c.bf16 %v933_v48, %v933_v48  ;;  %v1013_v51 = vpack.c.bf16 %v949_v49, %v949_v49 }
 0x12e   : > { %1062 = vst.msk [vmem:[%s2011_s15 + $0xbc] sm:$0xf] %vm1014_vm2, %v997_v50 }
 0x12f   : > { %1078 = vst.msk [vmem:[%s2011_s15 + $0xfc] sm:$0xf] %vm1014_vm2, %v1013_v51 }
 0x130   : > { %s2420_s27 = smov (!%p1088_p8, %s1087_s27), 64 }
 0x131   : > { %s1604_s6 = sshll.u32 %s2420_s27, 2 }
 0x132   : > { %p1607_p9 = scmp.eq.s32.totalorder %s1604_s6, 0 }
 0x133   : > { %s2276_s7 = sshrl.u32 (!%p1607_p9), %s2420_s27, 5 }
 0x134   : > { %1096 = sbr.rel (%p1607_p9) target bundleno = 368 (0x170), region = 44  ;;  %p1608_p10 = scmp.le.s32.totalorder (!%p1607_p9), %s2276_s7, 0 }
 0x139   : > { %1375 = sbr.rel (%p1608_p10) target bundleno = 351 (0x15f), region = 116  ;;  %s2411_s18 = smov (!%p1608_p10), %s2270_s5 }
 0x13a   : > { %s2412_s23 = smov (!%p1608_p10), %s2011_s15  ;;  %s2285_s26 = smov (!%p1608_p10), 0  }
 0x13b   : > { %s2287_s8 = smov (!%p1608_p10), 0  }
 0x13e LB: >> { %v1113_v40 = vld [vmem:[%s1825_s23] sm:$0xf]  ;;  %v1115_v41 = vld [vmem:[%s1825_s23 + $0x4] sm:$0xf]  ;;  %v1117_v52 = vld [vmem:[%s1825_s23 + $0x8] sm:$0xf]  ;;  %s1833_s8 = sphi %s2287_s8, %s1107_s8   ;;  %s1829_s26 = sphi %s2285_s26, %s2415_s26   ;;  %s1825_s23 = sphi %s2412_s23, %s2414_s23   ;;  %s1821_s18 = sphi %s2411_s18, %s2413_s18  }
 0x13f   : >> { %1114 = vst [vmem:[%s1821_s18] sm:$0xf] %v1113_v40  ;;  %v1119_v53 = vld [vmem:[%s1825_s23 + $0xc] sm:$0xf]  ;;  %v1121_v54 = vld [vmem:[%s1825_s23 + $0x10] sm:$0xf]  ;;  %s1177_s9 = sadd.s32 1, %s1829_s26 }
 0x140   : >> { %1116 = vst [vmem:[%s1821_s18 + $0x4] sm:$0xf] %v1115_v41  ;;  %v1123_v55 = vld [vmem:[%s1825_s23 + $0x14] sm:$0xf]  ;;  %v1125_v56 = vld [vmem:[%s1825_s23 + $0x18] sm:$0xf]  ;;  %p1178_p11 = scmp.ge.s32.totalorder %s1177_s9, %s2276_s7 }
 0x141   : >> { %1118 = vst [vmem:[%s1821_s18 + $0x8] sm:$0xf] %v1117_v52  ;;  %v1127_v57 = vld [vmem:[%s1825_s23 + $0x1c] sm:$0xf]  ;;  %v1129_v58 = vld [vmem:[%s1825_s23 + $0x20] sm:$0xf] }
 0x142   : >> { %1120 = vst [vmem:[%s1821_s18 + $0xc] sm:$0xf] %v1119_v53  ;;  %v1131_v59 = vld [vmem:[%s1825_s23 + $0x24] sm:$0xf]  ;;  %v1133_v60 = vld [vmem:[%s1825_s23 + $0x28] sm:$0xf] }
 0x143   : >> { %1122 = vst [vmem:[%s1821_s18 + $0x10] sm:$0xf] %v1121_v54  ;;  %v1135_v61 = vld [vmem:[%s1825_s23 + $0x2c] sm:$0xf]  ;;  %v1137_v62 = vld [vmem:[%s1825_s23 + $0x30] sm:$0xf] }
 0x144   : >> { %1124 = vst [vmem:[%s1821_s18 + $0x14] sm:$0xf] %v1123_v55  ;;  %v1139_v63 = vld [vmem:[%s1825_s23 + $0x34] sm:$0xf]  ;;  %v1141_v0 = vld [vmem:[%s1825_s23 + $0x38] sm:$0xf] }
 0x145   : >> { %1126 = vst [vmem:[%s1821_s18 + $0x18] sm:$0xf] %v1125_v56  ;;  %v1143_v1 = vld [vmem:[%s1825_s23 + $0x3c] sm:$0xf]  ;;  %v1145_v2 = vld [vmem:[%s1825_s23 + $0x40] sm:$0xf] }
 0x146   : >> { %1128 = vst [vmem:[%s1821_s18 + $0x1c] sm:$0xf] %v1127_v57  ;;  %v1147_v3 = vld [vmem:[%s1825_s23 + $0x44] sm:$0xf]  ;;  %s2422_s9 = smov (%p1178_p11, %s1177_s9), 0  ;;  %s1107_s8 = sadd.s32 1, %s1833_s8  }
 0x147   : >> { %1130 = vst [vmem:[%s1821_s18 + $0x20] sm:$0xf] %v1129_v58  ;;  %v1149_v4 = vld [vmem:[%s1825_s23 + $0x48] sm:$0xf]  ;;  %v1151_v5 = vld [vmem:[%s1825_s23 + $0x4c] sm:$0xf]  ;;  %p1106_p12 = scmp.ge.s32.totalorder %s1107_s8, %s2276_s7  ;;  %s2415_s26 = smov %s2422_s9 }
 0x148   : >> { %1132 = vst [vmem:[%s1821_s18 + $0x24] sm:$0xf] %v1131_v59  ;;  %s1609_s10 = sshll.u32 %s2422_s9, 7  ;;  %v1153_v6 = vld [vmem:[%s1825_s23 + $0x50] sm:$0xf] }
 0x149   : >> { %1134 = vst [vmem:[%s1821_s18 + $0x28] sm:$0xf] %v1133_v60  ;;  %s2346_s11 = scalar_lea.vmem %s2011_s15, %s1609_s10 [#allocation2]   ;;  %s1183_s12 = scalar_lea.vmem %s2270_s5, %s1609_s10   ;;  %v1155_v7 = vld [vmem:[%s1825_s23 + $0x54] sm:$0xf]  ;;  %v1157_v8 = vld [vmem:[%s1825_s23 + $0x58] sm:$0xf] }
 0x14a   : >> { %1136 = vst [vmem:[%s1821_s18 + $0x2c] sm:$0xf] %v1135_v61  ;;  %v1159_v9 = vld [vmem:[%s1825_s23 + $0x5c] sm:$0xf]  ;;  %v1161_v10 = vld [vmem:[%s1825_s23 + $0x60] sm:$0xf] }
 0x14b   : >> { %1138 = vst [vmem:[%s1821_s18 + $0x30] sm:$0xf] %v1137_v62  ;;  %v1163_v11 = vld [vmem:[%s1825_s23 + $0x64] sm:$0xf]  ;;  %v1165_v12 = vld [vmem:[%s1825_s23 + $0x68] sm:$0xf] }
 0x14c   : >> { %1140 = vst [vmem:[%s1821_s18 + $0x34] sm:$0xf] %v1139_v63  ;;  %v1167_v13 = vld [vmem:[%s1825_s23 + $0x6c] sm:$0xf]  ;;  %v1169_v14 = vld [vmem:[%s1825_s23 + $0x70] sm:$0xf] }
 0x14d   : >> { %1142 = vst [vmem:[%s1821_s18 + $0x38] sm:$0xf] %v1141_v0  ;;  %v1171_v15 = vld [vmem:[%s1825_s23 + $0x74] sm:$0xf]  ;;  %v1173_v16 = vld [vmem:[%s1825_s23 + $0x78] sm:$0xf] }
 0x14e   : >> { %1144 = vst [vmem:[%s1821_s18 + $0x3c] sm:$0xf] %v1143_v1  ;;  %v1175_v17 = vld [vmem:[%s1825_s23 + $0x7c] sm:$0xf]  ;;  %s2414_s23 = smov %s2346_s11 }
 0x14f   : >> { %1146 = vst [vmem:[%s1821_s18 + $0x40] sm:$0xf] %v1145_v2 }
 0x150   : >> { %1148 = vst [vmem:[%s1821_s18 + $0x44] sm:$0xf] %v1147_v3 }
 0x151   : >> { %1150 = vst [vmem:[%s1821_s18 + $0x48] sm:$0xf] %v1149_v4 }
 0x152   : >> { %1152 = vst [vmem:[%s1821_s18 + $0x4c] sm:$0xf] %v1151_v5 }
 0x153   : >> { %1154 = vst [vmem:[%s1821_s18 + $0x50] sm:$0xf] %v1153_v6 }
 0x154   : >> { %1156 = vst [vmem:[%s1821_s18 + $0x54] sm:$0xf] %v1155_v7 }
 0x155   : >> { %1158 = vst [vmem:[%s1821_s18 + $0x58] sm:$0xf] %v1157_v8 }
 0x156   : >> { %1160 = vst [vmem:[%s1821_s18 + $0x5c] sm:$0xf] %v1159_v9 }
 0x157   : >> { %1162 = vst [vmem:[%s1821_s18 + $0x60] sm:$0xf] %v1161_v10 }
 0x158   : >> { %1164 = vst [vmem:[%s1821_s18 + $0x64] sm:$0xf] %v1163_v11 }
 0x159   : >> { %1166 = vst [vmem:[%s1821_s18 + $0x68] sm:$0xf] %v1165_v12 }
 0x15a   : >> { %1168 = vst [vmem:[%s1821_s18 + $0x6c] sm:$0xf] %v1167_v13  ;;  %1109 = sbr.rel (!%p1106_p12) target bundleno = 318 (0x13e), region = 122 }
 0x15b   : >> { %1170 = vst [vmem:[%s1821_s18 + $0x70] sm:$0xf] %v1169_v14 }
 0x15c   : >> { %1172 = vst [vmem:[%s1821_s18 + $0x74] sm:$0xf] %v1171_v15 }
 0x15d   : >> { %1174 = vst [vmem:[%s1821_s18 + $0x78] sm:$0xf] %v1173_v16 }
 0x15e   : >> { %1176 = vst [vmem:[%s1821_s18 + $0x7c] sm:$0xf] %v1175_v17  ;;  %s2413_s18 = smov %s1183_s12 }
 0x15f PF: > { %s2387_s13 = sand.u32 31, %s2420_s27   ;;  %s1656_s14 = sshll.u32 %s2276_s7, 7 }
 0x160   : > { %s1188_s17 = scalar_lea.vmem %s2011_s15, %s1656_s14 [#allocation2]   ;;  %s1190_s20 = scalar_lea.vmem %s2270_s5, %s1656_s14  }
 0x161   : > { %p1614_p13 = scmp.le.s32.totalorder %s2387_s13, 0 }
 0x162   : > { %s1835_s21 = smov (!%p1614_p13), %s1190_s20   ;;  %s1839_s24 = smov (!%p1614_p13), %s1188_s17  }
 0x163   : > { %1389 = sbr.rel (%p1614_p13) target bundleno = 368 (0x170), region = 127  ;;  %s1843_s25 = smov (!%p1614_p13), 0  }
 0x164   : > { %s1847_s28 = smov (!%p1614_p13), 0  }
 0x168 LB: >> { %v1200_v18 = vld [vmem:[%s1841_s24] sm:$0xf]  ;;  %s1202_s27 = sadd.s32 1, %s1845_s25  ;;  %s1194_s28 = sadd.s32 1, %s1849_s28   ;;  %s1849_s28 = sphi %s1847_s28, %s1194_s28   ;;  %s1845_s25 = sphi %s1843_s25, %s1844_s25   ;;  %s1841_s24 = sphi %s1839_s24, %s1207_s24   ;;  %s1837_s21 = sphi %s1835_s21, %s1208_s21  }
 0x169   : >> { %1201 = vst [vmem:[%s1837_s21] sm:$0xf] %v1200_v18  ;;  %p1203_p0 = scmp.ge.s32.totalorder %s1202_s27, %s2387_s13  ;;  %p1193_p1 = scmp.ge.s32.totalorder %s1194_s28, %s2387_s13 }
 0x16b   : >> { %s2424_s27 = smov (%p1203_p0, %s1202_s27), 0  ;;  %1196 = sbr.rel (!%p1193_p1) target bundleno = 360 (0x168), region = 133 }
 0x16c   : >> { %s1615_s15 = sshll.u32 %s2424_s27, 2  ;;  %s1844_s25 = smov %s2424_s27  }
 0x16d   : >> { %s1207_s24 = scalar_lea.vmem %s1188_s17, %s1615_s15 [#allocation2]   ;;  %s1208_s21 = scalar_lea.vmem %s1190_s20, %s1615_s15  }
 0x170 PF: > { %p11_p2 = scmp.ge.s32.totalorder %s1891_s19, 4   ;;  %s2416_s15 = smov %s1813_s16 }
 0x171   : > { %s2417_s16 = smov %s1899_s22  ;;  %s2418_s17 = smov %s1891_s19 }
 0x172   :  { %13 = sbr.rel (!%p11_p2) target bundleno = 2 (0x2), region = 144 }

// kernel: horseshoe_forward.26
= control target key start
LH: loop header
LB: loop body
LE: loop exit
PB: predicated region body
PF: predicated region fallthrough
CT: control target
= control target key end

     0   :  { %s1876_s15 = smov 0   ;;  %s1878_s16 = smov 0   ;;  %s2405_s0 = inlined_call_operand.vmem [shape: bf16[800,72], index: 0, kind: input, shape index: {}]   ;;  %s2406_s1 = inlined_call_operand.vmem [shape: bf16[72,2], index: 1, kind: input, shape index: {}]   ;;  %s2407_s2 = inlined_call_operand.vmem [shape: f32[1,2], index: 2, kind: input, shape index: {}]   ;;  %s2408_s3 = inlined_call_operand.vmem [shape: f32[1,2], index: 3, kind: input, shape index: {}]   ;;  %s2409_s4 = inlined_call_operand.vmem [shape: bf16[800,2], index: 4, kind: output, shape index: {}]  }
   0x1   :  { %s1880_s17 = smov 0  }
   0x2 LB: > { %s1889_s18 = sadd.s32 4294967295, %s1817_s17   ;;  %s1891_s19 = sadd.s32 1, %s1817_s17   ;;  %s1817_s17 = sphi %s1880_s17, %s2418_s17   ;;  %s1813_s16 = sphi %s1878_s16, %s2417_s16   ;;  %s1809_s15 = sphi %s1876_s15, %s2416_s15  }
   0x3   : > { %s107_s20 = ssub.s32 %s1817_s17, %s1891_s19  ;;  %s110_s21 = sadd.s32 1, %s1813_s16 }
   0x4   : > { %p108_p0 = scmp.eq.s32.totalorder %s107_s20, 0  ;;  %p120_p1 = scmp.ne.s32.totalorder %s1813_s16, %s1809_s15 }
   0x5   : > { %p121_p2 = scmp.eq.s32.totalorder %s1889_s18, 1  ;;  %p1422_p3 = scmp.ge.s32.totalorder %s1817_s17, 1 }
   0x6   : > { %s1899_s22 = scalar_select %p108_p0, %s1813_s16, %s110_s21  }
   0x7   : > { %p1901_p4 = por %p121_p2, %p120_p1  ;;  %p171_p5 = scmp.lt.s32.totalorder %s1817_s17, 3 }
   0x9   : > { %p172_p6 = pnand %p1422_p3, %p171_p5 }
   0xa   : > { %s1909_s26 = sshll.u32 (!%p172_p6), %s1889_s18, 6  ;;  %s197_s24 = sand.u32 (!%p172_p6), 1, %s1809_s15  }
   0xb   : > { %175 = sbr.rel (%p172_p6) target bundleno = 368 (0x170), region = 36  ;;  %p205_p7 = scmp.lt.s32.totalorder (!%p172_p6), %s1909_s26, 99 }
   0xc   : > { %s1423_s25 = sshll.u32 (!%p172_p6), %s197_s24, 8 }
   0xd   : > { %s2011_s15 = scalar_lea.vmem (!%p172_p6), [#allocation2], %s1423_s25  }
  0x10   : > { %v292_v0 = vld [vmem:[%s2406_s1 + $0x20] sm:$0xf]  ;;  %vm577_vm0 = vcmask 1043456   ;;  %v1654_v4 = vld [vmem:[%s2406_s1 + $0x18] sm:$0xff]  ;;  %v1653_v5 = vld [vmem:[%s2406_s1 + $0x10] sm:$0xff]  ;;  %s206_s5 = scalar_select %p205_p7, %s1909_s26, 99 }
  0x11   : > { %v470_v1 = vunpack.c.l.b16 %v292_v0  ;;  %v1652_v6 = vld [vmem:[%s2406_s1 + $0x8] sm:$0xff]  ;;  %v1651_v7 = vld [vmem:[%s2406_s1] sm:$0xff]  ;;  %vm480_vm1 = vcmask 588800   ;;  %vm1014_vm2 = vcmask 11264   ;;  %s1087_s27 = ssub.s32 (%p1901_p4), 100, %s1909_s26  ;;  %s1655_s28 = sshll.u32 (%p1901_p4), %s1889_s18, 8 }
  0x12   : > { %s1425_s8 = sshll.u32 %s206_s5, 2  ;;  %v1997_v40 = vld [vmem:[%s2407_s2] ss:$0 sm:$0xff]  ;;  %p1088_p8 = scmp.lt.s32.totalorder (%p1901_p4), %s1087_s27, 64 }
  0x13   : > { %v475_v2 = vpack.c.b16 %v470_v1, %v470_v1  ;;  %s1928_s13 = scalar_lea.vmem %s2405_s0, %s1425_s8  ;;  %v2002_v41 = vld [vmem:[%s2408_s3] ss:$0 sm:$0xff]  ;;  %s2270_s5 = scalar_lea.vmem (%p1901_p4), %s2409_s4, %s1655_s28  }
  0x14   : > { %v1619_v8 = vld [vmem:[%s1928_s13] sm:$0xff]  ;;  %v1620_v12 = vld [vmem:[%s1928_s13 + $0x8] sm:$0xff]  ;;  %v1621_v16 = vld [vmem:[%s1928_s13 + $0x10] sm:$0xff] }
  0x15   : > { %v579_v3 = vsel %vm577_vm0, %v475_v2, 0  ;;  %v1627_v9 = vld [vmem:[%s1928_s13 + $0x40] sm:$0xff]  ;;  %v1628_v13 = vld [vmem:[%s1928_s13 + $0x48] sm:$0xff]  ;;  %v1629_v17 = vld [vmem:[%s1928_s13 + $0x50] sm:$0xff] }
  0x16   : > { %584 = vmatpush.bf16.msra.mxu0 %v579_v3  ;;  %1658 = vmatpush.bf16.msra.mxu1 %v579_v3  ;;  %v1635_v10 = vld [vmem:[%s1928_s13 + $0x80] sm:$0xff]  ;;  %v1636_v14 = vld [vmem:[%s1928_s13 + $0x88] sm:$0xff]  ;;  %v1637_v18 = vld [vmem:[%s1928_s13 + $0x90] sm:$0xff] }
  0x17   : > { %1659 = vmatpush.bf16.msra.mxu2 %v579_v3  ;;  %1660 = vmatpush.bf16.msra.mxu3 %v579_v3  ;;  %v1643_v11 = vld [vmem:[%s1928_s13 + $0xc0] sm:$0xff]  ;;  %v1644_v15 = vld [vmem:[%s1928_s13 + $0xc8] sm:$0xff]  ;;  %v1645_v19 = vld [vmem:[%s1928_s13 + $0xd0] sm:$0xff] }
  0x18   : > { %v1622_v20 = vld [vmem:[%s1928_s13 + $0x18] sm:$0xff]  ;;  %v1623_v24 = vld [vmem:[%s1928_s13 + $0x20] sm:$0xff]  ;;  %v1624_v28 = vld [vmem:[%s1928_s13 + $0x28] sm:$0xff] }
  0x19   : > { %v1630_v21 = vld [vmem:[%s1928_s13 + $0x58] sm:$0xff]  ;;  %v1631_v25 = vld [vmem:[%s1928_s13 + $0x60] sm:$0xff]  ;;  %v1632_v29 = vld [vmem:[%s1928_s13 + $0x68] sm:$0xff] }
  0x1a   : > { %585 = vmatpush.bf16.msra.mxu0 %v1654_v4  ;;  %1661 = vmatpush.bf16.msra.mxu1 %v1654_v4  ;;  %v1638_v22 = vld [vmem:[%s1928_s13 + $0x98] sm:$0xff]  ;;  %v1639_v26 = vld [vmem:[%s1928_s13 + $0xa0] sm:$0xff]  ;;  %v1640_v30 = vld [vmem:[%s1928_s13 + $0xa8] sm:$0xff] }
  0x1b   : > { %1662 = vmatpush.bf16.msra.mxu2 %v1654_v4  ;;  %1663 = vmatpush.bf16.msra.mxu3 %v1654_v4  ;;  %v1646_v23 = vld [vmem:[%s1928_s13 + $0xd8] sm:$0xff]  ;;  %v1647_v27 = vld [vmem:[%s1928_s13 + $0xe0] sm:$0xff]  ;;  %v1648_v31 = vld [vmem:[%s1928_s13 + $0xe8] sm:$0xff] }
  0x1c   : > { %v1625_v32 = vld [vmem:[%s1928_s13 + $0x30] sm:$0xff]  ;;  %v1626_v36 = vld [vmem:[%s1928_s13 + $0x38] sm:$0xff] }
  0x1d   : > { %v1633_v33 = vld [vmem:[%s1928_s13 + $0x70] sm:$0xff]  ;;  %v1634_v37 = vld [vmem:[%s1928_s13 + $0x78] sm:$0xff] }
  0x1e   : > { %586 = vmatpush.bf16.msra.mxu0 %v1653_v5  ;;  %1664 = vmatpush.bf16.msra.mxu1 %v1653_v5  ;;  %v1641_v34 = vld [vmem:[%s1928_s13 + $0xb0] sm:$0xff]  ;;  %v1642_v38 = vld [vmem:[%s1928_s13 + $0xb8] sm:$0xff] }
  0x1f   : > { %1665 = vmatpush.bf16.msra.mxu2 %v1653_v5  ;;  %1666 = vmatpush.bf16.msra.mxu3 %v1653_v5  ;;  %v1649_v35 = vld [vmem:[%s1928_s13 + $0xf0] sm:$0xff]  ;;  %v1650_v39 = vld [vmem:[%s1928_s13 + $0xf8] sm:$0xff] }
  0x22   : > { %587 = vmatpush.bf16.msra.mxu0 %v1652_v6  ;;  %1667 = vmatpush.bf16.msra.mxu1 %v1652_v6 }
  0x23   : > { %1668 = vmatpush.bf16.msra.mxu2 %v1652_v6  ;;  %1669 = vmatpush.bf16.msra.mxu3 %v1652_v6 }
  0x26   : > { %588 = vmatpush.bf16.msra.mxu0 %v1651_v7  ;;  %1670 = vmatpush.bf16.msra.mxu1 %v1651_v7 }
  0x27   : > { %1671 = vmatpush.bf16.msra.mxu2 %v1651_v7  ;;  %1672 = vmatpush.bf16.msra.mxu3 %v1651_v7 }
  0x29   : > { %1570 = vmatmul.msk.bf16.vlgmr.msra.gmra.mxu0 %vm480_vm1, %v1619_v8  ;;  %1578 = vmatmul.msk.bf16.vlgmr.msra.gmra.mxu1 %vm480_vm1, %v1627_v9 }
  0x2a   : > { %1586 = vmatmul.msk.bf16.vlgmr.msra.gmra.mxu2 %vm480_vm1, %v1635_v10  ;;  %1594 = vmatmul.msk.bf16.vlgmr.msra.gmra.mxu3 %vm480_vm1, %v1643_v11 }
  0x39   : > { %1571 = vmatmul.msk.bf16.gmra.mxu0 %vm480_vm1, %v1620_v12  ;;  %1579 = vmatmul.msk.bf16.gmra.mxu1 %vm480_vm1, %v1628_v13 }
  0x3a   : > { %1587 = vmatmul.msk.bf16.gmra.mxu2 %vm480_vm1, %v1636_v14  ;;  %1595 = vmatmul.msk.bf16.gmra.mxu3 %vm480_vm1, %v1644_v15 }
  0x49   : > { %1572 = vmatmul.msk.bf16.gmra.mxu0 %vm480_vm1, %v1621_v16  ;;  %1580 = vmatmul.msk.bf16.gmra.mxu1 %vm480_vm1, %v1629_v17 }
  0x4a   : > { %1588 = vmatmul.msk.bf16.gmra.mxu2 %vm480_vm1, %v1637_v18  ;;  %1596 = vmatmul.msk.bf16.gmra.mxu3 %vm480_vm1, %v1645_v19 }
  0x59   : > { %1573 = vmatmul.msk.bf16.gmra.mxu0 %vm480_vm1, %v1622_v20  ;;  %1581 = vmatmul.msk.bf16.gmra.mxu1 %vm480_vm1, %v1630_v21 }
  0x5a   : > { %1589 = vmatmul.msk.bf16.gmra.mxu2 %vm480_vm1, %v1638_v22  ;;  %1597 = vmatmul.msk.bf16.gmra.mxu3 %vm480_vm1, %v1646_v23 }
  0x69   : > { %1574 = vmatmul.msk.bf16.gmra.mxu0 %vm480_vm1, %v1623_v24  ;;  %1582 = vmatmul.msk.bf16.gmra.mxu1 %vm480_vm1, %v1631_v25 }
  0x6a   : > { %1590 = vmatmul.msk.bf16.gmra.mxu2 %vm480_vm1, %v1639_v26  ;;  %1598 = vmatmul.msk.bf16.gmra.mxu3 %vm480_vm1, %v1647_v27 }
  0x79   : > { %1575 = vmatmul.msk.bf16.gmra.mxu0 %vm480_vm1, %v1624_v28  ;;  %1583 = vmatmul.msk.bf16.gmra.mxu1 %vm480_vm1, %v1632_v29 }
  0x7a   : > { %1591 = vmatmul.msk.bf16.gmra.mxu2 %vm480_vm1, %v1640_v30  ;;  %1599 = vmatmul.msk.bf16.gmra.mxu3 %vm480_vm1, %v1648_v31 }
  0x89   : > { %1576 = vmatmul.msk.bf16.gmra.mxu0 %vm480_vm1, %v1625_v32  ;;  %1584 = vmatmul.msk.bf16.gmra.mxu1 %vm480_vm1, %v1633_v33 }
  0x8a   : > { %1592 = vmatmul.msk.bf16.gmra.mxu2 %vm480_vm1, %v1641_v34  ;;  %1600 = vmatmul.msk.bf16.gmra.mxu3 %vm480_vm1, %v1649_v35 }
  0x99   : > { %1577 = vmatmul.msk.bf16.gmra.mxu0 %vm480_vm1, %v1626_v36  ;;  %1585 = vmatmul.msk.bf16.gmra.mxu1 %vm480_vm1, %v1634_v37 }
  0x9a   : > { %1593 = vmatmul.msk.bf16.gmra.mxu2 %vm480_vm1, %v1642_v38  ;;  %1601 = vmatmul.msk.bf16.gmra.mxu3 %vm480_vm1, %v1650_v39 }
  0xa6   : > { %v590_v42 = vpop.f32.mrf.mxu0  ;;  %v630_v43 = vpop.f32.mrf.mxu1 }
  0xa7   : > { %v754_v44 = vmul.f32 %v1997_v40, %v590_v42  ;;  %v770_v45 = vmul.f32 %v1997_v40, %v630_v43 }
  0xa9   : > { %v822_v46 = vadd.f32 %v2002_v41, %v754_v44  ;;  %v838_v47 = vadd.f32 %v2002_v41, %v770_v45 }
  0xab   : > { %v886_v48 = vmax.f32 %v822_v46, 0.0  ;;  %v902_v49 = vmax.f32 %v838_v47, 0.0 }
  0xad   : > { %v950_v50 = vpack.c.bf16 %v886_v48, %v886_v48  ;;  %v966_v51 = vpack.c.bf16 %v902_v49, %v902_v49  ;;  %v670_v52 = vpop.f32.mrf.mxu2  ;;  %v710_v53 = vpop.f32.mrf.mxu3 }
  0xae   : > { %v786_v54 = vmul.f32 %v1997_v40, %v670_v52  ;;  %v802_v55 = vmul.f32 %v1997_v40, %v710_v53  ;;  %v592_v56 = vpop.f32.mrf.mxu0  ;;  %v632_v57 = vpop.f32.mrf.mxu1 }
  0xaf   : > { %1015 = vst.msk [vmem:[%s2011_s15] sm:$0xf] %vm1014_vm2, %v950_v50  ;;  %v755_v58 = vmul.f32 %v1997_v40, %v592_v56  ;;  %v771_v59 = vmul.f32 %v1997_v40, %v632_v57 }
  0xb0   : > { %1031 = vst.msk [vmem:[%s2011_s15 + $0x40] sm:$0xf] %vm1014_vm2, %v966_v51  ;;  %v854_v60 = vadd.f32 %v2002_v41, %v786_v54  ;;  %v870_v61 = vadd.f32 %v2002_v41, %v802_v55 }
  0xb1   : > { %v823_v62 = vadd.f32 %v2002_v41, %v755_v58  ;;  %v839_v63 = vadd.f32 %v2002_v41, %v771_v59 }
  0xb2   : > { %v918_v0 = vmax.f32 %v854_v60, 0.0  ;;  %v934_v1 = vmax.f32 %v870_v61, 0.0 }
  0xb3   : > { %v887_v2 = vmax.f32 %v823_v62, 0.0  ;;  %v903_v3 = vmax.f32 %v839_v63, 0.0 }
  0xb4   : > { %v982_v4 = vpack.c.bf16 %v918_v0, %v918_v0  ;;  %v998_v5 = vpack.c.bf16 %v934_v1, %v934_v1 }
  0xb5   : > { %v951_v6 = vpack.c.bf16 %v887_v2, %v887_v2  ;;  %v967_v7 = vpack.c.bf16 %v903_v3, %v903_v3  ;;  %v672_v8 = vpop.f32.mrf.mxu2  ;;  %v712_v9 = vpop.f32.mrf.mxu3 }
  0xb6   : > { %1047 = vst.msk [vmem:[%s2011_s15 + $0x80] sm:$0xf] %vm1014_vm2, %v982_v4  ;;  %v787_v10 = vmul.f32 %v1997_v40, %v672_v8  ;;  %v803_v11 = vmul.f32 %v1997_v40, %v712_v9  ;;  %v595_v12 = vpop.f32.mrf.mxu0  ;;  %v635_v13 = vpop.f32.mrf.mxu1 }
  0xb7   : > { %1063 = vst.msk [vmem:[%s2011_s15 + $0xc0] sm:$0xf] %vm1014_vm2, %v998_v5  ;;  %v756_v14 = vmul.f32 %v1997_v40, %v595_v12  ;;  %v772_v15 = vmul.f32 %v1997_v40, %v635_v13 }
  0xb8   : > { %1016 = vst.msk [vmem:[%s2011_s15 + $0x4] sm:$0xf] %vm1014_vm2, %v951_v6  ;;  %v855_v16 = vadd.f32 %v2002_v41, %v787_v10  ;;  %v871_v17 = vadd.f32 %v2002_v41, %v803_v11 }
  0xb9   : > { %1032 = vst.msk [vmem:[%s2011_s15 + $0x44] sm:$0xf] %vm1014_vm2, %v967_v7  ;;  %v824_v18 = vadd.f32 %v2002_v41, %v756_v14  ;;  %v840_v19 = vadd.f32 %v2002_v41, %v772_v15 }
  0xba   : > { %v919_v20 = vmax.f32 %v855_v16, 0.0  ;;  %v935_v21 = vmax.f32 %v871_v17, 0.0 }
  0xbb   : > { %v888_v22 = vmax.f32 %v824_v18, 0.0  ;;  %v904_v23 = vmax.f32 %v840_v19, 0.0 }
  0xbc   : > { %v983_v24 = vpack.c.bf16 %v919_v20, %v919_v20  ;;  %v999_v25 = vpack.c.bf16 %v935_v21, %v935_v21 }
  0xbd   : > { %v952_v26 = vpack.c.bf16 %v888_v22, %v888_v22  ;;  %v968_v27 = vpack.c.bf16 %v904_v23, %v904_v23  ;;  %v675_v28 = vpop.f32.mrf.mxu2  ;;  %v715_v29 = vpop.f32.mrf.mxu3 }
  0xbe   : > { %1048 = vst.msk [vmem:[%s2011_s15 + $0x84] sm:$0xf] %vm1014_vm2, %v983_v24  ;;  %v788_v30 = vmul.f32 %v1997_v40, %v675_v28  ;;  %v804_v31 = vmul.f32 %v1997_v40, %v715_v29  ;;  %v597_v32 = vpop.f32.mrf.mxu0  ;;  %v637_v33 = vpop.f32.mrf.mxu1 }
  0xbf   : > { %1064 = vst.msk [vmem:[%s2011_s15 + $0xc4] sm:$0xf] %vm1014_vm2, %v999_v25  ;;  %v757_v34 = vmul.f32 %v1997_v40, %v597_v32  ;;  %v773_v35 = vmul.f32 %v1997_v40, %v637_v33 }
  0xc0   : > { %1017 = vst.msk [vmem:[%s2011_s15 + $0x8] sm:$0xf] %vm1014_vm2, %v952_v26  ;;  %v856_v36 = vadd.f32 %v2002_v41, %v788_v30  ;;  %v872_v37 = vadd.f32 %v2002_v41, %v804_v31 }
  0xc1   : > { %1033 = vst.msk [vmem:[%s2011_s15 + $0x48] sm:$0xf] %vm1014_vm2, %v968_v27  ;;  %v825_v38 = vadd.f32 %v2002_v41, %v757_v34  ;;  %v841_v39 = vadd.f32 %v2002_v41, %v773_v35 }
  0xc2   : > { %v920_v42 = vmax.f32 %v856_v36, 0.0  ;;  %v936_v43 = vmax.f32 %v872_v37, 0.0 }
  0xc3   : > { %v889_v44 = vmax.f32 %v825_v38, 0.0  ;;  %v905_v45 = vmax.f32 %v841_v39, 0.0 }
  0xc4   : > { %v984_v46 = vpack.c.bf16 %v920_v42, %v920_v42  ;;  %v1000_v47 = vpack.c.bf16 %v936_v43, %v936_v43 }
  0xc5   : > { %v953_v48 = vpack.c.bf16 %v889_v44, %v889_v44  ;;  %v969_v49 = vpack.c.bf16 %v905_v45, %v905_v45  ;;  %v677_v50 = vpop.f32.mrf.mxu2  ;;  %v717_v51 = vpop.f32.mrf.mxu3 }
  0xc6   : > { %1049 = vst.msk [vmem:[%s2011_s15 + $0x88] sm:$0xf] %vm1014_vm2, %v984_v46  ;;  %v789_v52 = vmul.f32 %v1997_v40, %v677_v50  ;;  %v805_v53 = vmul.f32 %v1997_v40, %v717_v51  ;;  %v600_v54 = vpop.f32.mrf.mxu0  ;;  %v640_v55 = vpop.f32.mrf.mxu1 }
  0xc7   : > { %1065 = vst.msk [vmem:[%s2011_s15 + $0xc8] sm:$0xf] %vm1014_vm2, %v1000_v47  ;;  %v758_v56 = vmul.f32 %v1997_v40, %v600_v54  ;;  %v774_v57 = vmul.f32 %v1997_v40, %v640_v55 }
  0xc8   : > { %1018 = vst.msk [vmem:[%s2011_s15 + $0xc] sm:$0xf] %vm1014_vm2, %v953_v48  ;;  %v857_v58 = vadd.f32 %v2002_v41, %v789_v52  ;;  %v873_v59 = vadd.f32 %v2002_v41, %v805_v53 }
  0xc9   : > { %1034 = vst.msk [vmem:[%s2011_s15 + $0x4c] sm:$0xf] %vm1014_vm2, %v969_v49  ;;  %v826_v60 = vadd.f32 %v2002_v41, %v758_v56  ;;  %v842_v61 = vadd.f32 %v2002_v41, %v774_v57 }
  0xca   : > { %v921_v62 = vmax.f32 %v857_v58, 0.0  ;;  %v937_v63 = vmax.f32 %v873_v59, 0.0 }
  0xcb   : > { %v890_v0 = vmax.f32 %v826_v60, 0.0  ;;  %v906_v1 = vmax.f32 %v842_v61, 0.0 }
  0xcc   : > { %v985_v2 = vpack.c.bf16 %v921_v62, %v921_v62  ;;  %v1001_v3 = vpack.c.bf16 %v937_v63, %v937_v63 }
  0xcd   : > { %v954_v4 = vpack.c.bf16 %v890_v0, %v890_v0  ;;  %v970_v5 = vpack.c.bf16 %v906_v1, %v906_v1  ;;  %v680_v6 = vpop.f32.mrf.mxu2  ;;  %v720_v7 = vpop.f32.mrf.mxu3 }
  0xce   : > { %1050 = vst.msk [vmem:[%s2011_s15 + $0x8c] sm:$0xf] %vm1014_vm2, %v985_v2  ;;  %v790_v8 = vmul.f32 %v1997_v40, %v680_v6  ;;  %v806_v9 = vmul.f32 %v1997_v40, %v720_v7  ;;  %v602_v10 = vpop.f32.mrf.mxu0  ;;  %v642_v11 = vpop.f32.mrf.mxu1 }
  0xcf   : > { %1066 = vst.msk [vmem:[%s2011_s15 + $0xcc] sm:$0xf] %vm1014_vm2, %v1001_v3  ;;  %v759_v12 = vmul.f32 %v1997_v40, %v602_v10  ;;  %v775_v13 = vmul.f32 %v1997_v40, %v642_v11 }
  0xd0   : > { %1019 = vst.msk [vmem:[%s2011_s15 + $0x10] sm:$0xf] %vm1014_vm2, %v954_v4  ;;  %v858_v14 = vadd.f32 %v2002_v41, %v790_v8  ;;  %v874_v15 = vadd.f32 %v2002_v41, %v806_v9 }
  0xd1   : > { %1035 = vst.msk [vmem:[%s2011_s15 + $0x50] sm:$0xf] %vm1014_vm2, %v970_v5  ;;  %v827_v16 = vadd.f32 %v2002_v41, %v759_v12  ;;  %v843_v17 = vadd.f32 %v2002_v41, %v775_v13 }
  0xd2   : > { %v922_v18 = vmax.f32 %v858_v14, 0.0  ;;  %v938_v19 = vmax.f32 %v874_v15, 0.0 }
  0xd3   : > { %v891_v20 = vmax.f32 %v827_v16, 0.0  ;;  %v907_v21 = vmax.f32 %v843_v17, 0.0 }
  0xd4   : > { %v986_v22 = vpack.c.bf16 %v922_v18, %v922_v18  ;;  %v1002_v23 = vpack.c.bf16 %v938_v19, %v938_v19 }
  0xd5   : > { %v955_v24 = vpack.c.bf16 %v891_v20, %v891_v20  ;;  %v971_v25 = vpack.c.bf16 %v907_v21, %v907_v21  ;;  %v682_v26 = vpop.f32.mrf.mxu2  ;;  %v722_v27 = vpop.f32.mrf.mxu3 }
  0xd6   : > { %1051 = vst.msk [vmem:[%s2011_s15 + $0x90] sm:$0xf] %vm1014_vm2, %v986_v22  ;;  %v791_v28 = vmul.f32 %v1997_v40, %v682_v26  ;;  %v807_v29 = vmul.f32 %v1997_v40, %v722_v27  ;;  %v605_v30 = vpop.f32.mrf.mxu0  ;;  %v645_v31 = vpop.f32.mrf.mxu1 }
  0xd7   : > { %1067 = vst.msk [vmem:[%s2011_s15 + $0xd0] sm:$0xf] %vm1014_vm2, %v1002_v23  ;;  %v760_v32 = vmul.f32 %v1997_v40, %v605_v30  ;;  %v776_v33 = vmul.f32 %v1997_v40, %v645_v31 }
  0xd8   : > { %1020 = vst.msk [vmem:[%s2011_s15 + $0x14] sm:$0xf] %vm1014_vm2, %v955_v24  ;;  %v859_v34 = vadd.f32 %v2002_v41, %v791_v28  ;;  %v875_v35 = vadd.f32 %v2002_v41, %v807_v29 }
  0xd9   : > { %1036 = vst.msk [vmem:[%s2011_s15 + $0x54] sm:$0xf] %vm1014_vm2, %v971_v25  ;;  %v828_v36 = vadd.f32 %v2002_v41, %v760_v32  ;;  %v844_v37 = vadd.f32 %v2002_v41, %v776_v33 }
  0xda   : > { %v923_v38 = vmax.f32 %v859_v34, 0.0  ;;  %v939_v39 = vmax.f32 %v875_v35, 0.0 }
  0xdb   : > { %v892_v42 = vmax.f32 %v828_v36, 0.0  ;;  %v908_v43 = vmax.f32 %v844_v37, 0.0 }
  0xdc   : > { %v987_v44 = vpack.c.bf16 %v923_v38, %v923_v38  ;;  %v1003_v45 = vpack.c.bf16 %v939_v39, %v939_v39 }
  0xdd   : > { %v956_v46 = vpack.c.bf16 %v892_v42, %v892_v42  ;;  %v972_v47 = vpack.c.bf16 %v908_v43, %v908_v43  ;;  %v685_v48 = vpop.f32.mrf.mxu2  ;;  %v725_v49 = vpop.f32.mrf.mxu3 }
  0xde   : > { %1052 = vst.msk [vmem:[%s2011_s15 + $0x94] sm:$0xf] %vm1014_vm2, %v987_v44  ;;  %v792_v50 = vmul.f32 %v1997_v40, %v685_v48  ;;  %v808_v51 = vmul.f32 %v1997_v40, %v725_v49  ;;  %v607_v52 = vpop.f32.mrf.mxu0  ;;  %v647_v53 = vpop.f32.mrf.mxu1 }
  0xdf   : > { %1068 = vst.msk [vmem:[%s2011_s15 + $0xd4] sm:$0xf] %vm1014_vm2, %v1003_v45  ;;  %v761_v54 = vmul.f32 %v1997_v40, %v607_v52  ;;  %v777_v55 = vmul.f32 %v1997_v40, %v647_v53 }
  0xe0   : > { %1021 = vst.msk [vmem:[%s2011_s15 + $0x18] sm:$0xf] %vm1014_vm2, %v956_v46  ;;  %v860_v56 = vadd.f32 %v2002_v41, %v792_v50  ;;  %v876_v57 = vadd.f32 %v2002_v41, %v808_v51 }
  0xe1   : > { %1037 = vst.msk [vmem:[%s2011_s15 + $0x58] sm:$0xf] %vm1014_vm2, %v972_v47  ;;  %v829_v58 = vadd.f32 %v2002_v41, %v761_v54  ;;  %v845_v59 = vadd.f32 %v2002_v41, %v777_v55 }
  0xe2   : > { %v924_v60 = vmax.f32 %v860_v56, 0.0  ;;  %v940_v61 = vmax.f32 %v876_v57, 0.0 }
  0xe3   : > { %v893_v62 = vmax.f32 %v829_v58, 0.0  ;;  %v909_v63 = vmax.f32 %v845_v59, 0.0 }
  0xe4   : > { %v988_v0 = vpack.c.bf16 %v924_v60, %v924_v60  ;;  %v1004_v1 = vpack.c.bf16 %v940_v61, %v940_v61 }
  0xe5   : > { %v957_v2 = vpack.c.bf16 %v893_v62, %v893_v62  ;;  %v973_v3 = vpack.c.bf16 %v909_v63, %v909_v63  ;;  %v687_v4 = vpop.f32.mrf.mxu2  ;;  %v727_v5 = vpop.f32.mrf.mxu3 }
  0xe6   : > { %1053 = vst.msk [vmem:[%s2011_s15 + $0x98] sm:$0xf] %vm1014_vm2, %v988_v0  ;;  %v793_v6 = vmul.f32 %v1997_v40, %v687_v4  ;;  %v809_v7 = vmul.f32 %v1997_v40, %v727_v5  ;;  %v610_v8 = vpop.f32.mrf.mxu0  ;;  %v650_v9 = vpop.f32.mrf.mxu1 }
  0xe7   : > { %1069 = vst.msk [vmem:[%s2011_s15 + $0xd8] sm:$0xf] %vm1014_vm2, %v1004_v1  ;;  %v762_v10 = vmul.f32 %v1997_v40, %v610_v8  ;;  %v778_v11 = vmul.f32 %v1997_v40, %v650_v9 }
  0xe8   : > { %1022 = vst.msk [vmem:[%s2011_s15 + $0x1c] sm:$0xf] %vm1014_vm2, %v957_v2  ;;  %v861_v12 = vadd.f32 %v2002_v41, %v793_v6  ;;  %v877_v13 = vadd.f32 %v2002_v41, %v809_v7 }
  0xe9   : > { %1038 = vst.msk [vmem:[%s2011_s15 + $0x5c] sm:$0xf] %vm1014_vm2, %v973_v3  ;;  %v830_v14 = vadd.f32 %v2002_v41, %v762_v10  ;;  %v846_v15 = vadd.f32 %v2002_v41, %v778_v11 }
  0xea   : > { %v925_v16 = vmax.f32 %v861_v12, 0.0  ;;  %v941_v17 = vmax.f32 %v877_v13, 0.0 }
  0xeb   : > { %v894_v18 = vmax.f32 %v830_v14, 0.0  ;;  %v910_v19 = vmax.f32 %v846_v15, 0.0 }
  0xec   : > { %v989_v20 = vpack.c.bf16 %v925_v16, %v925_v16  ;;  %v1005_v21 = vpack.c.bf16 %v941_v17, %v941_v17 }
  0xed   : > { %v958_v22 = vpack.c.bf16 %v894_v18, %v894_v18  ;;  %v974_v23 = vpack.c.bf16 %v910_v19, %v910_v19  ;;  %v690_v24 = vpop.f32.mrf.mxu2  ;;  %v730_v25 = vpop.f32.mrf.mxu3 }
  0xee   : > { %1054 = vst.msk [vmem:[%s2011_s15 + $0x9c] sm:$0xf] %vm1014_vm2, %v989_v20  ;;  %v794_v26 = vmul.f32 %v1997_v40, %v690_v24  ;;  %v810_v27 = vmul.f32 %v1997_v40, %v730_v25  ;;  %v612_v28 = vpop.f32.mrf.mxu0  ;;  %v652_v29 = vpop.f32.mrf.mxu1 }
  0xef   : > { %1070 = vst.msk [vmem:[%s2011_s15 + $0xdc] sm:$0xf] %vm1014_vm2, %v1005_v21  ;;  %v763_v30 = vmul.f32 %v1997_v40, %v612_v28  ;;  %v779_v31 = vmul.f32 %v1997_v40, %v652_v29 }
  0xf0   : > { %1023 = vst.msk [vmem:[%s2011_s15 + $0x20] sm:$0xf] %vm1014_vm2, %v958_v22  ;;  %v862_v32 = vadd.f32 %v2002_v41, %v794_v26  ;;  %v878_v33 = vadd.f32 %v2002_v41, %v810_v27 }
  0xf1   : > { %1039 = vst.msk [vmem:[%s2011_s15 + $0x60] sm:$0xf] %vm1014_vm2, %v974_v23  ;;  %v831_v34 = vadd.f32 %v2002_v41, %v763_v30  ;;  %v847_v35 = vadd.f32 %v2002_v41, %v779_v31 }
  0xf2   : > { %v926_v36 = vmax.f32 %v862_v32, 0.0  ;;  %v942_v37 = vmax.f32 %v878_v33, 0.0 }
  0xf3   : > { %v895_v38 = vmax.f32 %v831_v34, 0.0  ;;  %v911_v39 = vmax.f32 %v847_v35, 0.0 }
  0xf4   : > { %v990_v42 = vpack.c.bf16 %v926_v36, %v926_v36  ;;  %v1006_v43 = vpack.c.bf16 %v942_v37, %v942_v37 }
  0xf5   : > { %v959_v44 = vpack.c.bf16 %v895_v38, %v895_v38  ;;  %v975_v45 = vpack.c.bf16 %v911_v39, %v911_v39  ;;  %v692_v46 = vpop.f32.mrf.mxu2  ;;  %v732_v47 = vpop.f32.mrf.mxu3 }
  0xf6   : > { %1055 = vst.msk [vmem:[%s2011_s15 + $0xa0] sm:$0xf] %vm1014_vm2, %v990_v42  ;;  %v795_v48 = vmul.f32 %v1997_v40, %v692_v46  ;;  %v811_v49 = vmul.f32 %v1997_v40, %v732_v47  ;;  %v615_v50 = vpop.f32.mrf.mxu0  ;;  %v655_v51 = vpop.f32.mrf.mxu1 }
  0xf7   : > { %1071 = vst.msk [vmem:[%s2011_s15 + $0xe0] sm:$0xf] %vm1014_vm2, %v1006_v43  ;;  %v764_v52 = vmul.f32 %v1997_v40, %v615_v50  ;;  %v780_v53 = vmul.f32 %v1997_v40, %v655_v51 }
  0xf8   : > { %1024 = vst.msk [vmem:[%s2011_s15 + $0x24] sm:$0xf] %vm1014_vm2, %v959_v44  ;;  %v863_v54 = vadd.f32 %v2002_v41, %v795_v48  ;;  %v879_v55 = vadd.f32 %v2002_v41, %v811_v49 }
  0xf9   : > { %1040 = vst.msk [vmem:[%s2011_s15 + $0x64] sm:$0xf] %vm1014_vm2, %v975_v45  ;;  %v832_v56 = vadd.f32 %v2002_v41, %v764_v52  ;;  %v848_v57 = vadd.f32 %v2002_v41, %v780_v53 }
  0xfa   : > { %v927_v58 = vmax.f32 %v863_v54, 0.0  ;;  %v943_v59 = vmax.f32 %v879_v55, 0.0 }
  0xfb   : > { %v896_v60 = vmax.f32 %v832_v56, 0.0  ;;  %v912_v61 = vmax.f32 %v848_v57, 0.0 }
  0xfc   : > { %v991_v62 = vpack.c.bf16 %v927_v58, %v927_v58  ;;  %v1007_v63 = vpack.c.bf16 %v943_v59, %v943_v59 }
  0xfd   : > { %v960_v0 = vpack.c.bf16 %v896_v60, %v896_v60  ;;  %v976_v1 = vpack.c.bf16 %v912_v61, %v912_v61  ;;  %v695_v2 = vpop.f32.mrf.mxu2  ;;  %v735_v3 = vpop.f32.mrf.mxu3 }
  0xfe   : > { %1056 = vst.msk [vmem:[%s2011_s15 + $0xa4] sm:$0xf] %vm1014_vm2, %v991_v62  ;;  %v796_v4 = vmul.f32 %v1997_v40, %v695_v2  ;;  %v812_v5 = vmul.f32 %v1997_v40, %v735_v3  ;;  %v617_v6 = vpop.f32.mrf.mxu0  ;;  %v657_v7 = vpop.f32.mrf.mxu1 }
  0xff   : > { %1072 = vst.msk [vmem:[%s2011_s15 + $0xe4] sm:$0xf] %vm1014_vm2, %v1007_v63  ;;  %v765_v8 = vmul.f32 %v1997_v40, %v617_v6  ;;  %v781_v9 = vmul.f32 %v1997_v40, %v657_v7 }
 0x100   : > { %1025 = vst.msk [vmem:[%s2011_s15 + $0x28] sm:$0xf] %vm1014_vm2, %v960_v0  ;;  %v864_v10 = vadd.f32 %v2002_v41, %v796_v4  ;;  %v880_v11 = vadd.f32 %v2002_v41, %v812_v5 }
 0x101   : > { %1041 = vst.msk [vmem:[%s2011_s15 + $0x68] sm:$0xf] %vm1014_vm2, %v976_v1  ;;  %v833_v12 = vadd.f32 %v2002_v41, %v765_v8  ;;  %v849_v13 = vadd.f32 %v2002_v41, %v781_v9 }
 0x102   : > { %v928_v14 = vmax.f32 %v864_v10, 0.0  ;;  %v944_v15 = vmax.f32 %v880_v11, 0.0 }
 0x103   : > { %v897_v16 = vmax.f32 %v833_v12, 0.0  ;;  %v913_v17 = vmax.f32 %v849_v13, 0.0 }
 0x104   : > { %v992_v18 = vpack.c.bf16 %v928_v14, %v928_v14  ;;  %v1008_v19 = vpack.c.bf16 %v944_v15, %v944_v15 }
 0x105   : > { %v961_v20 = vpack.c.bf16 %v897_v16, %v897_v16  ;;  %v977_v21 = vpack.c.bf16 %v913_v17, %v913_v17  ;;  %v697_v22 = vpop.f32.mrf.mxu2  ;;  %v737_v23 = vpop.f32.mrf.mxu3 }
 0x106   : > { %1057 = vst.msk [vmem:[%s2011_s15 + $0xa8] sm:$0xf] %vm1014_vm2, %v992_v18  ;;  %v797_v24 = vmul.f32 %v1997_v40, %v697_v22  ;;  %v813_v25 = vmul.f32 %v1997_v40, %v737_v23  ;;  %v620_v26 = vpop.f32.mrf.mxu0  ;;  %v660_v27 = vpop.f32.mrf.mxu1 }
 0x107   : > { %1073 = vst.msk [vmem:[%s2011_s15 + $0xe8] sm:$0xf] %vm1014_vm2, %v1008_v19  ;;  %v766_v28 = vmul.f32 %v1997_v40, %v620_v26  ;;  %v782_v29 = vmul.f32 %v1997_v40, %v660_v27 }
 0x108   : > { %1026 = vst.msk [vmem:[%s2011_s15 + $0x2c] sm:$0xf] %vm1014_vm2, %v961_v20  ;;  %v865_v30 = vadd.f32 %v2002_v41, %v797_v24  ;;  %v881_v31 = vadd.f32 %v2002_v41, %v813_v25 }
 0x109   : > { %1042 = vst.msk [vmem:[%s2011_s15 + $0x6c] sm:$0xf] %vm1014_vm2, %v977_v21  ;;  %v834_v32 = vadd.f32 %v2002_v41, %v766_v28  ;;  %v850_v33 = vadd.f32 %v2002_v41, %v782_v29 }
 0x10a   : > { %v929_v34 = vmax.f32 %v865_v30, 0.0  ;;  %v945_v35 = vmax.f32 %v881_v31, 0.0 }
 0x10b   : > { %v898_v36 = vmax.f32 %v834_v32, 0.0  ;;  %v914_v37 = vmax.f32 %v850_v33, 0.0 }
 0x10c   : > { %v993_v38 = vpack.c.bf16 %v929_v34, %v929_v34  ;;  %v1009_v39 = vpack.c.bf16 %v945_v35, %v945_v35 }
 0x10d   : > { %v962_v42 = vpack.c.bf16 %v898_v36, %v898_v36  ;;  %v978_v43 = vpack.c.bf16 %v914_v37, %v914_v37  ;;  %v700_v44 = vpop.f32.mrf.mxu2  ;;  %v740_v45 = vpop.f32.mrf.mxu3 }
 0x10e   : > { %1058 = vst.msk [vmem:[%s2011_s15 + $0xac] sm:$0xf] %vm1014_vm2, %v993_v38  ;;  %v798_v46 = vmul.f32 %v1997_v40, %v700_v44  ;;  %v814_v47 = vmul.f32 %v1997_v40, %v740_v45  ;;  %v622_v48 = vpop.f32.mrf.mxu0  ;;  %v662_v49 = vpop.f32.mrf.mxu1 }
 0x10f   : > { %1074 = vst.msk [vmem:[%s2011_s15 + $0xec] sm:$0xf] %vm1014_vm2, %v1009_v39  ;;  %v767_v50 = vmul.f32 %v1997_v40, %v622_v48  ;;  %v783_v51 = vmul.f32 %v1997_v40, %v662_v49 }
 0x110   : > { %1027 = vst.msk [vmem:[%s2011_s15 + $0x30] sm:$0xf] %vm1014_vm2, %v962_v42  ;;  %v866_v52 = vadd.f32 %v2002_v41, %v798_v46  ;;  %v882_v53 = vadd.f32 %v2002_v41, %v814_v47 }
 0x111   : > { %1043 = vst.msk [vmem:[%s2011_s15 + $0x70] sm:$0xf] %vm1014_vm2, %v978_v43  ;;  %v835_v54 = vadd.f32 %v2002_v41, %v767_v50  ;;  %v851_v55 = vadd.f32 %v2002_v41, %v783_v51 }
 0x112   : > { %v930_v56 = vmax.f32 %v866_v52, 0.0  ;;  %v946_v57 = vmax.f32 %v882_v53, 0.0 }
 0x113   : > { %v899_v58 = vmax.f32 %v835_v54, 0.0  ;;  %v915_v59 = vmax.f32 %v851_v55, 0.0 }
 0x114   : > { %v994_v60 = vpack.c.bf16 %v930_v56, %v930_v56  ;;  %v1010_v61 = vpack.c.bf16 %v946_v57, %v946_v57 }
 0x115   : > { %v963_v62 = vpack.c.bf16 %v899_v58, %v899_v58  ;;  %v979_v63 = vpack.c.bf16 %v915_v59, %v915_v59  ;;  %v702_v0 = vpop.f32.mrf.mxu2  ;;  %v742_v1 = vpop.f32.mrf.mxu3 }
 0x116   : > { %1059 = vst.msk [vmem:[%s2011_s15 + $0xb0] sm:$0xf] %vm1014_vm2, %v994_v60  ;;  %v799_v2 = vmul.f32 %v1997_v40, %v702_v0  ;;  %v815_v3 = vmul.f32 %v1997_v40, %v742_v1  ;;  %v625_v4 = vpop.f32.mrf.mxu0  ;;  %v665_v5 = vpop.f32.mrf.mxu1 }
 0x117   : > { %1075 = vst.msk [vmem:[%s2011_s15 + $0xf0] sm:$0xf] %vm1014_vm2, %v1010_v61  ;;  %v768_v6 = vmul.f32 %v1997_v40, %v625_v4  ;;  %v784_v7 = vmul.f32 %v1997_v40, %v665_v5 }
 0x118   : > { %1028 = vst.msk [vmem:[%s2011_s15 + $0x34] sm:$0xf] %vm1014_vm2, %v963_v62  ;;  %v867_v8 = vadd.f32 %v2002_v41, %v799_v2  ;;  %v883_v9 = vadd.f32 %v2002_v41, %v815_v3 }
 0x119   : > { %1044 = vst.msk [vmem:[%s2011_s15 + $0x74] sm:$0xf] %vm1014_vm2, %v979_v63  ;;  %v836_v10 = vadd.f32 %v2002_v41, %v768_v6  ;;  %v852_v11 = vadd.f32 %v2002_v41, %v784_v7 }
 0x11a   : > { %v931_v12 = vmax.f32 %v867_v8, 0.0  ;;  %v947_v13 = vmax.f32 %v883_v9, 0.0 }
 0x11b   : > { %v900_v14 = vmax.f32 %v836_v10, 0.0  ;;  %v916_v15 = vmax.f32 %v852_v11, 0.0 }
 0x11c   : > { %v995_v16 = vpack.c.bf16 %v931_v12, %v931_v12  ;;  %v1011_v17 = vpack.c.bf16 %v947_v13, %v947_v13 }
 0x11d   : > { %v964_v18 = vpack.c.bf16 %v900_v14, %v900_v14  ;;  %v980_v19 = vpack.c.bf16 %v916_v15, %v916_v15  ;;  %v705_v20 = vpop.f32.mrf.mxu2  ;;  %v745_v21 = vpop.f32.mrf.mxu3 }
 0x11e   : > { %1060 = vst.msk [vmem:[%s2011_s15 + $0xb4] sm:$0xf] %vm1014_vm2, %v995_v16  ;;  %v800_v22 = vmul.f32 %v1997_v40, %v705_v20  ;;  %v816_v23 = vmul.f32 %v1997_v40, %v745_v21  ;;  %v627_v24 = vpop.f32.mrf.mxu0  ;;  %v667_v25 = vpop.f32.mrf.mxu1 }
 0x11f   : > { %1076 = vst.msk [vmem:[%s2011_s15 + $0xf4] sm:$0xf] %vm1014_vm2, %v1011_v17  ;;  %v769_v26 = vmul.f32 %v1997_v40, %v627_v24  ;;  %v785_v27 = vmul.f32 %v1997_v40, %v667_v25 }
 0x120   : > { %1029 = vst.msk [vmem:[%s2011_s15 + $0x38] sm:$0xf] %vm1014_vm2, %v964_v18  ;;  %v868_v28 = vadd.f32 %v2002_v41, %v800_v22  ;;  %v884_v29 = vadd.f32 %v2002_v41, %v816_v23 }
 0x121   : > { %1045 = vst.msk [vmem:[%s2011_s15 + $0x78] sm:$0xf] %vm1014_vm2, %v980_v19  ;;  %v837_v30 = vadd.f32 %v2002_v41, %v769_v26  ;;  %v853_v31 = vadd.f32 %v2002_v41, %v785_v27 }
 0x122   : > { %v932_v32 = vmax.f32 %v868_v28, 0.0  ;;  %v948_v33 = vmax.f32 %v884_v29, 0.0 }
 0x123   : > { %v901_v34 = vmax.f32 %v837_v30, 0.0  ;;  %v917_v35 = vmax.f32 %v853_v31, 0.0 }
 0x124   : > { %v996_v36 = vpack.c.bf16 %v932_v32, %v932_v32  ;;  %v1012_v37 = vpack.c.bf16 %v948_v33, %v948_v33 }
 0x125   : > { %v965_v38 = vpack.c.bf16 %v901_v34, %v901_v34  ;;  %v981_v39 = vpack.c.bf16 %v917_v35, %v917_v35  ;;  %v707_v42 = vpop.f32.mrf.mxu2  ;;  %v747_v43 = vpop.f32.mrf.mxu3 }
 0x126   : > { %1061 = vst.msk [vmem:[%s2011_s15 + $0xb8] sm:$0xf] %vm1014_vm2, %v996_v36  ;;  %v801_v44 = vmul.f32 %v1997_v40, %v707_v42  ;;  %v817_v45 = vmul.f32 %v1997_v40, %v747_v43 }
 0x127   : > { %1077 = vst.msk [vmem:[%s2011_s15 + $0xf8] sm:$0xf] %vm1014_vm2, %v1012_v37 }
 0x128   : > { %1030 = vst.msk [vmem:[%s2011_s15 + $0x3c] sm:$0xf] %vm1014_vm2, %v965_v38  ;;  %v869_v46 = vadd.f32 %v2002_v41, %v801_v44  ;;  %v885_v47 = vadd.f32 %v2002_v41, %v817_v45 }
 0x129   : > { %1046 = vst.msk [vmem:[%s2011_s15 + $0x7c] sm:$0xf] %vm1014_vm2, %v981_v39 }
 0x12a   : > { %v933_v48 = vmax.f32 %v869_v46, 0.0  ;;  %v949_v49 = vmax.f32 %v885_v47, 0.0 }
 0x12b   : > { %1085 = sbr.rel (!%p1901_p4) target bundleno = 368 (0x170), region = 40 }
 0x12c   : > { %v997_v50 = vpack.c.bf16 %v933_v48, %v933_v48  ;;  %v1013_v51 = vpack.c.bf16 %v949_v49, %v949_v49 }
 0x12e   : > { %1062 = vst.msk [vmem:[%s2011_s15 + $0xbc] sm:$0xf] %vm1014_vm2, %v997_v50 }
 0x12f   : > { %1078 = vst.msk [vmem:[%s2011_s15 + $0xfc] sm:$0xf] %vm1014_vm2, %v1013_v51 }
 0x130   : > { %s2420_s27 = smov (!%p1088_p8, %s1087_s27), 64 }
 0x131   : > { %s1604_s6 = sshll.u32 %s2420_s27, 2 }
 0x132   : > { %p1607_p9 = scmp.eq.s32.totalorder %s1604_s6, 0 }
 0x133   : > { %s2276_s7 = sshrl.u32 (!%p1607_p9), %s2420_s27, 5 }
 0x134   : > { %1096 = sbr.rel (%p1607_p9) target bundleno = 368 (0x170), region = 44  ;;  %p1608_p10 = scmp.le.s32.totalorder (!%p1607_p9), %s2276_s7, 0 }
 0x139   : > { %1375 = sbr.rel (%p1608_p10) target bundleno = 351 (0x15f), region = 116  ;;  %s2411_s18 = smov (!%p1608_p10), %s2270_s5 }
 0x13a   : > { %s2412_s23 = smov (!%p1608_p10), %s2011_s15  ;;  %s2285_s26 = smov (!%p1608_p10), 0  }
 0x13b   : > { %s2287_s8 = smov (!%p1608_p10), 0  }
 0x13e LB: >> { %v1113_v40 = vld [vmem:[%s1825_s23] sm:$0xf]  ;;  %v1115_v41 = vld [vmem:[%s1825_s23 + $0x4] sm:$0xf]  ;;  %v1117_v52 = vld [vmem:[%s1825_s23 + $0x8] sm:$0xf]  ;;  %s1833_s8 = sphi %s2287_s8, %s1107_s8   ;;  %s1829_s26 = sphi %s2285_s26, %s2415_s26   ;;  %s1825_s23 = sphi %s2412_s23, %s2414_s23   ;;  %s1821_s18 = sphi %s2411_s18, %s2413_s18  }
 0x13f   : >> { %1114 = vst [vmem:[%s1821_s18] sm:$0xf] %v1113_v40  ;;  %v1119_v53 = vld [vmem:[%s1825_s23 + $0xc] sm:$0xf]  ;;  %v1121_v54 = vld [vmem:[%s1825_s23 + $0x10] sm:$0xf]  ;;  %s1177_s9 = sadd.s32 1, %s1829_s26 }
 0x140   : >> { %1116 = vst [vmem:[%s1821_s18 + $0x4] sm:$0xf] %v1115_v41  ;;  %v1123_v55 = vld [vmem:[%s1825_s23 + $0x14] sm:$0xf]  ;;  %v1125_v56 = vld [vmem:[%s1825_s23 + $0x18] sm:$0xf]  ;;  %p1178_p11 = scmp.ge.s32.totalorder %s1177_s9, %s2276_s7 }
 0x141   : >> { %1118 = vst [vmem:[%s1821_s18 + $0x8] sm:$0xf] %v1117_v52  ;;  %v1127_v57 = vld [vmem:[%s1825_s23 + $0x1c] sm:$0xf]  ;;  %v1129_v58 = vld [vmem:[%s1825_s23 + $0x20] sm:$0xf] }
 0x142   : >> { %1120 = vst [vmem:[%s1821_s18 + $0xc] sm:$0xf] %v1119_v53  ;;  %v1131_v59 = vld [vmem:[%s1825_s23 + $0x24] sm:$0xf]  ;;  %v1133_v60 = vld [vmem:[%s1825_s23 + $0x28] sm:$0xf] }
 0x143   : >> { %1122 = vst [vmem:[%s1821_s18 + $0x10] sm:$0xf] %v1121_v54  ;;  %v1135_v61 = vld [vmem:[%s1825_s23 + $0x2c] sm:$0xf]  ;;  %v1137_v62 = vld [vmem:[%s1825_s23 + $0x30] sm:$0xf] }
 0x144   : >> { %1124 = vst [vmem:[%s1821_s18 + $0x14] sm:$0xf] %v1123_v55  ;;  %v1139_v63 = vld [vmem:[%s1825_s23 + $0x34] sm:$0xf]  ;;  %v1141_v0 = vld [vmem:[%s1825_s23 + $0x38] sm:$0xf] }
 0x145   : >> { %1126 = vst [vmem:[%s1821_s18 + $0x18] sm:$0xf] %v1125_v56  ;;  %v1143_v1 = vld [vmem:[%s1825_s23 + $0x3c] sm:$0xf]  ;;  %v1145_v2 = vld [vmem:[%s1825_s23 + $0x40] sm:$0xf] }
 0x146   : >> { %1128 = vst [vmem:[%s1821_s18 + $0x1c] sm:$0xf] %v1127_v57  ;;  %v1147_v3 = vld [vmem:[%s1825_s23 + $0x44] sm:$0xf]  ;;  %s2422_s9 = smov (%p1178_p11, %s1177_s9), 0  ;;  %s1107_s8 = sadd.s32 1, %s1833_s8  }
 0x147   : >> { %1130 = vst [vmem:[%s1821_s18 + $0x20] sm:$0xf] %v1129_v58  ;;  %v1149_v4 = vld [vmem:[%s1825_s23 + $0x48] sm:$0xf]  ;;  %v1151_v5 = vld [vmem:[%s1825_s23 + $0x4c] sm:$0xf]  ;;  %p1106_p12 = scmp.ge.s32.totalorder %s1107_s8, %s2276_s7  ;;  %s2415_s26 = smov %s2422_s9 }
 0x148   : >> { %1132 = vst [vmem:[%s1821_s18 + $0x24] sm:$0xf] %v1131_v59  ;;  %s1609_s10 = sshll.u32 %s2422_s9, 7  ;;  %v1153_v6 = vld [vmem:[%s1825_s23 + $0x50] sm:$0xf] }
 0x149   : >> { %1134 = vst [vmem:[%s1821_s18 + $0x28] sm:$0xf] %v1133_v60  ;;  %s2346_s11 = scalar_lea.vmem %s2011_s15, %s1609_s10 [#allocation2]   ;;  %s1183_s12 = scalar_lea.vmem %s2270_s5, %s1609_s10   ;;  %v1155_v7 = vld [vmem:[%s1825_s23 + $0x54] sm:$0xf]  ;;  %v1157_v8 = vld [vmem:[%s1825_s23 + $0x58] sm:$0xf] }
 0x14a   : >> { %1136 = vst [vmem:[%s1821_s18 + $0x2c] sm:$0xf] %v1135_v61  ;;  %v1159_v9 = vld [vmem:[%s1825_s23 + $0x5c] sm:$0xf]  ;;  %v1161_v10 = vld [vmem:[%s1825_s23 + $0x60] sm:$0xf] }
 0x14b   : >> { %1138 = vst [vmem:[%s1821_s18 + $0x30] sm:$0xf] %v1137_v62  ;;  %v1163_v11 = vld [vmem:[%s1825_s23 + $0x64] sm:$0xf]  ;;  %v1165_v12 = vld [vmem:[%s1825_s23 + $0x68] sm:$0xf] }
 0x14c   : >> { %1140 = vst [vmem:[%s1821_s18 + $0x34] sm:$0xf] %v1139_v63  ;;  %v1167_v13 = vld [vmem:[%s1825_s23 + $0x6c] sm:$0xf]  ;;  %v1169_v14 = vld [vmem:[%s1825_s23 + $0x70] sm:$0xf] }
 0x14d   : >> { %1142 = vst [vmem:[%s1821_s18 + $0x38] sm:$0xf] %v1141_v0  ;;  %v1171_v15 = vld [vmem:[%s1825_s23 + $0x74] sm:$0xf]  ;;  %v1173_v16 = vld [vmem:[%s1825_s23 + $0x78] sm:$0xf] }
 0x14e   : >> { %1144 = vst [vmem:[%s1821_s18 + $0x3c] sm:$0xf] %v1143_v1  ;;  %v1175_v17 = vld [vmem:[%s1825_s23 + $0x7c] sm:$0xf]  ;;  %s2414_s23 = smov %s2346_s11 }
 0x14f   : >> { %1146 = vst [vmem:[%s1821_s18 + $0x40] sm:$0xf] %v1145_v2 }
 0x150   : >> { %1148 = vst [vmem:[%s1821_s18 + $0x44] sm:$0xf] %v1147_v3 }
 0x151   : >> { %1150 = vst [vmem:[%s1821_s18 + $0x48] sm:$0xf] %v1149_v4 }
 0x152   : >> { %1152 = vst [vmem:[%s1821_s18 + $0x4c] sm:$0xf] %v1151_v5 }
 0x153   : >> { %1154 = vst [vmem:[%s1821_s18 + $0x50] sm:$0xf] %v1153_v6 }
 0x154   : >> { %1156 = vst [vmem:[%s1821_s18 + $0x54] sm:$0xf] %v1155_v7 }
 0x155   : >> { %1158 = vst [vmem:[%s1821_s18 + $0x58] sm:$0xf] %v1157_v8 }
 0x156   : >> { %1160 = vst [vmem:[%s1821_s18 + $0x5c] sm:$0xf] %v1159_v9 }
 0x157   : >> { %1162 = vst [vmem:[%s1821_s18 + $0x60] sm:$0xf] %v1161_v10 }
 0x158   : >> { %1164 = vst [vmem:[%s1821_s18 + $0x64] sm:$0xf] %v1163_v11 }
 0x159   : >> { %1166 = vst [vmem:[%s1821_s18 + $0x68] sm:$0xf] %v1165_v12 }
 0x15a   : >> { %1168 = vst [vmem:[%s1821_s18 + $0x6c] sm:$0xf] %v1167_v13  ;;  %1109 = sbr.rel (!%p1106_p12) target bundleno = 318 (0x13e), region = 122 }
 0x15b   : >> { %1170 = vst [vmem:[%s1821_s18 + $0x70] sm:$0xf] %v1169_v14 }
 0x15c   : >> { %1172 = vst [vmem:[%s1821_s18 + $0x74] sm:$0xf] %v1171_v15 }
 0x15d   : >> { %1174 = vst [vmem:[%s1821_s18 + $0x78] sm:$0xf] %v1173_v16 }
 0x15e   : >> { %1176 = vst [vmem:[%s1821_s18 + $0x7c] sm:$0xf] %v1175_v17  ;;  %s2413_s18 = smov %s1183_s12 }
 0x15f PF: > { %s2387_s13 = sand.u32 31, %s2420_s27   ;;  %s1656_s14 = sshll.u32 %s2276_s7, 7 }
 0x160   : > { %s1188_s17 = scalar_lea.vmem %s2011_s15, %s1656_s14 [#allocation2]   ;;  %s1190_s20 = scalar_lea.vmem %s2270_s5, %s1656_s14  }
 0x161   : > { %p1614_p13 = scmp.le.s32.totalorder %s2387_s13, 0 }
 0x162   : > { %s1835_s21 = smov (!%p1614_p13), %s1190_s20   ;;  %s1839_s24 = smov (!%p1614_p13), %s1188_s17  }
 0x163   : > { %1389 = sbr.rel (%p1614_p13) target bundleno = 368 (0x170), region = 127  ;;  %s1843_s25 = smov (!%p1614_p13), 0  }
 0x164   : > { %s1847_s28 = smov (!%p1614_p13), 0  }
 0x168 LB: >> { %v1200_v18 = vld [vmem:[%s1841_s24] sm:$0xf]  ;;  %s1202_s27 = sadd.s32 1, %s1845_s25  ;;  %s1194_s28 = sadd.s32 1, %s1849_s28   ;;  %s1849_s28 = sphi %s1847_s28, %s1194_s28   ;;  %s1845_s25 = sphi %s1843_s25, %s1844_s25   ;;  %s1841_s24 = sphi %s1839_s24, %s1207_s24   ;;  %s1837_s21 = sphi %s1835_s21, %s1208_s21  }
 0x169   : >> { %1201 = vst [vmem:[%s1837_s21] sm:$0xf] %v1200_v18  ;;  %p1203_p0 = scmp.ge.s32.totalorder %s1202_s27, %s2387_s13  ;;  %p1193_p1 = scmp.ge.s32.totalorder %s1194_s28, %s2387_s13 }
 0x16b   : >> { %s2424_s27 = smov (%p1203_p0, %s1202_s27), 0  ;;  %1196 = sbr.rel (!%p1193_p1) target bundleno = 360 (0x168), region = 133 }
 0x16c   : >> { %s1615_s15 = sshll.u32 %s2424_s27, 2  ;;  %s1844_s25 = smov %s2424_s27  }
 0x16d   : >> { %s1207_s24 = scalar_lea.vmem %s1188_s17, %s1615_s15 [#allocation2]   ;;  %s1208_s21 = scalar_lea.vmem %s1190_s20, %s1615_s15  }
 0x170 PF: > { %p11_p2 = scmp.ge.s32.totalorder %s1891_s19, 4   ;;  %s2416_s15 = smov %s1813_s16 }
 0x171   : > { %s2417_s16 = smov %s1899_s22  ;;  %s2418_s17 = smov %s1891_s19 }
 0x172   :  { %13 = sbr.rel (!%p11_p2) target bundleno = 2 (0x2), region = 144 }

// kernel: horseshoe_forward.27
= control target key start
LH: loop header
LB: loop body
LE: loop exit
PB: predicated region body
PF: predicated region fallthrough
CT: control target
= control target key end

     0   :  { %s438_s6 = smov 0   ;;  %s440_s7 = smov 0   ;;  %s491_s0 = inlined_call_operand.vmem [shape: bf16[2,2,400], index: 0, kind: input, shape index: {}]   ;;  %s492_s1 = inlined_call_operand.vmem [shape: f32[2,2,400], index: 1, kind: output, shape index: {}]  }
   0x1   :  { %s442_s8 = smov 0  }
   0x2 LB: > { %s23_s9 = sadd.s32 1, %s422_s7  ;;  %p369_p0 = scmp.ge.s32.totalorder %s426_s8, 1  ;;  %s426_s8 = sphi %s442_s8, %s11_s8   ;;  %s422_s7 = sphi %s440_s7, %s494_s7   ;;  %s418_s6 = sphi %s438_s6, %s493_s6  }
   0x3   : > { %p25_p1 = scmp.ge.s32.totalorder %s23_s9, 2  ;;  %p107_p2 = scmp.lt.s32.totalorder %s426_s8, 3 }
   0x5   : > { %s496_s9 = smov (%p25_p1, %s23_s9), 0  ;;  %p108_p3 = pnand %p369_p0, %p107_p2 }
   0x6   : > { %p135_p4 = scmp.lt.s32.totalorder (!%p108_p3), %s418_s6, 1 }
   0x7   : > { %111 = sbr.rel (%p108_p3) target bundleno = 101 (0x65), region = 24 }
   0xc   : > { %s498_s6 = smov (!%p135_p4, %s418_s6), 1  ;;  %vm165_vm0 = vcmask 1041408   ;;  %vm187_vm1 = vcmask 123904   ;;  %vm203_vm2 = vcmask 1045508   ;;  %vm205_vm3 = vcmask 1043456  }
   0xd   : > { %s370_s10 = sshll.u32 %s498_s6, 2  ;;  %vm275_vm4 = vcmask 1043458   ;;  %s375_s14 = sshll.u32 %s498_s6, 3  ;;  %vm278_vm9 = vcmask 130054  }
   0xe   : > { %s141_s13 = scalar_lea.vmem %s491_s0, %s370_s10  ;;  %vm276_vm5 = vmor %vm275_vm4, %vm165_vm0  ;;  %s151_s17 = scalar_lea.vmem %s492_s1, %s375_s14 }
   0xf   : > { %v153_v0 = vld [vmem:[%s141_s13] sm:$0xf]  ;;  %vm277_vm8 = vmor %vm203_vm2, %vm276_vm5 }
  0x10   : > { %v154_v1 = vunpack.c.l.bf16 %v153_v0  ;;  %vm279_vm12 = vmor %vm278_vm9, %vm277_vm8 }
  0x12   : > { %156 = vst [vmem:[#allocation1] ss:$4 sm:$0xff] %v154_v1 }
  0x19   : > { %v157_v2 = vld.sshfl [vmem:[#allocation1] sm:$0xff pattern:$0x73625140]  ;;  %v158_v3 = vld.sshfl [vmem:[#allocation1 + $0x8] sm:$0xff pattern:$0x73625140] }
  0x1a   : > { %v159_v4 = vld.sshfl [vmem:[#allocation1 + $0x10] sm:$0xff pattern:$0x73625140]  ;;  %v160_v5 = vld.sshfl [vmem:[#allocation1 + $0x18] sm:$0xff pattern:$0x73625140] }
  0x1b   : > { %v166_v6 = vsel %vm165_vm0, %v157_v2, -inf  ;;  %v173_v7 = vsel %vm165_vm0, %v158_v3, -inf  ;;  %v180_v8 = vsel %vm165_vm0, %v159_v4, -inf  ;;  %v188_v9 = vsel %vm187_vm1, %v160_v5, -inf }
  0x1c   : > { %v167_v10 = vrot.slane %v166_v6, 4  ;;  %v174_v11 = vrot.slane %v173_v7, 4  ;;  %v181_v12 = vrot.slane %v180_v8, 4  ;;  %v189_v13 = vrot.slane %v188_v9, 4 }
  0x1e   : > { %v168_v14 = vmax.f32 %v166_v6, %v167_v10  ;;  %v175_v15 = vmax.f32 %v173_v7, %v174_v11  ;;  %v182_v16 = vmax.f32 %v180_v8, %v181_v12  ;;  %v190_v17 = vmax.f32 %v188_v9, %v189_v13 }
  0x20   : > { %v169_v18 = vrot.slane %v168_v14, 2  ;;  %v176_v19 = vrot.slane %v175_v15, 2  ;;  %v183_v20 = vrot.slane %v182_v16, 2  ;;  %v191_v21 = vrot.slane %v190_v17, 2 }
  0x22   : > { %v170_v22 = vmax.f32 %v168_v14, %v169_v18  ;;  %v177_v23 = vmax.f32 %v175_v15, %v176_v19  ;;  %v184_v24 = vmax.f32 %v182_v16, %v183_v20  ;;  %v192_v25 = vmax.f32 %v190_v17, %v191_v21 }
  0x24   : > { %v171_v26 = vrot.slane %v170_v22, 1  ;;  %v178_v27 = vrot.slane %v177_v23, 1  ;;  %v185_v28 = vrot.slane %v184_v24, 1  ;;  %v193_v29 = vrot.slane %v192_v25, 1 }
  0x26   : > { %v179_v30 = vmax.f32 %v177_v23, %v178_v27  ;;  %v186_v31 = vmax.f32 %v184_v24, %v185_v28  ;;  %v194_v32 = vmax.f32 %v192_v25, %v193_v29  ;;  %v172_v33 = vmax.f32 %v170_v22, %v171_v26 }
  0x28   : > { %v199_v34 = vrot.slane %v179_v30, 6  ;;  %v200_v35 = vrot.slane %v186_v31, 4  ;;  %v201_v36 = vrot.slane %v194_v32, 2 }
  0x2a   : > { %v202_v37 = vsel %vm165_vm0, %v172_v33, %v199_v34  ;;  %v204_v38 = vsel %vm203_vm2, %v200_v35, %v201_v36 }
  0x2b   : > { %v206_v39 = vsel %vm205_vm3, %v202_v37, %v204_v38 }
  0x2c   : > { %v208_v40 = vsub.f32 %v154_v1, %v206_v39 }
  0x2e   : > { %v209_v41 = vmul.f32 1.442695, %v208_v40 }
  0x30   : > { %400 = vpow2.f32 %v209_v41 }
  0x36   : > { %v401_v42 = vpop.eup %400 }
  0x37   : > { %212 = vst [vmem:[#allocation1] ss:$4 sm:$0xff] %v401_v42 }
  0x3e   : > { %v213_v43 = vld.sshfl [vmem:[#allocation1] sm:$0xff pattern:$0x73625140]  ;;  %v214_v44 = vld.sshfl [vmem:[#allocation1 + $0x8] sm:$0xff pattern:$0x73625140] }
  0x3f   : > { %v215_v45 = vld.sshfl [vmem:[#allocation1 + $0x10] sm:$0xff pattern:$0x73625140]  ;;  %v216_v46 = vld.sshfl [vmem:[#allocation1 + $0x18] sm:$0xff pattern:$0x73625140] }
  0x40   : > { %v221_v47 = vsel %vm165_vm0, %v213_v43, 0.0  ;;  %v228_v48 = vsel %vm165_vm0, %v214_v44, 0.0  ;;  %v235_v49 = vsel %vm165_vm0, %v215_v45, 0.0  ;;  %v242_v50 = vsel %vm187_vm1, %v216_v46, 0.0 }
  0x41   : > { %v222_v51 = vrot.slane %v221_v47, 4  ;;  %v229_v52 = vrot.slane %v228_v48, 4  ;;  %v236_v53 = vrot.slane %v235_v49, 4  ;;  %v243_v54 = vrot.slane %v242_v50, 4 }
  0x43   : > { %v223_v55 = vadd.f32 %v222_v51, %v221_v47  ;;  %v230_v56 = vadd.f32 %v229_v52, %v228_v48  ;;  %v237_v57 = vadd.f32 %v236_v53, %v235_v49  ;;  %v244_v58 = vadd.f32 %v243_v54, %v242_v50 }
  0x45   : > { %v224_v59 = vrot.slane %v223_v55, 2  ;;  %v231_v60 = vrot.slane %v230_v56, 2  ;;  %v238_v61 = vrot.slane %v237_v57, 2  ;;  %v245_v62 = vrot.slane %v244_v58, 2 }
  0x47   : > { %v225_v63 = vadd.f32 %v224_v59, %v223_v55  ;;  %v232_v0 = vadd.f32 %v231_v60, %v230_v56  ;;  %v239_v1 = vadd.f32 %v238_v61, %v237_v57  ;;  %v246_v2 = vadd.f32 %v245_v62, %v244_v58 }
  0x49   : > { %v226_v3 = vrot.slane %v225_v63, 1  ;;  %v233_v4 = vrot.slane %v232_v0, 1  ;;  %v240_v5 = vrot.slane %v239_v1, 1  ;;  %v247_v6 = vrot.slane %v246_v2, 1 }
  0x4b   : > { %v234_v7 = vadd.f32 %v233_v4, %v232_v0  ;;  %v241_v8 = vadd.f32 %v240_v5, %v239_v1  ;;  %v248_v9 = vadd.f32 %v247_v6, %v246_v2  ;;  %v227_v10 = vadd.f32 %v226_v3, %v225_v63 }
  0x4d   : > { %v253_v11 = vrot.slane %v234_v7, 6  ;;  %v254_v12 = vrot.slane %v241_v8, 4  ;;  %v255_v13 = vrot.slane %v248_v9, 2 }
  0x4f   : > { %v256_v14 = vsel %vm165_vm0, %v227_v10, %v253_v11  ;;  %v257_v15 = vsel %vm203_vm2, %v254_v12, %v255_v13 }
  0x50   : > { %v258_v16 = vsel %vm205_vm3, %v256_v14, %v257_v15 }
  0x51   : > { %402 = vrcp.f32 %v258_v16  ;;  %v271_v20 = vand.u32 2147483648, %v258_v16  ;;  %v269_v22 = vand.u32 2147483647, %v258_v16  ;;  %vm265_vm7 = vweird.f32 %v258_v16 }
  0x53   : > { %v272_v24 = vor.u32 1.1754944e-38, %v271_v20  ;;  %vm270_vm11 = vcmp.eq.f32.partialorder %v269_v22, 8.507059e+37 }
  0x57   : > { %v403_v17 = vpop.eup %402 }
  0x58   : > { %v261_v18 = vmul.f32 %v403_v17, %v258_v16  ;;  %vm266_vm6 = vweird.f32 %v403_v17 }
  0x59   : > { %vm267_vm10 = vmor %vm265_vm7, %vm266_vm6 }
  0x5a   : > { %v262_v19 = vsub.f32 1.0, %v261_v18 }
  0x5c   : > { %v263_v21 = vmul.f32 %v403_v17, %v262_v19 }
  0x5e   : > { %v264_v23 = vadd.f32 %v403_v17, %v263_v21 }
  0x60   : > { %v268_v25 = vsel %vm267_vm10, %v403_v17, %v264_v23 }
  0x61   : > { %v273_v26 = vsel %vm270_vm11, %v272_v24, %v268_v25 }
  0x62   : > { %v274_v27 = vmul.f32 %v401_v42, %v273_v26 }
  0x64   : > { %280 = vst.msk [vmem:[%s151_s17] sm:$0xff] %vm279_vm12, %v274_v27 }
  0x65 PF: > { %s11_s8 = sadd.s32 1, %s426_s8   ;;  %s493_s6 = smov %s422_s7 }
  0x66   : > { %p8_p5 = scmp.ge.s32.totalorder %s11_s8, 4   ;;  %s494_s7 = smov %s496_s9 }
  0x68   :  { %10 = sbr.rel (!%p8_p5) target bundleno = 2 (0x2), region = 54 }

</bundles_post_ra>
